<compile_context>
chip_gen: v7x
topology: tpu7x:2x2x1
jax: 0.10.0
libtpu: 0.0.40
codegen_flags: <defaults>
</compile_context>

<pallas_src>
import math
import numpy as np
import jax
import jax.numpy as jnp
from jax.experimental import pallas as pl
from jax.experimental.pallas import tpu as pltpu

# ------------------------- configuration (small shapes) -------------------------
B = 2
STATE_DIM = 4          # qpos dim
ACTION_DIM = 6
NUM_QUERIES = 8
HIDDEN_DIM = 32        # transformer.d_model
NUM_HEADS = 4
HEAD_DIM = HIDDEN_DIM // NUM_HEADS
DIM_FF = 64
LATENT_DIM = 32        # fixed in the module
NUM_CAMS = 1
IMG_C, IMG_H, IMG_W = 3, 16, 16
BACKBONE_C = 8         # backbones[0].num_channels
FEAT_H, FEAT_W = 4, 4  # backbone output spatial size (16/4)

S_ENC = 1 + 1 + NUM_QUERIES              # CVAE encoder sequence length (10)
S_MEM = 2 + FEAT_H * FEAT_W * NUM_CAMS   # transformer memory sequence length (18)
LANE = 128                               # lane-dense slab / output width

# --------------------------- parameter slab layout --------------------------------
# Every weight matrix (K, N<=128) occupies rows [off, off+K) / cols [0, N) of the
# weight slab; every bias / norm vector occupies one row of the vector slab.
# Offsets are static Python ints -> static in-kernel slices (zero-cost views).


def _pad8(n):
    return ((n + 7) // 8) * 8


_H = HIDDEN_DIM
_W_ENTRIES = [
    ("cls_embed", 1, _H),
    ("e_act_w", ACTION_DIM, _H),
    ("e_joint_w", STATE_DIM, _H),
    ("pos_table", S_ENC, _H),
    ("ce_in_w", _H, 3 * _H),
    ("ce_out_w", _H, _H),
    ("ce_ff1_w", _H, DIM_FF),
    ("ce_ff2_w", DIM_FF, _H),
    ("lat_w", _H, 2 * LATENT_DIM),
    ("lout_w", LATENT_DIM, _H),
    ("conv_w", IMG_C, BACKBONE_C),
    ("proj_w", BACKBONE_C, _H),
    ("rob_w", STATE_DIM, _H),
    ("pos_full", 2 + FEAT_H * FEAT_W, _H),
    ("query_embed", NUM_QUERIES, _H),
    ("te_in_w", _H, 3 * _H),
    ("te_out_w", _H, _H),
    ("te_ff1_w", _H, DIM_FF),
    ("te_ff2_w", DIM_FF, _H),
    ("td_s_out_w", _H, _H),
    ("td_c_in_w", _H, 3 * _H),
    ("td_c_out_w", _H, _H),
    ("td_ff1_w", _H, DIM_FF),
    ("td_ff2_w", DIM_FF, _H),
    ("head_w", _H, LANE),          # fused action_head + is_pad_head, zero-padded to 128
]
_W_OFF = {}
_roff = 0
for _n, _r, _c in _W_ENTRIES:
    _W_OFF[_n] = (_roff, _r, _c)
    _roff += _pad8(_r)             # 8-aligned row offsets -> aligned sublane loads
W_ROWS = _roff

_V_ENTRIES = [
    ("e_act_b", _H), ("e_joint_b", _H),
    ("ce_in_b", 3 * _H), ("ce_out_b", _H), ("ce_n1_g", _H), ("ce_n1_b", _H),
    ("ce_ff1_b", DIM_FF), ("ce_ff2_b", _H), ("ce_n2_g", _H), ("ce_n2_b", _H),
    ("lat_b", 2 * LATENT_DIM), ("lout_b", _H),
    ("conv_b", BACKBONE_C), ("proj_b", _H), ("rob_b", _H),
    ("te_in_b", 3 * _H), ("te_out_b", _H), ("te_n1_g", _H), ("te_n1_b", _H),
    ("te_ff1_b", DIM_FF), ("te_ff2_b", _H), ("te_n2_g", _H), ("te_n2_b", _H),
    ("td_s_in_b", 3 * _H), ("td_s_out_b", _H), ("td_n1_g", _H), ("td_n1_b", _H),
    ("td_c_in_b", 3 * _H), ("td_c_out_b", _H), ("td_n2_g", _H), ("td_n2_b", _H),
    ("td_ff1_b", DIM_FF), ("td_ff2_b", _H), ("td_n3_g", _H), ("td_n3_b", _H),
    ("dn_g", _H), ("dn_b", _H),
    ("head_b", LANE),
]
_V_OFF = {name: (i, c) for i, (name, c) in enumerate(_V_ENTRIES)}
V_ROWS = _pad8(len(_V_ENTRIES))

# --------------------------- in-kernel math helpers ------------------------------


def _wp(ref, name):
    off, r, c = _W_OFF[name]
    return ref[off:off + r, 0:c]


def _vp(ref, name):
    off, c = _V_OFF[name]
    return ref[off:off + 1, 0:c]


def _mm(x, w):
    """2-D matmul on the MXU: bf16 operands, f32 accumulation."""
    return jnp.dot(x.astype(jnp.bfloat16), w.astype(jnp.bfloat16),
                   preferred_element_type=jnp.float32)


def _mm32(x, w):
    """Tiny-K matmul kept in f32 (no bf16 cast traffic; MXU throughput irrelevant)."""
    return jnp.dot(x, w, preferred_element_type=jnp.float32)


def _linear(x, w, b):
    lead, k = x.shape[:-1], x.shape[-1]
    return (_mm(x.reshape(-1, k), w) + b).reshape(*lead, w.shape[-1])


def _linear32(x, w, b):
    lead, k = x.shape[:-1], x.shape[-1]
    return (_mm32(x.reshape(-1, k), w) + b).reshape(*lead, w.shape[-1])


def _layernorm(x, g, b):
    m = jnp.mean(x, axis=-1, keepdims=True)
    v = jnp.mean(jnp.square(x - m), axis=-1, keepdims=True)
    return (x - m) * jax.lax.rsqrt(v + 1e-5) * g + b


def _softmax_lastdim(s):
    s = s - jnp.max(s, axis=-1, keepdims=True)
    p = jnp.exp(s)
    return p * pl.reciprocal(jnp.sum(p, axis=-1, keepdims=True), approx=True)


def _mha(query, key, value, in_w, in_b, out_w, out_b, *, nh, bias=None, qk_fused=False):
    """PyTorch nn.MultiheadAttention semantics; heads folded into the batch axis."""
    b_, sq, h = query.shape
    sk = key.shape[1]
    dh = h // nh
    scale = 1.0 / math.sqrt(dh)

    if qk_fused:
        # query is key -> single (H, 2H) matmul for the q/k projections
        qk = _mm(query.reshape(-1, h), in_w[:, :2 * h]) + in_b[:, :2 * h]
        q = qk[:, :h].reshape(b_, sq, h)
        k = qk[:, h:2 * h].reshape(b_, sk, h)
    else:
        q = _linear(query, in_w[:, :h], in_b[:, :h])
        k = _linear(key, in_w[:, h:2 * h], in_b[:, h:2 * h])
    v = _linear(value, in_w[:, 2 * h:3 * h], in_b[:, 2 * h:3 * h])

    # fold heads into the leading batch axis: (nh*B, S, dh) -> one batched einsum
    qh = jnp.concatenate([q[:, :, i * dh:(i + 1) * dh] for i in range(nh)], axis=0)
    kh = jnp.concatenate([k[:, :, i * dh:(i + 1) * dh] for i in range(nh)], axis=0)
    vh = jnp.concatenate([v[:, :, i * dh:(i + 1) * dh] for i in range(nh)], axis=0)

    s = jnp.einsum('bqd,bkd->bqk', qh.astype(jnp.bfloat16), kh.astype(jnp.bfloat16),
                   preferred_element_type=jnp.float32) * scale
    if bias is not None:
        s = s + jnp.concatenate([bias] * nh, axis=0)       # (nh*B, 1, Sk)
    p = _softmax_lastdim(s)
    o = jnp.einsum('bqk,bkd->bqd', p.astype(jnp.bfloat16), vh.astype(jnp.bfloat16),
                   preferred_element_type=jnp.float32)      # (nh*B, Sq, dh)

    # heads back onto lanes -> one lane-dense (B*Sq, H) @ (H, H) output projection
    o = jnp.concatenate([o[i * b_:(i + 1) * b_] for i in range(nh)], axis=-1)
    return (_mm(o.reshape(b_ * sq, h), out_w) + out_b).reshape(b_, sq, h)


def _enc_layer(x, pos, wr, vr, pfx, bias=None):
    """DETR post-norm TransformerEncoderLayer (dropout = identity)."""
    q = x + pos
    a = _mha(q, q, x,
             _wp(wr, pfx + "in_w"), _vp(vr, pfx + "in_b"),
             _wp(wr, pfx + "out_w"), _vp(vr, pfx + "out_b"),
             nh=NUM_HEADS, bias=bias, qk_fused=True)
    x = _layernorm(x + a, _vp(vr, pfx + "n1_g"), _vp(vr, pfx + "n1_b"))
    ff = _linear(jnp.maximum(_linear(x, _wp(wr, pfx + "ff1_w"), _vp(vr, pfx + "ff1_b")), 0.0),
                 _wp(wr, pfx + "ff2_w"), _vp(vr, pfx + "ff2_b"))
    return _layernorm(x + ff, _vp(vr, pfx + "n2_g"), _vp(vr, pfx + "n2_b"))

# ------------------------------- fused kernel -------------------------------------


def _detr_vae_kernel(qpos_ref, actions_ref, key_pad_ref, eps_ref, img_ref, pool_ref,
                     wr, vr, lat_ref, head_ref):
    bsz = qpos_ref.shape[0]
    h = HIDDEN_DIM
    qpos = qpos_ref[...]

    # ------------------- CVAE encoder (training path, vq=False) -------------------
    cls_tok = jnp.broadcast_to(_wp(wr, "cls_embed").reshape(1, 1, h), (bsz, 1, h))
    qpos_tok = (_mm32(qpos, _wp(wr, "e_joint_w")) + _vp(vr, "e_joint_b")).reshape(bsz, 1, h)
    act_tok = _linear32(actions_ref[...], _wp(wr, "e_act_w"), _vp(vr, "e_act_b"))
    x = jnp.concatenate([cls_tok, qpos_tok, act_tok], axis=1)          # (B, S_enc, H)

    pos_enc = _wp(wr, "pos_table")[None]                               # (1, S_enc, H)
    bias = key_pad_ref[...][:, None, :] * (-1e9)                       # key-padding bias
    x = _enc_layer(x, pos_enc, wr, vr, "ce_", bias=bias)

    latent_info = _mm(x[:, 0, :], _wp(wr, "lat_w")) + _vp(vr, "lat_b")     # (B, 2L)
    mu = latent_info[:, :LATENT_DIM]
    logvar = latent_info[:, LATENT_DIM:2 * LATENT_DIM]
    latent_sample = mu + jnp.exp(0.5 * logvar) * eps_ref[...]              # reparametrize
    latent_input = _mm(latent_sample, _wp(wr, "lout_w")) + _vp(vr, "lout_b")   # (B, H)
    lat_ref[...] = jnp.concatenate(
        [latent_info, jnp.zeros((bsz, LANE - 2 * LATENT_DIM), jnp.float32)], axis=-1)

    # ---- backbone stand-in: 1x1 conv + relu, 1x1 input_proj (batched), 4x4 avg pool ----
    feats = jnp.maximum(_linear32(img_ref[...], _wp(wr, "conv_w"), _vp(vr, "conv_b")), 0.0)
    yproj = _linear32(feats, _wp(wr, "proj_w"), _vp(vr, "proj_b"))     # (B, HW, H)
    pool = pool_ref[...]                                               # (hw_out, hw_in)
    # avg pool commutes with the 1x1 projection (pool rows sum to 1): pool after proj.
    img_tok = jnp.concatenate([_mm(pool, yproj[b])[None] for b in range(bsz)], axis=0)

    # ------------- transformer encoder over [latent, proprio, image tokens] -------------
    prop_tok = (_mm32(qpos, _wp(wr, "rob_w")) + _vp(vr, "rob_b")).reshape(bsz, 1, h)
    src = jnp.concatenate([latent_input.reshape(bsz, 1, h), prop_tok, img_tok], axis=1)
    pos_mem = _wp(wr, "pos_full")[None]                                # (1, S_mem, H)
    memory = _enc_layer(src, pos_mem, wr, vr, "te_")

    # ------------------- transformer decoder (1 layer, post-norm) -------------------
    # Self-attention on tgt = 0 is a constant: the value projection of 0 is its bias,
    # and the softmax-average of identical rows is that row -> b_v @ W_out + b_out.
    v_bias = _vp(vr, "td_s_in_b")[:, 2 * h:3 * h]                      # (1, H)
    sa = _mm(v_bias, _wp(wr, "td_s_out_w")) + _vp(vr, "td_s_out_b")    # (1, H)
    tgt_row = _layernorm(sa, _vp(vr, "td_n1_g"), _vp(vr, "td_n1_b"))
    tgt = jnp.broadcast_to(tgt_row.reshape(1, 1, h), (bsz, NUM_QUERIES, h))

    query_pos = _wp(wr, "query_embed")[None]                           # (1, nq, H)
    a = _mha(tgt + query_pos, memory + pos_mem, memory,
             _wp(wr, "td_c_in_w"), _vp(vr, "td_c_in_b"),
             _wp(wr, "td_c_out_w"), _vp(vr, "td_c_out_b"), nh=NUM_HEADS)
    tgt = _layernorm(tgt + a, _vp(vr, "td_n2_g"), _vp(vr, "td_n2_b"))
    ff = _linear(jnp.maximum(_linear(tgt, _wp(wr, "td_ff1_w"), _vp(vr, "td_ff1_b")), 0.0),
                 _wp(wr, "td_ff2_w"), _vp(vr, "td_ff2_b"))
    tgt = _layernorm(tgt + ff, _vp(vr, "td_n3_g"), _vp(vr, "td_n3_b"))
    hs = _layernorm(tgt, _vp(vr, "dn_g"), _vp(vr, "dn_b"))

    # fused, lane-padded action_head + is_pad_head -> one dense (B*nq, 128) store
    out = _mm(hs.reshape(bsz * NUM_QUERIES, h), _wp(wr, "head_w")) + _vp(vr, "head_b")
    head_ref[...] = out

# ------------------------------ host-side wrapper ----------------------------------


def detr_vae_forward(packed, qpos, image, env_state, actions, is_pad, eps_key):
    del env_state  # unused (backbones path)
    bsz = qpos.shape[0]
    eps = jax.random.normal(eps_key, (bsz, LATENT_DIM), jnp.float32)
    key_pad = jnp.concatenate(
        [jnp.zeros((bsz, 2), jnp.float32), is_pad.astype(jnp.float32)], axis=1)
    # TODO(synk): multi-camera support would concat per-camera tokens; NUM_CAMS = 1 here.
    img = jnp.transpose(image[:, 0].astype(jnp.float32), (0, 2, 3, 1)).reshape(
        bsz, IMG_H * IMG_W, IMG_C)                                     # NCHW -> (B, HW, C)

    lat, head = pl.pallas_call(
        _detr_vae_kernel,
        out_shape=(jax.ShapeDtypeStruct((bsz, LANE), jnp.float32),
                   jax.ShapeDtypeStruct((bsz * NUM_QUERIES, LANE), jnp.float32)),
        compiler_params=pltpu.CompilerParams(vmem_limit_bytes=32 * 1024 * 1024),
    )(qpos.astype(jnp.float32), actions.astype(jnp.float32), key_pad, eps, img,
      packed["pool_mat"], packed["wslab"], packed["vslab"])

    mu = lat[:, :LATENT_DIM]
    logvar = lat[:, LATENT_DIM:2 * LATENT_DIM]
    out = head.reshape(bsz, NUM_QUERIES, LANE)
    a_hat = out[..., :ACTION_DIM]
    is_pad_hat = out[..., ACTION_DIM:ACTION_DIM + 1]
    return a_hat, is_pad_hat, (mu, logvar), None, None

# ----------------------------------- constants ------------------------------------


def get_sinusoid_encoding_table(n_position, d_hid):
    def angle_vec(pos):
        return [pos / np.power(10000, 2 * (j // 2) / d_hid) for j in range(d_hid)]
    tbl = np.array([angle_vec(p) for p in range(n_position)], dtype=np.float64)
    tbl[:, 0::2] = np.sin(tbl[:, 0::2])
    tbl[:, 1::2] = np.cos(tbl[:, 1::2])
    return jnp.asarray(tbl[None], dtype=jnp.float32)          # (1, n_pos, d)


def sine_pos_embed_2d_flat(h, w, d):
    # TODO(synk): DETR PositionEmbeddingSine lives in the external backbone module;
    # this is a deterministic 2D sine embedding of the right shape (h*w, d).
    half = d // 2
    dim_t = 10000.0 ** (2 * (np.arange(half) // 2) / half)
    y = (np.arange(h, dtype=np.float64) + 1.0) / h * 2 * np.pi
    x = (np.arange(w, dtype=np.float64) + 1.0) / w * 2 * np.pi
    py = y[:, None] / dim_t[None, :]
    px = x[:, None] / dim_t[None, :]
    py = np.stack([np.sin(py[:, 0::2]), np.cos(py[:, 1::2])], axis=2).reshape(h, half)
    px = np.stack([np.sin(px[:, 0::2]), np.cos(px[:, 1::2])], axis=2).reshape(w, half)
    pos = np.concatenate(
        [np.broadcast_to(py[:, None, :], (h, w, half)),
         np.broadcast_to(px[None, :, :], (h, w, half))], axis=-1)   # (h, w, d)
    return jnp.asarray(pos.reshape(h * w, d), dtype=jnp.float32)


def _avg_pool_matrix(in_h, in_w, out_h, out_w):
    """(out_h*out_w, in_h*in_w) average-pooling matrix so pooling is an MXU matmul."""
    fh, fw = in_h // out_h, in_w // out_w
    m = np.zeros((out_h * out_w, in_h * in_w), np.float32)
    for oy in range(out_h):
        for ox in range(out_w):
            q = oy * out_w + ox
            for dy in range(fh):
                for dx in range(fw):
                    m[q, (oy * fh + dy) * in_w + (ox * fw + dx)] = 1.0 / (fh * fw)
    return jnp.asarray(m)

# ------------------------------- parameter init ------------------------------------


def _init_linear(key, fan_in, fan_out):
    kw, kb = jax.random.split(key)
    lim = 1.0 / np.sqrt(fan_in)
    w = jax.random.uniform(kw, (fan_in, fan_out), jnp.float32, -lim, lim)
    b = jax.random.uniform(kb, (fan_out,), jnp.float32, -lim, lim)
    return w, b


def _init_mha(key, H):
    k1, k2 = jax.random.split(key)
    in_w, in_b = _init_linear(k1, H, 3 * H)
    out_w, out_b = _init_linear(k2, H, H)
    return dict(in_w=in_w, in_b=in_b, out_w=out_w, out_b=out_b)


def _init_enc_layer(key, H, FF):
    ks = jax.random.split(key, 3)
    ff1_w, ff1_b = _init_linear(ks[1], H, FF)
    ff2_w, ff2_b = _init_linear(ks[2], FF, H)
    return dict(attn=_init_mha(ks[0], H), ff1_w=ff1_w, ff1_b=ff1_b,
                ff2_w=ff2_w, ff2_b=ff2_b,
                norm1_g=jnp.ones((H,), jnp.float32), norm1_b=jnp.zeros((H,), jnp.float32),
                norm2_g=jnp.ones((H,), jnp.float32), norm2_b=jnp.zeros((H,), jnp.float32))


def _init_dec_layer(key, H, FF):
    ks = jax.random.split(key, 4)
    ff1_w, ff1_b = _init_linear(ks[2], H, FF)
    ff2_w, ff2_b = _init_linear(ks[3], FF, H)
    return dict(self_attn=_init_mha(ks[0], H), cross_attn=_init_mha(ks[1], H),
                ff1_w=ff1_w, ff1_b=ff1_b, ff2_w=ff2_w, ff2_b=ff2_b,
                norm1_g=jnp.ones((H,), jnp.float32), norm1_b=jnp.zeros((H,), jnp.float32),
                norm2_g=jnp.ones((H,), jnp.float32), norm2_b=jnp.zeros((H,), jnp.float32),
                norm3_g=jnp.ones((H,), jnp.float32), norm3_b=jnp.zeros((H,), jnp.float32))


def init_params(key):
    ks = jax.random.split(key, 16)
    H = HIDDEN_DIM
    p = {}
    p["cls_embed"] = jax.random.normal(ks[0], (1, H), jnp.float32)
    p["encoder_action_proj_w"], p["encoder_action_proj_b"] = _init_linear(ks[1], ACTION_DIM, H)
    p["encoder_joint_proj_w"], p["encoder_joint_proj_b"] = _init_linear(ks[2], STATE_DIM, H)
    p["latent_proj_w"], p["latent_proj_b"] = _init_linear(ks[3], H, LATENT_DIM * 2)
    p["latent_out_proj_w"], p["latent_out_proj_b"] = _init_linear(ks[4], LATENT_DIM, H)
    p["pos_table"] = get_sinusoid_encoding_table(1 + 1 + NUM_QUERIES, H)
    p["cvae_enc"] = _init_enc_layer(ks[5], H, DIM_FF)

    # TODO(synk): real ResNet backbone is an external module; synthetic stand-in:
    # 1x1 conv + ReLU + 4x4 average pooling (done inside the fused kernel).
    bw, bb = _init_linear(ks[6], IMG_C, BACKBONE_C)
    p["backbone"] = dict(conv_w=bw, conv_b=bb)
    p["input_proj_w"], p["input_proj_b"] = _init_linear(ks[7], BACKBONE_C, H)
    p["input_proj_robot_state_w"], p["input_proj_robot_state_b"] = _init_linear(ks[8], STATE_DIM, H)
    p["query_embed"] = jax.random.normal(ks[9], (NUM_QUERIES, H), jnp.float32)
    p["additional_pos_embed"] = jax.random.normal(ks[10], (2, H), jnp.float32)
    # TODO(synk): external DETR transformer/encoder modules are stood in by 1 encoder
    # layer + 1 decoder layer (post-norm) matching DETR layer semantics.
    p["transformer"] = dict(
        enc=_init_enc_layer(ks[11], H, DIM_FF),
        dec=_init_dec_layer(ks[12], H, DIM_FF),
        dec_norm_g=jnp.ones((H,), jnp.float32),
        dec_norm_b=jnp.zeros((H,), jnp.float32),
    )
    p["action_head_w"], p["action_head_b"] = _init_linear(ks[13], H, ACTION_DIM)
    p["is_pad_head_w"], p["is_pad_head_b"] = _init_linear(ks[14], H, 1)

    # fixed (non-learned) constants used by the fused kernel
    p["pos2d_flat"] = sine_pos_embed_2d_flat(FEAT_H, FEAT_W, H)        # (16, H)
    p["pool_mat"] = _avg_pool_matrix(IMG_H, IMG_W, FEAT_H, FEAT_W)     # (16, 256)
    return p


def pack_params(p):
    """Pack all learned params / constant tables into two lane-padded f32 slabs."""
    t = p["transformer"]
    head_w = jnp.zeros((_H, LANE), jnp.float32)
    head_w = head_w.at[:, :ACTION_DIM].set(p["action_head_w"])
    head_w = head_w.at[:, ACTION_DIM:ACTION_DIM + 1].set(p["is_pad_head_w"])
    head_b = jnp.zeros((LANE,), jnp.float32)
    head_b = head_b.at[:ACTION_DIM].set(p["action_head_b"])
    head_b = head_b.at[ACTION_DIM:ACTION_DIM + 1].set(p["is_pad_head_b"])
    pos_full = jnp.concatenate([p["additional_pos_embed"], p["pos2d_flat"]], axis=0)

    wvals = {
        "cls_embed": p["cls_embed"],
        "e_act_w": p["encoder_action_proj_w"],
        "e_joint_w": p["encoder_joint_proj_w"],
        "pos_table": p["pos_table"][0],
        "ce_in_w": p["cvae_enc"]["attn"]["in_w"],
        "ce_out_w": p["cvae_enc"]["attn"]["out_w"],
        "ce_ff1_w": p["cvae_enc"]["ff1_w"],
        "ce_ff2_w": p["cvae_enc"]["ff2_w"],
        "lat_w": p["latent_proj_w"],
        "lout_w": p["latent_out_proj_w"],
        "conv_w": p["backbone"]["conv_w"],
        "proj_w": p["input_proj_w"],
        "rob_w": p["input_proj_robot_state_w"],
        "pos_full": pos_full,
        "query_embed": p["query_embed"],
        "te_in_w": t["enc"]["attn"]["in_w"],
        "te_out_w": t["enc"]["attn"]["out_w"],
        "te_ff1_w": t["enc"]["ff1_w"],
        "te_ff2_w": t["enc"]["ff2_w"],
        "td_s_out_w": t["dec"]["self_attn"]["out_w"],
        "td_c_in_w": t["dec"]["cross_attn"]["in_w"],
        "td_c_out_w": t["dec"]["cross_attn"]["out_w"],
        "td_ff1_w": t["dec"]["ff1_w"],
        "td_ff2_w": t["dec"]["ff2_w"],
        "head_w": head_w,
    }
    vvals = {
        "e_act_b": p["encoder_action_proj_b"],
        "e_joint_b": p["encoder_joint_proj_b"],
        "ce_in_b": p["cvae_enc"]["attn"]["in_b"],
        "ce_out_b": p["cvae_enc"]["attn"]["out_b"],
        "ce_n1_g": p["cvae_enc"]["norm1_g"], "ce_n1_b": p["cvae_enc"]["norm1_b"],
        "ce_ff1_b": p["cvae_enc"]["ff1_b"], "ce_ff2_b": p["cvae_enc"]["ff2_b"],
        "ce_n2_g": p["cvae_enc"]["norm2_g"], "ce_n2_b": p["cvae_enc"]["norm2_b"],
        "lat_b": p["latent_proj_b"], "lout_b": p["latent_out_proj_b"],
        "conv_b": p["backbone"]["conv_b"],
        "proj_b": p["input_proj_b"],
        "rob_b": p["input_proj_robot_state_b"],
        "te_in_b": t["enc"]["attn"]["in_b"], "te_out_b": t["enc"]["attn"]["out_b"],
        "te_n1_g": t["enc"]["norm1_g"], "te_n1_b": t["enc"]["norm1_b"],
        "te_ff1_b": t["enc"]["ff1_b"], "te_ff2_b": t["enc"]["ff2_b"],
        "te_n2_g": t["enc"]["norm2_g"], "te_n2_b": t["enc"]["norm2_b"],
        "td_s_in_b": t["dec"]["self_attn"]["in_b"],
        "td_s_out_b": t["dec"]["self_attn"]["out_b"],
        "td_n1_g": t["dec"]["norm1_g"], "td_n1_b": t["dec"]["norm1_b"],
        "td_c_in_b": t["dec"]["cross_attn"]["in_b"],
        "td_c_out_b": t["dec"]["cross_attn"]["out_b"],
        "td_n2_g": t["dec"]["norm2_g"], "td_n2_b": t["dec"]["norm2_b"],
        "td_ff1_b": t["dec"]["ff1_b"], "td_ff2_b": t["dec"]["ff2_b"],
        "td_n3_g": t["dec"]["norm3_g"], "td_n3_b": t["dec"]["norm3_b"],
        "dn_g": t["dec_norm_g"], "dn_b": t["dec_norm_b"],
        "head_b": head_b,
    }
    wslab = jnp.zeros((W_ROWS, LANE), jnp.float32)
    for name, r, c in _W_ENTRIES:
        off = _W_OFF[name][0]
        wslab = wslab.at[off:off + r, :c].set(wvals[name].astype(jnp.float32))
    vslab = jnp.zeros((V_ROWS, LANE), jnp.float32)
    for name, c in _V_ENTRIES:
        off = _V_OFF[name][0]
        vslab = vslab.at[off, :c].set(vvals[name].astype(jnp.float32))
    return {"wslab": wslab, "vslab": vslab, "pool_mat": p["pool_mat"]}

# ------------------------------------- main ----------------------------------------

if __name__ == "__main__":
    key = jax.random.PRNGKey(0)
    pkey, dkey, ekey = jax.random.split(key, 3)
    params = init_params(pkey)
    packed = pack_params(params)     # done once; per-step wrapper does no param concats

    kq, ki, ka = jax.random.split(dkey, 3)
    qpos = jax.random.normal(kq, (B, STATE_DIM), jnp.float32)
    image = jax.random.normal(ki, (B, NUM_CAMS, IMG_C, IMG_H, IMG_W), jnp.float32)
    actions = jax.random.normal(ka, (B, NUM_QUERIES, ACTION_DIM), jnp.float32)
    is_pad = jnp.broadcast_to(jnp.arange(NUM_QUERIES)[None, :] >= NUM_QUERIES - 2,
                              (B, NUM_QUERIES))
    env_state = None

    fwd = jax.jit(detr_vae_forward)
    a_hat, is_pad_hat, (mu, logvar), probs, binaries = fwd(
        packed, qpos, image, env_state, actions, is_pad, ekey)
    jax.block_until_ready((a_hat, is_pad_hat, mu, logvar))

    assert a_hat.shape == (B, NUM_QUERIES, ACTION_DIM)
    assert is_pad_hat.shape == (B, NUM_QUERIES, 1)
    assert mu.shape == (B, LATENT_DIM) and logvar.shape == (B, LATENT_DIM)
    assert bool(jnp.all(jnp.isfinite(a_hat))) and bool(jnp.all(jnp.isfinite(is_pad_hat)))
    assert bool(jnp.all(jnp.isfinite(mu))) and bool(jnp.all(jnp.isfinite(logvar)))
    print("KERNEL_OK")
</pallas_src>

<mosaic_0001>
module attributes {stable_mosaic.version = 11 : i64} {
  func.func @_detr_vae_kernel(%arg0: memref<2x4xf32, #tpu.memory_space<vmem>>, %arg1: memref<2x8x6xf32, #tpu.memory_space<vmem>>, %arg2: memref<2x10xf32, #tpu.memory_space<vmem>>, %arg3: memref<2x32xf32, #tpu.memory_space<vmem>>, %arg4: memref<2x256x3xf32, #tpu.memory_space<vmem>>, %arg5: memref<16x256xf32, #tpu.memory_space<vmem>>, %arg6: memref<704x128xf32, #tpu.memory_space<vmem>>, %arg7: memref<40x128xf32, #tpu.memory_space<vmem>>, %arg8: memref<2x128xf32, #tpu.memory_space<vmem>>, %arg9: memref<16x128xf32, #tpu.memory_space<vmem>>) attributes {dimension_semantics = [], scalar_prefetch = 0 : i64, scratch_operands = 0 : i64, tpu.core_type = #tpu.core_type<tc>} {
    %c0 = arith.constant 0 : index
    %c0_0 = arith.constant 0 : index
    %0 = vector.load %arg0[%c0, %c0_0] : memref<2x4xf32, #tpu.memory_space<vmem>>, vector<2x4xf32>
    %c0_1 = arith.constant 0 : index
    %c0_2 = arith.constant 0 : index
    %1 = vector.load %arg6[%c0_1, %c0_2] : memref<704x128xf32, #tpu.memory_space<vmem>>, vector<1x32xf32>
    %2 = vector.shape_cast %1 : vector<1x32xf32> to vector<1x1x32xf32>
    %3 = vector.shape_cast %2 : vector<1x1x32xf32> to vector<1x1x32xf32>
    %4 = vector.broadcast %3 : vector<1x1x32xf32> to vector<2x1x32xf32>
    %c16 = arith.constant 16 : index
    %c0_3 = arith.constant 0 : index
    %5 = vector.load %arg6[%c16, %c0_3] : memref<704x128xf32, #tpu.memory_space<vmem>>, vector<4x32xf32>
    %cst = arith.constant dense<0.000000e+00> : vector<2x32xf32>
    %6 = tpu.matmul %0, %5, %cst {dimension_numbers = #tpu.dot_dimension_numbers<[1], [0], [0], [1], [0, 0, 1, 1], [], []>} : vector<2x4xf32>, vector<4x32xf32>, vector<2x32xf32> -> vector<2x32xf32>
    %c1 = arith.constant 1 : index
    %c0_4 = arith.constant 0 : index
    %7 = vector.load %arg7[%c1, %c0_4] : memref<40x128xf32, #tpu.memory_space<vmem>>, vector<1x32xf32>
    %8 = vector.broadcast %7 : vector<1x32xf32> to vector<2x32xf32>
    %9 = arith.addf %6, %8 : vector<2x32xf32>
    %10 = vector.shape_cast %9 : vector<2x32xf32> to vector<2x1x32xf32>
    %c0_5 = arith.constant 0 : index
    %c0_6 = arith.constant 0 : index
    %c0_7 = arith.constant 0 : index
    %11 = vector.load %arg1[%c0_5, %c0_6, %c0_7] : memref<2x8x6xf32, #tpu.memory_space<vmem>>, vector<2x8x6xf32>
    %c8 = arith.constant 8 : index
    %c0_8 = arith.constant 0 : index
    %12 = vector.load %arg6[%c8, %c0_8] : memref<704x128xf32, #tpu.memory_space<vmem>>, vector<6x32xf32>
    %c0_9 = arith.constant 0 : index
    %c0_10 = arith.constant 0 : index
    %13 = vector.load %arg7[%c0_9, %c0_10] : memref<40x128xf32, #tpu.memory_space<vmem>>, vector<1x32xf32>
    %14 = vector.shape_cast %11 : vector<2x8x6xf32> to vector<16x6xf32>
    %cst_11 = arith.constant dense<0.000000e+00> : vector<16x32xf32>
    %15 = tpu.matmul %14, %12, %cst_11 {dimension_numbers = #tpu.dot_dimension_numbers<[1], [0], [0], [1], [0, 0, 1, 1], [], []>} : vector<16x6xf32>, vector<6x32xf32>, vector<16x32xf32> -> vector<16x32xf32>
    %16 = vector.broadcast %13 : vector<1x32xf32> to vector<16x32xf32>
    %17 = arith.addf %15, %16 : vector<16x32xf32>
    %18 = vector.shape_cast %17 : vector<16x32xf32> to vector<2x8x32xf32>
    %19 = tpu.concatenate %4, %10, %18 in 1 : vector<2x1x32xf32>, vector<2x1x32xf32>, vector<2x8x32xf32> -> vector<2x10x32xf32>
    %c24 = arith.constant 24 : index
    %c0_12 = arith.constant 0 : index
    %20 = vector.load %arg6[%c24, %c0_12] : memref<704x128xf32, #tpu.memory_space<vmem>>, vector<10x32xf32>
    %21 = vector.shape_cast %20 : vector<10x32xf32> to vector<1x10x32xf32>
    %c0_13 = arith.constant 0 : index
    %c0_14 = arith.constant 0 : index
    %22 = vector.load %arg2[%c0_13, %c0_14] : memref<2x10xf32, #tpu.memory_space<vmem>>, vector<2x10xf32>
    %23 = vector.shape_cast %22 : vector<2x10xf32> to vector<2x1x10xf32>
    %cst_15 = arith.constant -1.000000e+09 : f32
    %24 = vector.broadcast %cst_15 : f32 to vector<2x1x10xf32>
    %25 = arith.mulf %23, %24 : vector<2x1x10xf32>
    %26 = vector.broadcast %21 : vector<1x10x32xf32> to vector<2x10x32xf32>
    %27 = arith.addf %19, %26 : vector<2x10x32xf32>
    %c40 = arith.constant 40 : index
    %c0_16 = arith.constant 0 : index
    %28 = vector.load %arg6[%c40, %c0_16] : memref<704x128xf32, #tpu.memory_space<vmem>>, vector<32x96xf32>
    %c2 = arith.constant 2 : index
    %c0_17 = arith.constant 0 : index
    %29 = vector.load %arg7[%c2, %c0_17] : memref<40x128xf32, #tpu.memory_space<vmem>>, vector<1x96xf32>
    %c72 = arith.constant 72 : index
    %c0_18 = arith.constant 0 : index
    %30 = vector.load %arg6[%c72, %c0_18] : memref<704x128xf32, #tpu.memory_space<vmem>>, vector<32x32xf32>
    %c3 = arith.constant 3 : index
    %c0_19 = arith.constant 0 : index
    %31 = vector.load %arg7[%c3, %c0_19] : memref<40x128xf32, #tpu.memory_space<vmem>>, vector<1x32xf32>
    %32 = vector.shape_cast %27 : vector<2x10x32xf32> to vector<20x32xf32>
    %33 = vector.extract_strided_slice %28 {offsets = [0, 0], sizes = [32, 64], strides = [1, 1]} : vector<32x96xf32> to vector<32x64xf32>
    %34 = arith.truncf %32 : vector<20x32xf32> to vector<20x32xbf16>
    %35 = arith.truncf %33 : vector<32x64xf32> to vector<32x64xbf16>
    %cst_20 = arith.constant dense<0.000000e+00> : vector<20x64xf32>
    %36 = tpu.matmul %34, %35, %cst_20 {dimension_numbers = #tpu.dot_dimension_numbers<[1], [0], [0], [1], [0, 0, 1, 1], [], []>} : vector<20x32xbf16>, vector<32x64xbf16>, vector<20x64xf32> -> vector<20x64xf32>
    %37 = vector.extract_strided_slice %29 {offsets = [0, 0], sizes = [1, 64], strides = [1, 1]} : vector<1x96xf32> to vector<1x64xf32>
    %38 = vector.broadcast %37 : vector<1x64xf32> to vector<20x64xf32>
    %39 = arith.addf %36, %38 : vector<20x64xf32>
    %40 = vector.extract_strided_slice %39 {offsets = [0, 0], sizes = [20, 32], strides = [1, 1]} : vector<20x64xf32> to vector<20x32xf32>
    %41 = vector.shape_cast %40 : vector<20x32xf32> to vector<2x10x32xf32>
    %42 = vector.extract_strided_slice %39 {offsets = [0, 32], sizes = [20, 32], strides = [1, 1]} : vector<20x64xf32> to vector<20x32xf32>
    %43 = vector.shape_cast %42 : vector<20x32xf32> to vector<2x10x32xf32>
    %44 = vector.extract_strided_slice %28 {offsets = [0, 64], sizes = [32, 32], strides = [1, 1]} : vector<32x96xf32> to vector<32x32xf32>
    %45 = vector.extract_strided_slice %29 {offsets = [0, 64], sizes = [1, 32], strides = [1, 1]} : vector<1x96xf32> to vector<1x32xf32>
    %46 = vector.shape_cast %19 : vector<2x10x32xf32> to vector<20x32xf32>
    %47 = arith.truncf %46 : vector<20x32xf32> to vector<20x32xbf16>
    %48 = arith.truncf %44 : vector<32x32xf32> to vector<32x32xbf16>
    %cst_21 = arith.constant dense<0.000000e+00> : vector<20x32xf32>
    %49 = tpu.matmul %47, %48, %cst_21 {dimension_numbers = #tpu.dot_dimension_numbers<[1], [0], [0], [1], [0, 0, 1, 1], [], []>} : vector<20x32xbf16>, vector<32x32xbf16>, vector<20x32xf32> -> vector<20x32xf32>
    %50 = vector.broadcast %45 : vector<1x32xf32> to vector<20x32xf32>
    %51 = arith.addf %49, %50 : vector<20x32xf32>
    %52 = vector.shape_cast %51 : vector<20x32xf32> to vector<2x10x32xf32>
    %53 = vector.extract_strided_slice %41 {offsets = [0, 0, 0], sizes = [2, 10, 8], strides = [1, 1, 1]} : vector<2x10x32xf32> to vector<2x10x8xf32>
    %54 = vector.extract_strided_slice %41 {offsets = [0, 0, 8], sizes = [2, 10, 8], strides = [1, 1, 1]} : vector<2x10x32xf32> to vector<2x10x8xf32>
    %55 = vector.extract_strided_slice %41 {offsets = [0, 0, 16], sizes = [2, 10, 8], strides = [1, 1, 1]} : vector<2x10x32xf32> to vector<2x10x8xf32>
    %56 = vector.extract_strided_slice %41 {offsets = [0, 0, 24], sizes = [2, 10, 8], strides = [1, 1, 1]} : vector<2x10x32xf32> to vector<2x10x8xf32>
    %57 = tpu.concatenate %53, %54, %55, %56 in 0 : vector<2x10x8xf32>, vector<2x10x8xf32>, vector<2x10x8xf32>, vector<2x10x8xf32> -> vector<8x10x8xf32>
    %58 = vector.extract_strided_slice %43 {offsets = [0, 0, 0], sizes = [2, 10, 8], strides = [1, 1, 1]} : vector<2x10x32xf32> to vector<2x10x8xf32>
    %59 = vector.extract_strided_slice %43 {offsets = [0, 0, 8], sizes = [2, 10, 8], strides = [1, 1, 1]} : vector<2x10x32xf32> to vector<2x10x8xf32>
    %60 = vector.extract_strided_slice %43 {offsets = [0, 0, 16], sizes = [2, 10, 8], strides = [1, 1, 1]} : vector<2x10x32xf32> to vector<2x10x8xf32>
    %61 = vector.extract_strided_slice %43 {offsets = [0, 0, 24], sizes = [2, 10, 8], strides = [1, 1, 1]} : vector<2x10x32xf32> to vector<2x10x8xf32>
    %62 = tpu.concatenate %58, %59, %60, %61 in 0 : vector<2x10x8xf32>, vector<2x10x8xf32>, vector<2x10x8xf32>, vector<2x10x8xf32> -> vector<8x10x8xf32>
    %63 = vector.extract_strided_slice %52 {offsets = [0, 0, 0], sizes = [2, 10, 8], strides = [1, 1, 1]} : vector<2x10x32xf32> to vector<2x10x8xf32>
    %64 = vector.extract_strided_slice %52 {offsets = [0, 0, 8], sizes = [2, 10, 8], strides = [1, 1, 1]} : vector<2x10x32xf32> to vector<2x10x8xf32>
    %65 = vector.extract_strided_slice %52 {offsets = [0, 0, 16], sizes = [2, 10, 8], strides = [1, 1, 1]} : vector<2x10x32xf32> to vector<2x10x8xf32>
    %66 = vector.extract_strided_slice %52 {offsets = [0, 0, 24], sizes = [2, 10, 8], strides = [1, 1, 1]} : vector<2x10x32xf32> to vector<2x10x8xf32>
    %67 = tpu.concatenate %63, %64, %65, %66 in 0 : vector<2x10x8xf32>, vector<2x10x8xf32>, vector<2x10x8xf32>, vector<2x10x8xf32> -> vector<8x10x8xf32>
    %68 = arith.truncf %57 : vector<8x10x8xf32> to vector<8x10x8xbf16>
    %69 = arith.truncf %62 : vector<8x10x8xf32> to vector<8x10x8xbf16>
    "tpu.trace_start"() <{level = 10 : i32, message = "bqd,bkd->bqk"}> : () -> ()
    %cst_22 = arith.constant dense<0.000000e+00> : vector<8x10x10xf32>
    %70 = tpu.matmul %68, %69, %cst_22 {dimension_numbers = #tpu.dot_dimension_numbers<[2], [2], [1], [1], [0, 0, 0, 1, 1, 1], [0], [0]>} : vector<8x10x8xbf16>, vector<8x10x8xbf16>, vector<8x10x10xf32> -> vector<8x10x10xf32>
    "tpu.trace_stop"() : () -> ()
    %cst_23 = arith.constant 0.353553385 : f32
    %71 = vector.broadcast %cst_23 : f32 to vector<8x10x10xf32>
    %72 = arith.mulf %70, %71 : vector<8x10x10xf32>
    %73 = tpu.concatenate %25, %25, %25, %25 in 0 : vector<2x1x10xf32>, vector<2x1x10xf32>, vector<2x1x10xf32>, vector<2x1x10xf32> -> vector<8x1x10xf32>
    %74 = vector.broadcast %73 : vector<8x1x10xf32> to vector<8x10x10xf32>
    %75 = arith.addf %72, %74 : vector<8x10x10xf32>
    %cst_24 = arith.constant dense<0xFF800000> : vector<8x10xf32>
    %76 = vector.multi_reduction <maximumf>, %75, %cst_24 [2] : vector<8x10x10xf32> to vector<8x10xf32>
    %77 = vector.shape_cast %76 : vector<8x10xf32> to vector<8x10x1xf32>
    %78 = vector.broadcast %77 : vector<8x10x1xf32> to vector<8x10x10xf32>
    %79 = arith.subf %75, %78 : vector<8x10x10xf32>
    %80 = math.exp %79 : vector<8x10x10xf32>
    %cst_25 = arith.constant dense<0.000000e+00> : vector<8x10xf32>
    %81 = vector.multi_reduction <add>, %80, %cst_25 [2] : vector<8x10x10xf32> to vector<8x10xf32>
    %82 = vector.shape_cast %81 : vector<8x10xf32> to vector<8x10x1xf32>
    %83 = tpu.reciprocal %82 {approx = true} : vector<8x10x1xf32> -> vector<8x10x1xf32>
    %84 = vector.broadcast %83 : vector<8x10x1xf32> to vector<8x10x10xf32>
    %85 = arith.mulf %80, %84 : vector<8x10x10xf32>
    %86 = arith.truncf %85 : vector<8x10x10xf32> to vector<8x10x10xbf16>
    %87 = arith.truncf %67 : vector<8x10x8xf32> to vector<8x10x8xbf16>
    "tpu.trace_start"() <{level = 10 : i32, message = "bqk,bkd->bqd"}> : () -> ()
    %cst_26 = arith.constant dense<0.000000e+00> : vector<8x10x8xf32>
    %88 = tpu.matmul %86, %87, %cst_26 {dimension_numbers = #tpu.dot_dimension_numbers<[2], [1], [1], [2], [0, 0, 0, 1, 1, 2], [0], [0]>} : vector<8x10x10xbf16>, vector<8x10x8xbf16>, vector<8x10x8xf32> -> vector<8x10x8xf32>
    "tpu.trace_stop"() : () -> ()
    %89 = vector.extract_strided_slice %88 {offsets = [0, 0, 0], sizes = [2, 10, 8], strides = [1, 1, 1]} : vector<8x10x8xf32> to vector<2x10x8xf32>
    %90 = vector.extract_strided_slice %88 {offsets = [2, 0, 0], sizes = [2, 10, 8], strides = [1, 1, 1]} : vector<8x10x8xf32> to vector<2x10x8xf32>
    %91 = vector.extract_strided_slice %88 {offsets = [4, 0, 0], sizes = [2, 10, 8], strides = [1, 1, 1]} : vector<8x10x8xf32> to vector<2x10x8xf32>
    %92 = vector.extract_strided_slice %88 {offsets = [6, 0, 0], sizes = [2, 10, 8], strides = [1, 1, 1]} : vector<8x10x8xf32> to vector<2x10x8xf32>
    %93 = tpu.concatenate %89, %90, %91, %92 in 2 : vector<2x10x8xf32>, vector<2x10x8xf32>, vector<2x10x8xf32>, vector<2x10x8xf32> -> vector<2x10x32xf32>
    %94 = vector.shape_cast %93 : vector<2x10x32xf32> to vector<20x32xf32>
    %95 = arith.truncf %94 : vector<20x32xf32> to vector<20x32xbf16>
    %96 = arith.truncf %30 : vector<32x32xf32> to vector<32x32xbf16>
    %cst_27 = arith.constant dense<0.000000e+00> : vector<20x32xf32>
    %97 = tpu.matmul %95, %96, %cst_27 {dimension_numbers = #tpu.dot_dimension_numbers<[1], [0], [0], [1], [0, 0, 1, 1], [], []>} : vector<20x32xbf16>, vector<32x32xbf16>, vector<20x32xf32> -> vector<20x32xf32>
    %98 = vector.broadcast %31 : vector<1x32xf32> to vector<20x32xf32>
    %99 = arith.addf %97, %98 : vector<20x32xf32>
    %100 = vector.shape_cast %99 : vector<20x32xf32> to vector<2x10x32xf32>
    %101 = arith.addf %19, %100 : vector<2x10x32xf32>
    %c4 = arith.constant 4 : index
    %c0_28 = arith.constant 0 : index
    %102 = vector.load %arg7[%c4, %c0_28] : memref<40x128xf32, #tpu.memory_space<vmem>>, vector<1x32xf32>
    %c5 = arith.constant 5 : index
    %c0_29 = arith.constant 0 : index
    %103 = vector.load %arg7[%c5, %c0_29] : memref<40x128xf32, #tpu.memory_space<vmem>>, vector<1x32xf32>
    %cst_30 = arith.constant dense<0.000000e+00> : vector<2x10xf32>
    %104 = vector.multi_reduction <add>, %101, %cst_30 [2] : vector<2x10x32xf32> to vector<2x10xf32>
    %105 = vector.shape_cast %104 : vector<2x10xf32> to vector<2x10x1xf32>
    %cst_31 = arith.constant 3.200000e+01 : f32
    %106 = vector.broadcast %cst_31 : f32 to vector<2x10x1xf32>
    %107 = arith.divf %105, %106 : vector<2x10x1xf32>
    %108 = vector.broadcast %107 : vector<2x10x1xf32> to vector<2x10x32xf32>
    %109 = arith.subf %101, %108 : vector<2x10x32xf32>
    %110 = arith.mulf %109, %109 : vector<2x10x32xf32>
    %cst_32 = arith.constant dense<0.000000e+00> : vector<2x10xf32>
    %111 = vector.multi_reduction <add>, %110, %cst_32 [2] : vector<2x10x32xf32> to vector<2x10xf32>
    %112 = vector.shape_cast %111 : vector<2x10xf32> to vector<2x10x1xf32>
    %cst_33 = arith.constant 3.200000e+01 : f32
    %113 = vector.broadcast %cst_33 : f32 to vector<2x10x1xf32>
    %114 = arith.divf %112, %113 : vector<2x10x1xf32>
    %115 = vector.broadcast %107 : vector<2x10x1xf32> to vector<2x10x32xf32>
    %116 = arith.subf %101, %115 : vector<2x10x32xf32>
    %cst_34 = arith.constant 9.99999974E-6 : f32
    %117 = vector.broadcast %cst_34 : f32 to vector<2x10x1xf32>
    %118 = arith.addf %114, %117 : vector<2x10x1xf32>
    %119 = math.rsqrt %118 : vector<2x10x1xf32>
    %120 = vector.broadcast %119 : vector<2x10x1xf32> to vector<2x10x32xf32>
    %121 = arith.mulf %116, %120 : vector<2x10x32xf32>
    %122 = vector.shape_cast %102 : vector<1x32xf32> to vector<1x1x32xf32>
    %123 = vector.broadcast %122 : vector<1x1x32xf32> to vector<2x10x32xf32>
    %124 = arith.mulf %121, %123 : vector<2x10x32xf32>
    %125 = vector.shape_cast %103 : vector<1x32xf32> to vector<1x1x32xf32>
    %126 = vector.broadcast %125 : vector<1x1x32xf32> to vector<2x10x32xf32>
    %127 = arith.addf %124, %126 : vector<2x10x32xf32>
    %c104 = arith.constant 104 : index
    %c0_35 = arith.constant 0 : index
    %128 = vector.load %arg6[%c104, %c0_35] : memref<704x128xf32, #tpu.memory_space<vmem>>, vector<32x64xf32>
    %c6 = arith.constant 6 : index
    %c0_36 = arith.constant 0 : index
    %129 = vector.load %arg7[%c6, %c0_36] : memref<40x128xf32, #tpu.memory_space<vmem>>, vector<1x64xf32>
    %130 = vector.shape_cast %127 : vector<2x10x32xf32> to vector<20x32xf32>
    %131 = arith.truncf %130 : vector<20x32xf32> to vector<20x32xbf16>
    %132 = arith.truncf %128 : vector<32x64xf32> to vector<32x64xbf16>
    %cst_37 = arith.constant dense<0.000000e+00> : vector<20x64xf32>
    %133 = tpu.matmul %131, %132, %cst_37 {dimension_numbers = #tpu.dot_dimension_numbers<[1], [0], [0], [1], [0, 0, 1, 1], [], []>} : vector<20x32xbf16>, vector<32x64xbf16>, vector<20x64xf32> -> vector<20x64xf32>
    %134 = vector.broadcast %129 : vector<1x64xf32> to vector<20x64xf32>
    %135 = arith.addf %133, %134 : vector<20x64xf32>
    %136 = vector.shape_cast %135 : vector<20x64xf32> to vector<2x10x64xf32>
    %cst_38 = arith.constant 0.000000e+00 : f32
    %137 = vector.broadcast %cst_38 : f32 to vector<2x10x64xf32>
    %138 = arith.maximumf %136, %137 : vector<2x10x64xf32>
    %c136 = arith.constant 136 : index
    %c0_39 = arith.constant 0 : index
    %139 = vector.load %arg6[%c136, %c0_39] : memref<704x128xf32, #tpu.memory_space<vmem>>, vector<64x32xf32>
    %c7 = arith.constant 7 : index
    %c0_40 = arith.constant 0 : index
    %140 = vector.load %arg7[%c7, %c0_40] : memref<40x128xf32, #tpu.memory_space<vmem>>, vector<1x32xf32>
    %141 = vector.shape_cast %138 : vector<2x10x64xf32> to vector<20x64xf32>
    %142 = arith.truncf %141 : vector<20x64xf32> to vector<20x64xbf16>
    %143 = arith.truncf %139 : vector<64x32xf32> to vector<64x32xbf16>
    %cst_41 = arith.constant dense<0.000000e+00> : vector<20x32xf32>
    %144 = tpu.matmul %142, %143, %cst_41 {dimension_numbers = #tpu.dot_dimension_numbers<[1], [0], [0], [1], [0, 0, 1, 1], [], []>} : vector<20x64xbf16>, vector<64x32xbf16>, vector<20x32xf32> -> vector<20x32xf32>
    %145 = vector.broadcast %140 : vector<1x32xf32> to vector<20x32xf32>
    %146 = arith.addf %144, %145 : vector<20x32xf32>
    %147 = vector.shape_cast %146 : vector<20x32xf32> to vector<2x10x32xf32>
    %148 = arith.addf %127, %147 : vector<2x10x32xf32>
    %c8_42 = arith.constant 8 : index
    %c0_43 = arith.constant 0 : index
    %149 = vector.load %arg7[%c8_42, %c0_43] : memref<40x128xf32, #tpu.memory_space<vmem>>, vector<1x32xf32>
    %c9 = arith.constant 9 : index
    %c0_44 = arith.constant 0 : index
    %150 = vector.load %arg7[%c9, %c0_44] : memref<40x128xf32, #tpu.memory_space<vmem>>, vector<1x32xf32>
    %cst_45 = arith.constant dense<0.000000e+00> : vector<2x10xf32>
    %151 = vector.multi_reduction <add>, %148, %cst_45 [2] : vector<2x10x32xf32> to vector<2x10xf32>
    %152 = vector.shape_cast %151 : vector<2x10xf32> to vector<2x10x1xf32>
    %cst_46 = arith.constant 3.200000e+01 : f32
    %153 = vector.broadcast %cst_46 : f32 to vector<2x10x1xf32>
    %154 = arith.divf %152, %153 : vector<2x10x1xf32>
    %155 = vector.broadcast %154 : vector<2x10x1xf32> to vector<2x10x32xf32>
    %156 = arith.subf %148, %155 : vector<2x10x32xf32>
    %157 = arith.mulf %156, %156 : vector<2x10x32xf32>
    %cst_47 = arith.constant dense<0.000000e+00> : vector<2x10xf32>
    %158 = vector.multi_reduction <add>, %157, %cst_47 [2] : vector<2x10x32xf32> to vector<2x10xf32>
    %159 = vector.shape_cast %158 : vector<2x10xf32> to vector<2x10x1xf32>
    %cst_48 = arith.constant 3.200000e+01 : f32
    %160 = vector.broadcast %cst_48 : f32 to vector<2x10x1xf32>
    %161 = arith.divf %159, %160 : vector<2x10x1xf32>
    %162 = vector.broadcast %154 : vector<2x10x1xf32> to vector<2x10x32xf32>
    %163 = arith.subf %148, %162 : vector<2x10x32xf32>
    %cst_49 = arith.constant 9.99999974E-6 : f32
    %164 = vector.broadcast %cst_49 : f32 to vector<2x10x1xf32>
    %165 = arith.addf %161, %164 : vector<2x10x1xf32>
    %166 = math.rsqrt %165 : vector<2x10x1xf32>
    %167 = vector.broadcast %166 : vector<2x10x1xf32> to vector<2x10x32xf32>
    %168 = arith.mulf %163, %167 : vector<2x10x32xf32>
    %169 = vector.shape_cast %149 : vector<1x32xf32> to vector<1x1x32xf32>
    %170 = vector.broadcast %169 : vector<1x1x32xf32> to vector<2x10x32xf32>
    %171 = arith.mulf %168, %170 : vector<2x10x32xf32>
    %172 = vector.shape_cast %150 : vector<1x32xf32> to vector<1x1x32xf32>
    %173 = vector.broadcast %172 : vector<1x1x32xf32> to vector<2x10x32xf32>
    %174 = arith.addf %171, %173 : vector<2x10x32xf32>
    %175 = vector.extract_strided_slice %174 {offsets = [0, 0, 0], sizes = [2, 1, 32], strides = [1, 1, 1]} : vector<2x10x32xf32> to vector<2x1x32xf32>
    %176 = vector.shape_cast %175 : vector<2x1x32xf32> to vector<2x32xf32>
    %c200 = arith.constant 200 : index
    %c0_50 = arith.constant 0 : index
    %177 = vector.load %arg6[%c200, %c0_50] : memref<704x128xf32, #tpu.memory_space<vmem>>, vector<32x64xf32>
    %178 = arith.truncf %176 : vector<2x32xf32> to vector<2x32xbf16>
    %179 = arith.truncf %177 : vector<32x64xf32> to vector<32x64xbf16>
    %cst_51 = arith.constant dense<0.000000e+00> : vector<2x64xf32>
    %180 = tpu.matmul %178, %179, %cst_51 {dimension_numbers = #tpu.dot_dimension_numbers<[1], [0], [0], [1], [0, 0, 1, 1], [], []>} : vector<2x32xbf16>, vector<32x64xbf16>, vector<2x64xf32> -> vector<2x64xf32>
    %c10 = arith.constant 10 : index
    %c0_52 = arith.constant 0 : index
    %181 = vector.load %arg7[%c10, %c0_52] : memref<40x128xf32, #tpu.memory_space<vmem>>, vector<1x64xf32>
    %182 = vector.broadcast %181 : vector<1x64xf32> to vector<2x64xf32>
    %183 = arith.addf %180, %182 : vector<2x64xf32>
    %184 = vector.extract_strided_slice %183 {offsets = [0, 0], sizes = [2, 32], strides = [1, 1]} : vector<2x64xf32> to vector<2x32xf32>
    %185 = vector.extract_strided_slice %183 {offsets = [0, 32], sizes = [2, 32], strides = [1, 1]} : vector<2x64xf32> to vector<2x32xf32>
    %cst_53 = arith.constant 5.000000e-01 : f32
    %186 = vector.broadcast %cst_53 : f32 to vector<2x32xf32>
    %187 = arith.mulf %186, %185 : vector<2x32xf32>
    %188 = math.exp %187 : vector<2x32xf32>
    %c0_54 = arith.constant 0 : index
    %c0_55 = arith.constant 0 : index
    %189 = vector.load %arg3[%c0_54, %c0_55] : memref<2x32xf32, #tpu.memory_space<vmem>>, vector<2x32xf32>
    %190 = arith.mulf %188, %189 : vector<2x32xf32>
    %191 = arith.addf %184, %190 : vector<2x32xf32>
    %c232 = arith.constant 232 : index
    %c0_56 = arith.constant 0 : index
    %192 = vector.load %arg6[%c232, %c0_56] : memref<704x128xf32, #tpu.memory_space<vmem>>, vector<32x32xf32>
    %193 = arith.truncf %191 : vector<2x32xf32> to vector<2x32xbf16>
    %194 = arith.truncf %192 : vector<32x32xf32> to vector<32x32xbf16>
    %cst_57 = arith.constant dense<0.000000e+00> : vector<2x32xf32>
    %195 = tpu.matmul %193, %194, %cst_57 {dimension_numbers = #tpu.dot_dimension_numbers<[1], [0], [0], [1], [0, 0, 1, 1], [], []>} : vector<2x32xbf16>, vector<32x32xbf16>, vector<2x32xf32> -> vector<2x32xf32>
    %c11 = arith.constant 11 : index
    %c0_58 = arith.constant 0 : index
    %196 = vector.load %arg7[%c11, %c0_58] : memref<40x128xf32, #tpu.memory_space<vmem>>, vector<1x32xf32>
    %197 = vector.broadcast %196 : vector<1x32xf32> to vector<2x32xf32>
    %198 = arith.addf %195, %197 : vector<2x32xf32>
    %cst_59 = arith.constant 0.000000e+00 : f32
    %199 = vector.broadcast %cst_59 : f32 to vector<2x64xf32>
    %200 = tpu.concatenate %183, %199 in 1 : vector<2x64xf32>, vector<2x64xf32> -> vector<2x128xf32>
    %c0_60 = arith.constant 0 : index
    %c0_61 = arith.constant 0 : index
    %201 = vector.load %arg8[%c0_60, %c0_61] : memref<2x128xf32, #tpu.memory_space<vmem>>, vector<2x128xf32>
    tpu.vector_store %arg8[%c0_60, %c0_61], %200 {strides = array<i32>} : memref<2x128xf32, #tpu.memory_space<vmem>>, vector<2x128xf32>,
    %c0_62 = arith.constant 0 : index
    %c0_63 = arith.constant 0 : index
    %c0_64 = arith.constant 0 : index
    %202 = vector.load %arg4[%c0_62, %c0_63, %c0_64] : memref<2x256x3xf32, #tpu.memory_space<vmem>>, vector<2x256x3xf32>
    %c264 = arith.constant 264 : index
    %c0_65 = arith.constant 0 : index
    %203 = vector.load %arg6[%c264, %c0_65] : memref<704x128xf32, #tpu.memory_space<vmem>>, vector<3x8xf32>
    %c12 = arith.constant 12 : index
    %c0_66 = arith.constant 0 : index
    %204 = vector.load %arg7[%c12, %c0_66] : memref<40x128xf32, #tpu.memory_space<vmem>>, vector<1x8xf32>
    %205 = vector.shape_cast %202 : vector<2x256x3xf32> to vector<512x3xf32>
    %cst_67 = arith.constant dense<0.000000e+00> : vector<512x8xf32>
    %206 = tpu.matmul %205, %203, %cst_67 {dimension_numbers = #tpu.dot_dimension_numbers<[1], [0], [0], [1], [0, 0, 1, 1], [], []>} : vector<512x3xf32>, vector<3x8xf32>, vector<512x8xf32> -> vector<512x8xf32>
    %207 = vector.broadcast %204 : vector<1x8xf32> to vector<512x8xf32>
    %208 = arith.addf %206, %207 : vector<512x8xf32>
    %209 = vector.shape_cast %208 : vector<512x8xf32> to vector<2x256x8xf32>
    %cst_68 = arith.constant 0.000000e+00 : f32
    %210 = vector.broadcast %cst_68 : f32 to vector<2x256x8xf32>
    %211 = arith.maximumf %209, %210 : vector<2x256x8xf32>
    %c272 = arith.constant 272 : index
    %c0_69 = arith.constant 0 : index
    %212 = vector.load %arg6[%c272, %c0_69] : memref<704x128xf32, #tpu.memory_space<vmem>>, vector<8x32xf32>
    %c13 = arith.constant 13 : index
    %c0_70 = arith.constant 0 : index
    %213 = vector.load %arg7[%c13, %c0_70] : memref<40x128xf32, #tpu.memory_space<vmem>>, vector<1x32xf32>
    %214 = vector.shape_cast %211 : vector<2x256x8xf32> to vector<512x8xf32>
    %cst_71 = arith.constant dense<0.000000e+00> : vector<512x32xf32>
    %215 = tpu.matmul %214, %212, %cst_71 {dimension_numbers = #tpu.dot_dimension_numbers<[1], [0], [0], [1], [0, 0, 1, 1], [], []>} : vector<512x8xf32>, vector<8x32xf32>, vector<512x32xf32> -> vector<512x32xf32>
    %216 = vector.broadcast %213 : vector<1x32xf32> to vector<512x32xf32>
    %217 = arith.addf %215, %216 : vector<512x32xf32>
    %218 = vector.shape_cast %217 : vector<512x32xf32> to vector<2x256x32xf32>
    %c0_72 = arith.constant 0 : index
    %c0_73 = arith.constant 0 : index
    %219 = vector.load %arg5[%c0_72, %c0_73] : memref<16x256xf32, #tpu.memory_space<vmem>>, vector<16x256xf32>
    %220 = vector.extract_strided_slice %218 {offsets = [0, 0, 0], sizes = [1, 256, 32], strides = [1, 1, 1]} : vector<2x256x32xf32> to vector<1x256x32xf32>
    %221 = vector.shape_cast %220 : vector<1x256x32xf32> to vector<256x32xf32>
    %222 = arith.truncf %219 : vector<16x256xf32> to vector<16x256xbf16>
    %223 = arith.truncf %221 : vector<256x32xf32> to vector<256x32xbf16>
    %cst_74 = arith.constant dense<0.000000e+00> : vector<16x32xf32>
    %224 = tpu.matmul %222, %223, %cst_74 {dimension_numbers = #tpu.dot_dimension_numbers<[1], [0], [0], [1], [0, 0, 1, 1], [], []>} : vector<16x256xbf16>, vector<256x32xbf16>, vector<16x32xf32> -> vector<16x32xf32>
    %225 = vector.shape_cast %224 : vector<16x32xf32> to vector<1x16x32xf32>
    %226 = vector.extract_strided_slice %218 {offsets = [1, 0, 0], sizes = [1, 256, 32], strides = [1, 1, 1]} : vector<2x256x32xf32> to vector<1x256x32xf32>
    %227 = vector.shape_cast %226 : vector<1x256x32xf32> to vector<256x32xf32>
    %228 = arith.truncf %219 : vector<16x256xf32> to vector<16x256xbf16>
    %229 = arith.truncf %227 : vector<256x32xf32> to vector<256x32xbf16>
    %cst_75 = arith.constant dense<0.000000e+00> : vector<16x32xf32>
    %230 = tpu.matmul %228, %229, %cst_75 {dimension_numbers = #tpu.dot_dimension_numbers<[1], [0], [0], [1], [0, 0, 1, 1], [], []>} : vector<16x256xbf16>, vector<256x32xbf16>, vector<16x32xf32> -> vector<16x32xf32>
    %231 = vector.shape_cast %230 : vector<16x32xf32> to vector<1x16x32xf32>
    %232 = tpu.concatenate %225, %231 in 0 : vector<1x16x32xf32>, vector<1x16x32xf32> -> vector<2x16x32xf32>
    %c280 = arith.constant 280 : index
    %c0_76 = arith.constant 0 : index
    %233 = vector.load %arg6[%c280, %c0_76] : memref<704x128xf32, #tpu.memory_space<vmem>>, vector<4x32xf32>
    %cst_77 = arith.constant dense<0.000000e+00> : vector<2x32xf32>
    %234 = tpu.matmul %0, %233, %cst_77 {dimension_numbers = #tpu.dot_dimension_numbers<[1], [0], [0], [1], [0, 0, 1, 1], [], []>} : vector<2x4xf32>, vector<4x32xf32>, vector<2x32xf32> -> vector<2x32xf32>
    %c14 = arith.constant 14 : index
    %c0_78 = arith.constant 0 : index
    %235 = vector.load %arg7[%c14, %c0_78] : memref<40x128xf32, #tpu.memory_space<vmem>>, vector<1x32xf32>
    %236 = vector.broadcast %235 : vector<1x32xf32> to vector<2x32xf32>
    %237 = arith.addf %234, %236 : vector<2x32xf32>
    %238 = vector.shape_cast %237 : vector<2x32xf32> to vector<2x1x32xf32>
    %239 = vector.shape_cast %198 : vector<2x32xf32> to vector<2x1x32xf32>
    %240 = tpu.concatenate %239, %238, %232 in 1 : vector<2x1x32xf32>, vector<2x1x32xf32>, vector<2x16x32xf32> -> vector<2x18x32xf32>
    %c288 = arith.constant 288 : index
    %c0_79 = arith.constant 0 : index
    %241 = vector.load %arg6[%c288, %c0_79] : memref<704x128xf32, #tpu.memory_space<vmem>>, vector<18x32xf32>
    %242 = vector.shape_cast %241 : vector<18x32xf32> to vector<1x18x32xf32>
    %243 = vector.broadcast %242 : vector<1x18x32xf32> to vector<2x18x32xf32>
    %244 = arith.addf %240, %243 : vector<2x18x32xf32>
    %c320 = arith.constant 320 : index
    %c0_80 = arith.constant 0 : index
    %245 = vector.load %arg6[%c320, %c0_80] : memref<704x128xf32, #tpu.memory_space<vmem>>, vector<32x96xf32>
    %c15 = arith.constant 15 : index
    %c0_81 = arith.constant 0 : index
    %246 = vector.load %arg7[%c15, %c0_81] : memref<40x128xf32, #tpu.memory_space<vmem>>, vector<1x96xf32>
    %c352 = arith.constant 352 : index
    %c0_82 = arith.constant 0 : index
    %247 = vector.load %arg6[%c352, %c0_82] : memref<704x128xf32, #tpu.memory_space<vmem>>, vector<32x32xf32>
    %c16_83 = arith.constant 16 : index
    %c0_84 = arith.constant 0 : index
    %248 = vector.load %arg7[%c16_83, %c0_84] : memref<40x128xf32, #tpu.memory_space<vmem>>, vector<1x32xf32>
    %249 = vector.shape_cast %244 : vector<2x18x32xf32> to vector<36x32xf32>
    %250 = vector.extract_strided_slice %245 {offsets = [0, 0], sizes = [32, 64], strides = [1, 1]} : vector<32x96xf32> to vector<32x64xf32>
    %251 = arith.truncf %249 : vector<36x32xf32> to vector<36x32xbf16>
    %252 = arith.truncf %250 : vector<32x64xf32> to vector<32x64xbf16>
    %cst_85 = arith.constant dense<0.000000e+00> : vector<36x64xf32>
    %253 = tpu.matmul %251, %252, %cst_85 {dimension_numbers = #tpu.dot_dimension_numbers<[1], [0], [0], [1], [0, 0, 1, 1], [], []>} : vector<36x32xbf16>, vector<32x64xbf16>, vector<36x64xf32> -> vector<36x64xf32>
    %254 = vector.extract_strided_slice %246 {offsets = [0, 0], sizes = [1, 64], strides = [1, 1]} : vector<1x96xf32> to vector<1x64xf32>
    %255 = vector.broadcast %254 : vector<1x64xf32> to vector<36x64xf32>
    %256 = arith.addf %253, %255 : vector<36x64xf32>
    %257 = vector.extract_strided_slice %256 {offsets = [0, 0], sizes = [36, 32], strides = [1, 1]} : vector<36x64xf32> to vector<36x32xf32>
    %258 = vector.shape_cast %257 : vector<36x32xf32> to vector<2x18x32xf32>
    %259 = vector.extract_strided_slice %256 {offsets = [0, 32], sizes = [36, 32], strides = [1, 1]} : vector<36x64xf32> to vector<36x32xf32>
    %260 = vector.shape_cast %259 : vector<36x32xf32> to vector<2x18x32xf32>
    %261 = vector.extract_strided_slice %245 {offsets = [0, 64], sizes = [32, 32], strides = [1, 1]} : vector<32x96xf32> to vector<32x32xf32>
    %262 = vector.extract_strided_slice %246 {offsets = [0, 64], sizes = [1, 32], strides = [1, 1]} : vector<1x96xf32> to vector<1x32xf32>
    %263 = vector.shape_cast %240 : vector<2x18x32xf32> to vector<36x32xf32>
    %264 = arith.truncf %263 : vector<36x32xf32> to vector<36x32xbf16>
    %265 = arith.truncf %261 : vector<32x32xf32> to vector<32x32xbf16>
    %cst_86 = arith.constant dense<0.000000e+00> : vector<36x32xf32>
    %266 = tpu.matmul %264, %265, %cst_86 {dimension_numbers = #tpu.dot_dimension_numbers<[1], [0], [0], [1], [0, 0, 1, 1], [], []>} : vector<36x32xbf16>, vector<32x32xbf16>, vector<36x32xf32> -> vector<36x32xf32>
    %267 = vector.broadcast %262 : vector<1x32xf32> to vector<36x32xf32>
    %268 = arith.addf %266, %267 : vector<36x32xf32>
    %269 = vector.shape_cast %268 : vector<36x32xf32> to vector<2x18x32xf32>
    %270 = vector.extract_strided_slice %258 {offsets = [0, 0, 0], sizes = [2, 18, 8], strides = [1, 1, 1]} : vector<2x18x32xf32> to vector<2x18x8xf32>
    %271 = vector.extract_strided_slice %258 {offsets = [0, 0, 8], sizes = [2, 18, 8], strides = [1, 1, 1]} : vector<2x18x32xf32> to vector<2x18x8xf32>
    %272 = vector.extract_strided_slice %258 {offsets = [0, 0, 16], sizes = [2, 18, 8], strides = [1, 1, 1]} : vector<2x18x32xf32> to vector<2x18x8xf32>
    %273 = vector.extract_strided_slice %258 {offsets = [0, 0, 24], sizes = [2, 18, 8], strides = [1, 1, 1]} : vector<2x18x32xf32> to vector<2x18x8xf32>
    %274 = tpu.concatenate %270, %271, %272, %273 in 0 : vector<2x18x8xf32>, vector<2x18x8xf32>, vector<2x18x8xf32>, vector<2x18x8xf32> -> vector<8x18x8xf32>
    %275 = vector.extract_strided_slice %260 {offsets = [0, 0, 0], sizes = [2, 18, 8], strides = [1, 1, 1]} : vector<2x18x32xf32> to vector<2x18x8xf32>
    %276 = vector.extract_strided_slice %260 {offsets = [0, 0, 8], sizes = [2, 18, 8], strides = [1, 1, 1]} : vector<2x18x32xf32> to vector<2x18x8xf32>
    %277 = vector.extract_strided_slice %260 {offsets = [0, 0, 16], sizes = [2, 18, 8], strides = [1, 1, 1]} : vector<2x18x32xf32> to vector<2x18x8xf32>
    %278 = vector.extract_strided_slice %260 {offsets = [0, 0, 24], sizes = [2, 18, 8], strides = [1, 1, 1]} : vector<2x18x32xf32> to vector<2x18x8xf32>
    %279 = tpu.concatenate %275, %276, %277, %278 in 0 : vector<2x18x8xf32>, vector<2x18x8xf32>, vector<2x18x8xf32>, vector<2x18x8xf32> -> vector<8x18x8xf32>
    %280 = vector.extract_strided_slice %269 {offsets = [0, 0, 0], sizes = [2, 18, 8], strides = [1, 1, 1]} : vector<2x18x32xf32> to vector<2x18x8xf32>
    %281 = vector.extract_strided_slice %269 {offsets = [0, 0, 8], sizes = [2, 18, 8], strides = [1, 1, 1]} : vector<2x18x32xf32> to vector<2x18x8xf32>
    %282 = vector.extract_strided_slice %269 {offsets = [0, 0, 16], sizes = [2, 18, 8], strides = [1, 1, 1]} : vector<2x18x32xf32> to vector<2x18x8xf32>
    %283 = vector.extract_strided_slice %269 {offsets = [0, 0, 24], sizes = [2, 18, 8], strides = [1, 1, 1]} : vector<2x18x32xf32> to vector<2x18x8xf32>
    %284 = tpu.concatenate %280, %281, %282, %283 in 0 : vector<2x18x8xf32>, vector<2x18x8xf32>, vector<2x18x8xf32>, vector<2x18x8xf32> -> vector<8x18x8xf32>
    %285 = arith.truncf %274 : vector<8x18x8xf32> to vector<8x18x8xbf16>
    %286 = arith.truncf %279 : vector<8x18x8xf32> to vector<8x18x8xbf16>
    "tpu.trace_start"() <{level = 10 : i32, message = "bqd,bkd->bqk"}> : () -> ()
    %cst_87 = arith.constant dense<0.000000e+00> : vector<8x18x18xf32>
    %287 = tpu.matmul %285, %286, %cst_87 {dimension_numbers = #tpu.dot_dimension_numbers<[2], [2], [1], [1], [0, 0, 0, 1, 1, 1], [0], [0]>} : vector<8x18x8xbf16>, vector<8x18x8xbf16>, vector<8x18x18xf32> -> vector<8x18x18xf32>
    "tpu.trace_stop"() : () -> ()
    %cst_88 = arith.constant 0.353553385 : f32
    %288 = vector.broadcast %cst_88 : f32 to vector<8x18x18xf32>
    %289 = arith.mulf %287, %288 : vector<8x18x18xf32>
    %cst_89 = arith.constant dense<0xFF800000> : vector<8x18xf32>
    %290 = vector.multi_reduction <maximumf>, %289, %cst_89 [2] : vector<8x18x18xf32> to vector<8x18xf32>
    %291 = vector.shape_cast %290 : vector<8x18xf32> to vector<8x18x1xf32>
    %292 = vector.broadcast %291 : vector<8x18x1xf32> to vector<8x18x18xf32>
    %293 = arith.subf %289, %292 : vector<8x18x18xf32>
    %294 = math.exp %293 : vector<8x18x18xf32>
    %cst_90 = arith.constant dense<0.000000e+00> : vector<8x18xf32>
    %295 = vector.multi_reduction <add>, %294, %cst_90 [2] : vector<8x18x18xf32> to vector<8x18xf32>
    %296 = vector.shape_cast %295 : vector<8x18xf32> to vector<8x18x1xf32>
    %297 = tpu.reciprocal %296 {approx = true} : vector<8x18x1xf32> -> vector<8x18x1xf32>
    %298 = vector.broadcast %297 : vector<8x18x1xf32> to vector<8x18x18xf32>
    %299 = arith.mulf %294, %298 : vector<8x18x18xf32>
    %300 = arith.truncf %299 : vector<8x18x18xf32> to vector<8x18x18xbf16>
    %301 = arith.truncf %284 : vector<8x18x8xf32> to vector<8x18x8xbf16>
    "tpu.trace_start"() <{level = 10 : i32, message = "bqk,bkd->bqd"}> : () -> ()
    %cst_91 = arith.constant dense<0.000000e+00> : vector<8x18x8xf32>
    %302 = tpu.matmul %300, %301, %cst_91 {dimension_numbers = #tpu.dot_dimension_numbers<[2], [1], [1], [2], [0, 0, 0, 1, 1, 2], [0], [0]>} : vector<8x18x18xbf16>, vector<8x18x8xbf16>, vector<8x18x8xf32> -> vector<8x18x8xf32>
    "tpu.trace_stop"() : () -> ()
    %303 = vector.extract_strided_slice %302 {offsets = [0, 0, 0], sizes = [2, 18, 8], strides = [1, 1, 1]} : vector<8x18x8xf32> to vector<2x18x8xf32>
    %304 = vector.extract_strided_slice %302 {offsets = [2, 0, 0], sizes = [2, 18, 8], strides = [1, 1, 1]} : vector<8x18x8xf32> to vector<2x18x8xf32>
    %305 = vector.extract_strided_slice %302 {offsets = [4, 0, 0], sizes = [2, 18, 8], strides = [1, 1, 1]} : vector<8x18x8xf32> to vector<2x18x8xf32>
    %306 = vector.extract_strided_slice %302 {offsets = [6, 0, 0], sizes = [2, 18, 8], strides = [1, 1, 1]} : vector<8x18x8xf32> to vector<2x18x8xf32>
    %307 = tpu.concatenate %303, %304, %305, %306 in 2 : vector<2x18x8xf32>, vector<2x18x8xf32>, vector<2x18x8xf32>, vector<2x18x8xf32> -> vector<2x18x32xf32>
    %308 = vector.shape_cast %307 : vector<2x18x32xf32> to vector<36x32xf32>
    %309 = arith.truncf %308 : vector<36x32xf32> to vector<36x32xbf16>
    %310 = arith.truncf %247 : vector<32x32xf32> to vector<32x32xbf16>
    %cst_92 = arith.constant dense<0.000000e+00> : vector<36x32xf32>
    %311 = tpu.matmul %309, %310, %cst_92 {dimension_numbers = #tpu.dot_dimension_numbers<[1], [0], [0], [1], [0, 0, 1, 1], [], []>} : vector<36x32xbf16>, vector<32x32xbf16>, vector<36x32xf32> -> vector<36x32xf32>
    %312 = vector.broadcast %248 : vector<1x32xf32> to vector<36x32xf32>
    %313 = arith.addf %311, %312 : vector<36x32xf32>
    %314 = vector.shape_cast %313 : vector<36x32xf32> to vector<2x18x32xf32>
    %315 = arith.addf %240, %314 : vector<2x18x32xf32>
    %c17 = arith.constant 17 : index
    %c0_93 = arith.constant 0 : index
    %316 = vector.load %arg7[%c17, %c0_93] : memref<40x128xf32, #tpu.memory_space<vmem>>, vector<1x32xf32>
    %c18 = arith.constant 18 : index
    %c0_94 = arith.constant 0 : index
    %317 = vector.load %arg7[%c18, %c0_94] : memref<40x128xf32, #tpu.memory_space<vmem>>, vector<1x32xf32>
    %cst_95 = arith.constant dense<0.000000e+00> : vector<2x18xf32>
    %318 = vector.multi_reduction <add>, %315, %cst_95 [2] : vector<2x18x32xf32> to vector<2x18xf32>
    %319 = vector.shape_cast %318 : vector<2x18xf32> to vector<2x18x1xf32>
    %cst_96 = arith.constant 3.200000e+01 : f32
    %320 = vector.broadcast %cst_96 : f32 to vector<2x18x1xf32>
    %321 = arith.divf %319, %320 : vector<2x18x1xf32>
    %322 = vector.broadcast %321 : vector<2x18x1xf32> to vector<2x18x32xf32>
    %323 = arith.subf %315, %322 : vector<2x18x32xf32>
    %324 = arith.mulf %323, %323 : vector<2x18x32xf32>
    %cst_97 = arith.constant dense<0.000000e+00> : vector<2x18xf32>
    %325 = vector.multi_reduction <add>, %324, %cst_97 [2] : vector<2x18x32xf32> to vector<2x18xf32>
    %326 = vector.shape_cast %325 : vector<2x18xf32> to vector<2x18x1xf32>
    %cst_98 = arith.constant 3.200000e+01 : f32
    %327 = vector.broadcast %cst_98 : f32 to vector<2x18x1xf32>
    %328 = arith.divf %326, %327 : vector<2x18x1xf32>
    %329 = vector.broadcast %321 : vector<2x18x1xf32> to vector<2x18x32xf32>
    %330 = arith.subf %315, %329 : vector<2x18x32xf32>
    %cst_99 = arith.constant 9.99999974E-6 : f32
    %331 = vector.broadcast %cst_99 : f32 to vector<2x18x1xf32>
    %332 = arith.addf %328, %331 : vector<2x18x1xf32>
    %333 = math.rsqrt %332 : vector<2x18x1xf32>
    %334 = vector.broadcast %333 : vector<2x18x1xf32> to vector<2x18x32xf32>
    %335 = arith.mulf %330, %334 : vector<2x18x32xf32>
    %336 = vector.shape_cast %316 : vector<1x32xf32> to vector<1x1x32xf32>
    %337 = vector.broadcast %336 : vector<1x1x32xf32> to vector<2x18x32xf32>
    %338 = arith.mulf %335, %337 : vector<2x18x32xf32>
    %339 = vector.shape_cast %317 : vector<1x32xf32> to vector<1x1x32xf32>
    %340 = vector.broadcast %339 : vector<1x1x32xf32> to vector<2x18x32xf32>
    %341 = arith.addf %338, %340 : vector<2x18x32xf32>
    %c384 = arith.constant 384 : index
    %c0_100 = arith.constant 0 : index
    %342 = vector.load %arg6[%c384, %c0_100] : memref<704x128xf32, #tpu.memory_space<vmem>>, vector<32x64xf32>
    %c19 = arith.constant 19 : index
    %c0_101 = arith.constant 0 : index
    %343 = vector.load %arg7[%c19, %c0_101] : memref<40x128xf32, #tpu.memory_space<vmem>>, vector<1x64xf32>
    %344 = vector.shape_cast %341 : vector<2x18x32xf32> to vector<36x32xf32>
    %345 = arith.truncf %344 : vector<36x32xf32> to vector<36x32xbf16>
    %346 = arith.truncf %342 : vector<32x64xf32> to vector<32x64xbf16>
    %cst_102 = arith.constant dense<0.000000e+00> : vector<36x64xf32>
    %347 = tpu.matmul %345, %346, %cst_102 {dimension_numbers = #tpu.dot_dimension_numbers<[1], [0], [0], [1], [0, 0, 1, 1], [], []>} : vector<36x32xbf16>, vector<32x64xbf16>, vector<36x64xf32> -> vector<36x64xf32>
    %348 = vector.broadcast %343 : vector<1x64xf32> to vector<36x64xf32>
    %349 = arith.addf %347, %348 : vector<36x64xf32>
    %350 = vector.shape_cast %349 : vector<36x64xf32> to vector<2x18x64xf32>
    %cst_103 = arith.constant 0.000000e+00 : f32
    %351 = vector.broadcast %cst_103 : f32 to vector<2x18x64xf32>
    %352 = arith.maximumf %350, %351 : vector<2x18x64xf32>
    %c416 = arith.constant 416 : index
    %c0_104 = arith.constant 0 : index
    %353 = vector.load %arg6[%c416, %c0_104] : memref<704x128xf32, #tpu.memory_space<vmem>>, vector<64x32xf32>
    %c20 = arith.constant 20 : index
    %c0_105 = arith.constant 0 : index
    %354 = vector.load %arg7[%c20, %c0_105] : memref<40x128xf32, #tpu.memory_space<vmem>>, vector<1x32xf32>
    %355 = vector.shape_cast %352 : vector<2x18x64xf32> to vector<36x64xf32>
    %356 = arith.truncf %355 : vector<36x64xf32> to vector<36x64xbf16>
    %357 = arith.truncf %353 : vector<64x32xf32> to vector<64x32xbf16>
    %cst_106 = arith.constant dense<0.000000e+00> : vector<36x32xf32>
    %358 = tpu.matmul %356, %357, %cst_106 {dimension_numbers = #tpu.dot_dimension_numbers<[1], [0], [0], [1], [0, 0, 1, 1], [], []>} : vector<36x64xbf16>, vector<64x32xbf16>, vector<36x32xf32> -> vector<36x32xf32>
    %359 = vector.broadcast %354 : vector<1x32xf32> to vector<36x32xf32>
    %360 = arith.addf %358, %359 : vector<36x32xf32>
    %361 = vector.shape_cast %360 : vector<36x32xf32> to vector<2x18x32xf32>
    %362 = arith.addf %341, %361 : vector<2x18x32xf32>
    %c21 = arith.constant 21 : index
    %c0_107 = arith.constant 0 : index
    %363 = vector.load %arg7[%c21, %c0_107] : memref<40x128xf32, #tpu.memory_space<vmem>>, vector<1x32xf32>
    %c22 = arith.constant 22 : index
    %c0_108 = arith.constant 0 : index
    %364 = vector.load %arg7[%c22, %c0_108] : memref<40x128xf32, #tpu.memory_space<vmem>>, vector<1x32xf32>
    %cst_109 = arith.constant dense<0.000000e+00> : vector<2x18xf32>
    %365 = vector.multi_reduction <add>, %362, %cst_109 [2] : vector<2x18x32xf32> to vector<2x18xf32>
    %366 = vector.shape_cast %365 : vector<2x18xf32> to vector<2x18x1xf32>
    %cst_110 = arith.constant 3.200000e+01 : f32
    %367 = vector.broadcast %cst_110 : f32 to vector<2x18x1xf32>
    %368 = arith.divf %366, %367 : vector<2x18x1xf32>
    %369 = vector.broadcast %368 : vector<2x18x1xf32> to vector<2x18x32xf32>
    %370 = arith.subf %362, %369 : vector<2x18x32xf32>
    %371 = arith.mulf %370, %370 : vector<2x18x32xf32>
    %cst_111 = arith.constant dense<0.000000e+00> : vector<2x18xf32>
    %372 = vector.multi_reduction <add>, %371, %cst_111 [2] : vector<2x18x32xf32> to vector<2x18xf32>
    %373 = vector.shape_cast %372 : vector<2x18xf32> to vector<2x18x1xf32>
    %cst_112 = arith.constant 3.200000e+01 : f32
    %374 = vector.broadcast %cst_112 : f32 to vector<2x18x1xf32>
    %375 = arith.divf %373, %374 : vector<2x18x1xf32>
    %376 = vector.broadcast %368 : vector<2x18x1xf32> to vector<2x18x32xf32>
    %377 = arith.subf %362, %376 : vector<2x18x32xf32>
    %cst_113 = arith.constant 9.99999974E-6 : f32
    %378 = vector.broadcast %cst_113 : f32 to vector<2x18x1xf32>
    %379 = arith.addf %375, %378 : vector<2x18x1xf32>
    %380 = math.rsqrt %379 : vector<2x18x1xf32>
    %381 = vector.broadcast %380 : vector<2x18x1xf32> to vector<2x18x32xf32>
    %382 = arith.mulf %377, %381 : vector<2x18x32xf32>
    %383 = vector.shape_cast %363 : vector<1x32xf32> to vector<1x1x32xf32>
    %384 = vector.broadcast %383 : vector<1x1x32xf32> to vector<2x18x32xf32>
    %385 = arith.mulf %382, %384 : vector<2x18x32xf32>
    %386 = vector.shape_cast %364 : vector<1x32xf32> to vector<1x1x32xf32>
    %387 = vector.broadcast %386 : vector<1x1x32xf32> to vector<2x18x32xf32>
    %388 = arith.addf %385, %387 : vector<2x18x32xf32>
    %c23 = arith.constant 23 : index
    %c0_114 = arith.constant 0 : index
    %389 = vector.load %arg7[%c23, %c0_114] : memref<40x128xf32, #tpu.memory_space<vmem>>, vector<1x96xf32>
    %390 = vector.extract_strided_slice %389 {offsets = [0, 64], sizes = [1, 32], strides = [1, 1]} : vector<1x96xf32> to vector<1x32xf32>
    %c480 = arith.constant 480 : index
    %c0_115 = arith.constant 0 : index
    %391 = vector.load %arg6[%c480, %c0_115] : memref<704x128xf32, #tpu.memory_space<vmem>>, vector<32x32xf32>
    %392 = arith.truncf %390 : vector<1x32xf32> to vector<1x32xbf16>
    %393 = arith.truncf %391 : vector<32x32xf32> to vector<32x32xbf16>
    %cst_116 = arith.constant dense<0.000000e+00> : vector<1x32xf32>
    %394 = tpu.matmul %392, %393, %cst_116 {dimension_numbers = #tpu.dot_dimension_numbers<[1], [0], [0], [1], [0, 0, 1, 1], [], []>} : vector<1x32xbf16>, vector<32x32xbf16>, vector<1x32xf32> -> vector<1x32xf32>
    %c24_117 = arith.constant 24 : index
    %c0_118 = arith.constant 0 : index
    %395 = vector.load %arg7[%c24_117, %c0_118] : memref<40x128xf32, #tpu.memory_space<vmem>>, vector<1x32xf32>
    %396 = arith.addf %394, %395 : vector<1x32xf32>
    %c25 = arith.constant 25 : index
    %c0_119 = arith.constant 0 : index
    %397 = vector.load %arg7[%c25, %c0_119] : memref<40x128xf32, #tpu.memory_space<vmem>>, vector<1x32xf32>
    %c26 = arith.constant 26 : index
    %c0_120 = arith.constant 0 : index
    %398 = vector.load %arg7[%c26, %c0_120] : memref<40x128xf32, #tpu.memory_space<vmem>>, vector<1x32xf32>
    %cst_121 = arith.constant dense<0.000000e+00> : vector<1xf32>
    %399 = vector.multi_reduction <add>, %396, %cst_121 [1] : vector<1x32xf32> to vector<1xf32>
    %400 = vector.shape_cast %399 : vector<1xf32> to vector<1x1xf32>
    %cst_122 = arith.constant 3.200000e+01 : f32
    %401 = vector.broadcast %cst_122 : f32 to vector<1x1xf32>
    %402 = arith.divf %400, %401 : vector<1x1xf32>
    %403 = vector.broadcast %402 : vector<1x1xf32> to vector<1x32xf32>
    %404 = arith.subf %396, %403 : vector<1x32xf32>
    %405 = arith.mulf %404, %404 : vector<1x32xf32>
    %cst_123 = arith.constant dense<0.000000e+00> : vector<1xf32>
    %406 = vector.multi_reduction <add>, %405, %cst_123 [1] : vector<1x32xf32> to vector<1xf32>
    %407 = vector.shape_cast %406 : vector<1xf32> to vector<1x1xf32>
    %cst_124 = arith.constant 3.200000e+01 : f32
    %408 = vector.broadcast %cst_124 : f32 to vector<1x1xf32>
    %409 = arith.divf %407, %408 : vector<1x1xf32>
    %410 = vector.broadcast %402 : vector<1x1xf32> to vector<1x32xf32>
    %411 = arith.subf %396, %410 : vector<1x32xf32>
    %cst_125 = arith.constant 9.99999974E-6 : f32
    %412 = vector.broadcast %cst_125 : f32 to vector<1x1xf32>
    %413 = arith.addf %409, %412 : vector<1x1xf32>
    %414 = math.rsqrt %413 : vector<1x1xf32>
    %415 = vector.broadcast %414 : vector<1x1xf32> to vector<1x32xf32>
    %416 = arith.mulf %411, %415 : vector<1x32xf32>
    %417 = arith.mulf %416, %397 : vector<1x32xf32>
    %418 = arith.addf %417, %398 : vector<1x32xf32>
    %419 = vector.shape_cast %418 : vector<1x32xf32> to vector<1x1x32xf32>
    %420 = vector.shape_cast %419 : vector<1x1x32xf32> to vector<1x1x32xf32>
    %421 = vector.broadcast %420 : vector<1x1x32xf32> to vector<2x8x32xf32>
    %c312 = arith.constant 312 : index
    %c0_126 = arith.constant 0 : index
    %422 = vector.load %arg6[%c312, %c0_126] : memref<704x128xf32, #tpu.memory_space<vmem>>, vector<8x32xf32>
    %423 = vector.shape_cast %422 : vector<8x32xf32> to vector<1x8x32xf32>
    %424 = vector.broadcast %423 : vector<1x8x32xf32> to vector<2x8x32xf32>
    %425 = arith.addf %421, %424 : vector<2x8x32xf32>
    %426 = vector.broadcast %242 : vector<1x18x32xf32> to vector<2x18x32xf32>
    %427 = arith.addf %388, %426 : vector<2x18x32xf32>
    %c512 = arith.constant 512 : index
    %c0_127 = arith.constant 0 : index
    %428 = vector.load %arg6[%c512, %c0_127] : memref<704x128xf32, #tpu.memory_space<vmem>>, vector<32x96xf32>
    %c27 = arith.constant 27 : index
    %c0_128 = arith.constant 0 : index
    %429 = vector.load %arg7[%c27, %c0_128] : memref<40x128xf32, #tpu.memory_space<vmem>>, vector<1x96xf32>
    %c544 = arith.constant 544 : index
    %c0_129 = arith.constant 0 : index
    %430 = vector.load %arg6[%c544, %c0_129] : memref<704x128xf32, #tpu.memory_space<vmem>>, vector<32x32xf32>
    %c28 = arith.constant 28 : index
    %c0_130 = arith.constant 0 : index
    %431 = vector.load %arg7[%c28, %c0_130] : memref<40x128xf32, #tpu.memory_space<vmem>>, vector<1x32xf32>
    %432 = vector.extract_strided_slice %428 {offsets = [0, 0], sizes = [32, 32], strides = [1, 1]} : vector<32x96xf32> to vector<32x32xf32>
    %433 = vector.extract_strided_slice %429 {offsets = [0, 0], sizes = [1, 32], strides = [1, 1]} : vector<1x96xf32> to vector<1x32xf32>
    %434 = vector.shape_cast %425 : vector<2x8x32xf32> to vector<16x32xf32>
    %435 = arith.truncf %434 : vector<16x32xf32> to vector<16x32xbf16>
    %436 = arith.truncf %432 : vector<32x32xf32> to vector<32x32xbf16>
    %cst_131 = arith.constant dense<0.000000e+00> : vector<16x32xf32>
    %437 = tpu.matmul %435, %436, %cst_131 {dimension_numbers = #tpu.dot_dimension_numbers<[1], [0], [0], [1], [0, 0, 1, 1], [], []>} : vector<16x32xbf16>, vector<32x32xbf16>, vector<16x32xf32> -> vector<16x32xf32>
    %438 = vector.broadcast %433 : vector<1x32xf32> to vector<16x32xf32>
    %439 = arith.addf %437, %438 : vector<16x32xf32>
    %440 = vector.shape_cast %439 : vector<16x32xf32> to vector<2x8x32xf32>
    %441 = vector.extract_strided_slice %428 {offsets = [0, 32], sizes = [32, 32], strides = [1, 1]} : vector<32x96xf32> to vector<32x32xf32>
    %442 = vector.extract_strided_slice %429 {offsets = [0, 32], sizes = [1, 32], strides = [1, 1]} : vector<1x96xf32> to vector<1x32xf32>
    %443 = vector.shape_cast %427 : vector<2x18x32xf32> to vector<36x32xf32>
    %444 = arith.truncf %443 : vector<36x32xf32> to vector<36x32xbf16>
    %445 = arith.truncf %441 : vector<32x32xf32> to vector<32x32xbf16>
    %cst_132 = arith.constant dense<0.000000e+00> : vector<36x32xf32>
    %446 = tpu.matmul %444, %445, %cst_132 {dimension_numbers = #tpu.dot_dimension_numbers<[1], [0], [0], [1], [0, 0, 1, 1], [], []>} : vector<36x32xbf16>, vector<32x32xbf16>, vector<36x32xf32> -> vector<36x32xf32>
    %447 = vector.broadcast %442 : vector<1x32xf32> to vector<36x32xf32>
    %448 = arith.addf %446, %447 : vector<36x32xf32>
    %449 = vector.shape_cast %448 : vector<36x32xf32> to vector<2x18x32xf32>
    %450 = vector.extract_strided_slice %428 {offsets = [0, 64], sizes = [32, 32], strides = [1, 1]} : vector<32x96xf32> to vector<32x32xf32>
    %451 = vector.extract_strided_slice %429 {offsets = [0, 64], sizes = [1, 32], strides = [1, 1]} : vector<1x96xf32> to vector<1x32xf32>
    %452 = vector.shape_cast %388 : vector<2x18x32xf32> to vector<36x32xf32>
    %453 = arith.truncf %452 : vector<36x32xf32> to vector<36x32xbf16>
    %454 = arith.truncf %450 : vector<32x32xf32> to vector<32x32xbf16>
    %cst_133 = arith.constant dense<0.000000e+00> : vector<36x32xf32>
    %455 = tpu.matmul %453, %454, %cst_133 {dimension_numbers = #tpu.dot_dimension_numbers<[1], [0], [0], [1], [0, 0, 1, 1], [], []>} : vector<36x32xbf16>, vector<32x32xbf16>, vector<36x32xf32> -> vector<36x32xf32>
    %456 = vector.broadcast %451 : vector<1x32xf32> to vector<36x32xf32>
    %457 = arith.addf %455, %456 : vector<36x32xf32>
    %458 = vector.shape_cast %457 : vector<36x32xf32> to vector<2x18x32xf32>
    %459 = vector.extract_strided_slice %440 {offsets = [0, 0, 0], sizes = [2, 8, 8], strides = [1, 1, 1]} : vector<2x8x32xf32> to vector<2x8x8xf32>
    %460 = vector.extract_strided_slice %440 {offsets = [0, 0, 8], sizes = [2, 8, 8], strides = [1, 1, 1]} : vector<2x8x32xf32> to vector<2x8x8xf32>
    %461 = vector.extract_strided_slice %440 {offsets = [0, 0, 16], sizes = [2, 8, 8], strides = [1, 1, 1]} : vector<2x8x32xf32> to vector<2x8x8xf32>
    %462 = vector.extract_strided_slice %440 {offsets = [0, 0, 24], sizes = [2, 8, 8], strides = [1, 1, 1]} : vector<2x8x32xf32> to vector<2x8x8xf32>
    %463 = tpu.concatenate %459, %460, %461, %462 in 0 : vector<2x8x8xf32>, vector<2x8x8xf32>, vector<2x8x8xf32>, vector<2x8x8xf32> -> vector<8x8x8xf32>
    %464 = vector.extract_strided_slice %449 {offsets = [0, 0, 0], sizes = [2, 18, 8], strides = [1, 1, 1]} : vector<2x18x32xf32> to vector<2x18x8xf32>
    %465 = vector.extract_strided_slice %449 {offsets = [0, 0, 8], sizes = [2, 18, 8], strides = [1, 1, 1]} : vector<2x18x32xf32> to vector<2x18x8xf32>
    %466 = vector.extract_strided_slice %449 {offsets = [0, 0, 16], sizes = [2, 18, 8], strides = [1, 1, 1]} : vector<2x18x32xf32> to vector<2x18x8xf32>
    %467 = vector.extract_strided_slice %449 {offsets = [0, 0, 24], sizes = [2, 18, 8], strides = [1, 1, 1]} : vector<2x18x32xf32> to vector<2x18x8xf32>
    %468 = tpu.concatenate %464, %465, %466, %467 in 0 : vector<2x18x8xf32>, vector<2x18x8xf32>, vector<2x18x8xf32>, vector<2x18x8xf32> -> vector<8x18x8xf32>
    %469 = vector.extract_strided_slice %458 {offsets = [0, 0, 0], sizes = [2, 18, 8], strides = [1, 1, 1]} : vector<2x18x32xf32> to vector<2x18x8xf32>
    %470 = vector.extract_strided_slice %458 {offsets = [0, 0, 8], sizes = [2, 18, 8], strides = [1, 1, 1]} : vector<2x18x32xf32> to vector<2x18x8xf32>
    %471 = vector.extract_strided_slice %458 {offsets = [0, 0, 16], sizes = [2, 18, 8], strides = [1, 1, 1]} : vector<2x18x32xf32> to vector<2x18x8xf32>
    %472 = vector.extract_strided_slice %458 {offsets = [0, 0, 24], sizes = [2, 18, 8], strides = [1, 1, 1]} : vector<2x18x32xf32> to vector<2x18x8xf32>
    %473 = tpu.concatenate %469, %470, %471, %472 in 0 : vector<2x18x8xf32>, vector<2x18x8xf32>, vector<2x18x8xf32>, vector<2x18x8xf32> -> vector<8x18x8xf32>
    %474 = arith.truncf %463 : vector<8x8x8xf32> to vector<8x8x8xbf16>
    %475 = arith.truncf %468 : vector<8x18x8xf32> to vector<8x18x8xbf16>
    "tpu.trace_start"() <{level = 10 : i32, message = "bqd,bkd->bqk"}> : () -> ()
    %cst_134 = arith.constant dense<0.000000e+00> : vector<8x8x18xf32>
    %476 = tpu.matmul %474, %475, %cst_134 {dimension_numbers = #tpu.dot_dimension_numbers<[2], [2], [1], [1], [0, 0, 0, 1, 1, 1], [0], [0]>} : vector<8x8x8xbf16>, vector<8x18x8xbf16>, vector<8x8x18xf32> -> vector<8x8x18xf32>
    "tpu.trace_stop"() : () -> ()
    %cst_135 = arith.constant 0.353553385 : f32
    %477 = vector.broadcast %cst_135 : f32 to vector<8x8x18xf32>
    %478 = arith.mulf %476, %477 : vector<8x8x18xf32>
    %cst_136 = arith.constant dense<0xFF800000> : vector<8x8xf32>
    %479 = vector.multi_reduction <maximumf>, %478, %cst_136 [2] : vector<8x8x18xf32> to vector<8x8xf32>
    %480 = vector.shape_cast %479 : vector<8x8xf32> to vector<8x8x1xf32>
    %481 = vector.broadcast %480 : vector<8x8x1xf32> to vector<8x8x18xf32>
    %482 = arith.subf %478, %481 : vector<8x8x18xf32>
    %483 = math.exp %482 : vector<8x8x18xf32>
    %cst_137 = arith.constant dense<0.000000e+00> : vector<8x8xf32>
    %484 = vector.multi_reduction <add>, %483, %cst_137 [2] : vector<8x8x18xf32> to vector<8x8xf32>
    %485 = vector.shape_cast %484 : vector<8x8xf32> to vector<8x8x1xf32>
    %486 = tpu.reciprocal %485 {approx = true} : vector<8x8x1xf32> -> vector<8x8x1xf32>
    %487 = vector.broadcast %486 : vector<8x8x1xf32> to vector<8x8x18xf32>
    %488 = arith.mulf %483, %487 : vector<8x8x18xf32>
    %489 = arith.truncf %488 : vector<8x8x18xf32> to vector<8x8x18xbf16>
    %490 = arith.truncf %473 : vector<8x18x8xf32> to vector<8x18x8xbf16>
    "tpu.trace_start"() <{level = 10 : i32, message = "bqk,bkd->bqd"}> : () -> ()
    %cst_138 = arith.constant dense<0.000000e+00> : vector<8x8x8xf32>
    %491 = tpu.matmul %489, %490, %cst_138 {dimension_numbers = #tpu.dot_dimension_numbers<[2], [1], [1], [2], [0, 0, 0, 1, 1, 2], [0], [0]>} : vector<8x8x18xbf16>, vector<8x18x8xbf16>, vector<8x8x8xf32> -> vector<8x8x8xf32>
    "tpu.trace_stop"() : () -> ()
    %492 = vector.extract_strided_slice %491 {offsets = [0, 0, 0], sizes = [2, 8, 8], strides = [1, 1, 1]} : vector<8x8x8xf32> to vector<2x8x8xf32>
    %493 = vector.extract_strided_slice %491 {offsets = [2, 0, 0], sizes = [2, 8, 8], strides = [1, 1, 1]} : vector<8x8x8xf32> to vector<2x8x8xf32>
    %494 = vector.extract_strided_slice %491 {offsets = [4, 0, 0], sizes = [2, 8, 8], strides = [1, 1, 1]} : vector<8x8x8xf32> to vector<2x8x8xf32>
    %495 = vector.extract_strided_slice %491 {offsets = [6, 0, 0], sizes = [2, 8, 8], strides = [1, 1, 1]} : vector<8x8x8xf32> to vector<2x8x8xf32>
    %496 = tpu.concatenate %492, %493, %494, %495 in 2 : vector<2x8x8xf32>, vector<2x8x8xf32>, vector<2x8x8xf32>, vector<2x8x8xf32> -> vector<2x8x32xf32>
    %497 = vector.shape_cast %496 : vector<2x8x32xf32> to vector<16x32xf32>
    %498 = arith.truncf %497 : vector<16x32xf32> to vector<16x32xbf16>
    %499 = arith.truncf %430 : vector<32x32xf32> to vector<32x32xbf16>
    %cst_139 = arith.constant dense<0.000000e+00> : vector<16x32xf32>
    %500 = tpu.matmul %498, %499, %cst_139 {dimension_numbers = #tpu.dot_dimension_numbers<[1], [0], [0], [1], [0, 0, 1, 1], [], []>} : vector<16x32xbf16>, vector<32x32xbf16>, vector<16x32xf32> -> vector<16x32xf32>
    %501 = vector.broadcast %431 : vector<1x32xf32> to vector<16x32xf32>
    %502 = arith.addf %500, %501 : vector<16x32xf32>
    %503 = vector.shape_cast %502 : vector<16x32xf32> to vector<2x8x32xf32>
    %504 = arith.addf %421, %503 : vector<2x8x32xf32>
    %c29 = arith.constant 29 : index
    %c0_140 = arith.constant 0 : index
    %505 = vector.load %arg7[%c29, %c0_140] : memref<40x128xf32, #tpu.memory_space<vmem>>, vector<1x32xf32>
    %c30 = arith.constant 30 : index
    %c0_141 = arith.constant 0 : index
    %506 = vector.load %arg7[%c30, %c0_141] : memref<40x128xf32, #tpu.memory_space<vmem>>, vector<1x32xf32>
    %cst_142 = arith.constant dense<0.000000e+00> : vector<2x8xf32>
    %507 = vector.multi_reduction <add>, %504, %cst_142 [2] : vector<2x8x32xf32> to vector<2x8xf32>
    %508 = vector.shape_cast %507 : vector<2x8xf32> to vector<2x8x1xf32>
    %cst_143 = arith.constant 3.200000e+01 : f32
    %509 = vector.broadcast %cst_143 : f32 to vector<2x8x1xf32>
    %510 = arith.divf %508, %509 : vector<2x8x1xf32>
    %511 = vector.broadcast %510 : vector<2x8x1xf32> to vector<2x8x32xf32>
    %512 = arith.subf %504, %511 : vector<2x8x32xf32>
    %513 = arith.mulf %512, %512 : vector<2x8x32xf32>
    %cst_144 = arith.constant dense<0.000000e+00> : vector<2x8xf32>
    %514 = vector.multi_reduction <add>, %513, %cst_144 [2] : vector<2x8x32xf32> to vector<2x8xf32>
    %515 = vector.shape_cast %514 : vector<2x8xf32> to vector<2x8x1xf32>
    %cst_145 = arith.constant 3.200000e+01 : f32
    %516 = vector.broadcast %cst_145 : f32 to vector<2x8x1xf32>
    %517 = arith.divf %515, %516 : vector<2x8x1xf32>
    %518 = vector.broadcast %510 : vector<2x8x1xf32> to vector<2x8x32xf32>
    %519 = arith.subf %504, %518 : vector<2x8x32xf32>
    %cst_146 = arith.constant 9.99999974E-6 : f32
    %520 = vector.broadcast %cst_146 : f32 to vector<2x8x1xf32>
    %521 = arith.addf %517, %520 : vector<2x8x1xf32>
    %522 = math.rsqrt %521 : vector<2x8x1xf32>
    %523 = vector.broadcast %522 : vector<2x8x1xf32> to vector<2x8x32xf32>
    %524 = arith.mulf %519, %523 : vector<2x8x32xf32>
    %525 = vector.shape_cast %505 : vector<1x32xf32> to vector<1x1x32xf32>
    %526 = vector.broadcast %525 : vector<1x1x32xf32> to vector<2x8x32xf32>
    %527 = arith.mulf %524, %526 : vector<2x8x32xf32>
    %528 = vector.shape_cast %506 : vector<1x32xf32> to vector<1x1x32xf32>
    %529 = vector.broadcast %528 : vector<1x1x32xf32> to vector<2x8x32xf32>
    %530 = arith.addf %527, %529 : vector<2x8x32xf32>
    %c576 = arith.constant 576 : index
    %c0_147 = arith.constant 0 : index
    %531 = vector.load %arg6[%c576, %c0_147] : memref<704x128xf32, #tpu.memory_space<vmem>>, vector<32x64xf32>
    %c31 = arith.constant 31 : index
    %c0_148 = arith.constant 0 : index
    %532 = vector.load %arg7[%c31, %c0_148] : memref<40x128xf32, #tpu.memory_space<vmem>>, vector<1x64xf32>
    %533 = vector.shape_cast %530 : vector<2x8x32xf32> to vector<16x32xf32>
    %534 = arith.truncf %533 : vector<16x32xf32> to vector<16x32xbf16>
    %535 = arith.truncf %531 : vector<32x64xf32> to vector<32x64xbf16>
    %cst_149 = arith.constant dense<0.000000e+00> : vector<16x64xf32>
    %536 = tpu.matmul %534, %535, %cst_149 {dimension_numbers = #tpu.dot_dimension_numbers<[1], [0], [0], [1], [0, 0, 1, 1], [], []>} : vector<16x32xbf16>, vector<32x64xbf16>, vector<16x64xf32> -> vector<16x64xf32>
    %537 = vector.broadcast %532 : vector<1x64xf32> to vector<16x64xf32>
    %538 = arith.addf %536, %537 : vector<16x64xf32>
    %539 = vector.shape_cast %538 : vector<16x64xf32> to vector<2x8x64xf32>
    %cst_150 = arith.constant 0.000000e+00 : f32
    %540 = vector.broadcast %cst_150 : f32 to vector<2x8x64xf32>
    %541 = arith.maximumf %539, %540 : vector<2x8x64xf32>
    %c608 = arith.constant 608 : index
    %c0_151 = arith.constant 0 : index
    %542 = vector.load %arg6[%c608, %c0_151] : memref<704x128xf32, #tpu.memory_space<vmem>>, vector<64x32xf32>
    %c32 = arith.constant 32 : index
    %c0_152 = arith.constant 0 : index
    %543 = vector.load %arg7[%c32, %c0_152] : memref<40x128xf32, #tpu.memory_space<vmem>>, vector<1x32xf32>
    %544 = vector.shape_cast %541 : vector<2x8x64xf32> to vector<16x64xf32>
    %545 = arith.truncf %544 : vector<16x64xf32> to vector<16x64xbf16>
    %546 = arith.truncf %542 : vector<64x32xf32> to vector<64x32xbf16>
    %cst_153 = arith.constant dense<0.000000e+00> : vector<16x32xf32>
    %547 = tpu.matmul %545, %546, %cst_153 {dimension_numbers = #tpu.dot_dimension_numbers<[1], [0], [0], [1], [0, 0, 1, 1], [], []>} : vector<16x64xbf16>, vector<64x32xbf16>, vector<16x32xf32> -> vector<16x32xf32>
    %548 = vector.broadcast %543 : vector<1x32xf32> to vector<16x32xf32>
    %549 = arith.addf %547, %548 : vector<16x32xf32>
    %550 = vector.shape_cast %549 : vector<16x32xf32> to vector<2x8x32xf32>
    %551 = arith.addf %530, %550 : vector<2x8x32xf32>
    %c33 = arith.constant 33 : index
    %c0_154 = arith.constant 0 : index
    %552 = vector.load %arg7[%c33, %c0_154] : memref<40x128xf32, #tpu.memory_space<vmem>>, vector<1x32xf32>
    %c34 = arith.constant 34 : index
    %c0_155 = arith.constant 0 : index
    %553 = vector.load %arg7[%c34, %c0_155] : memref<40x128xf32, #tpu.memory_space<vmem>>, vector<1x32xf32>
    %cst_156 = arith.constant dense<0.000000e+00> : vector<2x8xf32>
    %554 = vector.multi_reduction <add>, %551, %cst_156 [2] : vector<2x8x32xf32> to vector<2x8xf32>
    %555 = vector.shape_cast %554 : vector<2x8xf32> to vector<2x8x1xf32>
    %cst_157 = arith.constant 3.200000e+01 : f32
    %556 = vector.broadcast %cst_157 : f32 to vector<2x8x1xf32>
    %557 = arith.divf %555, %556 : vector<2x8x1xf32>
    %558 = vector.broadcast %557 : vector<2x8x1xf32> to vector<2x8x32xf32>
    %559 = arith.subf %551, %558 : vector<2x8x32xf32>
    %560 = arith.mulf %559, %559 : vector<2x8x32xf32>
    %cst_158 = arith.constant dense<0.000000e+00> : vector<2x8xf32>
    %561 = vector.multi_reduction <add>, %560, %cst_158 [2] : vector<2x8x32xf32> to vector<2x8xf32>
    %562 = vector.shape_cast %561 : vector<2x8xf32> to vector<2x8x1xf32>
    %cst_159 = arith.constant 3.200000e+01 : f32
    %563 = vector.broadcast %cst_159 : f32 to vector<2x8x1xf32>
    %564 = arith.divf %562, %563 : vector<2x8x1xf32>
    %565 = vector.broadcast %557 : vector<2x8x1xf32> to vector<2x8x32xf32>
    %566 = arith.subf %551, %565 : vector<2x8x32xf32>
    %cst_160 = arith.constant 9.99999974E-6 : f32
    %567 = vector.broadcast %cst_160 : f32 to vector<2x8x1xf32>
    %568 = arith.addf %564, %567 : vector<2x8x1xf32>
    %569 = math.rsqrt %568 : vector<2x8x1xf32>
    %570 = vector.broadcast %569 : vector<2x8x1xf32> to vector<2x8x32xf32>
    %571 = arith.mulf %566, %570 : vector<2x8x32xf32>
    %572 = vector.shape_cast %552 : vector<1x32xf32> to vector<1x1x32xf32>
    %573 = vector.broadcast %572 : vector<1x1x32xf32> to vector<2x8x32xf32>
    %574 = arith.mulf %571, %573 : vector<2x8x32xf32>
    %575 = vector.shape_cast %553 : vector<1x32xf32> to vector<1x1x32xf32>
    %576 = vector.broadcast %575 : vector<1x1x32xf32> to vector<2x8x32xf32>
    %577 = arith.addf %574, %576 : vector<2x8x32xf32>
    %c35 = arith.constant 35 : index
    %c0_161 = arith.constant 0 : index
    %578 = vector.load %arg7[%c35, %c0_161] : memref<40x128xf32, #tpu.memory_space<vmem>>, vector<1x32xf32>
    %c36 = arith.constant 36 : index
    %c0_162 = arith.constant 0 : index
    %579 = vector.load %arg7[%c36, %c0_162] : memref<40x128xf32, #tpu.memory_space<vmem>>, vector<1x32xf32>
    %cst_163 = arith.constant dense<0.000000e+00> : vector<2x8xf32>
    %580 = vector.multi_reduction <add>, %577, %cst_163 [2] : vector<2x8x32xf32> to vector<2x8xf32>
    %581 = vector.shape_cast %580 : vector<2x8xf32> to vector<2x8x1xf32>
    %cst_164 = arith.constant 3.200000e+01 : f32
    %582 = vector.broadcast %cst_164 : f32 to vector<2x8x1xf32>
    %583 = arith.divf %581, %582 : vector<2x8x1xf32>
    %584 = vector.broadcast %583 : vector<2x8x1xf32> to vector<2x8x32xf32>
    %585 = arith.subf %577, %584 : vector<2x8x32xf32>
    %586 = arith.mulf %585, %585 : vector<2x8x32xf32>
    %cst_165 = arith.constant dense<0.000000e+00> : vector<2x8xf32>
    %587 = vector.multi_reduction <add>, %586, %cst_165 [2] : vector<2x8x32xf32> to vector<2x8xf32>
    %588 = vector.shape_cast %587 : vector<2x8xf32> to vector<2x8x1xf32>
    %cst_166 = arith.constant 3.200000e+01 : f32
    %589 = vector.broadcast %cst_166 : f32 to vector<2x8x1xf32>
    %590 = arith.divf %588, %589 : vector<2x8x1xf32>
    %591 = vector.broadcast %583 : vector<2x8x1xf32> to vector<2x8x32xf32>
    %592 = arith.subf %577, %591 : vector<2x8x32xf32>
    %cst_167 = arith.constant 9.99999974E-6 : f32
    %593 = vector.broadcast %cst_167 : f32 to vector<2x8x1xf32>
    %594 = arith.addf %590, %593 : vector<2x8x1xf32>
    %595 = math.rsqrt %594 : vector<2x8x1xf32>
    %596 = vector.broadcast %595 : vector<2x8x1xf32> to vector<2x8x32xf32>
    %597 = arith.mulf %592, %596 : vector<2x8x32xf32>
    %598 = vector.shape_cast %578 : vector<1x32xf32> to vector<1x1x32xf32>
    %599 = vector.broadcast %598 : vector<1x1x32xf32> to vector<2x8x32xf32>
    %600 = arith.mulf %597, %599 : vector<2x8x32xf32>
    %601 = vector.shape_cast %579 : vector<1x32xf32> to vector<1x1x32xf32>
    %602 = vector.broadcast %601 : vector<1x1x32xf32> to vector<2x8x32xf32>
    %603 = arith.addf %600, %602 : vector<2x8x32xf32>
    %604 = vector.shape_cast %603 : vector<2x8x32xf32> to vector<16x32xf32>
    %c672 = arith.constant 672 : index
    %c0_168 = arith.constant 0 : index
    %605 = vector.load %arg6[%c672, %c0_168] : memref<704x128xf32, #tpu.memory_space<vmem>>, vector<32x128xf32>
    %606 = arith.truncf %604 : vector<16x32xf32> to vector<16x32xbf16>
    %607 = arith.truncf %605 : vector<32x128xf32> to vector<32x128xbf16>
    %cst_169 = arith.constant dense<0.000000e+00> : vector<16x128xf32>
    %608 = tpu.matmul %606, %607, %cst_169 {dimension_numbers = #tpu.dot_dimension_numbers<[1], [0], [0], [1], [0, 0, 1, 1], [], []>} : vector<16x32xbf16>, vector<32x128xbf16>, vector<16x128xf32> -> vector<16x128xf32>
    %c37 = arith.constant 37 : index
    %c0_170 = arith.constant 0 : index
    %609 = vector.load %arg7[%c37, %c0_170] : memref<40x128xf32, #tpu.memory_space<vmem>>, vector<1x128xf32>
    %610 = vector.broadcast %609 : vector<1x128xf32> to vector<16x128xf32>
    %611 = arith.addf %608, %610 : vector<16x128xf32>
    %c0_171 = arith.constant 0 : index
    %c0_172 = arith.constant 0 : index
    %612 = vector.load %arg9[%c0_171, %c0_172] : memref<16x128xf32, #tpu.memory_space<vmem>>, vector<16x128xf32>
    tpu.vector_store %arg9[%c0_171, %c0_172], %611 {strides = array<i32>} : memref<16x128xf32, #tpu.memory_space<vmem>>, vector<16x128xf32>,
    return
  }
}

</mosaic_0001>

<bundles_post_ra>
// kernel: detr_vae_forward.1
= control target key start
LH: loop header
LB: loop body
LE: loop exit
PB: predicated region body
PF: predicated region fallthrough
CT: control target
= control target key end

     0   :  { %15 = vsyncpa [#allocation3], 0  ;;  %s18423_s0 = inlined_call_operand.vmem [shape: f32[2,4], index: 0, kind: input, shape index: {}]   ;;  %s18424_s1 = inlined_call_operand.vmem [shape: f32[2,8,6], index: 1, kind: input, shape index: {}]   ;;  %s18425_s2 = inlined_call_operand.vmem [shape: f32[2,10], index: 2, kind: input, shape index: {}]   ;;  %s18426_s3 = inlined_call_operand.vmem [shape: f32[2,32], index: 3, kind: input, shape index: {}]   ;;  %s18427_s4 = inlined_call_operand.vmem [shape: f32[2,256,3], index: 4, kind: input, shape index: {}]   ;;  %s18428_s5 = inlined_call_operand.hbm [shape: f32[16,256], index: 5, kind: input, shape index: {}]   ;;  %s18429_s6 = inlined_call_operand.vmem [shape: f32[704,128], index: 6, kind: input, shape index: {}]   ;;  %s18430_s7 = inlined_call_operand.hbm [shape: f32[40,128], index: 7, kind: input, shape index: {}]   ;;  %s18431_s8 = inlined_call_operand.vmem [shape: f32[2,128], index: 8, kind: output, shape index: {0}]   ;;  %s18432_s9 = inlined_call_operand.vmem [shape: f32[16,128], index: 9, kind: output, shape index: {1}]  }
   0x1   :  { %16 = vsyncpa [#allocation5], 0  ;;  %s14184_s30 = smov [#allocation2]   ;;  %s14136_s13 = scalar_lea.hbm %s18428_s5, 512 }
   0x2   :  { %s32_s10 = sshll.u32 %s14184_s30, 4  ;;  %p14137_p0 = scmp.ne.s32.totalorder %s18428_s5, %s14136_s13  ;;  %s33_s10 = int_to_ptr.vmem [resolvable:$true] %s32_s10 }
   0x3   :  { %p14140_p1 = scmp.lt.u32.totalorder %s14136_s13, %s18428_s5 }
   0x5   :  { %p14142_p2 = pnand %p14140_p1, %p14137_p0 }
   0x7   :  { %14145 = shalt.err (!%p14142_p2)
}
   0x8   :  { %s14146_s18 = scalar_lea.vmem %s33_s10, 512  ;;  %p14151_p4 = scmp.lt.s32.totalorder %s33_s10, %s33_s10 }
   0x9   :  { %p14147_p3 = scmp.ne.s32.totalorder %s33_s10, %s14146_s18  ;;  %p14152_p5 = scmp.lt.s32.totalorder %s14146_s18, %s14146_s18 }
   0xb   :  { %p14153_p6 = por %p14152_p5, %p14151_p4 }
   0xd   :  { %p14154_p7 = pnand %p14153_p6, %p14147_p3 }
   0xf   :  { %14157 = shalt.err (!%p14154_p7)
}
  0x10   :  { %s14185_s19 = smov 256   ;;  %s14186_s20 = smov 16  }
  0x11   :  { %38 = dma.hbm_to_vmem [thread:$0]  %s18428_s5, 512, %s33_s10, [#allocation3], %s14185_s19, %s14185_s19, %s14186_s20  }
  0x12   :  { %s14187_s23 = smov [#allocation4]   ;;  %s14158_s27 = scalar_lea.hbm %s18430_s7, 640 }
  0x13   :  { %s46_s24 = sshll.u32 %s14187_s23, 4  ;;  %p14159_p8 = scmp.ne.s32.totalorder %s18430_s7, %s14158_s27  ;;  %s47_s24 = int_to_ptr.vmem [resolvable:$true] %s46_s24 }
  0x14   :  { %p14162_p9 = scmp.lt.u32.totalorder %s14158_s27, %s18430_s7 }
  0x16   :  { %p14164_p10 = pnand %p14162_p9, %p14159_p8 }
  0x18   :  { %14167 = shalt.err (!%p14164_p10)
}
  0x19   :  { %s14168_s12 = scalar_lea.vmem %s47_s24, 640  ;;  %p14173_p12 = scmp.lt.s32.totalorder %s47_s24, %s47_s24 }
  0x1a   :  { %p14169_p11 = scmp.ne.s32.totalorder %s47_s24, %s14168_s12  ;;  %p14174_p13 = scmp.lt.s32.totalorder %s14168_s12, %s14168_s12 }
  0x1c   :  { %p14175_p0 = por %p14174_p13, %p14173_p12 }
  0x1e   :  { %p14176_p1 = pnand %p14175_p0, %p14169_p11 }
  0x20   :  { %14179 = shalt.err (!%p14176_p1)
}
  0x21   :  { %s14188_s5 = smov 128   ;;  %s14189_s10 = smov 8  }
  0x22   :  { %52 = dma.hbm_to_vmem [thread:$0]  %s18430_s7, 640, %s47_s24, [#allocation5], %s14188_s5, %s14188_s5, %s14189_s10  }
  0x23   :  { %14180 = dma.done.wait [#allocation3], 512  }
  0x24   :  { %14181 = vsyncadd [#allocation3], 4294966784 }
  0x25   :  { %14182 = dma.done.wait [#allocation5], 640  }
  0x26   :  { %14183 = vsyncadd [#allocation5], 4294966656  ;;  %v18433_v0 = vmov 0.0   ;;  %vm14191_vm0 = vmmov 0   ;;  %vm72_vm1 = vcmask 1043456   ;;  %vm184_vm2 = vcmask 1045504  }
  0x27   :  { %12954 = vmatprep.subr.mxu0 %v18433_v0  ;;  %12956 = vmatprep.mubr.msk.f32.mxu0 %vm14191_vm0, %v18433_v0  ;;  %vm68_vm3 = vcmask 31744   ;;  %vm177_vm4 = vcmask 48128   ;;  %v62_v1 = vld [vmem:[%s18429_s6 + $0x10] sm:$0xf]  ;;  %v60_v2 = vld [vmem:[%s18423_s0] sm:$0x3]  ;;  %v150_v14 = vlaneseq }
  0x28   :  { %v171_v3 = vld [vmem:[%s18429_s6 + $0x8] sm:$0x3f]  ;;  %12955 = vmatpush3.msk.msra.mxu0 %vm72_vm1, %v62_v1  ;;  %v169_v4 = vld [vmem:[%s18424_s1] sm:$0xff]  ;;  %v320_v7 = vld [vmem:[%s18429_s6 + $0x30] sm:$0xff]  ;;  %v14192_v12 = vmov 1966171168  }
  0x29   :  { %12959 = vmatprep.subr.msk.mxu1 %vm184_vm2, %v171_v3  ;;  %v170_v5 = vld [vmem:[%s18424_s1 + $0x8] sm:$0xff]  ;;  %12957 = vmatmul.mubr.msk.f32.vlgmr.msra.gmra.mrb[0].mxu0 %vm68_vm3, %v60_v2  ;;  %v321_v9 = vld [vmem:[%s18429_s6 + $0x38] sm:$0xff]  ;;  %v322_v10 = vld [vmem:[%s18429_s6 + $0x40] sm:$0xff]  ;;  %v148_v13 = vunpack.c.l.s4 %v14192_v12  ;;  %v151_v16 = vshrl.u32 %v150_v14, 7  ;;  %v14193_v20 = vmov 1983009808  }
  0x2a   :  { %12960 = vmatpush3.msk.msra.mxu1 %vm184_vm2, %v171_v3  ;;  %12961 = vmatprep.mubr.msk.f32.mxu1 %vm177_vm4, %v169_v4  ;;  %v319_v6 = vld [vmem:[%s18429_s6 + $0x28] sm:$0xff]  ;;  %v14313_v11 = vpack.c.bf16 %v322_v10, %v321_v9  ;;  %v12270_v17 = vld [vmem:[#allocation4 + $0x1] ss:$0 sm:$0xff]  ;;  %v335_v21 = vunpack.c.l.s4 %v14193_v20  ;;  %v12273_v24 = vld [vmem:[#allocation4] ss:$0 sm:$0xff]  ;;  %vm279_vm5 = vcmask 1040384  }
  0x2b   :  { %12962 = vmatmul.mubr.msk.f32.vlgmr.msra.gmra.mrb[0].mxu1 %vm177_vm4, %v170_v5  ;;  %v14303_v8 = vpack.c.bf16 %v320_v7, %v319_v6  ;;  %v149_v15 = vunpack.c.0.s8 %v148_v13  ;;  %v14321_v27 = vsub.s32 0, %v151_v16  ;;  %v61_v34 = vld [vmem:[%s18429_s6] sm:$0x1]  ;;  %vm282_vm6 = vcmask 1041408   ;;  %v285_v41 = vld [vmem:[%s18429_s6 + $0x18] sm:$0xff]  ;;  %s14194_s7 = smov 112  }
  0x2c   :  { %v336_v29 = vunpack.c.0.s8 %v335_v21  ;;  %v286_v38 = vld [vmem:[%s18429_s6 + $0x20] sm:$0x3]  ;;  %vm434_vm7 = vcmask 261120   ;;  %s14195_s17 = smov 120   ;;  %s14196_s18 = smov 104   ;;  %vm1081_vm8 = vcmask 64512  }
  0x2d   :  { %12964 = vmatprep.subr.bf16.mxu0 %v14303_v8  ;;  %v14318_v18 = vsub.s32 %v149_v15, %v151_v16  ;;  %18453 = vst [vmem:[#allocation9_spill] sm:$0xff] %v14321_v27  ;;  %s14197_s19 = smov 64   ;;  %s14198_s21 = smov 96   ;;  %vm1928_vm9 = vcmask 1044480   ;;  %vm1523_vm10 = vcmask 80896   ;;  %vm1527_vm11 = vcmask 74752  }
  0x2e   :  { %12965 = vmatpush3.bf16.msra.mxu0 %v14303_v8  ;;  %v14334_v39 = vsub.s32 %v336_v29, %v151_v16  ;;  %vm2354_vm12 = vcmask 130048   ;;  %vm2359_vm13 = vcmask 195584   ;;  %vm2629_vm14 = vcmask 254976   ;;  %s14200_s5 = smov 32  }
  0x2f   :  { %12966 = vmatprep.subr.bf16.mxu0 %v14313_v11  ;;  %18452 = vst [vmem:[#allocation8_spill] sm:$0xff] %v14318_v18  ;;  %vm2999_vm15 = vcmask 523264   ;;  %vm3574_vm2 = vcmask 1042432   ;;  %vm3381_vm4 = vcmask 23552  }
  0x30   :  { %18454 = vst [vmem:[#allocation10_spill] sm:$0xff] %v14334_v39 }
  0x32   :  { %12967 = vmatpush3.bf16.msra.mxu0 %v14313_v11 }
  0x33   :  { %12980 = vmatprep.subr.bf16.mxu0 %v18433_v0 }
  0xfc   :  { %v142_v19 = vpop.f32.mrb[0].mxu0 }
  0xfd   :  { %v143_v22 = vadd.f32 %v12270_v17, %v142_v19  ;;  %v12958_v23 = vpop.f32.mrb[1].mxu0 }
  0xfe   :  { %v12963_v25 = vpop.f32.mrb[0].mxu1 }
  0xff   :  { %v153_v26 = vrot.slane %v143_v22, %v14318_v18  ;;  %v254_v28 = vpop.f32.mrb[1].mxu1  ;;  %v260_v30 = vadd.f32 %v12963_v25, %v12273_v24 }
 0x100   :  { %v255_v31 = vadd.f32 %v12273_v24, %v254_v28 }
 0x101   :  { %v154_v32 = vcombine.high %v153_v26, %v153_v26  ;;  %v161_v33 = vrot.slane %v153_v26, %v14318_v18  ;;  %v14336_v40 = vrot.slane %v260_v30, 6 }
 0x102   :  { %v14327_v35 = vrot.slane %v255_v31, 6 }
 0x103   :  { %v168_v36 = vrot.slane %v154_v32, %v14318_v18  ;;  %v266_v37 = vrot.slane %v161_v33, %v14321_v27  ;;  %v318_v51 = vadd.f32 %v286_v38, %v14336_v40 }
 0x104   :  { %v316_v45 = vadd.f32 %v286_v38, %v14327_v35  ;;  %v559_v52 = vrot.slane %v14327_v35, %v14334_v39 }
 0x105   :  { %v270_v42 = vrot.slane %v168_v36, %v14321_v27  ;;  %v280_v43 = vsel %vm279_vm5, %v61_v34, %v266_v37  ;;  %v380_v9 = vrot.slane %v318_v51, %v14334_v39 }
 0x106   :  { %v14345_v44 = vsel %vm282_vm6, %v280_v43, %v14327_v35  ;;  %v356_v57 = vrot.slane %v316_v45, %v14334_v39 }
 0x107   :  { %v281_v46 = vsel %vm279_vm5, %v61_v34, %v270_v42  ;;  %v315_v47 = vadd.f32 %v285_v41, %v14345_v44  ;;  %v536_v48 = vcombine.high %v14345_v44, %v14345_v44  ;;  %v543_v49 = vrot.slane %v14345_v44, %v14334_v39  ;;  %v14391_v42 = vld [vmem:[#allocation4 + $0x2] ss:$0 sm:$0xff] }
 0x108   :  { %v14356_v50 = vsel %vm282_vm6, %v281_v46, %v14336_v40 }
 0x109   :  { %v317_v53 = vadd.f32 %v285_v41, %v14356_v50  ;;  %v560_v54 = vcombine.high %v14356_v50, %v14356_v50  ;;  %v333_v55 = vcombine.high %v315_v47, %v315_v47  ;;  %v340_v56 = vrot.slane %v315_v47, %v14334_v39 }
 0x10a   :  { %v550_v58 = vrot.slane %v536_v48, %v14334_v39  ;;  %v551_v59 = vcombine.high %v543_v49, %v543_v49  ;;  %v567_v60 = vrot.slane %v14356_v50, %v14334_v39 }
 0x10b   :  { %v357_v61 = vcombine.high %v317_v53, %v317_v53  ;;  %v14370_v62 = vrot.slane %v560_v54, %v14334_v39  ;;  %v364_v63 = vrot.slane %v317_v53, %v14334_v39  ;;  %v347_v1 = vrot.slane %v333_v55, %v14334_v39 }
 0x10c   :  { %v575_v2 = vcombine.high %v567_v60, %v567_v60  ;;  %v601_v3 = vcombine.low %v559_v52, %v567_v60  ;;  %v552_v4 = vcombine.high %v550_v58, %v550_v58  ;;  %v584_v5 = vcombine.low %v543_v49, %v551_v59 }
 0x10d   :  { %v371_v6 = vrot.slane %v357_v61, %v14334_v39  ;;  %v348_v7 = vcombine.high %v340_v56, %v340_v56  ;;  %v398_v10 = vcombine.low %v356_v57, %v364_v63  ;;  %v349_v16 = vcombine.high %v347_v1, %v347_v1 }
 0x10e   :  { %v585_v12 = vcombine.low %v550_v58, %v552_v4  ;;  %v602_v13 = vcombine.low %v575_v2, %v14370_v62  ;;  %v592_v15 = vrot.slane %v584_v5, %v14334_v39  ;;  %v372_v17 = vcombine.high %v364_v63, %v364_v63 }
 0x10f   :  { %v373_v14 = vcombine.high %v371_v6, %v371_v6  ;;  %v609_v20 = vrot.slane %v601_v3, %v14334_v39  ;;  %v381_v22 = vcombine.low %v340_v56, %v348_v7  ;;  %v382_v24 = vcombine.low %v347_v1, %v349_v16 }
 0x110   :  { %v599_v19 = vrot.slane %v585_v12, %v14334_v39  ;;  %v616_v21 = vrot.slane %v602_v13, %v14334_v39  ;;  %v399_v25 = vcombine.low %v372_v17, %v371_v6  ;;  %v406_v29 = vrot.slane %v398_v10, %v14334_v39 }
 0x111   :  { %v415_v23 = vcombine.low %v373_v14, %v380_v9  ;;  %v389_v30 = vrot.slane %v381_v22, %v14334_v39  ;;  %v396_v31 = vrot.slane %v382_v24, %v14334_v39 }
 0x112   :  { %v600_v26 = vcombine.low %v592_v15, %v599_v19  ;;  %v617_v28 = vcombine.low %v609_v20, %v616_v21  ;;  %v413_v32 = vrot.slane %v399_v25, %v14334_v39 }
 0x113   :  { %v422_v33 = vrot.slane %v415_v23, %v14334_v39  ;;  %v397_v36 = vcombine.low %v389_v30, %v396_v31 }
 0x114   :  { %v629_v34 = vpack.c.bf16 %v617_v28, %v600_v26  ;;  %v414_v37 = vcombine.low %v406_v29, %v413_v32 }
 0x115   :  { %v427_v38 = vpack.c.bf16 %v422_v33, %v422_v33 }
 0x116   :  { %12976 = vmatprep.mubr.msk.bf16.mxu1 %vm434_vm7, %v629_v34  ;;  %v426_v41 = vpack.c.bf16 %v414_v37, %v397_v36 }
 0x118   :  { %12968 = vmatprep.mubr.msk.bf16.mxu0 %vm434_vm7, %v426_v41 }
 0x119   :  { %12969 = vmatmul.mubr.msk.bf16.vlgmr.msra.gmra.mrb[4].mxu0 %vm434_vm7, %v427_v38 }
 0x11a   :  { %12982 = vmatprep.mubr.msk.bf16.mxu0 %vm14191_vm0, %v18433_v0 }
 0x1ec   :  { %v12970_v43 = vpop.f32.mrb[4].mxu0 }
 0x1ed   :  { %v484_v45 = vadd.f32 %v12970_v43, %v14391_v42  ;;  %v475_v46 = vpop.f32.mrb[5].mxu0 }
 0x1ee   :  { %v476_v47 = vadd.f32 %v14391_v42, %v475_v46  ;;  %v12971_v48 = vpop.f32.mrb[6].mxu0 }
 0x1ef   :  { %v532_v49 = vrot.slane %v484_v45, %v14334_v39  ;;  %v478_v51 = vpop.f32.mrb[7].mxu0 }
 0x1f0   :  { %v492_v52 = vcombine.high %v476_v47, %v476_v47  ;;  %v499_v53 = vrot.slane %v476_v47, %v14334_v39  ;;  %v479_v54 = vadd.f32 %v14391_v42, %v478_v51 }
 0x1f1   :  { %778 = vrot.lane.b32.xlu0 %v532_v49, %s14194_s7  ;;  %758 = vrot.lane.b32.xlu1 %v532_v49, %s14195_s17  ;;  %v533_v55 = vcombine.high %v532_v49, %v532_v49 }
 0x1f2   :  { %v506_v56 = vrot.slane %v492_v52, %v14334_v39  ;;  %v509_v57 = vcombine.high %v479_v54, %v479_v54  ;;  %v516_v58 = vrot.slane %v479_v54, %v14334_v39  ;;  %v507_v59 = vcombine.high %v499_v53, %v499_v53 }
 0x1f3   :  { %v909_v16 = vrot.slane %v533_v55, %v14334_v39 }
 0x1f4   :  { %v523_v60 = vrot.slane %v509_v57, %v14334_v39  ;;  %v13788_v61 = vpack.i.bf16 %v533_v55, %v516_v58  ;;  %v524_v63 = vcombine.high %v516_v58, %v516_v58  ;;  %v508_v1 = vcombine.high %v506_v56, %v506_v56 }
 0x1f5   :  { %762 = vrot.lane.b32.xlu1 %v499_v53, %s14194_s7  ;;  %742 = vrot.lane.b32.xlu0 %v499_v53, %s14195_s17  ;;  %v862_v2 = vcombine.low %v499_v53, %v507_v59  ;;  %v885_v14 = vrot.slane %v516_v58, %v14334_v39 }
 0x1f6   :  { %v525_v3 = vcombine.high %v523_v60, %v523_v60  ;;  %v886_v4 = vcombine.low %v524_v63, %v523_v60  ;;  %v863_v5 = vcombine.low %v506_v56, %v508_v1 }
 0x1f7   :  { %v870_v7 = vrot.slane %v862_v2, %v14334_v39 }
 0x1f8   :  { %v887_v6 = vcombine.low %v525_v3, %v532_v49  ;;  %v877_v9 = vrot.slane %v863_v5, %v14334_v39  ;;  %v894_v10 = vrot.slane %v886_v4, %v14334_v39 }
 0x1f9   :  { %744 = vrot.lane.b32.xlu0 %v507_v59, %s14195_s17  ;;  %746 = vrot.lane.b32.xlu1 %v506_v56, %s14195_s17 }
 0x1fa   :  { %v901_v12 = vrot.slane %v887_v6, %v14334_v39  ;;  %v878_v13 = vcombine.low %v870_v7, %v877_v9 }
 0x1fc   :  { %v902_v15 = vcombine.low %v894_v10, %v901_v12  ;;  %v14415_v17 = vpack.c.bf16 %v885_v14, %v878_v13 }
 0x1fd   :  { %13789 = vrot.lane.b32.xlu0 %v13788_v61, %s14195_s17  ;;  %766 = vrot.lane.b32.xlu1 %v506_v56, %s14194_s7 }
 0x1fe   :  { %v14417_v19 = vpack.c.bf16 %v909_v16, %v902_v15 }
 0x201   :  { %764 = vrot.lane.b32.xlu0 %v507_v59, %s14194_s7  ;;  %13794 = vrot.lane.b32.xlu1 %v13788_v61, %s14194_s7 }
 0x205   :  { %752 = vrot.lane.b32.xlu0 %v524_v63, %s14195_s17  ;;  %748 = vrot.lane.b32.xlu1 %v508_v1, %s14195_s17 }
 0x209   :  { %768 = vrot.lane.b32.xlu0 %v508_v1, %s14194_s7  ;;  %754 = vrot.lane.b32.xlu1 %v523_v60, %s14195_s17 }
 0x20d   :  { %774 = vrot.lane.b32.xlu0 %v523_v60, %s14194_s7  ;;  %772 = vrot.lane.b32.xlu1 %v524_v63, %s14194_s7 }
 0x211   :  { %756 = vrot.lane.b32.xlu0 %v525_v3, %s14195_s17  ;;  %784 = vrot.lane.b32.xlu1 %v507_v59, %s14196_s18 }
 0x215   :  { %782 = vrot.lane.b32.xlu0 %v499_v53, %s14196_s18  ;;  %788 = vrot.lane.b32.xlu1 %v508_v1, %s14196_s18 }
 0x219   :  { %786 = vrot.lane.b32.xlu0 %v506_v56, %s14196_s18  ;;  %776 = vrot.lane.b32.xlu1 %v525_v3, %s14194_s7 }
 0x21d   :  { %792 = vrot.lane.b32.xlu0 %v524_v63, %s14196_s18  ;;  %794 = vrot.lane.b32.xlu1 %v523_v60, %s14196_s18 }
 0x221   :  { %796 = vrot.lane.b32.xlu0 %v525_v3, %s14196_s18  ;;  %798 = vrot.lane.b32.xlu1 %v532_v49, %s14196_s18 }
 0x225   :  { %790 = vrot.lane.b32.xlu0 %v516_v58, %s14196_s18  ;;  %800 = vrot.lane.b32.xlu1 %v533_v55, %s14196_s18 }
 0x229   :  { %633 = vrot.lane.b32.xlu0 %v14303_v8, %s14197_s19  ;;  %635 = vrot.lane.b32.xlu1 %v14313_v11, %s14197_s19 }
 0x22d   :  { %1130 = vrot.lane.b32.xlu1 %v14417_v19, %s14198_s21  ;;  %1079 = vrot.lane.b32.xlu0 %v14415_v17, %s14198_s21 }
 0x263   :  { %v779_v20 = vpop.permute.xlu0 %778  ;;  %v759_v21 = vpop.permute.xlu1 %758 }
 0x267   :  { %v763_v22 = vpop.permute.xlu1 %762  ;;  %v743_v23 = vpop.permute.xlu0 %742 }
 0x26b   :  { %v745_v24 = vpop.permute.xlu0 %744  ;;  %v747_v25 = vpop.permute.xlu1 %746 }
 0x26c   :  { %v910_v30 = vcombine.low %v743_v23, %v745_v24 }
 0x26e   :  { %v918_v34 = vrot.slane %v910_v30, %v14334_v39 }
 0x26f   :  { %v13790_v26 = vpop.permute.xlu0 %13789  ;;  %v767_v28 = vpop.permute.xlu1 %766 }
 0x270   :  { %v13791_v32 = vunpack.i.l.bf16 %v13790_v26  ;;  %v13792_v60 = vunpack.i.h.bf16 %v13790_v26 }
 0x272   :  { %v933_v43 = vrot.slane %v13791_v32, %v14334_v39  ;;  %v957_v4 = vrot.slane %v13792_v60, %v14334_v39 }
 0x273   :  { %v765_v29 = vpop.permute.xlu0 %764  ;;  %v13795_v8 = vpop.permute.xlu1 %13794 }
 0x274   :  { %v958_v36 = vcombine.low %v763_v22, %v765_v29  ;;  %v13796_v45 = vunpack.i.l.bf16 %v13795_v8  ;;  %v13797_v12 = vunpack.i.h.bf16 %v13795_v8 }
 0x276   :  { %v966_v48 = vrot.slane %v958_v36, %v14334_v39  ;;  %v981_v54 = vrot.slane %v13796_v45, %v14334_v39  ;;  %v1005_v22 = vrot.slane %v13797_v12, %v14334_v39 }
 0x277   :  { %v753_v31 = vpop.permute.xlu0 %752  ;;  %v749_v11 = vpop.permute.xlu1 %748 }
 0x278   :  { %v911_v33 = vcombine.low %v747_v25, %v749_v11 }
 0x27a   :  { %v925_v37 = vrot.slane %v911_v33, %v14334_v39 }
 0x27b   :  { %v769_v38 = vpop.permute.xlu0 %768  ;;  %v755_v41 = vpop.permute.xlu1 %754 }
 0x27c   :  { %v926_v46 = vcombine.low %v918_v34, %v925_v37  ;;  %v959_v47 = vcombine.low %v767_v28, %v769_v38  ;;  %v934_v56 = vcombine.low %v753_v31, %v755_v41  ;;  %v576_v31 = vcombine.high %v14370_v62, %v14370_v62 }
 0x27d   :  { %v583_v34 = vrot.slane %v14336_v40, %v14334_v39 }
 0x27e   :  { %v973_v49 = vrot.slane %v959_v47, %v14334_v39  ;;  %v14452_v51 = vpack.c.bf16 %v933_v43, %v926_v46  ;;  %v942_v63 = vrot.slane %v934_v56, %v14334_v39 }
 0x27f   :  { %v775_v52 = vpop.permute.xlu0 %774  ;;  %v773_v53 = vpop.permute.xlu1 %772  ;;  %v618_v46 = vcombine.low %v576_v31, %v583_v34 }
 0x280   :  { %v974_v55 = vcombine.low %v966_v48, %v973_v49  ;;  %1180 = vrot.lane.b32.xlu0 %v14452_v51, %s14198_s21  ;;  %v982_v6 = vcombine.low %v773_v53, %v775_v52 }
 0x281   :  { %v625_v52 = vrot.slane %v618_v46, %v14334_v39 }
 0x282   :  { %v14457_v57 = vpack.c.bf16 %v981_v54, %v974_v55  ;;  %v990_v14 = vrot.slane %v982_v6, %v14334_v39 }
 0x283   :  { %v757_v58 = vpop.permute.xlu0 %756  ;;  %v785_v59 = vpop.permute.xlu1 %784  ;;  %v630_v55 = vpack.c.bf16 %v625_v52, %v625_v52 }
 0x284   :  { %v935_v61 = vcombine.low %v757_v58, %v759_v21  ;;  %1280 = vrot.lane.b32.xlu0 %v14457_v57, %s14198_s21 }
 0x286   :  { %v949_v1 = vrot.slane %v935_v61, %v14334_v39 }
 0x287   :  { %v783_v2 = vpop.permute.xlu0 %782  ;;  %v789_v3 = vpop.permute.xlu1 %788 }
 0x288   :  { %v950_v5 = vcombine.low %v942_v63, %v949_v1  ;;  %v1006_v25 = vcombine.low %v783_v2, %v785_v59 }
 0x28a   :  { %v14464_v7 = vpack.c.bf16 %v957_v4, %v950_v5  ;;  %v1014_v11 = vrot.slane %v1006_v25, %v14334_v39 }
 0x28b   :  { %v787_v9 = vpop.permute.xlu0 %786  ;;  %v777_v10 = vpop.permute.xlu1 %776 }
 0x28c   :  { %v983_v13 = vcombine.low %v777_v10, %v779_v20  ;;  %1230 = vrot.lane.b32.xlu1 %v14464_v7, %s14198_s21  ;;  %v1007_v23 = vcombine.low %v787_v9, %v789_v3 }
 0x28e   :  { %v997_v15 = vrot.slane %v983_v13, %v14334_v39  ;;  %v1021_v20 = vrot.slane %v1007_v23, %v14334_v39 }
 0x28f   :  { %v793_v16 = vpop.permute.xlu0 %792  ;;  %v795_v21 = vpop.permute.xlu1 %794 }
 0x290   :  { %v998_v24 = vcombine.low %v990_v14, %v997_v15  ;;  %v1030_v26 = vcombine.low %v793_v16, %v795_v21  ;;  %v1022_v38 = vcombine.low %v1014_v11, %v1021_v20 }
 0x292   :  { %v14471_v28 = vpack.c.bf16 %v1005_v22, %v998_v24  ;;  %v1038_v32 = vrot.slane %v1030_v26, %v14334_v39 }
 0x293   :  { %v797_v29 = vpop.permute.xlu0 %796  ;;  %v799_v8 = vpop.permute.xlu1 %798 }
 0x294   :  { %v1031_v30 = vcombine.low %v797_v29, %v799_v8  ;;  %1330 = vrot.lane.b32.xlu1 %v14471_v28, %s14198_s21 }
 0x296   :  { %v1045_v33 = vrot.slane %v1031_v30, %v14334_v39 }
 0x297   :  { %v791_v36 = vpop.permute.xlu0 %790  ;;  %v801_v37 = vpop.permute.xlu1 %800 }
 0x298   :  { %v1029_v41 = vrot.slane %v791_v36, %v14334_v39  ;;  %v1046_v43 = vcombine.low %v1038_v32, %v1045_v33  ;;  %v1053_v45 = vrot.slane %v801_v37, %v14334_v39 }
 0x29a   :  { %v1076_v47 = vpack.c.bf16 %v1029_v41, %v1022_v38  ;;  %v1077_v62 = vpack.c.bf16 %v1053_v45, %v1046_v43 }
 0x29b   :  { %v634_v48 = vpop.permute.xlu0 %633  ;;  %v636_v49 = vpop.permute.xlu1 %635 }
 0x29c   :  { %12972 = vmatprep.subr.bf16.mxu1 %v634_v48  ;;  %1430 = vrot.lane.b32.xlu1 %v1077_v62, %s14198_s21 }
 0x29d   :  { %1380 = vrot.lane.b32.xlu0 %v1076_v47, %s14198_s21  ;;  %12973 = vmatpush3.bf16.msra.mxu1 %v634_v48 }
 0x29e   :  { %12974 = vmatprep.subr.bf16.mxu1 %v636_v49 }
 0x29f   :  { %v1080_v53 = vpop.permute.xlu0 %1079  ;;  %v1131_v56 = vpop.permute.xlu1 %1130 }
 0x2a0   :  { %v1086_v54 = vsel %vm1081_vm8, %v1080_v53, 0  ;;  %640 = vrot.lane.b32.xlu1 %v14391_v42, %s14197_s19  ;;  %v1136_v58 = vsel %vm1081_vm8, %v1131_v56, 0 }
 0x2a1   :  { %12975 = vmatpush3.bf16.msra.mxu1 %v636_v49  ;;  %12981 = vmatpush3.bf16.xpose.msra.mxu0 %v1086_v54 }
 0x2a2   :  { %12986 = vmatprep.subr.bf16.mxu1 %v18433_v0  ;;  %12992 = vmatprep.subr.bf16.mxu0 %v18433_v0 }
 0x2a4   :  { %12977 = vmatmul.mubr.msk.bf16.vlgmr.msra.gmra.mrb[4].mxu1 %vm434_vm7, %v630_v55 }
 0x2a5   :  { %12988 = vmatprep.mubr.msk.bf16.mxu1 %vm14191_vm0, %v18433_v0 }
 0x2a8   :  { %12983 = vmatmul.mubr.msk.bf16.vlgmr.msra.gmra.mrb[8].mxu0 %vm1081_vm8, %v14415_v17 }
 0x2a9   :  { %12994 = vmatprep.mubr.msk.bf16.mxu0 %vm14191_vm0, %v18433_v0 }
 0x2aa   :  { %12987 = vmatpush3.bf16.xpose.msra.mxu1 %v1136_v58 }
 0x2ab   :  { %12998 = vmatprep.subr.bf16.mxu1 %v18433_v0 }
 0x2b1   :  { %12989 = vmatmul.mubr.msk.bf16.vlgmr.msra.gmra.mrb[8].mxu1 %vm1081_vm8, %v14417_v19 }
 0x2b2   :  { %13000 = vmatprep.mubr.msk.bf16.mxu1 %vm14191_vm0, %v18433_v0 }
 0x2f2   :  { %v1181_v42 = vpop.permute.xlu0 %1180 }
 0x2f3   :  { %v1186_v59 = vsel %vm1081_vm8, %v1181_v42, 0 }
 0x2f4   :  { %12993 = vmatpush3.bf16.xpose.msra.mxu0 %v1186_v59  ;;  %v12277_v59 = vld.sshfl [vmem:[%s18425_s2] sm:$0x11 pattern:$0x75316420]  ;;  %s14199_s2 = smov 24  }
 0x2f5   :  { %13004 = vmatprep.subr.bf16.mxu0 %v18433_v0 }
 0x2f6   :  { %v1281_v17 = vpop.permute.xlu0 %1280 }
 0x2f7   :  { %v1286_v60 = vsel %vm1081_vm8, %v1281_v17, 0  ;;  %v303_v17 = vrot.slane %v12277_v59, %v14318_v18 }
 0x2fb   :  { %12995 = vmatmul.mubr.msk.bf16.vlgmr.msra.gmra.mrb[12].mxu0 %vm1081_vm8, %v14452_v51 }
 0x2fc   :  { %13005 = vmatpush3.bf16.xpose.msra.mxu0 %v1286_v60  ;;  %13006 = vmatprep.mubr.msk.bf16.mxu0 %vm14191_vm0, %v18433_v0  ;;  %v313_v60 = vmul.f32 -1e+09, %v303_v17 }
 0x2fd   :  { %13016 = vmatprep.subr.bf16.mxu0 %v18433_v0 }
 0x2fe   :  { %v1231_v19 = vpop.permute.xlu1 %1230 }
 0x2ff   :  { %v1236_v61 = vsel %vm1081_vm8, %v1231_v19, 0 }
 0x300   :  { %12999 = vmatpush3.bf16.xpose.msra.mxu1 %v1236_v61  ;;  %v14634_v61 = vrot.slane %v313_v60, %v14321_v27 }
 0x301   :  { %13010 = vmatprep.subr.bf16.mxu1 %v18433_v0 }
 0x303   :  { %13007 = vmatmul.mubr.msk.bf16.vlgmr.msra.gmra.mrb[16].mxu0 %vm1081_vm8, %v14457_v57 }
 0x304   :  { %13018 = vmatprep.mubr.msk.bf16.mxu0 %vm14191_vm0, %v18433_v0 }
 0x306   :  { %v1331_v63 = vpop.permute.xlu1 %1330 }
 0x307   :  { %v1336_v51 = vsel %vm1081_vm8, %v1331_v63, 0  ;;  %13001 = vmatmul.mubr.msk.bf16.vlgmr.msra.gmra.mrb[12].mxu1 %vm1081_vm8, %v14464_v7 }
 0x308   :  { %13011 = vmatpush3.bf16.xpose.msra.mxu1 %v1336_v51  ;;  %13012 = vmatprep.mubr.msk.bf16.mxu1 %vm14191_vm0, %v18433_v0 }
 0x309   :  { %13022 = vmatprep.subr.bf16.mxu1 %v18433_v0 }
 0x30e   :  { %v1431_v1 = vpop.permute.xlu1 %1430 }
 0x30f   :  { %v1436_v2 = vsel %vm1081_vm8, %v1431_v1, 0  ;;  %v1381_v3 = vpop.permute.xlu0 %1380  ;;  %13013 = vmatmul.mubr.msk.bf16.vlgmr.msra.gmra.mrb[16].mxu1 %vm1081_vm8, %v14471_v28 }
 0x310   :  { %v1386_v57 = vsel %vm1081_vm8, %v1381_v3, 0  ;;  %13023 = vmatpush3.bf16.xpose.msra.mxu1 %v1436_v2  ;;  %13024 = vmatprep.mubr.msk.bf16.mxu1 %vm14191_vm0, %v18433_v0 }
 0x311   :  { %13017 = vmatpush3.bf16.xpose.msra.mxu0 %v1386_v57  ;;  %13034 = vmatprep.subr.bf16.mxu1 %v18433_v0 }
 0x312   :  { %13028 = vmatprep.subr.bf16.mxu0 %v18433_v0  ;;  %v641_v4 = vpop.permute.xlu1 %640 }
 0x317   :  { %13025 = vmatmul.mubr.msk.bf16.vlgmr.msra.gmra.mrb[20].mxu1 %vm1081_vm8, %v1077_v62 }
 0x318   :  { %13019 = vmatmul.mubr.msk.bf16.vlgmr.msra.gmra.mrb[20].mxu0 %vm1081_vm8, %v1076_v47  ;;  %13036 = vmatprep.mubr.msk.bf16.mxu1 %vm14191_vm0, %v18433_v0 }
 0x319   :  { %13030 = vmatprep.mubr.msk.bf16.mxu0 %vm14191_vm0, %v18433_v0 }
 0x377   :  { %v12978_v5 = vpop.f32.mrb[4].mxu1 }
 0x378   :  { %v683_v6 = vpop.f32.mrb[5].mxu1  ;;  %v692_v10 = vadd.f32 %v12978_v5, %v641_v4 }
 0x379   :  { %v684_v7 = vadd.f32 %v683_v6, %v641_v4  ;;  %v12979_v9 = vpop.f32.mrb[6].mxu1 }
 0x37a   :  { %v686_v12 = vpop.f32.mrb[7].mxu1  ;;  %v14556_v28 = vrot.slane %v692_v10, %v14334_v39  ;;  %v296_v9 = vcombine.high %v12277_v59, %v12277_v59 }
 0x37b   :  { %v700_v13 = vcombine.high %v684_v7, %v684_v7  ;;  %v14541_v14 = vrot.slane %v684_v7, %v14334_v39  ;;  %v687_v15 = vadd.f32 %v686_v12, %v641_v4  ;;  %v1122_v16 = vpop.f32.mrb[8].mxu0 }
 0x37c   :  { %v12984_v21 = vpop.f32.mrb[9].mxu0  ;;  %v14589_v37 = vcombine.high %v14556_v28, %v14556_v28  ;;  %v1479_v19 = vmul.f32 0.35355338, %v1122_v16  ;;  %v310_v16 = vrot.slane %v296_v9, %v14318_v18  ;;  %v3373_v18 = vld [vmem:[%s18427_s4 + $0x1f0] sm:$0xff] }
 0x37d   :  { %v14544_v22 = vrot.slane %v700_v13, %v14334_v39  ;;  %v717_v23 = vcombine.high %v687_v15, %v687_v15  ;;  %v14547_v24 = vrot.slane %v687_v15, %v14334_v39  ;;  %802 = vrot.lane.b32.xlu1 %v14541_v14, %s14195_s17  ;;  %v1125_v25 = vpop.f32.mrb[10].mxu0  ;;  %v14553_v26 = vcombine.high %v14541_v14, %v14541_v14 }
 0x37e   :  { %v12985_v29 = vpop.f32.mrb[11].mxu0  ;;  %v1756_v54 = vrot.slane %v14589_v37, %v14334_v39  ;;  %v14637_v63 = vadd.f32 %v14634_v61, %v1479_v19  ;;  %v1480_v51 = vmul.f32 0.35355338, %v1125_v25 }
 0x37f   :  { %v14559_v8 = vrot.slane %v717_v23, %v14334_v39  ;;  %804 = vrot.lane.b32.xlu0 %v14553_v26, %s14195_s17  ;;  %v14565_v20 = vcombine.high %v14547_v24, %v14547_v24  ;;  %v14569_v30 = vcombine.high %v14544_v22, %v14544_v22  ;;  %v1709_v31 = vcombine.low %v14541_v14, %v14553_v26 }
 0x380   :  { %v1732_v46 = vrot.slane %v14547_v24, %v14334_v39  ;;  %v14608_v56 = vpack.i.bf16 %v14589_v37, %v14547_v24  ;;  %v1524_v1 = vsel %vm1523_vm10, %v14637_v63, -inf  ;;  %v14642_v2 = vadd.f32 %v14634_v61, %v1480_v51 }
 0x381   :  { %806 = vrot.lane.b32.xlu1 %v14544_v22, %s14195_s17  ;;  %v14577_v11 = vcombine.high %v14559_v8, %v14559_v8  ;;  %v1710_v32 = vcombine.low %v14544_v22, %v14569_v30  ;;  %v1733_v33 = vcombine.low %v14565_v20, %v14559_v8  ;;  %v1717_v34 = vrot.slane %v1709_v31, %v14334_v39 }
 0x382   :  { %v1528_v3 = vsel %vm1527_vm11, %v14642_v2, -inf  ;;  %v314_v29 = vmul.f32 -1e+09, %v310_v16 }
 0x383   :  { %812 = vrot.lane.b32.xlu0 %v14565_v20, %s14195_s17  ;;  %v1724_v36 = vrot.slane %v1710_v32, %v14334_v39  ;;  %v1734_v38 = vcombine.low %v14577_v11, %v14556_v28  ;;  %v1741_v47 = vrot.slane %v1733_v33, %v14334_v39 }
 0x384   :  { %v1172_v41 = vpop.f32.mrb[8].mxu1  ;;  %v14652_v33 = vrot.slane %v314_v29, %v14321_v27 }
 0x385   :  { %v12990_v43 = vpop.f32.mrb[9].mxu1  ;;  %808 = vrot.lane.b32.xlu1 %v14569_v30, %s14195_s17  ;;  %v1725_v45 = vcombine.low %v1717_v34, %v1724_v36  ;;  %v1748_v62 = vrot.slane %v1734_v38, %v14334_v39  ;;  %v1481_v31 = vmul.f32 0.35355338, %v1172_v41 }
 0x386   :  { %v1175_v48 = vpop.f32.mrb[10].mxu1 }
 0x387   :  { %v12991_v49 = vpop.f32.mrb[11].mxu1  ;;  %816 = vrot.lane.b32.xlu0 %v14577_v11, %s14195_s17  ;;  %v1917_v52 = vpack.c.bf16 %v1732_v46, %v1725_v45  ;;  %v1749_v53 = vcombine.low %v1741_v47, %v1748_v62  ;;  %v1482_v43 = vmul.f32 0.35355338, %v1175_v48  ;;  %v14655_v45 = vadd.f32 %v14652_v33, %v1481_v31 }
 0x389   :  { %814 = vrot.lane.b32.xlu1 %v14559_v8, %s14195_s17  ;;  %v1930_v55 = vsel %vm1928_vm9, %v1917_v52, 0  ;;  %v1918_v58 = vpack.c.bf16 %v1756_v54, %v1749_v53  ;;  %v1531_v49 = vsel %vm1523_vm10, %v14655_v45, -inf  ;;  %v14660_v52 = vadd.f32 %v14652_v33, %v1482_v43 }
 0x38a   :  { %13029 = vmatpush3.bf16.msra.mxu0 %v1930_v55 }
 0x38b   :  { %13799 = vrot.lane.b32.xlu0 %v14608_v56, %s14195_s17  ;;  %v1977_v42 = vsel %vm1928_vm9, %v1918_v58, 0  ;;  %13040 = vmatprep.subr.bf16.mxu0 %v18433_v0  ;;  %v1534_v19 = vsel %vm1527_vm11, %v14660_v52, -inf }
 0x38c   :  { %13035 = vmatpush3.bf16.msra.mxu1 %v1977_v42 }
 0x38d   :  { %818 = vrot.lane.b32.xlu1 %v14556_v28, %s14195_s17  ;;  %13046 = vmatprep.subr.bf16.mxu1 %v18433_v0 }
 0x38f   :  { %824 = vrot.lane.b32.xlu0 %v14553_v26, %s14194_s7 }
 0x391   :  { %822 = vrot.lane.b32.xlu1 %v14541_v14, %s14194_s7 }
 0x393   :  { %828 = vrot.lane.b32.xlu0 %v14569_v30, %s14194_s7 }
 0x395   :  { %826 = vrot.lane.b32.xlu1 %v14544_v22, %s14194_s7 }
 0x397   :  { %834 = vrot.lane.b32.xlu0 %v14559_v8, %s14194_s7 }
 0x399   :  { %832 = vrot.lane.b32.xlu1 %v14565_v20, %s14194_s7 }
 0x3b6   :  { %1525 = vmax.xlane.f32.xlu0 %v1524_v1 }
 0x3bd   :  { %1529 = vmax.xlane.f32.xlu1 %v1528_v3 }
 0x3cc   :  { %838 = vrot.lane.b32.xlu0 %v14556_v28, %s14194_s7 }
 0x3ce   :  { %836 = vrot.lane.b32.xlu1 %v14577_v11, %s14194_s7  ;;  %v1222_v57 = vpop.f32.mrb[12].mxu0 }
 0x3cf   :  { %v12996_v4 = vpop.f32.mrb[13].mxu0  ;;  %v1483_v46 = vmul.f32 0.35355338, %v1222_v57 }
 0x3d0   :  { %v1225_v5 = vpop.f32.mrb[14].mxu0 }
 0x3d1   :  { %v12997_v6 = vpop.f32.mrb[15].mxu0  ;;  %v1484_v47 = vmul.f32 0.35355338, %v1225_v5  ;;  %v14663_v59 = vadd.f32 %v14634_v61, %v1483_v46 }
 0x3d3   :  { %v14668_v51 = vadd.f32 %v14634_v61, %v1484_v47  ;;  %v1537_v3 = vsel %vm1523_vm10, %v14663_v59, -inf }
 0x3d5   :  { %v1540_v5 = vsel %vm1527_vm11, %v14668_v51, -inf }
 0x3d6   :  { %v1322_v7 = vpop.f32.mrb[16].mxu0 }
 0x3d7   :  { %v13008_v10 = vpop.f32.mrb[17].mxu0  ;;  %v1487_v1 = vmul.f32 0.35355338, %v1322_v7 }
 0x3d8   :  { %v1325_v12 = vpop.f32.mrb[18].mxu0 }
 0x3d9   :  { %v13009_v13 = vpop.f32.mrb[19].mxu0  ;;  %v1488_v4 = vmul.f32 0.35355338, %v1325_v12  ;;  %v14683_v7 = vadd.f32 %v14634_v61, %v1487_v1 }
 0x3da   :  { %v1272_v15 = vpop.f32.mrb[12].mxu1 }
 0x3db   :  { %v13002_v21 = vpop.f32.mrb[13].mxu1  ;;  %v1485_v58 = vmul.f32 0.35355338, %v1272_v15  ;;  %v14688_v15 = vadd.f32 %v14634_v61, %v1488_v4 }
 0x3dc   :  { %v1275_v23 = vpop.f32.mrb[14].mxu1  ;;  %v1549_v21 = vsel %vm1523_vm10, %v14683_v7, -inf }
 0x3dd   :  { %v13003_v25 = vpop.f32.mrb[15].mxu1  ;;  %v1486_v17 = vmul.f32 0.35355338, %v1275_v23  ;;  %v14673_v57 = vadd.f32 %v14652_v33, %v1485_v58  ;;  %v1552_v29 = vsel %vm1527_vm11, %v14688_v15, -inf }
 0x3df   :  { %v14678_v6 = vadd.f32 %v14652_v33, %v1486_v17  ;;  %v1543_v10 = vsel %vm1523_vm10, %v14673_v57, -inf }
 0x3e1   :  { %v1546_v12 = vsel %vm1527_vm11, %v14678_v6, -inf }
 0x3e2   :  { %v1372_v32 = vpop.f32.mrb[16].mxu1 }
 0x3e3   :  { %v13014_v34 = vpop.f32.mrb[17].mxu1  ;;  %v1489_v9 = vmul.f32 0.35355338, %v1372_v32 }
 0x3e4   :  { %v1375_v36 = vpop.f32.mrb[18].mxu1 }
 0x3e5   :  { %v13015_v38 = vpop.f32.mrb[19].mxu1  ;;  %v1490_v13 = vmul.f32 0.35355338, %v1375_v36  ;;  %v14693_v23 = vadd.f32 %v14652_v33, %v1489_v9 }
 0x3e7   :  { %v14698_v31 = vadd.f32 %v14652_v33, %v1490_v13  ;;  %v1555_v34 = vsel %vm1523_vm10, %v14693_v23, -inf }
 0x3e9   :  { %v1558_v38 = vsel %vm1527_vm11, %v14698_v31, -inf }
 0x3ea   :  { %v1472_v62 = vpop.f32.mrb[20].mxu1 }
 0x3eb   :  { %v1422_v41 = vpop.f32.mrb[20].mxu0  ;;  %v13026_v53 = vpop.f32.mrb[21].mxu1  ;;  %1532 = vmax.xlane.f32.xlu0 %v1531_v49  ;;  %v1493_v32 = vmul.f32 0.35355338, %v1472_v62 }
 0x3ec   :  { %v13020_v54 = vpop.f32.mrb[21].mxu0  ;;  %v1475_v55 = vpop.f32.mrb[22].mxu1  ;;  %v1491_v16 = vmul.f32 0.35355338, %v1422_v41 }
 0x3ed   :  { %v1425_v42 = vpop.f32.mrb[22].mxu0  ;;  %v13027_v48 = vpop.f32.mrb[23].mxu1  ;;  %v14713_v47 = vadd.f32 %v14652_v33, %v1493_v32 }
 0x3ee   :  { %v13021_v60 = vpop.f32.mrb[23].mxu0  ;;  %v1492_v25 = vmul.f32 0.35355338, %v1425_v42  ;;  %v14703_v36 = vadd.f32 %v14634_v61, %v1491_v16 }
 0x3ef   :  { %1535 = vmax.xlane.f32.xlu0 %v1534_v19  ;;  %v1567_v49 = vsel %vm1523_vm10, %v14713_v47, -inf }
 0x3f0   :  { %v14708_v43 = vadd.f32 %v14634_v61, %v1492_v25  ;;  %v1561_v46 = vsel %vm1523_vm10, %v14703_v36, -inf }
 0x3f2   :  { %1538 = vmax.xlane.f32.xlu1 %v1537_v3  ;;  %v1564_v62 = vsel %vm1527_vm11, %v14708_v43, -inf }
 0x3f3   :  { %1541 = vmax.xlane.f32.xlu0 %v1540_v5 }
 0x3f6   :  { %1544 = vmax.xlane.f32.xlu1 %v1543_v10 }
 0x3f7   :  { %1547 = vmax.xlane.f32.xlu0 %v1546_v12 }
 0x3fa   :  { %1550 = vmax.xlane.f32.xlu1 %v1549_v21 }
 0x3fb   :  { %1553 = vmax.xlane.f32.xlu0 %v1552_v29 }
 0x3fe   :  { %1556 = vmax.xlane.f32.xlu1 %v1555_v34 }
 0x3ff   :  { %1559 = vmax.xlane.f32.xlu0 %v1558_v38 }
 0x402   :  { %1562 = vmax.xlane.f32.xlu1 %v1561_v46 }
 0x403   :  { %1565 = vmax.xlane.f32.xlu0 %v1564_v62 }
 0x406   :  { %1568 = vmax.xlane.f32.xlu1 %v1567_v49 }
 0x417   :  { %13804 = vrot.lane.b32.xlu1 %v14608_v56, %s14194_s7  ;;  %v14735_v56 = vpop.permute.xlu1 %802 }
 0x419   :  { %842 = vrot.lane.b32.xlu0 %v14541_v14, %s14196_s18  ;;  %v14737_v14 = vpop.permute.xlu0 %804 }
 0x41b   :  { %844 = vrot.lane.b32.xlu1 %v14553_v26, %s14196_s18  ;;  %v1494_v26 = vmul.f32 0.35355338, %v1475_v55  ;;  %v14739_v61 = vpop.permute.xlu1 %806 }
 0x41d   :  { %846 = vrot.lane.b32.xlu0 %v14544_v22, %s14196_s18  ;;  %v14741_v22 = vpop.permute.xlu0 %812 }
 0x41f   :  { %848 = vrot.lane.b32.xlu1 %v14569_v30, %s14196_s18  ;;  %v14744_v30 = vadd.f32 %v14652_v33, %v1494_v26  ;;  %v14746_v41 = vpop.permute.xlu1 %808 }
 0x421   :  { %852 = vrot.lane.b32.xlu0 %v14565_v20, %s14196_s18  ;;  %v14750_v20 = vpop.permute.xlu0 %816 }
 0x423   :  { %854 = vrot.lane.b32.xlu1 %v14559_v8, %s14196_s18  ;;  %v1570_v8 = vsel %vm1527_vm11, %v14744_v30, -inf }
 0x425   :  { %v14754_v53 = vpop.permute.xlu0 %13799 }
 0x427   :  { %858 = vrot.lane.b32.xlu1 %v14556_v28, %s14196_s18  ;;  %v14752_v28 = vpop.permute.xlu1 %814 }
 0x429   :  { %v14758_v55 = vpop.permute.xlu0 %824 }
 0x42b   :  { %v14756_v54 = vpop.permute.xlu1 %818 }
 0x42d   :  { %v14762_v33 = vpop.permute.xlu0 %828 }
 0x42f   :  { %v14760_v58 = vpop.permute.xlu1 %822 }
 0x431   :  { %v14768_v48 = vpop.permute.xlu0 %834 }
 0x433   :  { %v14764_v42 = vpop.permute.xlu1 %826 }
 0x437   :  { %v14770_v17 = vpop.permute.xlu1 %832 }
 0x440   :  { %1571 = vmax.xlane.f32.xlu0 %v1570_v8 }
 0x443   :  { %v1526_v60 = vpop.xlane.xlu0 %1525 }
 0x444   :  { %v1573_v19 = vsub.f32 %v14637_v63, %v1526_v60 }
 0x446   :  { %v1589_v3 = vmul.f32 1.442695, %v1573_v19 }
 0x447   :  { %v14776_v10 = vpop.permute.xlu0 %838 }
 0x448   :  { %13888 = vpow2.f32 %v1589_v3 }
 0x44a   :  { %v1530_v1 = vpop.xlane.xlu1 %1529 }
 0x44b   :  { %v1574_v4 = vsub.f32 %v14642_v2, %v1530_v1 }
 0x44d   :  { %v1591_v5 = vmul.f32 1.442695, %v1574_v4 }
 0x44e   :  { %v14785_v2 = vpop.permute.xlu1 %836 }
 0x44f   :  { %13890 = vpow2.f32 %v1591_v5 }
 0x452   :  { %v14774_v9 = vpop.eup %13888 }
 0x456   :  { %856 = vrot.lane.b32.xlu0 %v14577_v11, %s14196_s18  ;;  %v1621_v11 = vsel %vm1523_vm10, %v14774_v9, 0.0 }
 0x459   :  { %v14780_v13 = vpop.eup %13890 }
 0x45a   :  { %v1624_v63 = vsel %vm1527_vm11, %v14780_v13, 0.0 }
 0x475   :  { %1622 = vadd.xlane.f32.xlu0 %v1621_v11 }
 0x478   :  { %v1533_v12 = vpop.xlane.xlu0 %1532 }
 0x479   :  { %v1575_v16 = vsub.f32 %v14655_v45, %v1533_v12  ;;  %1625 = vadd.xlane.f32.xlu0 %v1624_v63 }
 0x47b   :  { %v1593_v21 = vmul.f32 1.442695, %v1575_v16 }
 0x47c   :  { %v1536_v25 = vpop.xlane.xlu0 %1535 }
 0x47d   :  { %13892 = vpow2.f32 %v1593_v21  ;;  %v1576_v29 = vsub.f32 %v14660_v52, %v1536_v25 }
 0x47f   :  { %v1595_v32 = vmul.f32 1.442695, %v1576_v29  ;;  %v1539_v34 = vpop.xlane.xlu1 %1538 }
 0x480   :  { %v1577_v38 = vsub.f32 %v14663_v59, %v1539_v34  ;;  %v1542_v46 = vpop.xlane.xlu0 %1541 }
 0x481   :  { %13894 = vpow2.f32 %v1595_v32  ;;  %v1578_v62 = vsub.f32 %v14668_v51, %v1542_v46 }
 0x482   :  { %v1597_v49 = vmul.f32 1.442695, %v1577_v38 }
 0x483   :  { %v1599_v26 = vmul.f32 1.442695, %v1578_v62  ;;  %v1545_v8 = vpop.xlane.xlu1 %1544 }
 0x484   :  { %13896 = vpow2.f32 %v1597_v49  ;;  %v1579_v45 = vsub.f32 %v14673_v57, %v1545_v8  ;;  %v1548_v60 = vpop.xlane.xlu0 %1547 }
 0x485   :  { %13898 = vpow2.f32 %v1599_v26  ;;  %v1580_v19 = vsub.f32 %v14678_v6, %v1548_v60 }
 0x486   :  { %v1601_v1 = vmul.f32 1.442695, %v1579_v45 }
 0x487   :  { %v14792_v52 = vpop.eup %13892  ;;  %v1603_v3 = vmul.f32 1.442695, %v1580_v19  ;;  %v1551_v4 = vpop.xlane.xlu1 %1550 }
 0x488   :  { %13900 = vpow2.f32 %v1601_v1  ;;  %v1581_v59 = vsub.f32 %v14683_v7, %v1551_v4  ;;  %v1554_v5 = vpop.xlane.xlu0 %1553  ;;  %v1627_v51 = vsel %vm1523_vm10, %v14792_v52, 0.0 }
 0x489   :  { %1628 = vadd.xlane.f32.xlu0 %v1627_v51  ;;  %13902 = vpow2.f32 %v1603_v3  ;;  %v1582_v12 = vsub.f32 %v14688_v15, %v1554_v5 }
 0x48a   :  { %v1605_v57 = vmul.f32 1.442695, %v1581_v59 }
 0x48b   :  { %v14797_v11 = vpop.eup %13894  ;;  %v1557_v6 = vpop.xlane.xlu1 %1556  ;;  %v1607_v7 = vmul.f32 1.442695, %v1582_v12 }
 0x48c   :  { %v1630_v63 = vsel %vm1527_vm11, %v14797_v11, 0.0  ;;  %13904 = vpow2.f32 %v1605_v57  ;;  %v1583_v25 = vsub.f32 %v14693_v23, %v1557_v6  ;;  %v1560_v32 = vpop.xlane.xlu0 %1559 }
 0x48d   :  { %1631 = vadd.xlane.f32.xlu0 %v1630_v63  ;;  %13906 = vpow2.f32 %v1607_v7  ;;  %v1584_v46 = vsub.f32 %v14698_v31, %v1560_v32 }
 0x48e   :  { %v14802_v16 = vpop.eup %13896  ;;  %v1609_v38 = vmul.f32 1.442695, %v1583_v25 }
 0x48f   :  { %v14804_v21 = vpop.eup %13898  ;;  %v1633_v29 = vsel %vm1523_vm10, %v14802_v16, 0.0  ;;  %v1563_v49 = vpop.xlane.xlu1 %1562  ;;  %v1611_v26 = vmul.f32 1.442695, %v1584_v46 }
 0x490   :  { %1634 = vadd.xlane.f32.xlu1 %v1633_v29  ;;  %v1636_v15 = vsel %vm1527_vm11, %v14804_v21, 0.0  ;;  %13908 = vpow2.f32 %v1609_v38  ;;  %v1585_v8 = vsub.f32 %v14703_v36, %v1563_v49  ;;  %v1566_v45 = vpop.xlane.xlu0 %1565 }
 0x491   :  { %1637 = vadd.xlane.f32.xlu0 %v1636_v15  ;;  %13910 = vpow2.f32 %v1611_v26  ;;  %v1586_v1 = vsub.f32 %v14708_v43, %v1566_v45 }
 0x492   :  { %v14811_v34 = vpop.eup %13900  ;;  %v1613_v31 = vmul.f32 1.442695, %v1585_v8 }
 0x493   :  { %v1639_v62 = vsel %vm1523_vm10, %v14811_v34, 0.0  ;;  %v14816_v23 = vpop.eup %13902  ;;  %v1569_v3 = vpop.xlane.xlu1 %1568  ;;  %v1615_v36 = vmul.f32 1.442695, %v1586_v1 }
 0x494   :  { %v1642_v60 = vsel %vm1527_vm11, %v14816_v23, 0.0  ;;  %13912 = vpow2.f32 %v1613_v31  ;;  %v1587_v5 = vsub.f32 %v14713_v47, %v1569_v3  ;;  %v14851_v38 = vpop.permute.xlu0 %842 }
 0x495   :  { %1640 = vadd.xlane.f32.xlu0 %v1639_v62  ;;  %13914 = vpow2.f32 %v1615_v36  ;;  %v1757_v36 = vcombine.low %v14735_v56, %v14737_v14 }
 0x496   :  { %v14821_v19 = vpop.eup %13904  ;;  %v1617_v12 = vmul.f32 1.442695, %v1587_v5  ;;  %v13801_v5 = vunpack.i.l.bf16 %v14754_v53 }
 0x497   :  { %v1645_v4 = vsel %vm1523_vm10, %v14821_v19, 0.0  ;;  %v14826_v59 = vpop.eup %13906  ;;  %v14868_v1 = vpop.permute.xlu1 %13804 }
 0x498   :  { %v1648_v51 = vsel %vm1527_vm11, %v14826_v59, 0.0  ;;  %13916 = vpow2.f32 %v1617_v12  ;;  %v14853_v46 = vpop.permute.xlu0 %846  ;;  %v1765_v12 = vrot.slane %v1757_v36, %v14334_v39 }
 0x499   :  { %1643 = vadd.xlane.f32.xlu0 %v1642_v60 }
 0x49a   :  { %v14831_v57 = vpop.eup %13908 }
 0x49b   :  { %v1651_v43 = vsel %vm1523_vm10, %v14831_v57, 0.0  ;;  %v14835_v6 = vpop.eup %13910 }
 0x49c   :  { %v1654_v63 = vsel %vm1527_vm11, %v14835_v6, 0.0  ;;  %v14855_v62 = vpop.permute.xlu0 %852 }
 0x49d   :  { %1646 = vadd.xlane.f32.xlu0 %v1645_v4  ;;  %v14870_v4 = vpop.permute.xlu1 %844 }
 0x49e   :  { %v14839_v7 = vpop.eup %13912 }
 0x49f   :  { %v1657_v47 = vsel %vm1523_vm10, %v14839_v7, 0.0  ;;  %v14843_v25 = vpop.eup %13914 }
 0x4a0   :  { %v1660_v29 = vsel %vm1527_vm11, %v14843_v25, 0.0 }
 0x4a1   :  { %1649 = vadd.xlane.f32.xlu0 %v1648_v51  ;;  %v14878_v51 = vpop.permute.xlu1 %848 }
 0x4a2   :  { %v14847_v32 = vpop.eup %13916 }
 0x4a3   :  { %v1663_v15 = vsel %vm1523_vm10, %v14847_v32, 0.0 }
 0x4a5   :  { %1652 = vadd.xlane.f32.xlu0 %v1651_v43  ;;  %v1780_v43 = vrot.slane %v13801_v5, %v14334_v39  ;;  %v13802_v5 = vunpack.i.h.bf16 %v14754_v53 }
 0x4a9   :  { %1655 = vadd.xlane.f32.xlu0 %v1654_v63 }
 0x4ad   :  { %1658 = vadd.xlane.f32.xlu0 %v1657_v47 }
 0x4b1   :  { %1661 = vadd.xlane.f32.xlu0 %v1660_v29 }
 0x4b5   :  { %1664 = vadd.xlane.f32.xlu0 %v1663_v15 }
 0x4cb   :  { %850 = vrot.lane.b32.xlu0 %v14547_v24, %s14196_s18 }
 0x4cd   :  { %v1572_v49 = vpop.xlane.xlu0 %1571 }
 0x4ce   :  { %v1588_v26 = vsub.f32 %v14744_v30, %v1572_v49  ;;  %v1758_v30 = vcombine.low %v14739_v61, %v14746_v41  ;;  %v14884_v49 = vpop.permute.xlu1 %854 }
 0x4d0   :  { %v1619_v8 = vmul.f32 1.442695, %v1588_v26 }
 0x4d1   :  { %v14866_v31 = vpop.permute.xlu0 %856 }
 0x4d2   :  { %13918 = vpow2.f32 %v1619_v8  ;;  %v14893_v8 = vpop.permute.xlu1 %858 }
 0x4dc   :  { %v14860_v45 = vpop.eup %13918 }
 0x4dd   :  { %v1666_v60 = vsel %vm1527_vm11, %v14860_v45, 0.0 }
 0x4de   :  { %1667 = vadd.xlane.f32.xlu1 %v1666_v60  ;;  %v1781_v60 = vcombine.low %v14741_v22, %v14752_v28  ;;  %v13806_v22 = vunpack.i.l.bf16 %v14868_v1 }
 0x4e0   :  { %v1789_v36 = vrot.slane %v1781_v60, %v14334_v39 }
 0x4ef   :  { %860 = vrot.lane.b32.xlu1 %v14589_v37, %s14196_s18  ;;  %v1772_v37 = vrot.slane %v1758_v30, %v14334_v39 }
 0x4f1   :  { %v1773_v47 = vcombine.low %v1765_v12, %v1772_v37  ;;  %v1805_v37 = vcombine.low %v14760_v58, %v14758_v55 }
 0x4f3   :  { %v1919_v41 = vpack.c.bf16 %v1780_v43, %v1773_v47  ;;  %v1804_v43 = vrot.slane %v13802_v5, %v14334_v39  ;;  %v1813_v53 = vrot.slane %v1805_v37, %v14334_v39 }
 0x4f5   :  { %v2024_v26 = vsel %vm1928_vm9, %v1919_v41, 0  ;;  %v1830_v41 = vcombine.low %v14785_v2, %v14776_v10 }
 0x4f7   :  { %v1844_v10 = vrot.slane %v1830_v41, %v14334_v39 }
 0x502   :  { %v1623_v3 = vpop.xlane.xlu0 %1622 }
 0x503   :  { %13920 = vrcp.f32 %v1623_v3 }
 0x506   :  { %v1626_v24 = vpop.xlane.xlu0 %1625 }
 0x507   :  { %13922 = vrcp.f32 %v1626_v24 }
 0x50d   :  { %v13921_v63 = vpop.eup %13920 }
 0x50e   :  { %v1685_v15 = vmul.f32 %v13921_v63, %v14774_v9  ;;  %v1782_v9 = vcombine.low %v14750_v20, %v14756_v54  ;;  %v1806_v20 = vcombine.low %v14764_v42, %v14762_v33 }
 0x510   :  { %v1796_v3 = vrot.slane %v1782_v9, %v14334_v39  ;;  %v1820_v63 = vrot.slane %v1806_v20, %v14334_v39 }
 0x511   :  { %v13923_v29 = vpop.eup %13922 }
 0x512   :  { %v1686_v61 = vmul.f32 %v13923_v29, %v14780_v13  ;;  %v1797_v54 = vcombine.low %v1789_v36, %v1796_v3 }
 0x514   :  { %v1701_v56 = vpack.c.bf16 %v1686_v61, %v1685_v15  ;;  %v1920_v29 = vpack.c.bf16 %v1804_v43, %v1797_v54  ;;  %v1828_v15 = vrot.slane %v13806_v22, %v14334_v39  ;;  %v1821_v61 = vcombine.low %v1813_v53, %v1820_v63 }
 0x516   :  { %13031 = vmatmul.mubr.msk.bf16.vlgmr.msra.gmra.mrb[24].mxu0 %vm1523_vm10, %v1701_v56  ;;  %v1629_v14 = vpop.xlane.xlu0 %1628  ;;  %v2071_v9 = vsel %vm1928_vm9, %v1920_v29, 0  ;;  %v1921_v3 = vpack.c.bf16 %v1828_v15, %v1821_v61  ;;  %v1854_v15 = vcombine.low %v14853_v46, %v14878_v51 }
 0x517   :  { %13041 = vmatpush3.bf16.msra.mxu0 %v2024_v26  ;;  %13042 = vmatprep.mubr.msk.bf16.mxu0 %vm14191_vm0, %v18433_v0  ;;  %13924 = vrcp.f32 %v1629_v14 }
 0x518   :  { %13052 = vmatprep.subr.bf16.mxu0 %v18433_v0 }
 0x51a   :  { %v1632_v13 = vpop.xlane.xlu0 %1631 }
 0x51b   :  { %13926 = vrcp.f32 %v1632_v13  ;;  %v1829_v13 = vcombine.low %v14770_v17, %v14768_v48 }
 0x51d   :  { %v1635_v24 = vpop.xlane.xlu1 %1634  ;;  %v1837_v48 = vrot.slane %v1829_v13, %v14334_v39  ;;  %v1878_v13 = vcombine.low %v14866_v31, %v14893_v8 }
 0x51e   :  { %13928 = vrcp.f32 %v1635_v24  ;;  %v1638_v30 = vpop.xlane.xlu0 %1637 }
 0x51f   :  { %13930 = vrcp.f32 %v1638_v30  ;;  %v1845_v24 = vcombine.low %v1837_v48, %v1844_v10 }
 0x521   :  { %v13925_v12 = vpop.eup %13924 }
 0x522   :  { %v1641_v28 = vpop.xlane.xlu0 %1640  ;;  %v1687_v33 = vmul.f32 %v13925_v12, %v14792_v52  ;;  %v13807_v52 = vunpack.i.h.bf16 %v14868_v1 }
 0x523   :  { %13932 = vrcp.f32 %v1641_v28 }
 0x524   :  { %v1852_v17 = vrot.slane %v13807_v52, %v14334_v39  ;;  %v1877_v52 = vcombine.low %v14855_v62, %v14884_v49 }
 0x525   :  { %v13927_v47 = vpop.eup %13926 }
 0x526   :  { %v1688_v42 = vmul.f32 %v13927_v47, %v14797_v11  ;;  %v1644_v55 = vpop.xlane.xlu0 %1643  ;;  %v1922_v54 = vpack.c.bf16 %v1852_v17, %v1845_v24 }
 0x527   :  { %13934 = vrcp.f32 %v1644_v55 }
 0x528   :  { %v13929_v58 = vpop.eup %13928  ;;  %v1702_v56 = vpack.c.bf16 %v1688_v42, %v1687_v33  ;;  %v2165_v28 = vsel %vm1928_vm9, %v1922_v54, 0 }
 0x529   :  { %v13931_v14 = vpop.eup %13930  ;;  %v1689_v26 = vmul.f32 %v13929_v58, %v14802_v16  ;;  %v1868_v58 = vrot.slane %v1854_v15, %v14334_v39 }
 0x52a   :  { %v1690_v11 = vmul.f32 %v13931_v14, %v14804_v21  ;;  %13037 = vmatmul.mubr.msk.bf16.vlgmr.msra.gmra.mrb[24].mxu1 %vm1523_vm10, %v1702_v56  ;;  %v1647_v60 = vpop.xlane.xlu0 %1646  ;;  %v2118_v21 = vsel %vm1928_vm9, %v1921_v3, 0 }
 0x52b   :  { %13047 = vmatpush3.bf16.msra.mxu1 %v2071_v9  ;;  %13048 = vmatprep.mubr.msk.bf16.mxu1 %vm14191_vm0, %v18433_v0  ;;  %13936 = vrcp.f32 %v1647_v60  ;;  %v1892_v60 = vrot.slane %v1878_v13, %v14334_v39 }
 0x52c   :  { %v1703_v2 = vpack.c.bf16 %v1690_v11, %v1689_v26  ;;  %13058 = vmatprep.subr.bf16.mxu1 %v18433_v0 }
 0x52d   :  { %v13933_v1 = vpop.eup %13932 }
 0x52e   :  { %v1650_v16 = vpop.xlane.xlu0 %1649  ;;  %13043 = vmatmul.mubr.msk.bf16.vlgmr.msra.gmra.mrb[28].mxu0 %vm1523_vm10, %v1703_v2  ;;  %v1691_v36 = vmul.f32 %v13933_v1, %v14811_v34 }
 0x52f   :  { %13938 = vrcp.f32 %v1650_v16  ;;  %13053 = vmatpush3.bf16.msra.mxu0 %v2118_v21  ;;  %13054 = vmatprep.mubr.msk.bf16.mxu0 %vm14191_vm0, %v18433_v0 }
 0x530   :  { %13064 = vmatprep.subr.bf16.mxu0 %v18433_v0 }
 0x531   :  { %v13935_v30 = vpop.eup %13934 }
 0x532   :  { %v1692_v5 = vmul.f32 %v13935_v30, %v14816_v23  ;;  %v1653_v20 = vpop.xlane.xlu0 %1652 }
 0x533   :  { %13940 = vrcp.f32 %v1653_v20 }
 0x534   :  { %v1704_v37 = vpack.c.bf16 %v1692_v5, %v1691_v36 }
 0x535   :  { %v13937_v12 = vpop.eup %13936 }
 0x536   :  { %v1656_v22 = vpop.xlane.xlu0 %1655  ;;  %13049 = vmatmul.mubr.msk.bf16.vlgmr.msra.gmra.mrb[28].mxu1 %vm1523_vm10, %v1704_v37  ;;  %v1693_v23 = vmul.f32 %v13937_v12, %v14821_v19  ;;  %v1853_v19 = vcombine.low %v14851_v38, %v14870_v4 }
 0x537   :  { %13942 = vrcp.f32 %v1656_v22  ;;  %13059 = vmatpush3.bf16.msra.mxu1 %v2165_v28  ;;  %13060 = vmatprep.mubr.msk.bf16.mxu1 %vm14191_vm0, %v18433_v0 }
 0x538   :  { %13070 = vmatprep.subr.bf16.mxu1 %v18433_v0  ;;  %v1861_v41 = vrot.slane %v1853_v19, %v14334_v39 }
 0x539   :  { %v13939_v34 = vpop.eup %13938 }
 0x53a   :  { %v1694_v43 = vmul.f32 %v13939_v34, %v14826_v59  ;;  %v1659_v63 = vpop.xlane.xlu0 %1658  ;;  %v1869_v51 = vcombine.low %v1861_v41, %v1868_v58  ;;  %v324_v58 = vld [vmem:[%s18429_s6 + $0x48] sm:$0xff] }
 0x53b   :  { %13944 = vrcp.f32 %v1659_v63 }
 0x53c   :  { %v1705_v47 = vpack.c.bf16 %v1694_v43, %v1693_v23 }
 0x53d   :  { %v13941_v53 = vpop.eup %13940 }
 0x53e   :  { %v1662_v29 = vpop.xlane.xlu0 %1661  ;;  %13055 = vmatmul.mubr.msk.bf16.vlgmr.msra.gmra.mrb[32].mxu0 %vm1523_vm10, %v1705_v47  ;;  %v1695_v59 = vmul.f32 %v13941_v53, %v14831_v57 }
 0x53f   :  { %13946 = vrcp.f32 %v1662_v29  ;;  %13066 = vmatprep.mubr.msk.bf16.mxu0 %vm14191_vm0, %v18433_v0 }
 0x541   :  { %v13943_v33 = vpop.eup %13942 }
 0x542   :  { %v1696_v42 = vmul.f32 %v13943_v33, %v14835_v6  ;;  %v1665_v55 = vpop.xlane.xlu0 %1664 }
 0x543   :  { %13948 = vrcp.f32 %v1665_v55 }
 0x544   :  { %v1706_v61 = vpack.c.bf16 %v1696_v42, %v1695_v59 }
 0x545   :  { %v13945_v46 = vpop.eup %13944 }
 0x546   :  { %v851_v56 = vpop.permute.xlu0 %850  ;;  %13061 = vmatmul.mubr.msk.bf16.vlgmr.msra.gmra.mrb[32].mxu1 %vm1523_vm10, %v1706_v61  ;;  %v1697_v6 = vmul.f32 %v13945_v46, %v14839_v7  ;;  %v1885_v7 = vrot.slane %v1877_v52, %v14334_v39  ;;  %v325_v61 = vld [vmem:[%s18429_s6 + $0x50] sm:$0xff] }
 0x547   :  { %v1876_v14 = vrot.slane %v851_v56, %v14334_v39  ;;  %13072 = vmatprep.mubr.msk.bf16.mxu1 %vm14191_vm0, %v18433_v0  ;;  %v2463_v41 = vpack.c.bf16 %v325_v61, %v324_v58 }
 0x548   :  { %v1893_v3 = vcombine.low %v1885_v7, %v1892_v60 }
 0x549   :  { %v13947_v38 = vpop.eup %13946  ;;  %v1923_v57 = vpack.c.bf16 %v1876_v14, %v1869_v51  ;;  %v326_v14 = vld [vmem:[%s18429_s6 + $0x58] sm:$0xff] }
 0x54a   :  { %v1698_v4 = vmul.f32 %v13947_v38, %v14843_v25  ;;  %v327_v38 = vld [vmem:[%s18429_s6 + $0x60] sm:$0xff] }
 0x54b   :  { %v2212_v26 = vsel %vm1928_vm9, %v1923_v57, 0 }
 0x54c   :  { %13065 = vmatpush3.bf16.msra.mxu0 %v2212_v26  ;;  %v1707_v9 = vpack.c.bf16 %v1698_v4, %v1697_v6  ;;  %v2464_v6 = vpack.c.bf16 %v327_v38, %v326_v14 }
 0x54d   :  { %v13949_v48 = vpop.eup %13948  ;;  %13076 = vmatprep.subr.bf16.mxu0 %v2463_v41 }
 0x54e   :  { %v1699_v8 = vmul.f32 %v13949_v48, %v14847_v32 }
 0x54f   :  { %13067 = vmatmul.mubr.msk.bf16.vlgmr.msra.gmra.mrb[36].mxu0 %vm1523_vm10, %v1707_v9 }
 0x550   :  { %13077 = vmatpush3.bf16.msra.mxu0 %v2463_v41 }
 0x551   :  { %13078 = vmatprep.subr.bf16.mxu0 %v2464_v6 }
 0x554   :  { %13079 = vmatpush3.bf16.msra.mxu0 %v2464_v6 }
 0x56b   :  { %v1668_v11 = vpop.xlane.xlu1 %1667 }
 0x56c   :  { %13950 = vrcp.f32 %v1668_v11 }
 0x56f   :  { %v861_v25 = vpop.permute.xlu1 %860 }
 0x570   :  { %v1900_v10 = vrot.slane %v861_v25, %v14334_v39 }
 0x572   :  { %v1924_v2 = vpack.c.bf16 %v1900_v10, %v1893_v3 }
 0x574   :  { %v2259_v17 = vsel %vm1928_vm9, %v1924_v2, 0  ;;  %vm3194_vm9 = vcmask 1041409  }
 0x575   :  { %13071 = vmatpush3.bf16.msra.mxu1 %v2259_v17 }
 0x576   :  { %v13951_v31 = vpop.eup %13950 }
 0x577   :  { %v1700_v62 = vmul.f32 %v13951_v31, %v14860_v45 }
 0x579   :  { %v1708_v49 = vpack.c.bf16 %v1700_v62, %v1699_v8 }
 0x57b   :  { %13073 = vmatmul.mubr.msk.bf16.vlgmr.msra.gmra.mrb[36].mxu1 %vm1523_vm10, %v1708_v49 }
 0x5e9   :  { %v14970_v16 = vpop.f32.mrb[24].mxu0 }
 0x5ea   :  { %v13032_v21 = vpop.f32.mrb[25].mxu0 }
 0x5eb   :  { %v14972_v1 = vpop.f32.mrb[26].mxu0 }
 0x5ec   :  { %v13033_v24 = vpop.f32.mrb[27].mxu0 }
 0x5fd   :  { %v14974_v30 = vpop.f32.mrb[24].mxu1 }
 0x5fe   :  { %v13038_v36 = vpop.f32.mrb[25].mxu1 }
 0x5ff   :  { %v14976_v5 = vpop.f32.mrb[26].mxu1 }
 0x600   :  { %v13039_v20 = vpop.f32.mrb[27].mxu1 }
 0x601   :  { %v2060_v54 = vpop.f32.mrb[28].mxu0 }
 0x602   :  { %2306 = vrot.lane.b32.xlu0 %v2060_v54, %s14189_s10  ;;  %v13044_v32 = vpop.f32.mrb[29].mxu0 }
 0x603   :  { %v2063_v45 = vpop.f32.mrb[30].mxu0 }
 0x604   :  { %2308 = vrot.lane.b32.xlu1 %v2063_v45, %s14189_s10  ;;  %v13045_v37 = vpop.f32.mrb[31].mxu0 }
 0x609   :  { %v2107_v22 = vpop.f32.mrb[28].mxu1 }
 0x60a   :  { %v13050_v28 = vpop.f32.mrb[29].mxu1  ;;  %2310 = vrot.lane.b32.xlu0 %v2107_v22, %s14189_s10 }
 0x60b   :  { %v2110_v12 = vpop.f32.mrb[30].mxu1 }
 0x60c   :  { %v13051_v34 = vpop.f32.mrb[31].mxu1 }
 0x611   :  { %v2154_v23 = vpop.f32.mrb[32].mxu0 }
 0x612   :  { %2322 = vrot.lane.b32.xlu1 %v2154_v23, %s14186_s20  ;;  %v13056_v43 = vpop.f32.mrb[33].mxu0 }
 0x613   :  { %v2157_v63 = vpop.f32.mrb[34].mxu0 }
 0x614   :  { %v13057_v47 = vpop.f32.mrb[35].mxu0 }
 0x616   :  { %2324 = vrot.lane.b32.xlu1 %v2157_v63, %s14186_s20 }
 0x619   :  { %v2201_v29 = vpop.f32.mrb[32].mxu1 }
 0x61a   :  { %v13062_v53 = vpop.f32.mrb[33].mxu1  ;;  %2326 = vrot.lane.b32.xlu0 %v2201_v29, %s14186_s20 }
 0x61b   :  { %v2204_v15 = vpop.f32.mrb[34].mxu1 }
 0x61c   :  { %v13063_v33 = vpop.f32.mrb[35].mxu1 }
 0x622   :  { %v2248_v19 = vpop.f32.mrb[36].mxu0 }
 0x623   :  { %2338 = vrot.lane.b32.xlu1 %v2248_v19, %s14199_s2  ;;  %v13068_v59 = vpop.f32.mrb[37].mxu0 }
 0x624   :  { %v2251_v42 = vpop.f32.mrb[38].mxu0 }
 0x625   :  { %v13069_v55 = vpop.f32.mrb[39].mxu0 }
 0x627   :  { %2312 = vrot.lane.b32.xlu1 %v2110_v12, %s14189_s10 }
 0x64e   :  { %v2295_v56 = vpop.f32.mrb[36].mxu1 }
 0x64f   :  { %v13074_v46 = vpop.f32.mrb[37].mxu1  ;;  %2342 = vrot.lane.b32.xlu0 %v2295_v56, %s14199_s2 }
 0x650   :  { %v2298_v51 = vpop.f32.mrb[38].mxu1  ;;  %v12299_v46 = vld [vmem:[#allocation4 + $0x3] ss:$0 sm:$0xff] }
 0x651   :  { %v13075_v57 = vpop.f32.mrb[39].mxu1  ;;  %2344 = vrot.lane.b32.xlu1 %v2298_v51, %s14199_s2 }
 0x653   :  { %2340 = vrot.lane.b32.xlu0 %v2251_v42, %s14199_s2 }
 0x657   :  { %2328 = vrot.lane.b32.xlu0 %v2204_v15, %s14186_s20 }
 0x674   :  { %v2307_v13 = vpop.permute.xlu0 %2306 }
 0x675   :  { %v2350_v11 = vsel %vm1081_vm8, %v14970_v16, %v2307_v13 }
 0x676   :  { %v2309_v4 = vpop.permute.xlu1 %2308 }
 0x677   :  { %v2351_v36 = vsel %vm1081_vm8, %v14972_v1, %v2309_v4 }
 0x67c   :  { %v2311_v25 = vpop.permute.xlu0 %2310 }
 0x67d   :  { %v2352_v17 = vsel %vm1081_vm8, %v14974_v30, %v2311_v25 }
 0x684   :  { %v2323_v26 = vpop.permute.xlu1 %2322 }
 0x685   :  { %v2355_v60 = vsel %vm2354_vm12, %v2350_v11, %v2323_v26 }
 0x688   :  { %v2325_v9 = vpop.permute.xlu1 %2324 }
 0x689   :  { %v2356_v20 = vsel %vm2354_vm12, %v2351_v36, %v2325_v9 }
 0x68c   :  { %v2327_v10 = vpop.permute.xlu0 %2326 }
 0x68d   :  { %v2357_v31 = vsel %vm2354_vm12, %v2352_v17, %v2327_v10 }
 0x695   :  { %v2339_v52 = vpop.permute.xlu1 %2338 }
 0x696   :  { %v2360_v7 = vsel %vm2359_vm13, %v2355_v60, %v2339_v52 }
 0x697   :  { %v2368_v3 = vcombine.high %v2360_v7, %v2360_v7  ;;  %v2375_v48 = vrot.slane %v2360_v7, %v14334_v39 }
 0x699   :  { %v2382_v2 = vrot.slane %v2368_v3, %v14334_v39  ;;  %v2383_v16 = vcombine.high %v2375_v48, %v2375_v48  ;;  %v2313_v37 = vpop.permute.xlu1 %2312 }
 0x69a   :  { %v2353_v43 = vsel %vm1081_vm8, %v14976_v5, %v2313_v37 }
 0x69b   :  { %v2384_v8 = vcombine.high %v2382_v2, %v2382_v2  ;;  %v2416_v28 = vcombine.low %v2375_v48, %v2383_v16 }
 0x69d   :  { %v2417_v54 = vcombine.low %v2382_v2, %v2384_v8  ;;  %v2424_v53 = vrot.slane %v2416_v28, %v14334_v39 }
 0x69f   :  { %v2431_v23 = vrot.slane %v2417_v54, %v14334_v39 }
 0x6a1   :  { %v2432_v55 = vcombine.low %v2424_v53, %v2431_v23 }
 0x6c1   :  { %v2343_v62 = vpop.permute.xlu0 %2342 }
 0x6c2   :  { %v2362_v49 = vsel %vm2359_vm13, %v2357_v31, %v2343_v62 }
 0x6c3   :  { %v2392_v21 = vcombine.high %v2362_v49, %v2362_v49  ;;  %v2399_v24 = vrot.slane %v2362_v49, %v14334_v39  ;;  %v2345_v47 = vpop.permute.xlu1 %2344 }
 0x6c5   :  { %v2406_v32 = vrot.slane %v2392_v21, %v14334_v39  ;;  %v2407_v45 = vcombine.high %v2399_v24, %v2399_v24  ;;  %v2341_v30 = vpop.permute.xlu0 %2340 }
 0x6c6   :  { %v2361_v22 = vsel %vm2359_vm13, %v2356_v20, %v2341_v30 }
 0x6c7   :  { %v2434_v12 = vcombine.low %v2407_v45, %v2406_v32  ;;  %v2391_v34 = vrot.slane %v2361_v22, %v14334_v39  ;;  %v2408_v59 = vcombine.high %v2406_v32, %v2406_v32 }
 0x6c9   :  { %v2433_v1 = vcombine.low %v2391_v34, %v2399_v24  ;;  %v2329_v63 = vpop.permute.xlu0 %2328  ;;  %v2448_v15 = vrot.slane %v2434_v12, %v14334_v39 }
 0x6ca   :  { %v2358_v29 = vsel %vm2354_vm12, %v2353_v43, %v2329_v63 }
 0x6cb   :  { %v2441_v33 = vrot.slane %v2433_v1, %v14334_v39  ;;  %v2363_v19 = vsel %vm2359_vm13, %v2358_v29, %v2345_v47 }
 0x6cc   :  { %v2415_v42 = vrot.slane %v2363_v19, %v14334_v39 }
 0x6cd   :  { %v2449_v58 = vcombine.low %v2441_v33, %v2448_v15 }
 0x6ce   :  { %v2450_v61 = vcombine.low %v2408_v59, %v2415_v42 }
 0x6cf   :  { %v2461_v5 = vpack.c.bf16 %v2449_v58, %v2432_v55 }
 0x6d0   :  { %v2457_v41 = vrot.slane %v2450_v61, %v14334_v39 }
 0x6d1   :  { %13080 = vmatprep.mubr.msk.bf16.mxu0 %vm434_vm7, %v2461_v5 }
 0x6d2   :  { %v2462_v56 = vpack.c.bf16 %v2457_v41, %v2457_v41 }
 0x6d4   :  { %13081 = vmatmul.mubr.msk.bf16.vlgmr.msra.gmra.mrb[40].mxu0 %vm434_vm7, %v2462_v56 }
 0x7a7   :  { %v13082_v51 = vpop.f32.mrb[40].mxu0 }
 0x7a8   :  { %v2509_v14 = vpop.f32.mrb[41].mxu0  ;;  %v2518_v13 = vadd.f32 %v13082_v51, %v12299_v46  ;;  %v2697_v51 = vld [vmem:[%s18429_s6 + $0x70] sm:$0xff] }
 0x7a9   :  { %v2510_v38 = vadd.f32 %v12299_v46, %v2509_v14  ;;  %v13083_v57 = vpop.f32.mrb[42].mxu0  ;;  %v2698_v14 = vld [vmem:[%s18429_s6 + $0x78] sm:$0xff] }
 0x7aa   :  { %v2512_v6 = vpop.f32.mrb[43].mxu0  ;;  %v2566_v48 = vrot.slane %v2518_v13, %v14334_v39  ;;  %v2699_v57 = vld [vmem:[%s18429_s6 + $0x80] sm:$0xff] }
 0x7ab   :  { %v2526_v4 = vcombine.high %v2510_v38, %v2510_v38  ;;  %v2533_v26 = vrot.slane %v2510_v38, %v14334_v39  ;;  %v2513_v9 = vadd.f32 %v12299_v46, %v2512_v6  ;;  %v2696_v46 = vld [vmem:[%s18429_s6 + $0x68] sm:$0xff]  ;;  %v2801_v6 = vpack.c.bf16 %v2699_v57, %v2698_v14 }
 0x7ac   :  { %v2567_v21 = vcombine.high %v2566_v48, %v2566_v48  ;;  %v2800_v38 = vpack.c.bf16 %v2697_v51, %v2696_v46  ;;  %v2925_v14 = vld [vmem:[%s18429_s6 + $0x88] sm:$0xff] }
 0x7ad   :  { %v2540_v52 = vrot.slane %v2526_v4, %v14334_v39  ;;  %v2541_v11 = vcombine.high %v2533_v26, %v2533_v26  ;;  %v2543_v60 = vcombine.high %v2513_v9, %v2513_v9  ;;  %v2550_v7 = vrot.slane %v2513_v9, %v14334_v39 }
 0x7ae   :  { %v2615_v28 = vrot.slane %v2567_v21, %v14334_v39  ;;  %13084 = vmatprep.subr.bf16.mxu1 %v2800_v38 }
 0x7af   :  { %v2542_v25 = vcombine.high %v2540_v52, %v2540_v52  ;;  %v2568_v3 = vcombine.low %v2533_v26, %v2541_v11  ;;  %v2557_v10 = vrot.slane %v2543_v60, %v14334_v39  ;;  %v2558_v2 = vcombine.high %v2550_v7, %v2550_v7  ;;  %13085 = vmatpush3.bf16.msra.mxu1 %v2800_v38  ;;  %v2926_v38 = vld [vmem:[%s18429_s6 + $0x90] sm:$0xff] }
 0x7b0   :  { %v2591_v24 = vrot.slane %v2550_v7, %v14334_v39  ;;  %v2623_v23 = vadd.f32 %v2615_v28, %v14336_v40  ;;  %13086 = vmatprep.subr.bf16.mxu1 %v2801_v6  ;;  %v2991_v57 = vpack.c.bf16 %v2926_v38, %v2925_v14 }
 0x7b1   :  { %v2569_v17 = vcombine.low %v2540_v52, %v2542_v25  ;;  %v2559_v31 = vcombine.high %v2557_v10, %v2557_v10  ;;  %v2592_v8 = vcombine.low %v2558_v2, %v2557_v10  ;;  %v2576_v62 = vrot.slane %v2568_v3, %v14334_v39 }
 0x7b2   :  { %v2621_v22 = vadd.f32 %v2591_v24, %v14327_v35  ;;  %13092 = vmatprep.subr.bf16.mxu0 %v2991_v57 }
 0x7b3   :  { %v2593_v49 = vcombine.low %v2559_v31, %v2566_v48  ;;  %v2583_v16 = vrot.slane %v2569_v17, %v14334_v39  ;;  %v2600_v20 = vrot.slane %v2592_v8, %v14334_v39  ;;  %13087 = vmatpush3.bf16.msra.mxu1 %v2801_v6  ;;  %v12302_v17 = vld [vmem:[#allocation4 + $0x4] ss:$0 sm:$0xff]  ;;  %13093 = vmatpush3.bf16.msra.mxu0 %v2991_v57  ;;  %v2927_v6 = vld [vmem:[%s18429_s6 + $0x98] sm:$0xff] }
 0x7b4   :  { %v2630_v34 = vsel %vm2629_vm14, %v2621_v22, 0.0  ;;  %13104 = vmatprep.subr.bf16.mxu1 %v18433_v0 }
 0x7b5   :  { %v2584_v36 = vcombine.low %v2576_v62, %v2583_v16  ;;  %v2607_v54 = vrot.slane %v2593_v49, %v14334_v39  ;;  %v12303_v62 = vld [vmem:[#allocation4 + $0x5] ss:$0 sm:$0xff] }
 0x7b7   :  { %v2620_v32 = vadd.f32 %v2584_v36, %v14345_v44  ;;  %v2608_v45 = vcombine.low %v2600_v20, %v2607_v54  ;;  %v2636_v44 = vsel %vm2629_vm14, %v2623_v23, 0.0 }
 0x7b9   :  { %v2626_v30 = vsel %vm434_vm7, %v2620_v32, 0.0  ;;  %v2622_v37 = vadd.f32 %v2608_v45, %v14356_v50 }
 0x7ba   :  { %2627 = vadd.xlane.f32.xlu0 %v2626_v30 }
 0x7bb   :  { %v2633_v12 = vsel %vm434_vm7, %v2622_v37, 0.0 }
 0x7bc   :  { %2634 = vadd.xlane.f32.xlu1 %v2633_v12 }
 0x7be   :  { %2631 = vadd.xlane.f32.xlu0 %v2630_v34 }
 0x7c2   :  { %2637 = vadd.xlane.f32.xlu0 %v2636_v44 }
 0x847   :  { %v2628_v43 = vpop.xlane.xlu0 %2627 }
 0x848   :  { %v2640_v1 = vmul.f32 0.03125, %v2628_v43 }
 0x849   :  { %v2635_v50 = vpop.xlane.xlu1 %2634 }
 0x84a   :  { %v2644_v63 = vsub.f32 %v2620_v32, %v2640_v1  ;;  %v2642_v35 = vmul.f32 0.03125, %v2635_v50 }
 0x84b   :  { %v2632_v47 = vpop.xlane.xlu0 %2631 }
 0x84c   :  { %v2646_v29 = vsub.f32 %v2622_v37, %v2642_v35  ;;  %v2641_v53 = vmul.f32 0.03125, %v2632_v47  ;;  %v2648_v15 = vmul.f32 %v2644_v63, %v2644_v63 }
 0x84e   :  { %v2645_v33 = vsub.f32 %v2621_v22, %v2641_v53  ;;  %v2652_v19 = vsel %vm434_vm7, %v2648_v15, 0.0  ;;  %v2650_v59 = vmul.f32 %v2646_v29, %v2646_v29 }
 0x84f   :  { %2653 = vadd.xlane.f32.xlu1 %v2652_v19  ;;  %v2638_v42 = vpop.xlane.xlu0 %2637 }
 0x850   :  { %v2643_v40 = vmul.f32 0.03125, %v2638_v42  ;;  %v2658_v55 = vsel %vm434_vm7, %v2650_v59, 0.0  ;;  %v2649_v58 = vmul.f32 %v2645_v33, %v2645_v33 }
 0x851   :  { %2659 = vadd.xlane.f32.xlu0 %v2658_v55 }
 0x852   :  { %v2647_v61 = vsub.f32 %v2623_v23, %v2643_v40  ;;  %v2655_v5 = vsel %vm2629_vm14, %v2649_v58, 0.0 }
 0x853   :  { %2656 = vadd.xlane.f32.xlu1 %v2655_v5 }
 0x854   :  { %v2651_v41 = vmul.f32 %v2647_v61, %v2647_v61 }
 0x856   :  { %v2661_v56 = vsel %vm2629_vm14, %v2651_v41, 0.0 }
 0x857   :  { %2662 = vadd.xlane.f32.xlu0 %v2661_v56 }
 0x8dc   :  { %v2654_v4 = vpop.xlane.xlu1 %2653 }
 0x8dd   :  { %v2664_v26 = vmul.f32 0.03125, %v2654_v4  ;;  %v2928_v4 = vld [vmem:[%s18429_s6 + $0xa0] sm:$0xff] }
 0x8de   :  { %v2660_v9 = vpop.xlane.xlu0 %2659 }
 0x8df   :  { %v2668_v13 = vadd.f32 1e-05, %v2664_v26  ;;  %v2666_v52 = vmul.f32 0.03125, %v2660_v9  ;;  %v2992_v26 = vpack.c.bf16 %v2928_v4, %v2927_v6  ;;  %v2929_v9 = vld [vmem:[%s18429_s6 + $0xa8] sm:$0xff] }
 0x8e0   :  { %v2657_v11 = vpop.xlane.xlu1 %2656 }
 0x8e1   :  { %13952 = vrsqrt.f32 %v2668_v13  ;;  %v2670_v60 = vadd.f32 1e-05, %v2666_v52  ;;  %v2665_v7 = vmul.f32 0.03125, %v2657_v11  ;;  %13094 = vmatprep.subr.bf16.mxu0 %v2992_v26  ;;  %v2930_v13 = vld [vmem:[%s18429_s6 + $0xb0] sm:$0xff]  ;;  %v2931_v11 = vld [vmem:[%s18429_s6 + $0xb8] sm:$0xff] }
 0x8e2   :  { %13095 = vmatpush3.bf16.msra.mxu0 %v2992_v26  ;;  %v2993_v52 = vpack.c.bf16 %v2930_v13, %v2929_v9 }
 0x8e3   :  { %13954 = vrsqrt.f32 %v2670_v60  ;;  %v2669_v25 = vadd.f32 1e-05, %v2665_v7  ;;  %v2932_v60 = vld [vmem:[%s18429_s6 + $0xc0] sm:$0xff] }
 0x8e4   :  { %v2663_v3 = vpop.xlane.xlu0 %2662  ;;  %v2994_v7 = vpack.c.bf16 %v2932_v60, %v2931_v11  ;;  %13096 = vmatprep.subr.bf16.mxu0 %v2993_v52 }
 0x8e5   :  { %13956 = vrsqrt.f32 %v2669_v25  ;;  %v2667_v10 = vmul.f32 0.03125, %v2663_v3  ;;  %v12304_v25 = vld [vmem:[#allocation4 + $0x6] ss:$0 sm:$0xff] }
 0x8e6   :  { %13097 = vmatpush3.bf16.msra.mxu0 %v2993_v52 }
 0x8e7   :  { %v2671_v2 = vadd.f32 1e-05, %v2667_v10  ;;  %13098 = vmatprep.subr.bf16.mxu0 %v2994_v7 }
 0x8e9   :  { %13958 = vrsqrt.f32 %v2671_v2 }
 0x8ea   :  { %13099 = vmatpush3.bf16.msra.mxu0 %v2994_v7 }
 0x8eb   :  { %v13953_v48 = vpop.eup %13952 }
 0x8ec   :  { %v2676_v31 = vmul.f32 %v13953_v48, %v2644_v63 }
 0x8ed   :  { %v13955_v8 = vpop.eup %13954 }
 0x8ee   :  { %v2684_v49 = vmul.f32 %v12302_v17, %v2676_v31  ;;  %v2678_v16 = vmul.f32 %v13955_v8, %v2646_v29 }
 0x8ef   :  { %v13957_v21 = vpop.eup %13956 }
 0x8f0   :  { %v15067_v24 = vadd.f32 %v12303_v62, %v2684_v49  ;;  %v2686_v36 = vmul.f32 %v12302_v17, %v2678_v16  ;;  %v2677_v20 = vmul.f32 %v13957_v21, %v2645_v33 }
 0x8f2   :  { %v15069_v54 = vadd.f32 %v12303_v62, %v2686_v36  ;;  %v2685_v32 = vmul.f32 %v12302_v17, %v2677_v20  ;;  %v2705_v45 = vcombine.high %v15067_v24, %v15067_v24  ;;  %v2712_v30 = vrot.slane %v15067_v24, %v14334_v39 }
 0x8f3   :  { %v13959_v37 = vpop.eup %13958 }
 0x8f4   :  { %v2679_v22 = vmul.f32 %v13959_v37, %v2647_v61  ;;  %v2693_v28 = vadd.f32 %v12303_v62, %v2685_v32  ;;  %v2719_v12 = vrot.slane %v2705_v45, %v14334_v39  ;;  %v2720_v34 = vcombine.high %v2712_v30, %v2712_v30 }
 0x8f5   :  { %v2729_v23 = vcombine.high %v15069_v54, %v15069_v54  ;;  %v2736_v44 = vrot.slane %v15069_v54, %v14334_v39 }
 0x8f6   :  { %v2687_v43 = vmul.f32 %v12302_v17, %v2679_v22  ;;  %v2721_v1 = vcombine.high %v2719_v12, %v2719_v12  ;;  %v2728_v50 = vrot.slane %v2693_v28, %v14334_v39  ;;  %v2753_v63 = vcombine.low %v2712_v30, %v2720_v34 }
 0x8f7   :  { %v2743_v35 = vrot.slane %v2729_v23, %v14334_v39  ;;  %v2744_v47 = vcombine.high %v2736_v44, %v2736_v44 }
 0x8f8   :  { %v2695_v29 = vadd.f32 %v12303_v62, %v2687_v43  ;;  %v2754_v53 = vcombine.low %v2719_v12, %v2721_v1  ;;  %v2770_v15 = vcombine.low %v2728_v50, %v2736_v44  ;;  %v2761_v33 = vrot.slane %v2753_v63, %v14334_v39 }
 0x8f9   :  { %v2771_v19 = vcombine.low %v2744_v47, %v2743_v35  ;;  %v2745_v40 = vcombine.high %v2743_v35, %v2743_v35 }
 0x8fa   :  { %v2768_v59 = vrot.slane %v2754_v53, %v14334_v39  ;;  %v2778_v42 = vrot.slane %v2770_v15, %v14334_v39  ;;  %v2752_v55 = vrot.slane %v2695_v29, %v14334_v39 }
 0x8fb   :  { %v2785_v58 = vrot.slane %v2771_v19, %v14334_v39 }
 0x8fc   :  { %v2769_v61 = vcombine.low %v2761_v33, %v2768_v59  ;;  %v2787_v5 = vcombine.low %v2745_v40, %v2752_v55 }
 0x8fd   :  { %v2786_v41 = vcombine.low %v2778_v42, %v2785_v58 }
 0x8fe   :  { %v2794_v56 = vrot.slane %v2787_v5, %v14334_v39 }
 0x8ff   :  { %v2798_v46 = vpack.c.bf16 %v2786_v41, %v2769_v61 }
 0x900   :  { %v2799_v51 = vpack.c.bf16 %v2794_v56, %v2794_v56 }
 0x901   :  { %13088 = vmatprep.mubr.msk.bf16.mxu1 %vm434_vm7, %v2798_v46  ;;  %v12307_v46 = vld [vmem:[#allocation4 + $0x7] ss:$0 sm:$0xff] }
 0x902   :  { %13089 = vmatmul.mubr.msk.bf16.vlgmr.msra.gmra.mrb[40].mxu1 %vm434_vm7, %v2799_v51 }
 0x903   :  { %13108 = vmatprep.mubr.msk.bf16.mxu1 %vm14191_vm0, %v18433_v0 }
 0x9d5   :  { %v13090_v3 = vpop.f32.mrb[40].mxu1 }
 0x9d6   :  { %v2855_v10 = vadd.f32 %v13090_v3, %v12304_v25  ;;  %v2846_v2 = vpop.f32.mrb[41].mxu1 }
 0x9d7   :  { %v2847_v48 = vadd.f32 %v12304_v25, %v2846_v2  ;;  %v13091_v17 = vpop.f32.mrb[42].mxu1 }
 0x9d8   :  { %v2903_v31 = vrot.slane %v2855_v10, %v14334_v39  ;;  %v2849_v8 = vpop.f32.mrb[43].mxu1 }
 0x9d9   :  { %v2863_v62 = vcombine.high %v2847_v48, %v2847_v48  ;;  %v2870_v49 = vrot.slane %v2847_v48, %v14334_v39  ;;  %v2850_v16 = vadd.f32 %v12304_v25, %v2849_v8 }
 0x9da   :  { %v2904_v21 = vcombine.high %v2903_v31, %v2903_v31  ;;  %v2923_v1 = vmax.f32 %v2903_v31, 0.0 }
 0x9db   :  { %v2877_v36 = vrot.slane %v2863_v62, %v14334_v39  ;;  %v2878_v20 = vcombine.high %v2870_v49, %v2870_v49  ;;  %v2880_v32 = vcombine.high %v2850_v16, %v2850_v16  ;;  %v2887_v45 = vrot.slane %v2850_v16, %v14334_v39 }
 0x9dc   :  { %v2924_v28 = vmax.f32 %v2904_v21, 0.0  ;;  %v2915_v34 = vmax.f32 %v2870_v49, 0.0 }
 0x9dd   :  { %v2879_v30 = vcombine.high %v2877_v36, %v2877_v36  ;;  %v2916_v37 = vmax.f32 %v2878_v20, 0.0  ;;  %v2894_v22 = vrot.slane %v2880_v32, %v14334_v39  ;;  %v2895_v12 = vcombine.high %v2887_v45, %v2887_v45 }
 0x9de   :  { %v2917_v23 = vmax.f32 %v2877_v36, 0.0  ;;  %v2919_v50 = vmax.f32 %v2887_v45, 0.0  ;;  %v2978_v15 = vcombine.low %v2923_v1, %v2924_v28 }
 0x9df   :  { %v2918_v44 = vmax.f32 %v2879_v30, 0.0  ;;  %v2896_v43 = vcombine.high %v2894_v22, %v2894_v22  ;;  %v2920_v63 = vmax.f32 %v2895_v12, 0.0  ;;  %v2944_v35 = vcombine.low %v2915_v34, %v2916_v37 }
 0x9e0   :  { %v2921_v29 = vmax.f32 %v2894_v22, 0.0  ;;  %v2985_v58 = vrot.slane %v2978_v15, %v14334_v39 }
 0x9e1   :  { %v2945_v47 = vcombine.low %v2917_v23, %v2918_v44  ;;  %v2922_v53 = vmax.f32 %v2896_v43, 0.0  ;;  %v2961_v33 = vcombine.low %v2919_v50, %v2920_v63  ;;  %v2952_v42 = vrot.slane %v2944_v35, %v14334_v39  ;;  %v3176_v63 = vld [vmem:[%s18429_s6 + $0xc8] sm:$0xff]  ;;  %v3177_v35 = vld [vmem:[%s18429_s6 + $0xd0] sm:$0xff] }
 0x9e2   :  { %v2990_v56 = vpack.c.bf16 %v2985_v58, %v2985_v58  ;;  %v3315_v58 = vld [vmem:[%s18427_s4 + $0x20] sm:$0xff] }
 0x9e3   :  { %v2959_v19 = vrot.slane %v2945_v47, %v14334_v39  ;;  %v2962_v59 = vcombine.low %v2921_v29, %v2922_v53  ;;  %v2969_v40 = vrot.slane %v2961_v33, %v14334_v39  ;;  %v3178_v47 = vld [vmem:[%s18429_s6 + $0xd8] sm:$0xff]  ;;  %v3182_v29 = vpack.c.bf16 %v3177_v35, %v3176_v63  ;;  %v3179_v53 = vld [vmem:[%s18429_s6 + $0xe0] sm:$0xff] }
 0x9e4   :  { %v3183_v15 = vpack.c.bf16 %v3179_v53, %v3178_v47  ;;  %v3243_v33 = vld [vmem:[%s18426_s3] sm:$0x3] }
 0x9e5   :  { %v2976_v55 = vrot.slane %v2962_v59, %v14334_v39  ;;  %v2960_v61 = vcombine.low %v2952_v42, %v2959_v19  ;;  %13105 = vmatpush3.bf16.msra.mxu1 %v3182_v29  ;;  %v15171_v19 = vld [vmem:[%s18429_s6 + $0x108] sm:$0x7]  ;;  %v3311_v59 = vld [vmem:[%s18427_s4] sm:$0xff] }
 0x9e6   :  { %13106 = vmatprep.subr.bf16.mxu1 %v18433_v0  ;;  %13120 = vmatprep.subr.msk.mxu0 %vm3574_vm2, %v15171_v19  ;;  %v3312_v42 = vld [vmem:[%s18427_s4 + $0x8] sm:$0xff] }
 0x9e7   :  { %v2977_v5 = vcombine.low %v2969_v40, %v2976_v55  ;;  %v3313_v40 = vld [vmem:[%s18427_s4 + $0x10] sm:$0xff]  ;;  %v3314_v55 = vld [vmem:[%s18427_s4 + $0x18] sm:$0xff] }
 0x9e9   :  { %v2989_v41 = vpack.c.bf16 %v2977_v5, %v2960_v61  ;;  %13107 = vmatpush3.bf16.msra.mxu1 %v3183_v15  ;;  %v3316_v61 = vld [vmem:[%s18427_s4 + $0x28] sm:$0xff]  ;;  %v3317_v5 = vld [vmem:[%s18427_s4 + $0x30] sm:$0xff] }
 0x9ea   :  { %13112 = vmatprep.subr.bf16.mxu1 %v18433_v0 }
 0x9eb   :  { %13100 = vmatprep.mubr.msk.bf16.mxu0 %vm2999_vm15, %v2989_v41  ;;  %v3318_v41 = vld [vmem:[%s18427_s4 + $0x38] sm:$0xff] }
 0x9ec   :  { %13101 = vmatmul.mubr.msk.bf16.vlgmr.msra.gmra.mrb[44].mxu0 %vm2999_vm15, %v2990_v56  ;;  %v3319_v56 = vld [vmem:[%s18427_s4 + $0x40] sm:$0xff] }
 0x9ed   :  { %13121 = vmatpush3.msk.msra.mxu0 %vm3574_vm2, %v15171_v19  ;;  %13122 = vmatprep.mubr.msk.f32.mxu0 %vm3381_vm4, %v3311_v59  ;;  %v3347_v59 = vld [vmem:[%s18427_s4 + $0x120] sm:$0xff] }
 0x9f4   :  { %13123 = vmatmul.mubr.msk.f32.vlgmr.msra.gmra.mrb[2].mxu0 %vm3381_vm4, %v3312_v42  ;;  %v3348_v42 = vld [vmem:[%s18427_s4 + $0x128] sm:$0xff] }
 0x9f5   :  { %13125 = vmatprep.mubr.msk.f32.mxu0 %vm3381_vm4, %v3313_v40  ;;  %v3349_v40 = vld [vmem:[%s18427_s4 + $0x130] sm:$0xff] }
 0x9f8   :  { %13126 = vmatmul.mubr.msk.f32.gmra.mrb[48].mxu0 %vm3381_vm4, %v3314_v55  ;;  %v3350_v55 = vld [vmem:[%s18427_s4 + $0x138] sm:$0xff] }
 0x9f9   :  { %13128 = vmatprep.mubr.msk.f32.mxu0 %vm3381_vm4, %v3315_v58  ;;  %v3351_v58 = vld [vmem:[%s18427_s4 + $0x140] sm:$0xff] }
 0x9fc   :  { %13129 = vmatmul.mubr.msk.f32.gmra.mrb[50].mxu0 %vm3381_vm4, %v3316_v61  ;;  %v3352_v61 = vld [vmem:[%s18427_s4 + $0x148] sm:$0xff] }
 0x9fd   :  { %13131 = vmatprep.mubr.msk.f32.mxu0 %vm3381_vm4, %v3317_v5  ;;  %v3353_v5 = vld [vmem:[%s18427_s4 + $0x150] sm:$0xff] }
 0xa00   :  { %13132 = vmatmul.mubr.msk.f32.gmra.mrb[52].mxu0 %vm3381_vm4, %v3318_v41  ;;  %v3354_v41 = vld [vmem:[%s18427_s4 + $0x158] sm:$0xff] }
 0xa01   :  { %13134 = vmatprep.mubr.msk.f32.mxu0 %vm3381_vm4, %v3319_v56  ;;  %v3355_v56 = vld [vmem:[%s18427_s4 + $0x160] sm:$0xff] }
 0xabf   :  { %v13102_v51 = vpop.f32.mrb[44].mxu0 }
 0xac0   :  { %v3040_v14 = vpop.f32.mrb[45].mxu0  ;;  %v3049_v13 = vadd.f32 %v13102_v51, %v12307_v46  ;;  %v3321_v51 = vld [vmem:[%s18427_s4 + $0x50] sm:$0xff] }
 0xac1   :  { %v3041_v38 = vadd.f32 %v12307_v46, %v3040_v14  ;;  %v13103_v57 = vpop.f32.mrb[46].mxu0  ;;  %v3322_v14 = vld [vmem:[%s18427_s4 + $0x58] sm:$0xff] }
 0xac2   :  { %v3043_v6 = vpop.f32.mrb[47].mxu0  ;;  %v3097_v48 = vrot.slane %v3049_v13, %v14334_v39  ;;  %v3324_v57 = vld [vmem:[%s18427_s4 + $0x68] sm:$0xff]  ;;  %v3329_v13 = vld [vmem:[%s18427_s4 + $0x90] sm:$0xff] }
 0xac3   :  { %v3057_v4 = vcombine.high %v3041_v38, %v3041_v38  ;;  %v3064_v26 = vrot.slane %v3041_v38, %v14334_v39  ;;  %v3044_v9 = vadd.f32 %v12307_v46, %v3043_v6  ;;  %v3320_v46 = vld [vmem:[%s18427_s4 + $0x48] sm:$0xff]  ;;  %v3323_v38 = vld [vmem:[%s18427_s4 + $0x60] sm:$0xff]  ;;  %v3325_v6 = vld [vmem:[%s18427_s4 + $0x70] sm:$0xff] }
 0xac4   :  { %13135 = vmatmul.mubr.msk.f32.gmra.mrb[54].mxu0 %vm3381_vm4, %v3320_v46  ;;  %v3254_v46 = vld [vmem:[%s18429_s6 + $0xe8] sm:$0xff] }
 0xac5   :  { %v3071_v52 = vrot.slane %v3057_v4, %v14334_v39  ;;  %v3072_v11 = vcombine.high %v3064_v26, %v3064_v26  ;;  %v3074_v60 = vcombine.high %v3044_v9, %v3044_v9  ;;  %v3081_v7 = vrot.slane %v3044_v9, %v14334_v39  ;;  %13137 = vmatprep.mubr.msk.f32.mxu0 %vm3381_vm4, %v3321_v51  ;;  %v3326_v4 = vld [vmem:[%s18427_s4 + $0x78] sm:$0xff]  ;;  %v3328_v9 = vld [vmem:[%s18427_s4 + $0x88] sm:$0xff] }
 0xac6   :  { %v3356_v51 = vld [vmem:[%s18427_s4 + $0x168] sm:$0xff] }
 0xac7   :  { %v3073_v25 = vcombine.high %v3071_v52, %v3071_v52  ;;  %v3098_v3 = vcombine.low %v3064_v26, %v3072_v11  ;;  %v3088_v10 = vrot.slane %v3074_v60, %v14334_v39  ;;  %v3089_v2 = vcombine.high %v3081_v7, %v3081_v7  ;;  %v3327_v26 = vld [vmem:[%s18427_s4 + $0x80] sm:$0xff]  ;;  %v3332_v60 = vld [vmem:[%s18427_s4 + $0xa8] sm:$0xff]  ;;  %v3333_v7 = vld [vmem:[%s18427_s4 + $0xb0] sm:$0xff] }
 0xac8   :  { %13138 = vmatmul.mubr.msk.f32.gmra.mrb[56].mxu0 %vm3381_vm4, %v3322_v14  ;;  %v3331_v11 = vld [vmem:[%s18427_s4 + $0xa0] sm:$0xff]  ;;  %v3255_v14 = vld [vmem:[%s18429_s6 + $0xf0] sm:$0xff] }
 0xac9   :  { %v3099_v17 = vcombine.low %v3071_v52, %v3073_v25  ;;  %v3090_v31 = vcombine.high %v3088_v10, %v3088_v10  ;;  %v3115_v8 = vcombine.low %v3089_v2, %v3088_v10  ;;  %v3106_v62 = vrot.slane %v3098_v3, %v14334_v39  ;;  %13140 = vmatprep.mubr.msk.f32.mxu0 %vm3381_vm4, %v3323_v38  ;;  %v3330_v52 = vld [vmem:[%s18427_s4 + $0x98] sm:$0xff]  ;;  %v3335_v3 = vld [vmem:[%s18427_s4 + $0xc0] sm:$0xff]  ;;  %v3336_v10 = vld [vmem:[%s18427_s4 + $0xc8] sm:$0xff] }
 0xaca   :  { %v3334_v25 = vld [vmem:[%s18427_s4 + $0xb8] sm:$0xff]  ;;  %v3337_v2 = vld [vmem:[%s18427_s4 + $0xd0] sm:$0xff] }
 0xacb   :  { %v3116_v49 = vcombine.low %v3090_v31, %v3097_v48  ;;  %v3113_v16 = vrot.slane %v3099_v17, %v14334_v39  ;;  %v3123_v21 = vrot.slane %v3115_v8, %v14334_v39  ;;  %v3338_v48 = vld [vmem:[%s18427_s4 + $0xd8] sm:$0xff]  ;;  %v3339_v17 = vld [vmem:[%s18427_s4 + $0xe0] sm:$0xff]  ;;  %v3340_v31 = vld [vmem:[%s18427_s4 + $0xe8] sm:$0xff] }
 0xacc   :  { %13141 = vmatmul.mubr.msk.f32.gmra.mrb[58].mxu0 %vm3381_vm4, %v3324_v57  ;;  %v3341_v8 = vld [vmem:[%s18427_s4 + $0xf0] sm:$0xff]  ;;  %v3259_v57 = vpack.c.bf16 %v3255_v14, %v3254_v46 }
 0xacd   :  { %v3114_v36 = vcombine.low %v3106_v62, %v3113_v16  ;;  %v3130_v20 = vrot.slane %v3116_v49, %v14334_v39  ;;  %13143 = vmatprep.mubr.msk.f32.mxu0 %vm3381_vm4, %v3325_v6  ;;  %v3342_v62 = vld [vmem:[%s18427_s4 + $0xf8] sm:$0xff]  ;;  %v3343_v49 = vld [vmem:[%s18427_s4 + $0x100] sm:$0xff]  ;;  %v3344_v16 = vld [vmem:[%s18427_s4 + $0x108] sm:$0xff] }
 0xace   :  { %v3357_v38 = vld [vmem:[%s18427_s4 + $0x170] sm:$0xff]  ;;  %v3358_v6 = vld [vmem:[%s18427_s4 + $0x178] sm:$0xff]  ;;  %v15569_v39 = vld [vmem:[#allocation4 + $0xc] ss:$0 sm:$0xff] }
 0xacf   :  { %v3134_v32 = vadd.f32 %v3114_v36, %v15067_v24  ;;  %v3131_v45 = vcombine.low %v3123_v21, %v3130_v20 }
 0xad0   :  { %13144 = vmatmul.mubr.msk.f32.gmra.mrb[60].mxu0 %vm3381_vm4, %v3326_v4  ;;  %v3359_v4 = vld [vmem:[%s18427_s4 + $0x180] sm:$0xff] }
 0xad1   :  { %v3138_v30 = vsel %vm434_vm7, %v3134_v32, 0.0  ;;  %v3135_v37 = vadd.f32 %v3131_v45, %v15069_v54  ;;  %13146 = vmatprep.mubr.msk.f32.mxu0 %vm3381_vm4, %v3327_v26  ;;  %v3360_v26 = vld [vmem:[%s18427_s4 + $0x188] sm:$0xff] }
 0xad2   :  { %3139 = vadd.xlane.f32.xlu0 %v3138_v30 }
 0xad3   :  { %v3141_v22 = vsel %vm434_vm7, %v3135_v37, 0.0 }
 0xad4   :  { %3142 = vadd.xlane.f32.xlu1 %v3141_v22  ;;  %13147 = vmatmul.mubr.msk.f32.gmra.mrb[62].mxu0 %vm3381_vm4, %v3328_v9  ;;  %v12310_v22 = vld [vmem:[#allocation4 + $0x8] ss:$0 sm:$0xff]  ;;  %v3361_v9 = vld [vmem:[%s18427_s4 + $0x190] sm:$0xff] }
 0xad5   :  { %13149 = vmatprep.mubr.msk.f32.mxu0 %vm3381_vm4, %v3329_v13  ;;  %v3362_v13 = vld [vmem:[%s18427_s4 + $0x198] sm:$0xff] }
 0xad8   :  { %13150 = vmatmul.mubr.msk.f32.gmra.mrb[64].mxu0 %vm3381_vm4, %v3330_v52  ;;  %v3363_v52 = vld [vmem:[%s18427_s4 + $0x1a0] sm:$0xff] }
 0xad9   :  { %13152 = vmatprep.mubr.msk.f32.mxu0 %vm3381_vm4, %v3331_v11  ;;  %v3364_v11 = vld [vmem:[%s18427_s4 + $0x1a8] sm:$0xff] }
 0xadc   :  { %13153 = vmatmul.mubr.msk.f32.gmra.mrb[66].mxu0 %vm3381_vm4, %v3332_v60  ;;  %v3365_v60 = vld [vmem:[%s18427_s4 + $0x1b0] sm:$0xff] }
 0xadd   :  { %13155 = vmatprep.mubr.msk.f32.mxu0 %vm3381_vm4, %v3333_v7  ;;  %v3366_v7 = vld [vmem:[%s18427_s4 + $0x1b8] sm:$0xff] }
 0xae0   :  { %13156 = vmatmul.mubr.msk.f32.gmra.mrb[68].mxu0 %vm3381_vm4, %v3334_v25  ;;  %v3367_v25 = vld [vmem:[%s18427_s4 + $0x1c0] sm:$0xff] }
 0xae1   :  { %13158 = vmatprep.mubr.msk.f32.mxu0 %vm3381_vm4, %v3335_v3  ;;  %v3368_v3 = vld [vmem:[%s18427_s4 + $0x1c8] sm:$0xff] }
 0xae4   :  { %13159 = vmatmul.mubr.msk.f32.gmra.mrb[70].mxu0 %vm3381_vm4, %v3336_v10  ;;  %v3369_v10 = vld [vmem:[%s18427_s4 + $0x1d0] sm:$0xff] }
 0xae5   :  { %13161 = vmatprep.mubr.msk.f32.mxu0 %vm3381_vm4, %v3337_v2  ;;  %v3370_v2 = vld [vmem:[%s18427_s4 + $0x1d8] sm:$0xff] }
 0xae8   :  { %13162 = vmatmul.mubr.msk.f32.gmra.mrb[72].mxu0 %vm3381_vm4, %v3338_v48  ;;  %v3371_v48 = vld [vmem:[%s18427_s4 + $0x1e0] sm:$0xff] }
 0xae9   :  { %13164 = vmatprep.mubr.msk.f32.mxu0 %vm3381_vm4, %v3339_v17  ;;  %v3372_v17 = vld [vmem:[%s18427_s4 + $0x1e8] sm:$0xff] }
 0xaec   :  { %13165 = vmatmul.mubr.msk.f32.gmra.mrb[74].mxu0 %vm3381_vm4, %v3340_v31  ;;  %v12312_v31 = vld [vmem:[#allocation4 + $0xa] ss:$0 sm:$0xff] }
 0xaed   :  { %13167 = vmatprep.mubr.msk.f32.mxu0 %vm3381_vm4, %v3341_v8 }
 0xaf0   :  { %13168 = vmatmul.mubr.msk.f32.gmra.mrb[76].mxu0 %vm3381_vm4, %v3342_v62 }
 0xaf1   :  { %13170 = vmatprep.mubr.msk.f32.mxu0 %vm3381_vm4, %v3343_v49 }
 0xaf4   :  { %13171 = vmatmul.mubr.msk.f32.gmra.mrb[78].mxu0 %vm3381_vm4, %v3344_v16 }
 0xb5f   :  { %v3140_v28 = vpop.xlane.xlu0 %3139 }
 0xb60   :  { %v3144_v12 = vmul.f32 0.03125, %v3140_v28 }
 0xb61   :  { %v3143_v34 = vpop.xlane.xlu1 %3142 }
 0xb62   :  { %v15141_v23 = vsub.f32 %v3134_v32, %v3144_v12  ;;  %v3145_v44 = vmul.f32 0.03125, %v3143_v34  ;;  %v12311_v34 = vld [vmem:[#allocation4 + $0x9] ss:$0 sm:$0xff] }
 0xb64   :  { %v15143_v43 = vsub.f32 %v3135_v37, %v3145_v44  ;;  %v3148_v24 = vmul.f32 %v15141_v23, %v15141_v23 }
 0xb66   :  { %v3150_v1 = vsel %vm434_vm7, %v3148_v24, 0.0  ;;  %v3149_v54 = vmul.f32 %v15143_v43, %v15143_v43 }
 0xb67   :  { %3151 = vadd.xlane.f32.xlu0 %v3150_v1 }
 0xb68   :  { %v3153_v50 = vsel %vm434_vm7, %v3149_v54, 0.0 }
 0xb69   :  { %3154 = vadd.xlane.f32.xlu1 %v3153_v50 }
 0xb7a   :  { %3245 = vrot.lane.b32.xlu1 %v3243_v33, %s14200_s5 }
 0xbf4   :  { %v3152_v21 = vpop.xlane.xlu0 %3151 }
 0xbf5   :  { %v3156_v36 = vmul.f32 0.03125, %v3152_v21 }
 0xbf6   :  { %v3155_v20 = vpop.xlane.xlu1 %3154 }
 0xbf7   :  { %v3158_v32 = vadd.f32 1e-05, %v3156_v36  ;;  %v3157_v45 = vmul.f32 0.03125, %v3155_v20 }
 0xbf9   :  { %13960 = vrsqrt.f32 %v3158_v32  ;;  %v3159_v30 = vadd.f32 1e-05, %v3157_v45  ;;  %v3256_v45 = vld [vmem:[%s18429_s6 + $0xf8] sm:$0xff] }
 0xbfb   :  { %13962 = vrsqrt.f32 %v3159_v30  ;;  %v3257_v30 = vld [vmem:[%s18429_s6 + $0x100] sm:$0xff] }
 0xc03   :  { %v13961_v37 = vpop.eup %13960 }
 0xc04   :  { %v3162_v28 = vmul.f32 %v13961_v37, %v15141_v23  ;;  %v3345_v23 = vld [vmem:[%s18427_s4 + $0x110] sm:$0xff]  ;;  %v3260_v37 = vpack.c.bf16 %v3257_v30, %v3256_v45 }
 0xc05   :  { %v13963_v12 = vpop.eup %13962  ;;  %13173 = vmatprep.mubr.msk.f32.mxu0 %vm3381_vm4, %v3345_v23 }
 0xc06   :  { %v3168_v44 = vmul.f32 %v12310_v22, %v3162_v28  ;;  %v3163_v24 = vmul.f32 %v13963_v12, %v15143_v43  ;;  %v3346_v43 = vld [vmem:[%s18427_s4 + $0x118] sm:$0xff]  ;;  %v3246_v12 = vpop.permute.xlu1 %3245 }
 0xc07   :  { %13174 = vmatmul.mubr.msk.f32.gmra.mrb[80].mxu0 %vm3381_vm4, %v3346_v43 }
 0xc08   :  { %v3169_v1 = vmul.f32 %v12310_v22, %v3163_v24  ;;  %v3174_v54 = vadd.f32 %v12311_v34, %v3168_v44  ;;  %13176 = vmatprep.mubr.msk.f32.mxu0 %vm3381_vm4, %v3347_v59  ;;  %v15451_v22 = vpop.f32.mrb[2].mxu0 }
 0xc09   :  { %v15455_v28 = vpop.f32.mrb[3].mxu0 }
 0xc0a   :  { %v3175_v50 = vadd.f32 %v12311_v34, %v3169_v1  ;;  %v3180_v63 = vpack.c.bf16 %v3174_v54, %v3174_v54  ;;  %v15457_v24 = vpop.f32.mrb[48].mxu0 }
 0xc0b   :  { %13177 = vmatmul.mubr.msk.f32.gmra.mrb[82].mxu0 %vm3381_vm4, %v3348_v42  ;;  %v15460_v1 = vpop.f32.mrb[49].mxu0 }
 0xc0c   :  { %v3181_v35 = vpack.c.bf16 %v3175_v50, %v3175_v50  ;;  %v3191_v29 = vunpack.c.l.b16 %v3180_v63  ;;  %13179 = vmatprep.mubr.msk.f32.mxu0 %vm3381_vm4, %v3349_v40  ;;  %v15462_v54 = vpop.f32.mrb[50].mxu0 }
 0xc0d   :  { %v15464_v50 = vpop.f32.mrb[51].mxu0 }
 0xc0e   :  { %v3192_v47 = vunpack.c.l.b16 %v3181_v35  ;;  %v15466_v63 = vpop.f32.mrb[52].mxu0 }
 0xc0f   :  { %13180 = vmatmul.mubr.msk.f32.gmra.mrb[84].mxu0 %vm3381_vm4, %v3350_v55  ;;  %v15468_v35 = vpop.f32.mrb[53].mxu0 }
 0xc10   :  { %v3193_v53 = vrot.slane %v3192_v47, 7  ;;  %13182 = vmatprep.mubr.msk.f32.mxu0 %vm3381_vm4, %v3351_v58  ;;  %v15470_v47 = vpop.f32.mrb[54].mxu0 }
 0xc12   :  { %v3195_v15 = vsel %vm3194_vm9, %v3193_v53, %v3191_v29  ;;  %v15472_v29 = vpop.f32.mrb[55].mxu0 }
 0xc13   :  { %v3196_v33 = vpack.c.b16 %v3195_v15, %v3195_v15  ;;  %13183 = vmatmul.mubr.msk.f32.gmra.mrb[86].mxu0 %vm3381_vm4, %v3352_v61  ;;  %v15474_v53 = vpop.f32.mrb[56].mxu0 }
 0xc14   :  { %13185 = vmatprep.mubr.msk.f32.mxu0 %vm3381_vm4, %v3353_v5  ;;  %v15476_v15 = vpop.f32.mrb[57].mxu0 }
 0xc15   :  { %13109 = vmatmul.mubr.msk.bf16.vlgmr.msra.gmra.mrb[44].mxu1 %vm434_vm7, %v3196_v33  ;;  %v15478_v33 = vpop.f32.mrb[58].mxu0 }
 0xc16   :  { %13116 = vmatprep.mubr.msk.bf16.mxu1 %vm14191_vm0, %v18433_v0  ;;  %13113 = vmatpush3.bf16.msra.mxu1 %v3259_v57  ;;  %v15480_v23 = vpop.f32.mrb[59].mxu0 }
 0xc17   :  { %13186 = vmatmul.mubr.msk.f32.gmra.mrb[88].mxu0 %vm3381_vm4, %v3354_v41  ;;  %13114 = vmatprep.subr.bf16.mxu1 %v18433_v0  ;;  %v15482_v43 = vpop.f32.mrb[60].mxu0 }
 0xc18   :  { %13188 = vmatprep.mubr.msk.f32.mxu0 %vm3381_vm4, %v3355_v56  ;;  %v15484_v59 = vpop.f32.mrb[61].mxu0 }
 0xc19   :  { %v15486_v42 = vpop.f32.mrb[62].mxu0 }
 0xc1a   :  { %13115 = vmatpush3.bf16.msra.mxu1 %v3260_v37  ;;  %v15488_v40 = vpop.f32.mrb[63].mxu0 }
 0xc1b   :  { %13189 = vmatmul.mubr.msk.f32.gmra.mrb[90].mxu0 %vm3381_vm4, %v3356_v51  ;;  %13745 = vmatprep.subr.msk.mxu1 %vm3574_vm2, %v15171_v19  ;;  %v15490_v55 = vpop.f32.mrb[64].mxu0 }
 0xc1c   :  { %13191 = vmatprep.mubr.msk.f32.mxu0 %vm3381_vm4, %v3357_v38  ;;  %v15492_v58 = vpop.f32.mrb[65].mxu0 }
 0xc1d   :  { %v15494_v61 = vpop.f32.mrb[66].mxu0 }
 0xc1e   :  { %v15496_v5 = vpop.f32.mrb[67].mxu0 }
 0xc1f   :  { %13192 = vmatmul.mubr.msk.f32.gmra.mrb[92].mxu0 %vm3381_vm4, %v3358_v6  ;;  %v15498_v41 = vpop.f32.mrb[68].mxu0 }
 0xc20   :  { %13194 = vmatprep.mubr.msk.f32.mxu0 %vm3381_vm4, %v3359_v4  ;;  %v15500_v56 = vpop.f32.mrb[69].mxu0 }
 0xc21   :  { %v15502_v46 = vpop.f32.mrb[70].mxu0 }
 0xc22   :  { %v15504_v51 = vpop.f32.mrb[71].mxu0 }
 0xc23   :  { %13195 = vmatmul.mubr.msk.f32.gmra.mrb[94].mxu0 %vm3381_vm4, %v3360_v26  ;;  %v15506_v14 = vpop.f32.mrb[72].mxu0 }
 0xc24   :  { %13197 = vmatprep.mubr.msk.f32.mxu0 %vm3381_vm4, %v3361_v9  ;;  %v15508_v38 = vpop.f32.mrb[73].mxu0 }
 0xc25   :  { %v15510_v57 = vpop.f32.mrb[74].mxu0 }
 0xc26   :  { %v15512_v6 = vpop.f32.mrb[75].mxu0 }
 0xc27   :  { %13198 = vmatmul.mubr.msk.f32.gmra.mrb[96].mxu0 %vm3381_vm4, %v3362_v13  ;;  %v15514_v4 = vpop.f32.mrb[76].mxu0 }
 0xc28   :  { %13200 = vmatprep.mubr.msk.f32.mxu0 %vm3381_vm4, %v3363_v52  ;;  %v15516_v26 = vpop.f32.mrb[77].mxu0 }
 0xc29   :  { %v15518_v9 = vpop.f32.mrb[78].mxu0 }
 0xc2a   :  { %v15520_v13 = vpop.f32.mrb[79].mxu0 }
 0xc2b   :  { %13201 = vmatmul.mubr.msk.f32.gmra.mrb[98].mxu0 %vm3381_vm4, %v3364_v11 }
 0xc2c   :  { %13203 = vmatprep.mubr.msk.f32.mxu0 %vm3381_vm4, %v3365_v60 }
 0xc2f   :  { %13204 = vmatmul.mubr.msk.f32.gmra.mrb[100].mxu0 %vm3381_vm4, %v3366_v7 }
 0xc30   :  { %13206 = vmatprep.mubr.msk.f32.mxu0 %vm3381_vm4, %v3367_v25 }
 0xc33   :  { %13207 = vmatmul.mubr.msk.f32.gmra.mrb[102].mxu0 %vm3381_vm4, %v3368_v3 }
 0xc34   :  { %13209 = vmatprep.mubr.msk.f32.mxu0 %vm3381_vm4, %v3369_v10 }
 0xc37   :  { %13210 = vmatmul.mubr.msk.f32.gmra.mrb[104].mxu0 %vm3381_vm4, %v3370_v2 }
 0xc38   :  { %13212 = vmatprep.mubr.msk.f32.mxu0 %vm3381_vm4, %v3371_v48 }
 0xc3b   :  { %13213 = vmatmul.mubr.msk.f32.gmra.mrb[106].mxu0 %vm3381_vm4, %v3372_v17 }
 0xcda   :  { %v15522_v52 = vpop.f32.mrb[80].mxu0 }
 0xcdb   :  { %v15524_v11 = vpop.f32.mrb[81].mxu0 }
 0xcde   :  { %v15526_v60 = vpop.f32.mrb[82].mxu0 }
 0xcdf   :  { %v15528_v7 = vpop.f32.mrb[83].mxu0 }
 0xce2   :  { %v15530_v25 = vpop.f32.mrb[84].mxu0 }
 0xce3   :  { %v15532_v3 = vpop.f32.mrb[85].mxu0 }
 0xce6   :  { %v15534_v10 = vpop.f32.mrb[86].mxu0 }
 0xce7   :  { %v15536_v2 = vpop.f32.mrb[87].mxu0 }
 0xce8   :  { %v3234_v8 = vpop.f32.mrb[44].mxu1 }
 0xce9   :  { %v15437_v62 = vadd.f32 %v12312_v31, %v3234_v8  ;;  %v13110_v49 = vpop.f32.mrb[45].mxu1 }
 0xcea   :  { %v3237_v16 = vpop.f32.mrb[46].mxu1  ;;  %v15538_v48 = vpop.f32.mrb[88].mxu0 }
 0xceb   :  { %v3240_v21 = vmul.f32 0.5, %v15437_v62  ;;  %v3309_v36 = vsel %vm2999_vm15, %v15437_v62, 0.0  ;;  %v13111_v20 = vpop.f32.mrb[47].mxu1  ;;  %v15540_v17 = vpop.f32.mrb[89].mxu0 }
 0xcec   :  { %3310 = vst [vmem:[%s18431_s8] sm:$0x3] %v3309_v36 }
 0xced   :  { %v3241_v32 = vmul.f32 1.442695, %v3240_v21 }
 0xcee   :  { %v15542_v31 = vpop.f32.mrb[90].mxu0 }
 0xcef   :  { %13964 = vpow2.f32 %v3241_v32  ;;  %v15544_v8 = vpop.f32.mrb[91].mxu0 }
 0xcf2   :  { %v15546_v49 = vpop.f32.mrb[92].mxu0 }
 0xcf3   :  { %v15548_v16 = vpop.f32.mrb[93].mxu0 }
 0xcf6   :  { %v15550_v21 = vpop.f32.mrb[94].mxu0 }
 0xcf7   :  { %v15552_v36 = vpop.f32.mrb[95].mxu0 }
 0xcf9   :  { %v13965_v34 = vpop.eup %13964 }
 0xcfa   :  { %v3248_v44 = vmul.f32 %v13965_v34, %v3246_v12  ;;  %v15554_v20 = vpop.f32.mrb[96].mxu0 }
 0xcfb   :  { %18455 = vst [vmem:[#allocation11_spill] sm:$0xff] %v15554_v20  ;;  %v15556_v32 = vpop.f32.mrb[97].mxu0 }
 0xcfc   :  { %3250 = vrot.lane.b32.xlu0 %v3248_v44, %s14198_s21 }
 0xcfe   :  { %v15558_v45 = vpop.f32.mrb[98].mxu0 }
 0xcff   :  { %v15560_v30 = vpop.f32.mrb[99].mxu0 }
 0xd02   :  { %v15562_v37 = vpop.f32.mrb[100].mxu0 }
 0xd03   :  { %18456 = vst [vmem:[#allocation12_spill] sm:$0xff] %v15562_v37  ;;  %v15564_v12 = vpop.f32.mrb[101].mxu0  ;;  %v4027_v37 = vld [vmem:[%s18429_s6 + $0x110] sm:$0xff] }
 0xd04   :  { %18457 = vst [vmem:[#allocation13_spill] sm:$0xff] %v15564_v12 }
 0xd06   :  { %v15567_v0 = vpop.f32.mrb[102].mxu0 }
 0xd07   :  { %18458 = vst [vmem:[#allocation14_spill] sm:$0xff] %v15567_v0  ;;  %v15574_v20 = vpop.f32.mrb[103].mxu0  ;;  %v3650_v0 = vadd.f32 %v15451_v22, %v15569_v39  ;;  %v3665_v22 = vadd.f32 %v15569_v39, %v15464_v50  ;;  %v3685_v50 = vadd.f32 %v15569_v39, %v15472_v29  ;;  %v3705_v29 = vadd.f32 %v15569_v39, %v15480_v23 }
 0xd08   :  { %18459 = vst [vmem:[#allocation15_spill] sm:$0xff] %v15574_v20  ;;  %v3725_v23 = vadd.f32 %v15569_v39, %v15488_v40  ;;  %v3745_v40 = vadd.f32 %v15569_v39, %v15496_v5  ;;  %v3765_v5 = vadd.f32 %v15569_v39, %v15504_v51  ;;  %v3785_v51 = vadd.f32 %v15569_v39, %v15512_v6 }
 0xd09   :  { %v3805_v6 = vadd.f32 %v15569_v39, %v15520_v13  ;;  %v3825_v13 = vadd.f32 %v15569_v39, %v15528_v7  ;;  %v3845_v7 = vadd.f32 %v15569_v39, %v15536_v2  ;;  %v3865_v2 = vadd.f32 %v15569_v39, %v15544_v8 }
 0xd0a   :  { %v3885_v8 = vadd.f32 %v15569_v39, %v15552_v36  ;;  %v3905_v36 = vadd.f32 %v15569_v39, %v15560_v30 }
 0xd0f   :  { %v18466_v30 = vld [vmem:[#allocation15_spill] sm:$0xff] }
 0xd6e   :  { %v3251_v34 = vpop.permute.xlu0 %3250 }
 0xd6f   :  { %v3253_v44 = vadd.f32 %v3251_v34, %v15437_v62  ;;  %v3645_v62 = vadd.f32 %v15569_v39, %v15455_v28  ;;  %v15585_v34 = vpop.f32.mrb[104].mxu0  ;;  %v3655_v28 = vadd.f32 %v15569_v39, %v15460_v1  ;;  %v3670_v1 = vadd.f32 %v15462_v54, %v15569_v39 }
 0xd70   :  { %18460 = vst [vmem:[#allocation16_spill] sm:$0xff] %v15585_v34  ;;  %v3660_v34 = vadd.f32 %v15457_v24, %v15569_v39  ;;  %v3690_v54 = vadd.f32 %v15470_v47, %v15569_v39  ;;  %v3710_v47 = vadd.f32 %v15478_v33, %v15569_v39  ;;  %v3730_v33 = vadd.f32 %v15486_v42, %v15569_v39 }
 0xd71   :  { %v3258_v27 = vpack.c.bf16 %v3253_v44, %v3253_v44  ;;  %v15587_v44 = vpop.f32.mrb[105].mxu0  ;;  %v3963_v20 = vmax.f32 %v3645_v62, 0.0  ;;  %v3968_v24 = vmax.f32 %v3670_v1, 0.0  ;;  %v3750_v42 = vadd.f32 %v15494_v61, %v15569_v39 }
 0xd72   :  { %18461 = vst [vmem:[#allocation17_spill] sm:$0xff] %v15587_v44  ;;  %v15596_v12 = vpop.f32.mrb[106].mxu0  ;;  %v3965_v44 = vmax.f32 %v3655_v28, 0.0  ;;  %v3966_v62 = vmax.f32 %v3660_v34, 0.0  ;;  %v3770_v61 = vadd.f32 %v15502_v46, %v15569_v39  ;;  %v3790_v46 = vadd.f32 %v15510_v57, %v15569_v39 }
 0xd73   :  { %13117 = vmatmul.mubr.msk.bf16.vlgmr.msra.gmra.mrb[48].mxu1 %vm434_vm7, %v3258_v27  ;;  %v3374_v27 = vld [vmem:[%s18427_s4 + $0x1f8] sm:$0xff]  ;;  %18462 = vst [vmem:[#allocation18_spill] sm:$0xff] %v15596_v12  ;;  %v3967_v12 = vmax.f32 %v3665_v22, 0.0  ;;  %v3976_v22 = vmax.f32 %v3710_v47, 0.0  ;;  %v3810_v57 = vadd.f32 %v15518_v9, %v15569_v39  ;;  %v3830_v9 = vadd.f32 %v15526_v60, %v15569_v39 }
 0xd74   :  { %13746 = vmatpush3.msk.msra.mxu1 %vm3574_vm2, %v15171_v19  ;;  %13215 = vmatprep.mubr.msk.f32.mxu1 %vm3381_vm4, %v3373_v18  ;;  %v15598_v19 = vpop.f32.mrb[107].mxu0  ;;  %v3964_v18 = vmax.f32 %v3650_v0, 0.0  ;;  %v3675_v0 = vadd.f32 %v15569_v39, %v15468_v35  ;;  %v3695_v35 = vadd.f32 %v15569_v39, %v15476_v15  ;;  %v3715_v15 = vadd.f32 %v15569_v39, %v15484_v59 }
 0xd75   :  { %13218 = vmatprep.subr.mxu1 %v4027_v37  ;;  %v3735_v59 = vadd.f32 %v15569_v39, %v15492_v58  ;;  %v3755_v58 = vadd.f32 %v15569_v39, %v15500_v56  ;;  %v3775_v56 = vadd.f32 %v15569_v39, %v15508_v38  ;;  %v3795_v38 = vadd.f32 %v15569_v39, %v15516_v26 }
 0xd76   :  { %v3815_v26 = vadd.f32 %v15569_v39, %v15524_v11  ;;  %v3835_v11 = vadd.f32 %v15569_v39, %v15532_v3  ;;  %v3850_v60 = vadd.f32 %v15534_v10, %v15569_v39  ;;  %v3855_v3 = vadd.f32 %v15569_v39, %v15540_v17 }
 0xd77   :  { %v3993_v47 = vmax.f32 %v3795_v38, 0.0  ;;  %v3870_v10 = vadd.f32 %v15542_v31, %v15569_v39  ;;  %v3875_v17 = vadd.f32 %v15569_v39, %v15548_v16  ;;  %v3890_v31 = vadd.f32 %v15550_v21, %v15569_v39 }
 0xd78   :  { %v3895_v16 = vadd.f32 %v15569_v39, %v15556_v32  ;;  %v3910_v21 = vadd.f32 %v15558_v45, %v15569_v39  ;;  %v18464_v32 = vld [vmem:[#allocation13_spill] sm:$0xff]  ;;  %v18467_v45 = vld [vmem:[#allocation14_spill] sm:$0xff] }
 0xd7b   :  { %13216 = vmatmul.mubr.msk.f32.vlgmr.msra.gmra.mrb[2].mxu1 %vm3381_vm4, %v3374_v27  ;;  %v3972_v27 = vmax.f32 %v3690_v54, 0.0  ;;  %v3985_v54 = vmax.f32 %v3755_v58, 0.0  ;;  %v4011_v58 = vmax.f32 %v3885_v8, 0.0 }
 0xd7c   :  { %13219 = vmatpush3.msra.mxu1 %v4027_v37  ;;  %13220 = vmatprep.mubr.msk.f32.mxu1 %vm1081_vm8, %v3963_v20  ;;  %v3680_v20 = vadd.f32 %v15466_v63, %v15569_v39  ;;  %v3969_v37 = vmax.f32 %v3675_v0, 0.0  ;;  %v3700_v63 = vadd.f32 %v15474_v53, %v15569_v39  ;;  %v3720_v53 = vadd.f32 %v15482_v43, %v15569_v39 }
 0xd7d   :  { %v3979_v0 = vmax.f32 %v3725_v23, 0.0  ;;  %v3740_v43 = vadd.f32 %v15490_v55, %v15569_v39  ;;  %v3760_v55 = vadd.f32 %v15498_v41, %v15569_v39  ;;  %v3780_v41 = vadd.f32 %v15506_v14, %v15569_v39 }
 0xd7e   :  { %v3970_v34 = vmax.f32 %v3680_v20, 0.0  ;;  %v3974_v28 = vmax.f32 %v3700_v63, 0.0  ;;  %v3978_v1 = vmax.f32 %v3720_v53, 0.0  ;;  %v3981_v20 = vmax.f32 %v3735_v59, 0.0 }
 0xd7f   :  { %13221 = vmatmul.mubr.msk.f32.vlgmr.msra.gmra.mrb[52].mxu1 %vm1081_vm8, %v3964_v18  ;;  %v3975_v18 = vmax.f32 %v3705_v29, 0.0  ;;  %v3989_v63 = vmax.f32 %v3775_v56, 0.0  ;;  %v3991_v29 = vmax.f32 %v3785_v51, 0.0  ;;  %v3800_v14 = vadd.f32 %v15514_v4, %v15569_v39  ;;  %v18465_v56 = vld [vmem:[#allocation12_spill] sm:$0xff] }
 0xd80   :  { %13223 = vmatprep.mubr.msk.f32.mxu1 %vm1081_vm8, %v3965_v44  ;;  %v3971_v44 = vmax.f32 %v3685_v50, 0.0  ;;  %v3983_v50 = vmax.f32 %v3745_v40, 0.0  ;;  %v3820_v4 = vadd.f32 %v15522_v52, %v15569_v39  ;;  %v3997_v53 = vmax.f32 %v3815_v26, 0.0 }
 0xd81   :  { %v3999_v23 = vmax.f32 %v3825_v13, 0.0  ;;  %v3840_v52 = vadd.f32 %v15530_v25, %v15569_v39  ;;  %v4003_v59 = vmax.f32 %v3845_v7, 0.0  ;;  %v3860_v25 = vadd.f32 %v15538_v48, %v15569_v39  ;;  %v4613_v13 = vld [vmem:[#allocation2 + $0x18] sm:$0xff] }
 0xd82   :  { %v4007_v40 = vmax.f32 %v3865_v2, 0.0  ;;  %v3880_v48 = vadd.f32 %v15546_v49, %v15569_v39  ;;  %v18463_v49 = vld [vmem:[#allocation11_spill] sm:$0xff] }
 0xd83   :  { %13224 = vmatmul.mubr.msk.f32.gmra.mrb[54].mxu1 %vm1081_vm8, %v3966_v62  ;;  %v3977_v62 = vmax.f32 %v3715_v15, 0.0  ;;  %v3995_v15 = vmax.f32 %v3805_v6, 0.0 }
 0xd84   :  { %13226 = vmatprep.mubr.msk.f32.mxu1 %vm1081_vm8, %v3967_v12  ;;  %v3973_v12 = vmax.f32 %v3695_v35, 0.0  ;;  %v3987_v35 = vmax.f32 %v3765_v5, 0.0 }
 0xd87   :  { %13227 = vmatmul.mubr.msk.f32.gmra.mrb[56].mxu1 %vm1081_vm8, %v3968_v24  ;;  %v3980_v24 = vmax.f32 %v3730_v33, 0.0  ;;  %v4001_v33 = vmax.f32 %v3835_v11, 0.0 }
 0xd88   :  { %13229 = vmatprep.mubr.msk.f32.mxu1 %vm1081_vm8, %v3969_v37  ;;  %v3982_v37 = vmax.f32 %v3740_v43, 0.0  ;;  %v4005_v43 = vmax.f32 %v3855_v3, 0.0 }
 0xd8b   :  { %13230 = vmatmul.mubr.msk.f32.gmra.mrb[58].mxu1 %vm1081_vm8, %v3970_v34  ;;  %v3984_v34 = vmax.f32 %v3750_v42, 0.0  ;;  %v4009_v42 = vmax.f32 %v3875_v17, 0.0 }
 0xd8c   :  { %13232 = vmatprep.mubr.msk.f32.mxu1 %vm1081_vm8, %v3971_v44  ;;  %v3986_v44 = vmax.f32 %v3760_v55, 0.0  ;;  %v3900_v55 = vadd.f32 %v18463_v49, %v15569_v39 }
 0xd8e   :  { %v4014_v5 = vmax.f32 %v3900_v55, 0.0 }
 0xd8f   :  { %13233 = vmatmul.mubr.msk.f32.gmra.mrb[60].mxu1 %vm1081_vm8, %v3972_v27  ;;  %v3988_v27 = vmax.f32 %v3770_v61, 0.0  ;;  %v3915_v61 = vadd.f32 %v15569_v39, %v18464_v32 }
 0xd90   :  { %13235 = vmatprep.mubr.msk.f32.mxu1 %vm1081_vm8, %v3973_v12  ;;  %v3990_v12 = vmax.f32 %v3780_v41, 0.0 }
 0xd91   :  { %v4017_v41 = vmax.f32 %v3915_v61, 0.0 }
 0xd93   :  { %13236 = vmatmul.mubr.msk.f32.gmra.mrb[62].mxu1 %vm1081_vm8, %v3974_v28  ;;  %v3992_v28 = vmax.f32 %v3790_v46, 0.0 }
 0xd94   :  { %13238 = vmatprep.mubr.msk.f32.mxu1 %vm1081_vm8, %v3975_v18  ;;  %v3994_v18 = vmax.f32 %v3800_v14, 0.0  ;;  %v18469_v14 = vld [vmem:[#allocation16_spill] sm:$0xff] }
 0xd97   :  { %13239 = vmatmul.mubr.msk.f32.gmra.mrb[64].mxu1 %vm1081_vm8, %v3976_v22  ;;  %v3996_v22 = vmax.f32 %v3810_v57, 0.0 }
 0xd98   :  { %13241 = vmatprep.mubr.msk.f32.mxu1 %vm1081_vm8, %v3977_v62  ;;  %v3998_v62 = vmax.f32 %v3820_v4, 0.0 }
 0xd9b   :  { %13242 = vmatmul.mubr.msk.f32.gmra.mrb[66].mxu1 %vm1081_vm8, %v3978_v1  ;;  %v4000_v1 = vmax.f32 %v3830_v9, 0.0 }
 0xd9c   :  { %13244 = vmatprep.mubr.msk.f32.mxu1 %vm1081_vm8, %v3979_v0  ;;  %v4002_v0 = vmax.f32 %v3840_v52, 0.0 }
 0xd9f   :  { %13245 = vmatmul.mubr.msk.f32.gmra.mrb[68].mxu1 %vm1081_vm8, %v3980_v24  ;;  %v4004_v24 = vmax.f32 %v3850_v60, 0.0 }
 0xda0   :  { %13247 = vmatprep.mubr.msk.f32.mxu1 %vm1081_vm8, %v3981_v20  ;;  %v4006_v20 = vmax.f32 %v3860_v25, 0.0 }
 0xda3   :  { %13248 = vmatmul.mubr.msk.f32.gmra.mrb[70].mxu1 %vm1081_vm8, %v3982_v37  ;;  %v4008_v37 = vmax.f32 %v3870_v10, 0.0 }
 0xda4   :  { %13250 = vmatprep.mubr.msk.f32.mxu1 %vm1081_vm8, %v3983_v50  ;;  %v4010_v50 = vmax.f32 %v3880_v48, 0.0 }
 0xda7   :  { %13251 = vmatmul.mubr.msk.f32.gmra.mrb[72].mxu1 %vm1081_vm8, %v3984_v34  ;;  %v4012_v34 = vmax.f32 %v3890_v31, 0.0 }
 0xda8   :  { %13253 = vmatprep.mubr.msk.f32.mxu1 %vm1081_vm8, %v3985_v54  ;;  %v4013_v54 = vmax.f32 %v3895_v16, 0.0 }
 0xdab   :  { %13254 = vmatmul.mubr.msk.f32.gmra.mrb[74].mxu1 %vm1081_vm8, %v3986_v44  ;;  %v4015_v44 = vmax.f32 %v3905_v36, 0.0 }
 0xdac   :  { %13256 = vmatprep.mubr.msk.f32.mxu1 %vm1081_vm8, %v3987_v35  ;;  %v4016_v35 = vmax.f32 %v3910_v21, 0.0 }
 0xdaf   :  { %13257 = vmatmul.mubr.msk.f32.gmra.mrb[76].mxu1 %vm1081_vm8, %v3988_v27  ;;  %v3920_v27 = vadd.f32 %v18465_v56, %v15569_v39 }
 0xdb0   :  { %13259 = vmatprep.mubr.msk.f32.mxu1 %vm1081_vm8, %v3989_v63  ;;  %v3925_v63 = vadd.f32 %v15569_v39, %v18466_v30 }
 0xdb1   :  { %v4018_v51 = vmax.f32 %v3920_v27, 0.0 }
 0xdb2   :  { %v4019_v46 = vmax.f32 %v3925_v63, 0.0 }
 0xdb3   :  { %13260 = vmatmul.mubr.msk.f32.gmra.mrb[78].mxu1 %vm1081_vm8, %v3990_v12  ;;  %v3930_v12 = vadd.f32 %v18467_v45, %v15569_v39 }
 0xdb4   :  { %13262 = vmatprep.mubr.msk.f32.mxu1 %vm1081_vm8, %v3991_v29  ;;  %v18468_v29 = vld [vmem:[#allocation17_spill] sm:$0xff] }
 0xdb5   :  { %v3935_v38 = vadd.f32 %v15569_v39, %v18468_v29 }
 0xdb7   :  { %13263 = vmatmul.mubr.msk.f32.gmra.mrb[80].mxu1 %vm1081_vm8, %v3992_v28  ;;  %v4020_v28 = vmax.f32 %v3930_v12, 0.0  ;;  %v4021_v6 = vmax.f32 %v3935_v38, 0.0 }
 0xdb8   :  { %13265 = vmatprep.mubr.msk.f32.mxu1 %vm1081_vm8, %v3993_v47  ;;  %v3940_v47 = vadd.f32 %v18469_v14, %v15569_v39 }
 0xdba   :  { %v4022_v57 = vmax.f32 %v3940_v47, 0.0 }
 0xdbb   :  { %13266 = vmatmul.mubr.msk.f32.gmra.mrb[82].mxu1 %vm1081_vm8, %v3994_v18  ;;  %v3945_v18 = vadd.f32 %v15569_v39, %v15598_v19 }
 0xdbc   :  { %13268 = vmatprep.mubr.msk.f32.mxu1 %vm1081_vm8, %v3995_v15  ;;  %v18470_v15 = vld [vmem:[#allocation18_spill] sm:$0xff] }
 0xdbd   :  { %v3950_v26 = vadd.f32 %v18470_v15, %v15569_v39 }
 0xdbf   :  { %13269 = vmatmul.mubr.msk.f32.gmra.mrb[84].mxu1 %vm1081_vm8, %v3996_v22  ;;  %v4023_v22 = vmax.f32 %v3945_v18, 0.0  ;;  %v4024_v4 = vmax.f32 %v3950_v26, 0.0 }
 0xdc0   :  { %13271 = vmatprep.mubr.msk.f32.mxu1 %vm1081_vm8, %v3997_v53  ;;  %v4611_v53 = vld [vmem:[#allocation2 + $0x8] sm:$0xff] }
 0xdc3   :  { %13272 = vmatmul.mubr.msk.f32.gmra.mrb[86].mxu1 %vm1081_vm8, %v3998_v62  ;;  %v4615_v62 = vpack.c.bf16 %v4613_v13, %v4611_v53 }
 0xdc4   :  { %13274 = vmatprep.mubr.msk.f32.mxu1 %vm1081_vm8, %v3999_v23 }
 0xdc5   :  { %4664 = vmatprep.mubr.bf16.mxu0 %v4615_v62 }
 0xdc7   :  { %13275 = vmatmul.mubr.msk.f32.gmra.mrb[88].mxu1 %vm1081_vm8, %v4000_v1 }
 0xdc8   :  { %13277 = vmatprep.mubr.msk.f32.mxu1 %vm1081_vm8, %v4001_v33 }
 0xdcb   :  { %13278 = vmatmul.mubr.msk.f32.gmra.mrb[90].mxu1 %vm1081_vm8, %v4002_v0  ;;  %v15785_v0 = vld [vmem:[#allocation4 + $0xd] ss:$0 sm:$0xff] }
 0xdcc   :  { %13280 = vmatprep.mubr.msk.f32.mxu1 %vm1081_vm8, %v4003_v59 }
 0xdcf   :  { %13281 = vmatmul.mubr.msk.f32.gmra.mrb[92].mxu1 %vm1081_vm8, %v4004_v24 }
 0xdd0   :  { %13283 = vmatprep.mubr.msk.f32.mxu1 %vm1081_vm8, %v4005_v43 }
 0xdd3   :  { %13284 = vmatmul.mubr.msk.f32.gmra.mrb[94].mxu1 %vm1081_vm8, %v4006_v20 }
 0xdd4   :  { %13286 = vmatprep.mubr.msk.f32.mxu1 %vm1081_vm8, %v4007_v40 }
 0xdd7   :  { %13287 = vmatmul.mubr.msk.f32.gmra.mrb[96].mxu1 %vm1081_vm8, %v4008_v37 }
 0xdd8   :  { %13289 = vmatprep.mubr.msk.f32.mxu1 %vm1081_vm8, %v4009_v42 }
 0xddb   :  { %13290 = vmatmul.mubr.msk.f32.gmra.mrb[98].mxu1 %vm1081_vm8, %v4010_v50 }
 0xddc   :  { %13292 = vmatprep.mubr.msk.f32.mxu1 %vm1081_vm8, %v4011_v58 }
 0xddf   :  { %13293 = vmatmul.mubr.msk.f32.gmra.mrb[100].mxu1 %vm1081_vm8, %v4012_v34 }
 0xde0   :  { %13295 = vmatprep.mubr.msk.f32.mxu1 %vm1081_vm8, %v4013_v54 }
 0xde3   :  { %13296 = vmatmul.mubr.msk.f32.gmra.mrb[102].mxu1 %vm1081_vm8, %v4014_v5 }
 0xde4   :  { %13298 = vmatprep.mubr.msk.f32.mxu1 %vm1081_vm8, %v4015_v44 }
 0xde7   :  { %13299 = vmatmul.mubr.msk.f32.gmra.mrb[104].mxu1 %vm1081_vm8, %v4016_v35 }
 0xde8   :  { %13301 = vmatprep.mubr.msk.f32.mxu1 %vm1081_vm8, %v4017_v41 }
 0xdeb   :  { %13302 = vmatmul.mubr.msk.f32.gmra.mrb[106].mxu1 %vm1081_vm8, %v4018_v51 }
 0xdec   :  { %13304 = vmatprep.mubr.msk.f32.mxu1 %vm1081_vm8, %v4019_v46 }
 0xdef   :  { %13305 = vmatmul.mubr.msk.f32.gmra.mrb[108].mxu1 %vm1081_vm8, %v4020_v28 }
 0xdf0   :  { %13307 = vmatprep.mubr.msk.f32.mxu1 %vm1081_vm8, %v4021_v6 }
 0xdf3   :  { %13308 = vmatmul.mubr.msk.f32.gmra.mrb[110].mxu1 %vm1081_vm8, %v4022_v57 }
 0xdf4   :  { %13310 = vmatprep.mubr.msk.f32.mxu1 %vm1081_vm8, %v4023_v22 }
 0xdf7   :  { %13311 = vmatmul.mubr.msk.f32.gmra.mrb[112].mxu1 %vm1081_vm8, %v4024_v4 }
 0xe46   :  { %v15781_v19 = vpop.f32.mrb[48].mxu1 }
 0xe47   :  { %v13118_v9 = vpop.f32.mrb[49].mxu1 }
 0xe48   :  { %v3306_v23 = vpop.f32.mrb[50].mxu1 }
 0xe49   :  { %v13119_v11 = vpop.f32.mrb[51].mxu1 }
 0xe4e   :  { %v13217_v1 = vpop.f32.mrb[2].mxu1 }
 0xe4f   :  { %v3960_v52 = vadd.f32 %v13217_v1, %v15569_v39  ;;  %v3954_v33 = vpop.f32.mrb[3].mxu1 }
 0xe50   :  { %v3955_v7 = vadd.f32 %v15569_v39, %v3954_v33 }
 0xe51   :  { %v4026_v3 = vmax.f32 %v3960_v52, 0.0 }
 0xe52   :  { %v4025_v60 = vmax.f32 %v3955_v7, 0.0  ;;  %v13222_v59 = vpop.f32.mrb[52].mxu1 }
 0xe53   :  { %v4297_v24 = vadd.f32 %v13222_v59, %v15785_v0  ;;  %v4291_v25 = vpop.f32.mrb[53].mxu1 }
 0xe54   :  { %13313 = vmatprep.mubr.msk.f32.mxu1 %vm1081_vm8, %v4025_v60  ;;  %v4292_v43 = vadd.f32 %v15785_v0, %v4291_v25 }
 0xe55   :  { %13314 = vmatmul.mubr.msk.f32.gmra.mrb[114].mxu1 %vm1081_vm8, %v4026_v3 }
 0xe56   :  { %v4616_v2 = vpack.c.bf16 %v4297_v24, %v4292_v43  ;;  %v13225_v20 = vpop.f32.mrb[54].mxu1  ;;  %4721 = vmatprep.mubr.bf16.mxu1 %v4615_v62 }
 0xe57   :  { %v4307_v10 = vadd.f32 %v13225_v20, %v15785_v0  ;;  %v4301_v39 = vpop.f32.mrb[55].mxu1 }
 0xe58   :  { %v4302_v40 = vadd.f32 %v15785_v0, %v4301_v39 }
 0xe5a   :  { %v4617_v17 = vpack.c.bf16 %v4307_v10, %v4302_v40  ;;  %v13228_v37 = vpop.f32.mrb[56].mxu1 }
 0xe5b   :  { %v4317_v48 = vadd.f32 %v13228_v37, %v15785_v0  ;;  %v4311_v42 = vpop.f32.mrb[57].mxu1 }
 0xe5c   :  { %v4312_v8 = vadd.f32 %v15785_v0, %v4311_v42 }
 0xe5e   :  { %v4618_v50 = vpack.c.bf16 %v4317_v48, %v4312_v8  ;;  %v13231_v31 = vpop.f32.mrb[58].mxu1 }
 0xe5f   :  { %v4327_v58 = vadd.f32 %v13231_v31, %v15785_v0  ;;  %v4321_v16 = vpop.f32.mrb[59].mxu1 }
 0xe60   :  { %v4322_v34 = vadd.f32 %v15785_v0, %v4321_v16  ;;  %v4610_v16 = vld [vmem:[#allocation2] sm:$0xff] }
 0xe62   :  { %v4619_v49 = vpack.c.bf16 %v4327_v58, %v4322_v34  ;;  %v13234_v55 = vpop.f32.mrb[60].mxu1  ;;  %v4612_v34 = vld [vmem:[#allocation2 + $0x10] sm:$0xff] }
 0xe63   :  { %v4337_v54 = vadd.f32 %v13234_v55, %v15785_v0  ;;  %v4331_v36 = vpop.f32.mrb[61].mxu1 }
 0xe64   :  { %v4332_v5 = vadd.f32 %v15785_v0, %v4331_v36 }
 0xe66   :  { %v4620_v21 = vpack.c.bf16 %v4337_v54, %v4332_v5  ;;  %v13237_v44 = vpop.f32.mrb[62].mxu1 }
 0xe67   :  { %v4347_v32 = vadd.f32 %v13237_v44, %v15785_v0  ;;  %v4341_v61 = vpop.f32.mrb[63].mxu1 }
 0xe68   :  { %v4342_v35 = vadd.f32 %v15785_v0, %v4341_v61  ;;  %v18471_v61 = vmov 0.0  }
 0xe6a   :  { %v4621_v56 = vpack.c.bf16 %v4347_v32, %v4342_v35  ;;  %v13240_v27 = vpop.f32.mrb[64].mxu1  ;;  %v4730_v35 = vld [vmem:[%s18429_s6 + $0x118] sm:$0xf] }
 0xe6b   :  { %v4357_v41 = vadd.f32 %v13240_v27, %v15785_v0  ;;  %v4351_v30 = vpop.f32.mrb[65].mxu1 }
 0xe6c   :  { %v4352_v63 = vadd.f32 %v15785_v0, %v4351_v30 }
 0xe6e   :  { %v4622_v51 = vpack.c.bf16 %v4357_v41, %v4352_v63  ;;  %v13243_v45 = vpop.f32.mrb[66].mxu1 }
 0xe6f   :  { %v15804_v12 = vadd.f32 %v13243_v45, %v15785_v0  ;;  %v4361_v46 = vpop.f32.mrb[67].mxu1 }
 0xe70   :  { %v15807_v29 = vadd.f32 %v15785_v0, %v4361_v46 }
 0xe72   :  { %v4623_v38 = vpack.c.bf16 %v15804_v12, %v15807_v29  ;;  %v13246_v28 = vpop.f32.mrb[68].mxu1 }
 0xe73   :  { %v4377_v14 = vadd.f32 %v13246_v28, %v15785_v0  ;;  %v4371_v47 = vpop.f32.mrb[69].mxu1 }
 0xe74   :  { %v4372_v6 = vadd.f32 %v15785_v0, %v4371_v47 }
 0xe76   :  { %v4624_v18 = vpack.c.bf16 %v4377_v14, %v4372_v6  ;;  %v13249_v57 = vpop.f32.mrb[70].mxu1  ;;  %v14132_v14 = vld [vmem:[%s18423_s0] sm:$0x3] }
 0xe77   :  { %v4387_v15 = vadd.f32 %v13249_v57, %v15785_v0  ;;  %v4381_v26 = vpop.f32.mrb[71].mxu1 }
 0xe78   :  { %v4382_v22 = vadd.f32 %v15785_v0, %v4381_v26  ;;  %12739 = vmatprep.subr.bf16.mxu0 %v4624_v18 }
 0xe79   :  { %12740 = vmatpush3.bf16.msra.mxu0 %v4616_v2 }
 0xe7a   :  { %v4625_v4 = vpack.c.bf16 %v4387_v15, %v4382_v22  ;;  %v13252_v53 = vpop.f32.mrb[72].mxu1 }
 0xe7b   :  { %v4397_v13 = vadd.f32 %v13252_v53, %v15785_v0  ;;  %v4391_v62 = vpop.f32.mrb[73].mxu1 }
 0xe7c   :  { %v4392_v9 = vadd.f32 %v15785_v0, %v4391_v62  ;;  %12741 = vmatprep.subr.bf16.mxu0 %v4625_v4 }
 0xe7d   :  { %12742 = vmatpush3.bf16.msra.mxu0 %v4617_v17 }
 0xe7e   :  { %v4626_v23 = vpack.c.bf16 %v4397_v13, %v4392_v9  ;;  %v13255_v11 = vpop.f32.mrb[74].mxu1 }
 0xe7f   :  { %v4407_v1 = vadd.f32 %v13255_v11, %v15785_v0  ;;  %v4401_v52 = vpop.f32.mrb[75].mxu1 }
 0xe80   :  { %v4402_v33 = vadd.f32 %v15785_v0, %v4401_v52  ;;  %12743 = vmatprep.subr.bf16.mxu0 %v4626_v23 }
 0xe81   :  { %12744 = vmatpush3.bf16.msra.mxu0 %v4618_v50 }
 0xe82   :  { %v4627_v7 = vpack.c.bf16 %v4407_v1, %v4402_v33  ;;  %v13258_v60 = vpop.f32.mrb[76].mxu1 }
 0xe83   :  { %v4417_v59 = vadd.f32 %v13258_v60, %v15785_v0  ;;  %v4411_v3 = vpop.f32.mrb[77].mxu1 }
 0xe84   :  { %v4412_v24 = vadd.f32 %v15785_v0, %v4411_v3  ;;  %12745 = vmatprep.subr.bf16.mxu0 %v4627_v7 }
 0xe85   :  { %12746 = vmatpush3.bf16.msra.mxu0 %v4619_v49 }
 0xe86   :  { %v4628_v25 = vpack.c.bf16 %v4417_v59, %v4412_v24  ;;  %v13261_v43 = vpop.f32.mrb[78].mxu1 }
 0xe87   :  { %v4427_v2 = vadd.f32 %v13261_v43, %v15785_v0  ;;  %v4421_v20 = vpop.f32.mrb[79].mxu1 }
 0xe88   :  { %v4422_v10 = vadd.f32 %v15785_v0, %v4421_v20  ;;  %12747 = vmatprep.subr.bf16.mxu0 %v4628_v25 }
 0xe89   :  { %12748 = vmatpush3.bf16.msra.mxu0 %v4620_v21  ;;  %v15829_v21 = vpack.c.bf16 %v4612_v34, %v4610_v16 }
 0xe8a   :  { %v4629_v39 = vpack.c.bf16 %v4427_v2, %v4422_v10  ;;  %v13264_v40 = vpop.f32.mrb[80].mxu1 }
 0xe8b   :  { %v4437_v17 = vadd.f32 %v13264_v40, %v15785_v0  ;;  %v4431_v37 = vpop.f32.mrb[81].mxu1 }
 0xe8c   :  { %v4432_v48 = vadd.f32 %v15785_v0, %v4431_v37  ;;  %12749 = vmatprep.subr.bf16.mxu0 %v4629_v39 }
 0xe8d   :  { %12750 = vmatpush3.bf16.msra.mxu0 %v4621_v56 }
 0xe8e   :  { %v4630_v42 = vpack.c.bf16 %v4437_v17, %v4432_v48  ;;  %v13267_v8 = vpop.f32.mrb[82].mxu1 }
 0xe8f   :  { %v4447_v50 = vadd.f32 %v13267_v8, %v15785_v0  ;;  %v4441_v31 = vpop.f32.mrb[83].mxu1 }
 0xe90   :  { %v4442_v58 = vadd.f32 %v15785_v0, %v4441_v31  ;;  %12751 = vmatprep.subr.bf16.mxu0 %v4630_v42 }
 0xe91   :  { %12752 = vmatpush3.bf16.msra.mxu0 %v4622_v51 }
 0xe92   :  { %v4631_v49 = vpack.c.bf16 %v4447_v50, %v4442_v58  ;;  %v13270_v55 = vpop.f32.mrb[84].mxu1 }
 0xe93   :  { %v4457_v54 = vadd.f32 %v13270_v55, %v15785_v0  ;;  %v4451_v36 = vpop.f32.mrb[85].mxu1 }
 0xe94   :  { %12753 = vmatprep.subr.bf16.mxu0 %v4631_v49  ;;  %v4452_v5 = vadd.f32 %v15785_v0, %v4451_v36 }
 0xe95   :  { %12754 = vmatpush3.bf16.msra.mxu0 %v4623_v38 }
 0xe96   :  { %v4673_v44 = vpack.c.bf16 %v4457_v54, %v4452_v5  ;;  %v13273_v32 = vpop.f32.mrb[86].mxu1  ;;  %13316 = vmatprep.subr.mxu0 %v18471_v61 }
 0xe97   :  { %v4467_v56 = vadd.f32 %v13273_v32, %v15785_v0  ;;  %v4461_v27 = vpop.f32.mrb[87].mxu1 }
 0xe98   :  { %4665 = vmatmul.mubr.bf16.vlgmr.msra.gmra.mrb[108].mxu0 %v15829_v21  ;;  %v4462_v41 = vadd.f32 %v15785_v0, %v4461_v27 }
 0xe99   :  { %13317 = vmatpush3.msk.msra.mxu0 %vm72_vm1, %v4730_v35  ;;  %13318 = vmatprep.mubr.msk.f32.mxu0 %vm14191_vm0, %v18471_v61  ;;  %vm6699_vm1 = vcmask 140288  }
 0xe9a   :  { %v4674_v30 = vpack.c.bf16 %v4467_v56, %v4462_v41  ;;  %v13276_v63 = vpop.f32.mrb[88].mxu1  ;;  %13337 = vmatprep.subr.bf16.mxu0 %v18471_v61 }
 0xe9b   :  { %v4477_v51 = vadd.f32 %v13276_v63, %v15785_v0  ;;  %v4471_v45 = vpop.f32.mrb[89].mxu1 }
 0xe9c   :  { %v4472_v12 = vadd.f32 %v15785_v0, %v4471_v45 }
 0xe9e   :  { %v4675_v46 = vpack.c.bf16 %v4477_v51, %v4472_v12  ;;  %v13279_v29 = vpop.f32.mrb[90].mxu1 }
 0xe9f   :  { %v4487_v38 = vadd.f32 %v13279_v29, %v15785_v0  ;;  %v4481_v28 = vpop.f32.mrb[91].mxu1 }
 0xea0   :  { %13319 = vmatmul.mubr.msk.f32.vlgmr.msra.gmra.mrb[112].mxu0 %vm68_vm3, %v14132_v14  ;;  %v4482_v47 = vadd.f32 %v15785_v0, %v4481_v28  ;;  %vm6692_vm3 = vcmask 146432  }
 0xea1   :  { %13341 = vmatprep.mubr.msk.bf16.mxu0 %vm14191_vm0, %v18471_v61 }
 0xea2   :  { %v4676_v6 = vpack.c.bf16 %v4487_v38, %v4482_v47  ;;  %v13282_v18 = vpop.f32.mrb[92].mxu1 }
 0xea3   :  { %v4497_v57 = vadd.f32 %v13282_v18, %v15785_v0  ;;  %v4491_v15 = vpop.f32.mrb[93].mxu1  ;;  %v4896_v18 = vld [vmem:[%s18429_s6 + $0x140] sm:$0xff] }
 0xea4   :  { %v4492_v26 = vadd.f32 %v15785_v0, %v4491_v15 }
 0xea6   :  { %v4677_v22 = vpack.c.bf16 %v4497_v57, %v4492_v26  ;;  %v13285_v4 = vpop.f32.mrb[94].mxu1  ;;  %v4897_v57 = vld [vmem:[%s18429_s6 + $0x148] sm:$0xff]  ;;  %v4898_v26 = vld [vmem:[%s18429_s6 + $0x150] sm:$0xff] }
 0xea7   :  { %v4507_v53 = vadd.f32 %v13285_v4, %v15785_v0  ;;  %v4501_v13 = vpop.f32.mrb[95].mxu1  ;;  %v15885_v15 = vpack.c.bf16 %v4897_v57, %v4896_v18 }
 0xea8   :  { %v4502_v62 = vadd.f32 %v15785_v0, %v4501_v13  ;;  %v12314_v13 = vld [vmem:[#allocation4 + $0xb] ss:$0 sm:$0xff] }
 0xeaa   :  { %v4678_v9 = vpack.c.bf16 %v4507_v53, %v4502_v62  ;;  %v13288_v23 = vpop.f32.mrb[96].mxu1 }
 0xeab   :  { %v4517_v11 = vadd.f32 %v13288_v23, %v15785_v0  ;;  %v4511_v1 = vpop.f32.mrb[97].mxu1 }
 0xeac   :  { %v4512_v52 = vadd.f32 %v15785_v0, %v4511_v1 }
 0xeae   :  { %v4679_v33 = vpack.c.bf16 %v4517_v11, %v4512_v52  ;;  %v13291_v7 = vpop.f32.mrb[98].mxu1 }
 0xeaf   :  { %v4527_v60 = vadd.f32 %v13291_v7, %v15785_v0  ;;  %v4521_v59 = vpop.f32.mrb[99].mxu1  ;;  %v12447_v7 = vld [vmem:[#allocation4 + $0xe] ss:$0 sm:$0xff] }
 0xeb0   :  { %v4522_v3 = vadd.f32 %v15785_v0, %v4521_v59 }
 0xeb2   :  { %v4680_v24 = vpack.c.bf16 %v4527_v60, %v4522_v3  ;;  %v13294_v25 = vpop.f32.mrb[100].mxu1  ;;  %v18474_v3 = vld [vmem:[#allocation8_spill] sm:$0xff] }
 0xeb3   :  { %v4537_v43 = vadd.f32 %v13294_v25, %v15785_v0  ;;  %v4531_v2 = vpop.f32.mrb[101].mxu1 }
 0xeb4   :  { %v4532_v20 = vadd.f32 %v15785_v0, %v4531_v2 }
 0xeb6   :  { %v4681_v10 = vpack.c.bf16 %v4537_v43, %v4532_v20  ;;  %v13297_v39 = vpop.f32.mrb[102].mxu1 }
 0xeb7   :  { %v4547_v40 = vadd.f32 %v13297_v39, %v15785_v0  ;;  %v4541_v17 = vpop.f32.mrb[103].mxu1  ;;  %v18475_v39 = vld [vmem:[#allocation10_spill] sm:$0xff] }
 0xeb8   :  { %v4542_v37 = vadd.f32 %v15785_v0, %v4541_v17  ;;  %12761 = vmatprep.subr.bf16.mxu1 %v4681_v10 }
 0xeb9   :  { %12762 = vmatpush3.bf16.msra.mxu1 %v4673_v44 }
 0xeba   :  { %v4682_v48 = vpack.c.bf16 %v4547_v40, %v4542_v37  ;;  %v13300_v42 = vpop.f32.mrb[104].mxu1 }
 0xebb   :  { %v4557_v8 = vadd.f32 %v13300_v42, %v15785_v0  ;;  %v4551_v50 = vpop.f32.mrb[105].mxu1 }
 0xebc   :  { %v4552_v31 = vadd.f32 %v15785_v0, %v4551_v50  ;;  %12763 = vmatprep.subr.bf16.mxu1 %v4682_v48  ;;  %v18476_v50 = vld [vmem:[#allocation9_spill] sm:$0xff] }
 0xebd   :  { %12764 = vmatpush3.bf16.msra.mxu1 %v4674_v30 }
 0xebe   :  { %v4683_v58 = vpack.c.bf16 %v4557_v8, %v4552_v31  ;;  %v13303_v16 = vpop.f32.mrb[106].mxu1 }
 0xebf   :  { %v4567_v34 = vadd.f32 %v13303_v16, %v15785_v0  ;;  %v4561_v49 = vpop.f32.mrb[107].mxu1  ;;  %v4887_v16 = vld [vmem:[%s18429_s6 + $0x120] sm:$0xff] }
 0xec0   :  { %v4562_v55 = vadd.f32 %v15785_v0, %v4561_v49  ;;  %12765 = vmatprep.subr.bf16.mxu1 %v4683_v58 }
 0xec1   :  { %12766 = vmatpush3.bf16.msra.mxu1 %v4675_v46 }
 0xec2   :  { %v4684_v54 = vpack.c.bf16 %v4567_v34, %v4562_v55  ;;  %v13306_v36 = vpop.f32.mrb[108].mxu1 }
 0xec3   :  { %v4577_v5 = vadd.f32 %v13306_v36, %v15785_v0  ;;  %v4571_v44 = vpop.f32.mrb[109].mxu1 }
 0xec4   :  { %v4572_v32 = vadd.f32 %v15785_v0, %v4571_v44  ;;  %12767 = vmatprep.subr.bf16.mxu1 %v4684_v54 }
 0xec5   :  { %12768 = vmatpush3.bf16.msra.mxu1 %v4676_v6 }
 0xec6   :  { %v4685_v35 = vpack.c.bf16 %v4577_v5, %v4572_v32  ;;  %v13309_v56 = vpop.f32.mrb[110].mxu1 }
 0xec7   :  { %v4587_v27 = vadd.f32 %v13309_v56, %v15785_v0  ;;  %v4581_v41 = vpop.f32.mrb[111].mxu1 }
 0xec8   :  { %v4582_v30 = vadd.f32 %v15785_v0, %v4581_v41  ;;  %12769 = vmatprep.subr.bf16.mxu1 %v4685_v35 }
 0xec9   :  { %12770 = vmatpush3.bf16.msra.mxu1 %v4677_v22 }
 0xeca   :  { %v4686_v63 = vpack.c.bf16 %v4587_v27, %v4582_v30  ;;  %v13312_v51 = vpop.f32.mrb[112].mxu1 }
 0xecb   :  { %v4597_v45 = vadd.f32 %v13312_v51, %v15785_v0  ;;  %v4591_v12 = vpop.f32.mrb[113].mxu1 }
 0xecc   :  { %v4592_v46 = vadd.f32 %v15785_v0, %v4591_v12  ;;  %12771 = vmatprep.subr.bf16.mxu1 %v4686_v63 }
 0xecd   :  { %12772 = vmatpush3.bf16.msra.mxu1 %v4678_v9 }
 0xece   :  { %v4687_v29 = vpack.c.bf16 %v4597_v45, %v4592_v46 }
 0xed0   :  { %12773 = vmatprep.subr.bf16.mxu1 %v4687_v29 }
 0xed1   :  { %12774 = vmatpush3.bf16.msra.mxu1 %v4679_v33  ;;  %v4888_v33 = vld [vmem:[%s18429_s6 + $0x128] sm:$0xff] }
 0xf28   :  { %v13315_v38 = vpop.f32.mrb[114].mxu1 }
 0xf29   :  { %v4607_v28 = vadd.f32 %v13315_v38, %v15785_v0  ;;  %v4601_v14 = vpop.f32.mrb[115].mxu1 }
 0xf2a   :  { %v4602_v47 = vadd.f32 %v15785_v0, %v4601_v14  ;;  %v4899_v0 = vld [vmem:[%s18429_s6 + $0x158] sm:$0xff] }
 0xf2b   :  { %v15896_v22 = vpack.c.bf16 %v4899_v0, %v4898_v26 }
 0xf2c   :  { %v4688_v6 = vpack.c.bf16 %v4607_v28, %v4602_v47 }
 0xf2e   :  { %12775 = vmatprep.subr.bf16.mxu1 %v4688_v6 }
 0xf2f   :  { %12776 = vmatpush3.bf16.msra.mxu1 %v4680_v24 }
 0xf30   :  { %13321 = vmatprep.subr.bf16.mxu1 %v18471_v61 }
 0xf32   :  { %4722 = vmatmul.mubr.bf16.vlgmr.msra.gmra.mrb[116].mxu1 %v15829_v21  ;;  %v3304_v21 = vadd.f32 %v12314_v13, %v15781_v19  ;;  %v4889_v13 = vld [vmem:[%s18429_s6 + $0x130] sm:$0x3] }
 0xf33   :  { %13322 = vmatpush3.bf16.msra.mxu1 %v15885_v15  ;;  %13325 = vmatprep.mubr.msk.bf16.mxu1 %vm14191_vm0, %v18471_v61 }
 0xf34   :  { %13323 = vmatprep.subr.bf16.mxu1 %v18471_v61  ;;  %v4839_v24 = vrot.slane %v3304_v21, %v18474_v3 }
 0xf36   :  { %v4840_v10 = vcombine.high %v4839_v24, %v4839_v24  ;;  %v4847_v42 = vrot.slane %v4839_v24, %v18474_v3 }
 0xf37   :  { %13324 = vmatpush3.bf16.msra.mxu1 %v15896_v22 }
 0xf38   :  { %v4854_v58 = vrot.slane %v4840_v10, %v18474_v3 }
 0xf6b   :  { %v12755_v4 = vpop.f32.mrb[108].mxu0 }
 0xf6c   :  { %v12756_v53 = vpop.f32.mrb[109].mxu0 }
 0xf6d   :  { %v12757_v62 = vadd.f32 %v12756_v53, %v12755_v4  ;;  %v12758_v9 = vpop.f32.mrb[110].mxu0 }
 0xf6e   :  { %v12759_v23 = vpop.f32.mrb[111].mxu0 }
 0xf6f   :  { %v4871_v11 = vrot.slane %v12757_v62, 6  ;;  %v12760_v1 = vadd.f32 %v12759_v23, %v12758_v9 }
 0xf71   :  { %v15903_v52 = vrot.slane %v12760_v1, 6 }
 0xf73   :  { %18472 = vst [vmem:[#allocation11_spill] sm:$0xff] %v15903_v52  ;;  %v15910_v60 = vsel %vm282_vm6, %v4871_v11, %v15903_v52  ;;  %v4805_v59 = vpop.f32.mrb[112].mxu0 }
 0xf74   :  { %18473 = vst [vmem:[#allocation13_spill] sm:$0xff] %v15910_v60  ;;  %v4891_v25 = vadd.f32 %v4888_v33, %v15910_v60  ;;  %v4806_v43 = vadd.f32 %v12447_v7, %v4805_v59  ;;  %v13320_v2 = vpop.f32.mrb[113].mxu0 }
 0xf76   :  { %v4929_v20 = vcombine.high %v4891_v25, %v4891_v25  ;;  %v4816_v19 = vrot.slane %v4806_v43, %v18474_v3  ;;  %v4936_v40 = vrot.slane %v4891_v25, %v18475_v39 }
 0xf78   :  { %v4943_v17 = vrot.slane %v4929_v20, %v18475_v39  ;;  %v4817_v37 = vcombine.high %v4816_v19, %v4816_v19  ;;  %v4824_v48 = vrot.slane %v4816_v19, %v18474_v3  ;;  %v4944_v34 = vcombine.high %v4936_v40, %v4936_v40 }
 0xf7a   :  { %v4831_v8 = vrot.slane %v4817_v37, %v18474_v3  ;;  %v4860_v31 = vrot.slane %v4824_v48, %v18476_v50  ;;  %v4945_v49 = vcombine.high %v4943_v17, %v4943_v17  ;;  %v5011_v32 = vcombine.low %v4936_v40, %v4944_v34 }
 0xf7c   :  { %v4864_v55 = vrot.slane %v4831_v8, %v18476_v50  ;;  %v4883_v54 = vsel %vm279_vm5, %v4847_v42, %v4860_v31  ;;  %v5012_v27 = vcombine.low %v4943_v17, %v4945_v49  ;;  %v5019_v45 = vrot.slane %v5011_v32, %v18475_v39 }
 0xf7d   :  { %v15928_v36 = vsel %vm282_vm6, %v4883_v54, %v4871_v11  ;;  %v4892_v11 = vadd.f32 %v4889_v13, %v15903_v52 }
 0xf7e   :  { %18477 = vst [vmem:[#allocation12_spill] sm:$0xff] %v15928_v36  ;;  %v4890_v5 = vadd.f32 %v4887_v16, %v15928_v36  ;;  %v4884_v44 = vsel %vm279_vm5, %v4854_v58, %v4864_v55  ;;  %v5026_v12 = vrot.slane %v5012_v27, %v18475_v39 }
 0xf7f   :  { %v4952_v25 = vrot.slane %v4892_v11, %v18475_v39 }
 0xf80   :  { %v4912_v35 = vcombine.high %v4890_v5, %v4890_v5  ;;  %v4919_v56 = vrot.slane %v4890_v5, %v18475_v39  ;;  %v5027_v28 = vcombine.low %v5019_v45, %v5026_v12 }
 0xf82   :  { %v4926_v41 = vrot.slane %v4912_v35, %v18475_v39  ;;  %v4927_v30 = vcombine.high %v4919_v56, %v4919_v56  ;;  %v15972_v35 = vld [vmem:[#allocation4 + $0xf] ss:$0 sm:$0xff] }
 0xf84   :  { %v4928_v63 = vcombine.high %v4926_v41, %v4926_v41  ;;  %v4994_v51 = vcombine.low %v4919_v56, %v4927_v30 }
 0xf86   :  { %v4995_v46 = vcombine.low %v4926_v41, %v4928_v63  ;;  %v5002_v29 = vrot.slane %v4994_v51, %v18475_v39 }
 0xf88   :  { %v5009_v38 = vrot.slane %v4995_v46, %v18475_v39 }
 0xf8a   :  { %v5010_v14 = vcombine.low %v5002_v29, %v5009_v38 }
 0xf8c   :  { %v5075_v47 = vpack.c.bf16 %v5027_v28, %v5010_v14 }
 0xf8e   :  { %13326 = vmatmul.mubr.msk.bf16.vlgmr.msra.gmra.mrb[120].mxu1 %vm434_vm7, %v5075_v47 }
 0xf8f   :  { %13329 = vmatprep.mubr.msk.bf16.mxu1 %vm14191_vm0, %v18471_v61 }
0x1005   :  { %v12777_v6 = vpop.f32.mrb[116].mxu1 }
0x1006   :  { %v12778_v18 = vpop.f32.mrb[117].mxu1 }
0x1007   :  { %v12779_v57 = vadd.f32 %v12778_v18, %v12777_v6  ;;  %v12780_v26 = vpop.f32.mrb[118].mxu1 }
0x1008   :  { %v12781_v0 = vpop.f32.mrb[119].mxu1 }
0x1009   :  { %v4874_v4 = vrot.slane %v12779_v57, 6  ;;  %v12782_v53 = vadd.f32 %v12781_v0, %v12780_v26 }
0x100b   :  { %v15945_v62 = vsel %vm282_vm6, %v4884_v44, %v4874_v4  ;;  %v15947_v9 = vrot.slane %v12782_v53, 6 }
0x100c   :  { %18478 = vst [vmem:[#allocation15_spill] sm:$0xff] %v15945_v62  ;;  %v4893_v23 = vadd.f32 %v4887_v16, %v15945_v62 }
0x100d   :  { %18479 = vst [vmem:[#allocation14_spill] sm:$0xff] %v15947_v9  ;;  %v15953_v1 = vsel %vm282_vm6, %v4874_v4, %v15947_v9  ;;  %v4895_v48 = vadd.f32 %v4889_v13, %v15947_v9  ;;  %vm9287_vm6 = vcmask 253952  }
0x100e   :  { %18480 = vst [vmem:[#allocation17_spill] sm:$0xff] %v15953_v1  ;;  %v4953_v21 = vcombine.high %v4893_v23, %v4893_v23  ;;  %v4960_v7 = vrot.slane %v4893_v23, %v18475_v39  ;;  %v4894_v59 = vadd.f32 %v4888_v33, %v15953_v1 }
0x100f   :  { %v4993_v34 = vrot.slane %v4895_v48, %v18475_v39 }
0x1010   :  { %v4967_v3 = vrot.slane %v4953_v21, %v18475_v39  ;;  %v4968_v24 = vcombine.high %v4960_v7, %v4960_v7  ;;  %v4970_v43 = vcombine.high %v4894_v59, %v4894_v59  ;;  %v4977_v2 = vrot.slane %v4894_v59, %v18475_v39 }
0x1011   :  { %v5028_v17 = vcombine.low %v4952_v25, %v4960_v7 }
0x1012   :  { %v4969_v20 = vcombine.high %v4967_v3, %v4967_v3  ;;  %v5029_v19 = vcombine.low %v4968_v24, %v4967_v3  ;;  %v4984_v10 = vrot.slane %v4970_v43, %v18475_v39  ;;  %v4985_v40 = vcombine.high %v4977_v2, %v4977_v2 }
0x1013   :  { %v5036_v31 = vrot.slane %v5028_v17, %v18475_v39 }
0x1014   :  { %v5045_v37 = vcombine.low %v4969_v20, %v4977_v2  ;;  %v5043_v42 = vrot.slane %v5029_v19, %v18475_v39  ;;  %v5046_v33 = vcombine.low %v4985_v40, %v4984_v10  ;;  %v4986_v16 = vcombine.high %v4984_v10, %v4984_v10 }
0x1016   :  { %v5053_v8 = vrot.slane %v5045_v37, %v18475_v39  ;;  %v5060_v58 = vrot.slane %v5046_v33, %v18475_v39  ;;  %v5044_v49 = vcombine.low %v5036_v31, %v5043_v42  ;;  %v5062_v5 = vcombine.low %v4986_v16, %v4993_v34 }
0x1018   :  { %v5061_v55 = vcombine.low %v5053_v8, %v5060_v58  ;;  %v5069_v44 = vrot.slane %v5062_v5, %v18475_v39 }
0x101a   :  { %v5076_v54 = vpack.c.bf16 %v5061_v55, %v5044_v49  ;;  %v5077_v32 = vpack.c.bf16 %v5069_v44, %v5069_v44 }
0x101c   :  { %13330 = vmatmul.mubr.msk.bf16.gmra.mrb[124].mxu1 %vm434_vm7, %v5076_v54 }
0x101d   :  { %13333 = vmatprep.mubr.msk.bf16.mxu1 %vm14191_vm0, %v18471_v61 }
0x1024   :  { %13334 = vmatmul.mubr.msk.bf16.gmra.mrb[128].mxu1 %vm434_vm7, %v5077_v32 }
0x1061   :  { %v5127_v56 = vpop.f32.mrb[120].mxu1 }
0x1062   :  { %v5128_v27 = vadd.f32 %v15972_v35, %v5127_v56  ;;  %v13327_v41 = vpop.f32.mrb[121].mxu1 }
0x1063   :  { %v5130_v30 = vpop.f32.mrb[122].mxu1 }
0x1064   :  { %v5154_v63 = vcombine.high %v5128_v27, %v5128_v27  ;;  %v5161_v51 = vrot.slane %v5128_v27, %v18475_v39  ;;  %v5131_v45 = vadd.f32 %v15972_v35, %v5130_v30  ;;  %v13328_v12 = vpop.f32.mrb[123].mxu1 }
0x1066   :  { %v15978_v46 = vrot.slane %v5154_v63, %v18475_v39  ;;  %v5171_v29 = vcombine.high %v5131_v45, %v5131_v45  ;;  %v15981_v38 = vrot.slane %v5131_v45, %v18475_v39  ;;  %5628 = vrot.lane.b32.xlu0 %v5161_v51, %s14196_s18  ;;  %5556 = vrot.lane.b32.xlu1 %v5161_v51, %s14195_s17 }
0x1067   :  { %v5169_v28 = vcombine.high %v5161_v51, %v5161_v51 }
0x1068   :  { %v15987_v14 = vcombine.high %v15978_v46, %v15978_v46  ;;  %v15990_v47 = vrot.slane %v5171_v29, %v18475_v39  ;;  %v15994_v6 = vcombine.high %v15981_v38, %v15981_v38 }
0x1069   :  { %v5772_v18 = vcombine.low %v5161_v51, %v5169_v28 }
0x106a   :  { %v15998_v57 = vcombine.high %v15990_v47, %v15990_v47  ;;  %5592 = vrot.lane.b32.xlu1 %v5161_v51, %s14194_s7  ;;  %5560 = vrot.lane.b32.xlu0 %v15978_v46, %s14195_s17  ;;  %v5773_v26 = vcombine.low %v15978_v46, %v15987_v14  ;;  %v5789_v0 = vcombine.low %v15981_v38, %v15994_v6 }
0x106b   :  { %v5780_v13 = vrot.slane %v5772_v18, %v18475_v39 }
0x106c   :  { %v5787_v4 = vrot.slane %v5773_v26, %v18475_v39  ;;  %v5790_v53 = vcombine.low %v15990_v47, %v15998_v57  ;;  %v5797_v23 = vrot.slane %v5789_v0, %v18475_v39 }
0x106e   :  { %5558 = vrot.lane.b32.xlu1 %v5169_v28, %s14195_s17  ;;  %5564 = vrot.lane.b32.xlu0 %v15981_v38, %s14195_s17  ;;  %v5804_v11 = vrot.slane %v5790_v53, %v18475_v39  ;;  %v5788_v21 = vcombine.low %v5780_v13, %v5787_v4 }
0x1070   :  { %v5805_v7 = vcombine.low %v5797_v23, %v5804_v11 }
0x1072   :  { %5596 = vrot.lane.b32.xlu1 %v15978_v46, %s14194_s7  ;;  %5594 = vrot.lane.b32.xlu0 %v5169_v28, %s14194_s7  ;;  %v16019_v59 = vpack.c.bf16 %v5805_v7, %v5788_v21 }
0x1074   :  { %13357 = vmatprep.mubr.msk.bf16.mxu1 %vm1081_vm8, %v16019_v59 }
0x1076   :  { %5600 = vrot.lane.b32.xlu1 %v15981_v38, %s14194_s7  ;;  %5568 = vrot.lane.b32.xlu0 %v15990_v47, %s14195_s17 }
0x107a   :  { %5630 = vrot.lane.b32.xlu1 %v5169_v28, %s14196_s18  ;;  %5598 = vrot.lane.b32.xlu0 %v15987_v14, %s14194_s7 }
0x107e   :  { %5562 = vrot.lane.b32.xlu1 %v15987_v14, %s14195_s17  ;;  %5602 = vrot.lane.b32.xlu0 %v15994_v6, %s14194_s7 }
0x1082   :  { %5566 = vrot.lane.b32.xlu1 %v15994_v6, %s14195_s17  ;;  %5606 = vrot.lane.b32.xlu0 %v15998_v57, %s14194_s7 }
0x1086   :  { %5604 = vrot.lane.b32.xlu1 %v15990_v47, %s14194_s7 }
0x108a   :  { %5570 = vrot.lane.b32.xlu1 %v15998_v57, %s14195_s17 }
0x10d8   :  { %v16060_v41 = vpop.permute.xlu1 %5556  ;;  %v16094_v23 = vpop.permute.xlu0 %5628 }
0x10dc   :  { %v16066_v29 = vpop.permute.xlu1 %5592 }
0x10e0   :  { %v5559_v18 = vpop.permute.xlu1 %5558 }
0x10e4   :  { %v16076_v26 = vpop.permute.xlu1 %5596 }
0x10e8   :  { %v16082_v4 = vpop.permute.xlu1 %5600 }
0x10ec   :  { %v16088_v13 = vpop.permute.xlu1 %5630 }
0x10ef   :  { %v5135_v3 = vpop.f32.mrb[124].mxu1 }
0x10f0   :  { %v5136_v24 = vadd.f32 %v15972_v35, %v5135_v3  ;;  %v13331_v25 = vpop.f32.mrb[125].mxu1  ;;  %v5563_v11 = vpop.permute.xlu1 %5562 }
0x10f1   :  { %v5138_v20 = vpop.f32.mrb[126].mxu1  ;;  %v5854_v25 = vcombine.low %v16060_v41, %v5559_v18 }
0x10f2   :  { %v5188_v43 = vcombine.high %v5136_v24, %v5136_v24  ;;  %v16044_v2 = vrot.slane %v5136_v24, %v18475_v39  ;;  %v5139_v19 = vadd.f32 %v15972_v35, %v5138_v20  ;;  %v13332_v10 = vpop.f32.mrb[127].mxu1 }
0x10f4   :  { %v5202_v40 = vrot.slane %v5188_v43, %v18475_v39  ;;  %v5203_v17 = vcombine.high %v16044_v2, %v16044_v2  ;;  %v5205_v37 = vcombine.high %v5139_v19, %v5139_v19  ;;  %v5212_v48 = vrot.slane %v5139_v19, %v18475_v39  ;;  %v5567_v21 = vpop.permute.xlu1 %5566 }
0x10f5   :  { %v5812_v20 = vrot.slane %v16044_v2, %v18475_v39 }
0x10f6   :  { %5574 = vrot.lane.b32.xlu0 %v5203_v17, %s14195_s17  ;;  %5576 = vrot.lane.b32.xlu1 %v5202_v40, %s14195_s17  ;;  %v5204_v42 = vcombine.high %v5202_v40, %v5202_v40  ;;  %v5813_v33 = vcombine.low %v5203_v17, %v5202_v40  ;;  %v5219_v8 = vrot.slane %v5205_v37, %v18475_v39 }
0x10f7   :  { %v5143_v31 = vpop.f32.mrb[128].mxu1  ;;  %v5220_v58 = vcombine.high %v5212_v48, %v5212_v48 }
0x10f8   :  { %v5144_v16 = vadd.f32 %v15972_v35, %v5143_v31  ;;  %v13335_v34 = vpop.f32.mrb[129].mxu1  ;;  %v5814_v49 = vcombine.low %v5204_v42, %v5212_v48  ;;  %v5221_v54 = vcombine.high %v5219_v8, %v5219_v8  ;;  %v5821_v5 = vrot.slane %v5813_v33, %v18475_v39 }
0x10f9   :  { %v5146_v55 = vpop.f32.mrb[130].mxu1  ;;  %v5830_v27 = vcombine.low %v5220_v58, %v5219_v8 }
0x10fa   :  { %v5228_v44 = vrot.slane %v5144_v16, %v18475_v39  ;;  %5612 = vrot.lane.b32.xlu0 %v5202_v40, %s14194_s7  ;;  %5580 = vrot.lane.b32.xlu1 %v5212_v48, %s14195_s17  ;;  %v13336_v32 = vpop.f32.mrb[131].mxu1  ;;  %v5828_v56 = vrot.slane %v5814_v49, %v18475_v39 }
0x10fb   :  { %v5838_v51 = vrot.slane %v5830_v27, %v18475_v39 }
0x10fc   :  { %v5829_v30 = vcombine.low %v5821_v5, %v5828_v56  ;;  %v5831_v63 = vcombine.low %v5221_v54, %v5228_v44  ;;  %v5229_v0 = vcombine.high %v5228_v44, %v5228_v44 }
0x10fe   :  { %5616 = vrot.lane.b32.xlu0 %v5212_v48, %s14194_s7  ;;  %5610 = vrot.lane.b32.xlu1 %v5203_v17, %s14194_s7  ;;  %v5845_v45 = vrot.slane %v5831_v63, %v18475_v39  ;;  %v13808_v53 = vpack.i.bf16 %v5229_v0, %v16044_v2 }
0x1100   :  { %v5846_v12 = vcombine.low %v5838_v51, %v5845_v45 }
0x1102   :  { %5578 = vrot.lane.b32.xlu0 %v5204_v42, %s14195_s17  ;;  %5584 = vrot.lane.b32.xlu1 %v5219_v8, %s14195_s17  ;;  %v16070_v28 = vpack.c.bf16 %v5846_v12, %v5829_v30 }
0x1106   :  { %5582 = vrot.lane.b32.xlu0 %v5220_v58, %s14195_s17  ;;  %5614 = vrot.lane.b32.xlu1 %v5204_v42, %s14194_s7 }
0x110a   :  { %5620 = vrot.lane.b32.xlu0 %v5219_v8, %s14194_s7  ;;  %5618 = vrot.lane.b32.xlu1 %v5220_v58, %s14194_s7 }
0x110e   :  { %5622 = vrot.lane.b32.xlu1 %v5221_v54, %s14194_s7  ;;  %5586 = vrot.lane.b32.xlu0 %v5221_v54, %s14195_s17 }
0x1112   :  { %5624 = vrot.lane.b32.xlu0 %v5228_v44, %s14194_s7  ;;  %5588 = vrot.lane.b32.xlu1 %v5228_v44, %s14195_s17 }
0x1116   :  { %5634 = vrot.lane.b32.xlu1 %v15987_v14, %s14196_s18  ;;  %13809 = vrot.lane.b32.xlu0 %v13808_v53, %s14195_s17  ;;  %v5561_v14 = vpop.permute.xlu0 %5560 }
0x1117   :  { %v5855_v3 = vcombine.low %v5561_v14, %v5563_v11 }
0x1119   :  { %v5869_v19 = vrot.slane %v5855_v3, %v18475_v39 }
0x111a   :  { %5638 = vrot.lane.b32.xlu1 %v15994_v6, %s14196_s18  ;;  %5632 = vrot.lane.b32.xlu0 %v15978_v46, %s14196_s18  ;;  %v5565_v46 = vpop.permute.xlu0 %5564  ;;  %v16107_v6 = vpop.permute.xlu1 %5604 }
0x111b   :  { %v5871_v24 = vcombine.low %v5565_v46, %v5567_v21 }
0x111d   :  { %v5879_v10 = vrot.slane %v5871_v24, %v18475_v39 }
0x111e   :  { %5642 = vrot.lane.b32.xlu1 %v15998_v57, %s14196_s18  ;;  %5636 = vrot.lane.b32.xlu0 %v15981_v38, %s14196_s18  ;;  %v16109_v38 = vpop.permute.xlu0 %5594  ;;  %v5571_v57 = vpop.permute.xlu1 %5570 }
0x1122   :  { %13814 = vrot.lane.b32.xlu1 %v13808_v53, %s14194_s7  ;;  %5640 = vrot.lane.b32.xlu0 %v15990_v47, %s14196_s18  ;;  %v5569_v47 = vpop.permute.xlu0 %5568 }
0x1123   :  { %v5872_v7 = vcombine.low %v5569_v47, %v5571_v57 }
0x1125   :  { %v5886_v43 = vrot.slane %v5872_v7, %v18475_v39  ;;  %v5936_v7 = vcombine.low %v16066_v29, %v16109_v38 }
0x1126   :  { %5648 = vrot.lane.b32.xlu1 %v5202_v40, %s14196_s18  ;;  %5646 = vrot.lane.b32.xlu0 %v5203_v17, %s14196_s18  ;;  %v16130_v17 = vpack.c.bf16 %v5812_v20, %v5812_v20 }
0x1127   :  { %v5887_v40 = vcombine.low %v5879_v10, %v5886_v43 }
0x112a   :  { %5652 = vrot.lane.b32.xlu1 %v5212_v48, %s14196_s18  ;;  %5650 = vrot.lane.b32.xlu0 %v5204_v42, %s14196_s18  ;;  %v5853_v48 = vrot.slane %v5229_v0, %v18475_v39 }
0x112e   :  { %5656 = vrot.lane.b32.xlu1 %v5219_v8, %s14196_s18  ;;  %5654 = vrot.lane.b32.xlu0 %v5220_v58, %s14196_s18 }
0x1132   :  { %5660 = vrot.lane.b32.xlu1 %v5228_v44, %s14196_s18  ;;  %5658 = vrot.lane.b32.xlu0 %v5221_v54, %s14196_s18 }
0x1136   :  { %5400 = vrot.lane.b32.xlu1 %v15885_v15, %s14197_s19  ;;  %5644 = vrot.lane.b32.xlu0 %v16044_v2, %s14196_s18  ;;  %v5862_v15 = vrot.slane %v5854_v25, %v18475_v39 }
0x1138   :  { %v5870_v37 = vcombine.low %v5862_v15, %v5869_v19 }
0x113a   :  { %6142 = vrot.lane.b32.xlu1 %v16019_v59, %s14198_s21  ;;  %5402 = vrot.lane.b32.xlu0 %v15896_v22, %s14197_s19  ;;  %v16135_v2 = vpack.c.bf16 %v5887_v40, %v5870_v37  ;;  %v16142_v22 = vpack.c.bf16 %v5853_v48, %v5853_v48  ;;  %v5599_v59 = vpop.permute.xlu0 %5598 }
0x113b   :  { %v5937_v11 = vcombine.low %v16076_v26, %v5599_v59  ;;  %v5944_v59 = vrot.slane %v5936_v7, %v18475_v39  ;;  %v5256_v7 = vrot.slane %v15910_v60, %v18475_v39 }
0x113d   :  { %v5951_v10 = vrot.slane %v5937_v11, %v18475_v39 }
0x113e   :  { %6144 = vrot.lane.b32.xlu1 %v16130_v17, %s14198_s21  ;;  %5662 = vrot.lane.b32.xlu0 %v5229_v0, %s14196_s18  ;;  %v5603_v42 = vpop.permute.xlu0 %5602 }
0x113f   :  { %v5953_v14 = vcombine.low %v16082_v4, %v5603_v42 }
0x1141   :  { %v5961_v15 = vrot.slane %v5953_v14, %v18475_v39 }
0x1142   :  { %6274 = vrot.lane.b32.xlu1 %v16135_v2, %s14198_s21  ;;  %6208 = vrot.lane.b32.xlu0 %v16070_v28, %s14198_s21  ;;  %v5607_v33 = vpop.permute.xlu0 %5606 }
0x1143   :  { %v5954_v45 = vcombine.low %v16107_v6, %v5607_v33 }
0x1145   :  { %v5968_v6 = vrot.slane %v5954_v45, %v18475_v39 }
0x1146   :  { %6210 = vrot.lane.b32.xlu0 %v16142_v22, %s14198_s21 }
0x1168   :  { %v5575_v8 = vpop.permute.xlu0 %5574  ;;  %v5577_v31 = vpop.permute.xlu1 %5576 }
0x1169   :  { %v5895_v63 = vcombine.low %v5575_v8, %v5577_v31  ;;  %v5969_v8 = vcombine.low %v5961_v15, %v5968_v6 }
0x116b   :  { %v5903_v21 = vrot.slane %v5895_v63, %v18475_v39  ;;  %v5249_v63 = vcombine.high %v15910_v60, %v15910_v60 }
0x116c   :  { %v5613_v58 = vpop.permute.xlu0 %5612  ;;  %v5581_v16 = vpop.permute.xlu1 %5580 }
0x1170   :  { %v5617_v34 = vpop.permute.xlu0 %5616  ;;  %v5611_v49 = vpop.permute.xlu1 %5610 }
0x1171   :  { %v5977_v40 = vcombine.low %v5611_v49, %v5613_v58  ;;  %v5952_v58 = vcombine.low %v5944_v59, %v5951_v10 }
0x1173   :  { %v5985_v49 = vrot.slane %v5977_v40, %v18475_v39 }
0x1174   :  { %v5579_v55 = vpop.permute.xlu0 %5578  ;;  %v5585_v54 = vpop.permute.xlu1 %5584 }
0x1175   :  { %v5896_v27 = vcombine.low %v5579_v55, %v5581_v16 }
0x1177   :  { %v5910_v12 = vrot.slane %v5896_v27, %v18475_v39 }
0x1178   :  { %v5583_v5 = vpop.permute.xlu0 %5582  ;;  %v5615_v44 = vpop.permute.xlu1 %5614 }
0x1179   :  { %v5912_v51 = vcombine.low %v5583_v5, %v5585_v54  ;;  %v5911_v3 = vcombine.low %v5903_v21, %v5910_v12  ;;  %v5978_v24 = vcombine.low %v5615_v44, %v5617_v34 }
0x117b   :  { %v5920_v46 = vrot.slane %v5912_v51, %v18475_v39  ;;  %v5992_v31 = vrot.slane %v5978_v24, %v18475_v39  ;;  %v5232_v51 = vcombine.high %v15928_v36, %v15928_v36 }
0x117c   :  { %v5621_v32 = vpop.permute.xlu0 %5620  ;;  %v5619_v56 = vpop.permute.xlu1 %5618 }
0x117d   :  { %v5994_v20 = vcombine.low %v5619_v56, %v5621_v32  ;;  %v5993_v32 = vcombine.low %v5985_v49, %v5992_v31  ;;  %v16177_v56 = vpack.c.bf16 %v5969_v8, %v5952_v58 }
0x117f   :  { %v6002_v16 = vrot.slane %v5994_v20, %v18475_v39 }
0x1180   :  { %v5623_v41 = vpop.permute.xlu1 %5622  ;;  %v5587_v30 = vpop.permute.xlu0 %5586 }
0x1184   :  { %v5625_v18 = vpop.permute.xlu0 %5624  ;;  %v5589_v0 = vpop.permute.xlu1 %5588 }
0x1185   :  { %v5913_v53 = vcombine.low %v5587_v30, %v5589_v0  ;;  %v5995_v57 = vcombine.low %v5623_v41, %v5625_v18  ;;  %v6018_v18 = vcombine.low %v16094_v23, %v16088_v13  ;;  %v5263_v13 = vrot.slane %v5249_v63, %v18475_v39 }
0x1186   :  { %v5246_v23 = vrot.slane %v5232_v51, %v18475_v39 }
0x1187   :  { %v5927_v47 = vrot.slane %v5913_v53, %v18475_v39  ;;  %v6009_v37 = vrot.slane %v5995_v57, %v18475_v39  ;;  %v6026_v24 = vrot.slane %v6018_v18, %v18475_v39  ;;  %v5265_v10 = vcombine.high %v5263_v13, %v5263_v13 }
0x1188   :  { %v5635_v25 = vpop.permute.xlu1 %5634  ;;  %v13810_v43 = vpop.permute.xlu0 %13809 }
0x1189   :  { %v5928_v26 = vcombine.low %v5920_v46, %v5927_v47  ;;  %v13812_v19 = vunpack.i.h.bf16 %v13810_v43  ;;  %v13811_v4 = vunpack.i.l.bf16 %v13810_v43  ;;  %v6010_v55 = vcombine.low %v6002_v16, %v6009_v37 }
0x118b   :  { %v5935_v48 = vrot.slane %v13812_v19, %v18475_v39  ;;  %v5894_v29 = vrot.slane %v13811_v4, %v18475_v39  ;;  %v16161_v38 = vpack.c.bf16 %v5928_v26, %v5911_v3  ;;  %v16181_v30 = vpack.c.bf16 %v6010_v55, %v5993_v32 }
0x118c   :  { %v5639_v42 = vpop.permute.xlu1 %5638  ;;  %v5633_v33 = vpop.permute.xlu0 %5632  ;;  %v5239_v26 = vrot.slane %v15928_v36, %v18475_v39  ;;  %v5264_v4 = vcombine.high %v5256_v7, %v5256_v7  ;;  %v5290_v55 = vcombine.high %v15953_v1, %v15953_v1 }
0x118d   :  { %v16166_v34 = vpack.c.bf16 %v5894_v29, %v5894_v29  ;;  %6340 = vrot.lane.b32.xlu0 %v16161_v38, %s14198_s21  ;;  %v16171_v54 = vpack.c.bf16 %v5935_v48, %v5935_v48  ;;  %v6019_v27 = vcombine.low %v5633_v33, %v5635_v25  ;;  %v5248_v48 = vcombine.high %v5246_v23, %v5246_v23 }
0x118e   :  { %v5273_v29 = vcombine.high %v15945_v62, %v15945_v62  ;;  %v5247_v59 = vcombine.high %v5239_v26, %v5239_v26  ;;  %v5332_v33 = vcombine.low %v5263_v13, %v5265_v10 }
0x118f   :  { %6276 = vrot.lane.b32.xlu1 %v16166_v34, %s14198_s21  ;;  %v6033_v14 = vrot.slane %v6019_v27, %v18475_v39  ;;  %v5315_v58 = vcombine.low %v5246_v23, %v5248_v48  ;;  %v5272_v48 = vrot.slane %v15903_v52, %v18475_v39 }
0x1190   :  { %v5643_v5 = vpop.permute.xlu1 %5642  ;;  %v5637_v44 = vpop.permute.xlu0 %5636  ;;  %v5287_v49 = vrot.slane %v5273_v29, %v18475_v39  ;;  %v5314_v27 = vcombine.low %v5239_v26, %v5247_v59 }
0x1191   :  { %6342 = vrot.lane.b32.xlu0 %v16171_v54, %s14198_s21  ;;  %v6035_v41 = vcombine.low %v5637_v44, %v5639_v42  ;;  %v6034_v19 = vcombine.low %v6026_v24, %v6033_v14  ;;  %v5331_v42 = vcombine.low %v5256_v7, %v5264_v4  ;;  %v5304_v14 = vrot.slane %v5290_v55, %v18475_v39 }
0x1192   :  { %v5322_v7 = vrot.slane %v5314_v27, %v18475_v39 }
0x1193   :  { %6406 = vrot.lane.b32.xlu1 %v16177_v56, %s14198_s21  ;;  %v6043_v21 = vrot.slane %v6035_v41, %v18475_v39  ;;  %v5280_v41 = vrot.slane %v15945_v62, %v18475_v39 }
0x1194   :  { %v13815_v45 = vpop.permute.xlu1 %13814  ;;  %v5641_v12 = vpop.permute.xlu0 %5640 }
0x1195   :  { %v13817_v0 = vunpack.i.h.bf16 %v13815_v45  ;;  %v13816_v53 = vunpack.i.l.bf16 %v13815_v45  ;;  %v6036_v11 = vcombine.low %v5641_v12, %v5643_v5  ;;  %6472 = vrot.lane.b32.xlu0 %v16181_v30, %s14198_s21  ;;  %v5297_v5 = vrot.slane %v15953_v1, %v18475_v39 }
0x1196   :  { %v5339_v45 = vrot.slane %v5331_v42, %v18475_v39  ;;  %v5346_v12 = vrot.slane %v5332_v33, %v18475_v39  ;;  %v5288_v13 = vcombine.high %v5280_v41, %v5280_v41 }
0x1197   :  { %v6017_v46 = vrot.slane %v13817_v0, %v18475_v39  ;;  %v5976_v57 = vrot.slane %v13816_v53, %v18475_v39  ;;  %v6050_v47 = vrot.slane %v6036_v11, %v18475_v39  ;;  %v5329_v53 = vrot.slane %v5315_v58, %v18475_v39 }
0x1198   :  { %v5649_v6 = vpop.permute.xlu1 %5648  ;;  %v5647_v3 = vpop.permute.xlu0 %5646  ;;  %v5289_v11 = vcombine.high %v5287_v49, %v5287_v49  ;;  %v5349_v42 = vcombine.low %v5288_v13, %v5287_v49 }
0x1199   :  { %v16201_v25 = vpack.c.bf16 %v6017_v46, %v6017_v46  ;;  %v16203_v43 = vpack.c.bf16 %v5976_v57, %v5976_v57  ;;  %v6051_v20 = vcombine.low %v6043_v21, %v6050_v47  ;;  %v6059_v44 = vcombine.low %v5647_v3, %v5649_v6 }
0x119a   :  { %v5305_v21 = vcombine.high %v5297_v5, %v5297_v5  ;;  %v5347_v3 = vcombine.low %v5339_v45, %v5346_v12  ;;  %v5365_v4 = vcombine.low %v5289_v11, %v5297_v5  ;;  %v5363_v5 = vrot.slane %v5349_v42, %v18475_v39 }
0x119b   :  { %6408 = vrot.lane.b32.xlu1 %v16203_v43, %s14198_s21  ;;  %6474 = vrot.lane.b32.xlu0 %v16201_v25, %s14198_s21  ;;  %v16211_v37 = vpack.c.bf16 %v6051_v20, %v6034_v19  ;;  %v6067_v46 = vrot.slane %v6059_v44, %v18475_v39  ;;  %v5330_v19 = vcombine.low %v5322_v7, %v5329_v53 }
0x119c   :  { %v5653_v15 = vpop.permute.xlu1 %5652  ;;  %v5651_v40 = vpop.permute.xlu0 %5650  ;;  %v5366_v10 = vcombine.low %v5305_v21, %v5304_v14 }
0x119d   :  { %v6060_v16 = vcombine.low %v5651_v40, %v5653_v15 }
0x119e   :  { %v5380_v58 = vrot.slane %v5366_v10, %v18475_v39 }
0x119f   :  { %6538 = vrot.lane.b32.xlu1 %v16211_v37, %s14198_s21  ;;  %v6074_v18 = vrot.slane %v6060_v16, %v18475_v39  ;;  %v5373_v16 = vrot.slane %v5365_v4, %v18475_v39 }
0x11a0   :  { %v5657_v8 = vpop.permute.xlu1 %5656  ;;  %v5655_v31 = vpop.permute.xlu0 %5654 }
0x11a1   :  { %v6076_v32 = vcombine.low %v5655_v31, %v5657_v8  ;;  %v6075_v24 = vcombine.low %v6067_v46, %v6074_v18  ;;  %v5395_v8 = vpack.c.bf16 %v5347_v3, %v5330_v19  ;;  %v5348_v31 = vcombine.low %v5272_v48, %v5280_v41 }
0x11a2   :  { %v5381_v27 = vcombine.low %v5373_v16, %v5380_v58  ;;  %v5306_v41 = vcombine.high %v5304_v14, %v5304_v14 }
0x11a3   :  { %v6084_v57 = vrot.slane %v6076_v32, %v18475_v39  ;;  %v5356_v32 = vrot.slane %v5348_v31, %v18475_v39 }
0x11a4   :  { %v5661_v63 = vpop.permute.xlu1 %5660  ;;  %v5659_v51 = vpop.permute.xlu0 %5658 }
0x11a5   :  { %v6077_v0 = vcombine.low %v5659_v51, %v5661_v63  ;;  %v5313_v51 = vrot.slane %v15947_v9, %v18475_v39  ;;  %v5364_v12 = vcombine.low %v5356_v32, %v5363_v5 }
0x11a7   :  { %v6091_v47 = vrot.slane %v6077_v0, %v18475_v39  ;;  %v5396_v53 = vpack.c.bf16 %v5381_v27, %v5364_v12  ;;  %v5382_v11 = vcombine.low %v5306_v41, %v5313_v51 }
0x11a8   :  { %v5401_v23 = vpop.permute.xlu1 %5400  ;;  %v5645_v6 = vpop.permute.xlu0 %5644 }
0x11a9   :  { %v6092_v20 = vcombine.low %v6084_v57, %v6091_v47  ;;  %v6058_v26 = vrot.slane %v5645_v6, %v18475_v39  ;;  %13338 = vmatpush3.bf16.msra.mxu0 %v5401_v23  ;;  %v5389_v46 = vrot.slane %v5382_v11, %v18475_v39 }
0x11aa   :  { %13339 = vmatprep.subr.bf16.mxu0 %v18471_v61 }
0x11ab   :  { %v16235_v15 = vpack.c.bf16 %v6058_v26, %v6058_v26  ;;  %v16237_v40 = vpack.c.bf16 %v6092_v20, %v6075_v24  ;;  %v5397_v7 = vpack.c.bf16 %v5389_v46, %v5389_v46 }
0x11ac   :  { %v6143_v29 = vpop.permute.xlu1 %6142  ;;  %v5403_v59 = vpop.permute.xlu0 %5402 }
0x11ad   :  { %13340 = vmatpush3.bf16.msra.mxu0 %v5403_v59  ;;  %13747 = vmatprep.subr.msk.bf16.mxu1 %vm1081_vm8, %v6143_v29  ;;  %v6153_v33 = vsel %vm1081_vm8, %v6143_v29, 0 }
0x11ae   :  { %6540 = vrot.lane.b32.xlu1 %v16235_v15, %s14198_s21  ;;  %6604 = vrot.lane.b32.xlu0 %v16237_v40, %s14198_s21 }
0x11af   :  { %13354 = vmatpush3.bf16.xpose.msra.mxu1 %v6153_v33 }
0x11b0   :  { %v6145_v55 = vpop.permute.xlu1 %6144  ;;  %13342 = vmatmul.mubr.msk.bf16.vlgmr.msra.gmra.mrb[116].mxu0 %vm434_vm7, %v5395_v8  ;;  %v5663_v49 = vpop.permute.xlu0 %5662 }
0x11b1   :  { %v6099_v44 = vrot.slane %v5663_v49, %v18475_v39  ;;  %13748 = vmatprep.subr.msk.bf16.mxu1 %vm1081_vm8, %v6145_v55  ;;  %13345 = vmatprep.mubr.msk.bf16.mxu0 %vm14191_vm0, %v18471_v61  ;;  %v6156_v0 = vsel %vm1081_vm8, %v6145_v55, 0 }
0x11b3   :  { %v16256_v63 = vpack.c.bf16 %v6099_v44, %v6099_v44 }
0x11b4   :  { %v6209_v45 = vpop.permute.xlu0 %6208  ;;  %v6275_v14 = vpop.permute.xlu1 %6274 }
0x11b5   :  { %13749 = vmatprep.subr.msk.bf16.mxu0 %vm1081_vm8, %v6209_v45  ;;  %6606 = vrot.lane.b32.xlu1 %v16256_v63, %s14198_s21  ;;  %v6219_v18 = vsel %vm1081_vm8, %v6209_v45, 0  ;;  %v6285_v47 = vsel %vm1081_vm8, %v6275_v14, 0 }
0x11b6   :  { %13362 = vmatpush3.bf16.xpose.msra.mxu0 %v6219_v18 }
0x11b7   :  { %13356 = vmatpush3.bf16.xpose.msra.mxu1 %v6156_v0 }
0x11b8   :  { %13751 = vmatprep.subr.msk.bf16.mxu1 %vm1081_vm8, %v6275_v14  ;;  %13346 = vmatmul.mubr.msk.bf16.gmra.mrb[120].mxu0 %vm434_vm7, %v5396_v53  ;;  %v6211_v21 = vpop.permute.xlu0 %6210 }
0x11b9   :  { %13750 = vmatprep.subr.msk.bf16.mxu0 %vm1081_vm8, %v6211_v21  ;;  %13349 = vmatprep.mubr.msk.bf16.mxu0 %vm14191_vm0, %v18471_v61  ;;  %v6222_v57 = vsel %vm1081_vm8, %v6211_v21, 0 }
0x11ba   :  { %5407 = vrot.lane.b32.xlu1 %v15972_v35, %s14197_s19 }
0x11be   :  { %13358 = vmatmul.mubr.msk.bf16.vlgmr.msra.gmra.mrb[132].mxu1 %vm1081_vm8, %v16130_v17  ;;  %13364 = vmatpush3.bf16.xpose.msra.mxu0 %v6222_v57 }
0x11bf   :  { %13370 = vmatpush3.bf16.xpose.msra.mxu1 %v6285_v47  ;;  %13373 = vmatprep.mubr.msk.bf16.mxu1 %vm1081_vm8, %v16135_v2 }
0x11c0   :  { %13350 = vmatmul.mubr.msk.bf16.gmra.mrb[124].mxu0 %vm434_vm7, %v5397_v7 }
0x11c1   :  { %13365 = vmatprep.mubr.msk.bf16.mxu0 %vm1081_vm8, %v16070_v28 }
0x11c8   :  { %13366 = vmatmul.mubr.msk.bf16.vlgmr.msra.gmra.mrb[128].mxu0 %vm1081_vm8, %v16142_v22 }
0x11c9   :  { %13381 = vmatprep.mubr.msk.bf16.mxu0 %vm1081_vm8, %v16161_v38 }
0x11ff   :  { %v6341_v35 = vpop.permute.xlu0 %6340 }
0x1200   :  { %13753 = vmatprep.subr.msk.bf16.mxu0 %vm1081_vm8, %v6341_v35  ;;  %v6351_v17 = vsel %vm1081_vm8, %v6341_v35, 0 }
0x1201   :  { %v6277_v13 = vpop.permute.xlu1 %6276  ;;  %13378 = vmatpush3.bf16.xpose.msra.mxu0 %v6351_v17 }
0x1202   :  { %13752 = vmatprep.subr.msk.bf16.mxu1 %vm1081_vm8, %v6277_v13  ;;  %v6288_v2 = vsel %vm1081_vm8, %v6277_v13, 0 }
0x1203   :  { %13372 = vmatpush3.bf16.xpose.msra.mxu1 %v6288_v2  ;;  %v6343_v23 = vpop.permute.xlu0 %6342 }
0x1204   :  { %13754 = vmatprep.subr.msk.bf16.mxu0 %vm1081_vm8, %v6343_v23  ;;  %v6354_v22 = vsel %vm1081_vm8, %v6343_v23, 0 }
0x1205   :  { %v6407_v28 = vpop.permute.xlu1 %6406 }
0x1206   :  { %13755 = vmatprep.subr.msk.bf16.mxu1 %vm1081_vm8, %v6407_v28  ;;  %v6417_v6 = vsel %vm1081_vm8, %v6407_v28, 0 }
0x1207   :  { %v6473_v38 = vpop.permute.xlu0 %6472 }
0x1208   :  { %v6483_v24 = vsel %vm1081_vm8, %v6473_v38, 0 }
0x1209   :  { %13380 = vmatpush3.bf16.xpose.msra.mxu0 %v6354_v22 }
0x120a   :  { %13374 = vmatmul.mubr.msk.bf16.vlgmr.msra.gmra.mrb[136].mxu1 %vm1081_vm8, %v16166_v34  ;;  %13757 = vmatprep.subr.msk.bf16.mxu0 %vm1081_vm8, %v6473_v38 }
0x120b   :  { %13386 = vmatpush3.bf16.xpose.msra.mxu1 %v6417_v6  ;;  %13389 = vmatprep.mubr.msk.bf16.mxu1 %vm1081_vm8, %v16177_v56 }
0x120d   :  { %v6409_v3 = vpop.permute.xlu1 %6408  ;;  %v6475_v20 = vpop.permute.xlu0 %6474 }
0x120e   :  { %13756 = vmatprep.subr.msk.bf16.mxu1 %vm1081_vm8, %v6409_v3  ;;  %v6420_v34 = vsel %vm1081_vm8, %v6409_v3, 0  ;;  %v6486_v56 = vsel %vm1081_vm8, %v6475_v20, 0 }
0x1210   :  { %13382 = vmatmul.mubr.msk.bf16.vlgmr.msra.gmra.mrb[132].mxu0 %vm1081_vm8, %v16171_v54 }
0x1211   :  { %13394 = vmatpush3.bf16.xpose.msra.mxu0 %v6483_v24  ;;  %13397 = vmatprep.mubr.msk.bf16.mxu0 %vm1081_vm8, %v16181_v30  ;;  %v6539_v26 = vpop.permute.xlu1 %6538 }
0x1212   :  { %13758 = vmatprep.subr.msk.bf16.mxu0 %vm1081_vm8, %v6475_v20  ;;  %v6549_v54 = vsel %vm1081_vm8, %v6539_v26, 0 }
0x1213   :  { %13388 = vmatpush3.bf16.xpose.msra.mxu1 %v6420_v34 }
0x1214   :  { %13759 = vmatprep.subr.msk.bf16.mxu1 %vm1081_vm8, %v6539_v26 }
0x1219   :  { %13396 = vmatpush3.bf16.xpose.msra.mxu0 %v6486_v56 }
0x121a   :  { %13390 = vmatmul.mubr.msk.bf16.vlgmr.msra.gmra.mrb[140].mxu1 %vm1081_vm8, %v16203_v43 }
0x121b   :  { %13402 = vmatpush3.bf16.xpose.msra.mxu1 %v6549_v54  ;;  %13405 = vmatprep.mubr.msk.bf16.mxu1 %vm1081_vm8, %v16211_v37 }
0x1220   :  { %v6541_v30 = vpop.permute.xlu1 %6540  ;;  %v6605_v19 = vpop.permute.xlu0 %6604  ;;  %13398 = vmatmul.mubr.msk.bf16.vlgmr.msra.gmra.mrb[136].mxu0 %vm1081_vm8, %v16201_v25 }
0x1221   :  { %13760 = vmatprep.subr.msk.bf16.mxu1 %vm1081_vm8, %v6541_v30  ;;  %13761 = vmatprep.subr.msk.bf16.mxu0 %vm1081_vm8, %v6605_v19  ;;  %v6615_v4 = vsel %vm1081_vm8, %v6605_v19, 0  ;;  %v6552_v43 = vsel %vm1081_vm8, %v6541_v30, 0 }
0x1222   :  { %13410 = vmatpush3.bf16.xpose.msra.mxu0 %v6615_v4  ;;  %13413 = vmatprep.mubr.msk.bf16.mxu0 %vm1081_vm8, %v16237_v40 }
0x1223   :  { %13404 = vmatpush3.bf16.xpose.msra.mxu1 %v6552_v43 }
0x1227   :  { %v6607_v10 = vpop.permute.xlu1 %6606 }
0x1228   :  { %13762 = vmatprep.subr.msk.bf16.mxu0 %vm1081_vm8, %v6607_v10  ;;  %v6618_v37 = vsel %vm1081_vm8, %v6607_v10, 0 }
0x122a   :  { %13412 = vmatpush3.bf16.xpose.msra.mxu0 %v6618_v37  ;;  %13406 = vmatmul.mubr.msk.bf16.vlgmr.msra.gmra.mrb[144].mxu1 %vm1081_vm8, %v16235_v15 }
0x122c   :  { %v5408_v25 = vpop.permute.xlu1 %5407 }
0x1231   :  { %13414 = vmatmul.mubr.msk.bf16.vlgmr.msra.gmra.mrb[140].mxu0 %vm1081_vm8, %v16256_v63 }
0x1283   :  { %v5453_v48 = vpop.f32.mrb[116].mxu0 }
0x1284   :  { %v5454_v29 = vadd.f32 %v5453_v48, %v5408_v25  ;;  %v13343_v59 = vpop.f32.mrb[117].mxu0 }
0x1285   :  { %v5456_v40 = vpop.f32.mrb[118].mxu0 }
0x1286   :  { %v5480_v42 = vcombine.high %v5454_v29, %v5454_v29  ;;  %v5457_v33 = vadd.f32 %v5456_v40, %v5408_v25  ;;  %v13344_v8 = vpop.f32.mrb[119].mxu0  ;;  %v16329_v31 = vrot.slane %v5454_v29, %v18475_v39 }
0x1288   :  { %v16332_v16 = vrot.slane %v5480_v42, %v18475_v39  ;;  %v5497_v58 = vcombine.high %v5457_v33, %v5457_v33  ;;  %v16335_v15 = vrot.slane %v5457_v33, %v18475_v39  ;;  %5664 = vrot.lane.b32.xlu0 %v16329_v31, %s14195_s17  ;;  %v16341_v55 = vcombine.high %v16329_v31, %v16329_v31 }
0x128a   :  { %v16344_v49 = vrot.slane %v5497_v58, %v18475_v39  ;;  %5666 = vrot.lane.b32.xlu1 %v16341_v55, %s14195_s17  ;;  %v16350_v5 = vcombine.high %v16332_v16, %v16332_v16  ;;  %v16354_v44 = vcombine.high %v16335_v15, %v16335_v15  ;;  %v6974_v12 = vcombine.low %v16329_v31, %v16341_v55 }
0x128b   :  { %v5461_v32 = vpop.f32.mrb[120].mxu0 }
0x128c   :  { %v5462_v27 = vadd.f32 %v5461_v32, %v5408_v25  ;;  %v13347_v41 = vpop.f32.mrb[121].mxu0  ;;  %5670 = vrot.lane.b32.xlu0 %v16350_v5, %s14195_s17  ;;  %v16360_v63 = vcombine.high %v16344_v49, %v16344_v49  ;;  %v6975_v51 = vcombine.low %v16332_v16, %v16350_v5  ;;  %v6991_v18 = vcombine.low %v16335_v15, %v16354_v44 }
0x128d   :  { %v5464_v45 = vpop.f32.mrb[122].mxu0  ;;  %v6982_v17 = vrot.slane %v6974_v12, %v18475_v39 }
0x128e   :  { %v5514_v0 = vcombine.high %v5462_v27, %v5462_v27  ;;  %v16369_v53 = vrot.slane %v5462_v27, %v18475_v39  ;;  %v5465_v11 = vadd.f32 %v5464_v45, %v5408_v25  ;;  %v13348_v14 = vpop.f32.mrb[123].mxu0  ;;  %5668 = vrot.lane.b32.xlu1 %v16332_v16, %s14195_s17  ;;  %v6989_v21 = vrot.slane %v6975_v51, %v18475_v39 }
0x128f   :  { %v6992_v46 = vcombine.low %v16344_v49, %v16360_v63  ;;  %v6999_v13 = vrot.slane %v6991_v18, %v18475_v39 }
0x1290   :  { %v16377_v57 = vrot.slane %v5514_v0, %v18475_v39  ;;  %v5531_v47 = vcombine.high %v5465_v11, %v5465_v11  ;;  %v16380_v7 = vrot.slane %v5465_v11, %v18475_v39  ;;  %5674 = vrot.lane.b32.xlu0 %v16354_v44, %s14195_s17  ;;  %v16391_v23 = vcombine.high %v16369_v53, %v16369_v53 }
0x1291   :  { %v16384_v35 = vpop.f32.mrb[132].mxu1  ;;  %v7006_v2 = vrot.slane %v6992_v46, %v18475_v39  ;;  %v6990_v20 = vcombine.low %v6982_v17, %v6989_v21  ;;  %v7014_v26 = vrot.slane %v16369_v53, %v18475_v39 }
0x1292   :  { %v16395_v28 = vcombine.high %v16377_v57, %v16377_v57  ;;  %v16398_v22 = vrot.slane %v5531_v47, %v18475_v39  ;;  %v16402_v38 = vcombine.high %v16380_v7, %v16380_v7  ;;  %v16404_v6 = vpop.f32.mrb[133].mxu1  ;;  %5672 = vrot.lane.b32.xlu1 %v16335_v15, %s14195_s17 }
0x1293   :  { %v13360_v3 = vpop.f32.mrb[134].mxu1  ;;  %v5469_v24 = vpop.f32.mrb[124].mxu0  ;;  %v7007_v34 = vcombine.low %v6999_v13, %v7006_v2  ;;  %v7327_v59 = vpack.c.bf16 %v7014_v26, %v7014_v26 }
0x1294   :  { %v5470_v56 = vadd.f32 %v5469_v24, %v5408_v25  ;;  %v16410_v54 = vpop.f32.mrb[135].mxu1  ;;  %v13351_v30 = vpop.f32.mrb[125].mxu0  ;;  %5678 = vrot.lane.b32.xlu0 %v16360_v63, %s14195_s17  ;;  %v7016_v19 = vcombine.low %v16395_v28, %v16380_v7  ;;  %v16418_v10 = vcombine.high %v16398_v22, %v16398_v22  ;;  %v7015_v25 = vcombine.low %v16391_v23, %v16377_v57 }
0x1295   :  { %v5472_v4 = vpop.f32.mrb[126].mxu0  ;;  %v7326_v43 = vpack.c.bf16 %v7007_v34, %v6990_v20  ;;  %v7032_v29 = vcombine.low %v16402_v38, %v16398_v22  ;;  %v7349_v51 = vsel %vm279_vm5, %v7327_v59, 0  ;;  %v16545_v30 = vmul.f32 0.35355338, %v16404_v6 }
0x1296   :  { %v16421_v37 = vrot.slane %v5470_v56, %v18475_v39  ;;  %v13352_v48 = vpop.f32.mrb[127].mxu0  ;;  %5676 = vrot.lane.b32.xlu1 %v16344_v49, %s14195_s17  ;;  %v7030_v42 = vrot.slane %v7016_v19, %v18475_v39  ;;  %v7023_v58 = vrot.slane %v7015_v25, %v18475_v39 }
0x1297   :  { %13417 = vmatprep.subr.bf16.mxu1 %v7326_v43  ;;  %v7040_v32 = vrot.slane %v7032_v29, %v18475_v39  ;;  %v16554_v29 = vmul.f32 0.35355338, %v16410_v54 }
0x1298   :  { %v16431_v40 = vcombine.high %v16421_v37, %v16421_v37  ;;  %13418 = vmatpush3.bf16.msra.mxu1 %v7326_v43  ;;  %v7033_v33 = vcombine.low %v16418_v10, %v16421_v37  ;;  %v7031_v12 = vcombine.low %v7023_v58, %v7030_v42  ;;  %v6693_v42 = vsel %vm6692_vm3, %v16545_v30, -inf }
0x1299   :  { %13763 = vmatprep.subr.msk.bf16.mxu1 %vm279_vm5, %v7327_v59  ;;  %v6696_v54 = vsel %vm6692_vm3, %v16554_v29, -inf }
0x129a   :  { %5700 = vrot.lane.b32.xlu1 %v16329_v31, %s14194_s7  ;;  %v13818_v8 = vpack.i.bf16 %v16431_v40, %v16369_v53  ;;  %v7047_v27 = vrot.slane %v7033_v33, %v18475_v39  ;;  %v7055_v0 = vrot.slane %v16431_v40, %v18475_v39 }
0x129b   :  { %v16444_v41 = vpop.f32.mrb[128].mxu0 }
0x129c   :  { %13420 = vmatpush3.bf16.msra.mxu1 %v7349_v51  ;;  %13819 = vrot.lane.b32.xlu0 %v13818_v8, %s14195_s17  ;;  %v16448_v45 = vpop.f32.mrb[129].mxu0  ;;  %v7048_v18 = vcombine.low %v7040_v32, %v7047_v27  ;;  %v7329_v46 = vpack.c.bf16 %v7055_v0, %v7055_v0  ;;  %v16564_v58 = vmul.f32 0.35355338, %v16444_v41 }
0x129d   :  { %v13368_v11 = vpop.f32.mrb[130].mxu0 }
0x129e   :  { %5702 = vrot.lane.b32.xlu1 %v16341_v55, %s14194_s7  ;;  %v16454_v14 = vpop.f32.mrb[131].mxu0  ;;  %v7328_v21 = vpack.c.bf16 %v7048_v18, %v7031_v12  ;;  %v7406_v47 = vsel %vm279_vm5, %v7329_v46, 0 }
0x129f   :  { %v16557_v59 = vmul.f32 0.35355338, %v16454_v14 }
0x12a0   :  { %5704 = vrot.lane.b32.xlu0 %v16332_v16, %s14194_s7  ;;  %13425 = vmatprep.subr.bf16.mxu0 %v7328_v21 }
0x12a1   :  { %13426 = vmatpush3.bf16.msra.mxu0 %v7328_v21  ;;  %v6706_v18 = vsel %vm6692_vm3, %v16557_v59, -inf }
0x12a2   :  { %5706 = vrot.lane.b32.xlu1 %v16350_v5, %s14194_s7  ;;  %13764 = vmatprep.subr.msk.bf16.mxu0 %vm279_vm5, %v7329_v46  ;;  %v16577_v46 = vmul.f32 0.35355338, %v16448_v45 }
0x12a4   :  { %5708 = vrot.lane.b32.xlu0 %v16335_v15, %s14194_s7 }
0x12a5   :  { %13428 = vmatpush3.bf16.msra.mxu0 %v7406_v47 }
0x12a6   :  { %5710 = vrot.lane.b32.xlu1 %v16354_v44, %s14194_s7 }
0x12a8   :  { %5712 = vrot.lane.b32.xlu0 %v16344_v49, %s14194_s7 }
0x12aa   :  { %5714 = vrot.lane.b32.xlu1 %v16360_v63, %s14194_s7 }
0x12ac   :  { %5682 = vrot.lane.b32.xlu0 %v16391_v23, %s14195_s17 }
0x12ae   :  { %5684 = vrot.lane.b32.xlu1 %v16377_v57, %s14195_s17 }
0x12b0   :  { %5686 = vrot.lane.b32.xlu0 %v16395_v28, %s14195_s17 }
0x12b2   :  { %5688 = vrot.lane.b32.xlu1 %v16380_v7, %s14195_s17 }
0x12b4   :  { %5690 = vrot.lane.b32.xlu0 %v16402_v38, %s14195_s17 }
0x12b6   :  { %5692 = vrot.lane.b32.xlu1 %v16398_v22, %s14195_s17 }
0x12b8   :  { %5694 = vrot.lane.b32.xlu0 %v16418_v10, %s14195_s17 }
0x12ba   :  { %5696 = vrot.lane.b32.xlu1 %v16421_v37, %s14195_s17 }
0x12bc   :  { %13824 = vrot.lane.b32.xlu0 %v13818_v8, %s14194_s7 }
0x12be   :  { %5736 = vrot.lane.b32.xlu1 %v16329_v31, %s14196_s18 }
0x12c0   :  { %5740 = vrot.lane.b32.xlu0 %v16332_v16, %s14196_s18 }
0x12c2   :  { %5738 = vrot.lane.b32.xlu1 %v16341_v55, %s14196_s18 }
0x12c4   :  { %5744 = vrot.lane.b32.xlu0 %v16335_v15, %s14196_s18 }
0x12c6   :  { %5742 = vrot.lane.b32.xlu1 %v16350_v5, %s14196_s18 }
0x12c8   :  { %5748 = vrot.lane.b32.xlu0 %v16344_v49, %s14196_s18 }
0x12ca   :  { %5746 = vrot.lane.b32.xlu1 %v16354_v44, %s14196_s18 }
0x12cc   :  { %5718 = vrot.lane.b32.xlu0 %v16391_v23, %s14194_s7 }
0x12ce   :  { %5750 = vrot.lane.b32.xlu1 %v16360_v63, %s14196_s18 }
0x12d0   :  { %5722 = vrot.lane.b32.xlu0 %v16395_v28, %s14194_s7 }
0x12d2   :  { %5720 = vrot.lane.b32.xlu1 %v16377_v57, %s14194_s7 }
0x12d4   :  { %5726 = vrot.lane.b32.xlu0 %v16402_v38, %s14194_s7 }
0x12d6   :  { %5724 = vrot.lane.b32.xlu1 %v16380_v7, %s14194_s7 }
0x12d8   :  { %5730 = vrot.lane.b32.xlu0 %v16418_v10, %s14194_s7 }
0x12da   :  { %5728 = vrot.lane.b32.xlu1 %v16398_v22, %s14194_s7 }
0x12dc   :  { %5752 = vrot.lane.b32.xlu0 %v16369_v53, %s14196_s18 }
0x12dd   :  { %v13375_v31 = vpop.f32.mrb[136].mxu1 }
0x12de   :  { %5732 = vrot.lane.b32.xlu1 %v16421_v37, %s14194_s7  ;;  %v6324_v16 = vpop.f32.mrb[137].mxu1  ;;  %v16570_v51 = vmul.f32 0.35355338, %v13375_v31  ;;  %v6709_v31 = vsel %vm6699_vm1, %v16564_v58, -inf }
0x12df   :  { %v13376_v15 = vpop.f32.mrb[138].mxu1 }
0x12e0   :  { %5756 = vrot.lane.b32.xlu0 %v16377_v57, %s14196_s18  ;;  %v6327_v55 = vpop.f32.mrb[139].mxu1 }
0x12e2   :  { %5754 = vrot.lane.b32.xlu1 %v16391_v23, %s14196_s18  ;;  %v16540_v23 = vmul.f32 0.35355338, %v16384_v35 }
0x12e3   :  { %v16525_v49 = vpop.f32.mrb[132].mxu0 }
0x12e4   :  { %v16527_v5 = vpop.f32.mrb[133].mxu0  ;;  %v6700_v43 = vsel %vm6699_vm1, %v16540_v23, -inf }
0x12e5   :  { %v13384_v44 = vpop.f32.mrb[134].mxu0 }
0x12e6   :  { %v16529_v63 = vpop.f32.mrb[135].mxu0  ;;  %v16582_v44 = vmul.f32 0.35355338, %v6324_v16  ;;  %v6703_v16 = vsel %vm6692_vm3, %v16577_v46, -inf }
0x12ed   :  { %v13391_v53 = vpop.f32.mrb[140].mxu1 }
0x12ee   :  { %v16531_v17 = vpop.f32.mrb[141].mxu1 }
0x12ef   :  { %v13392_v13 = vpop.f32.mrb[142].mxu1 }
0x12f0   :  { %v6459_v2 = vpop.f32.mrb[143].mxu1  ;;  %v6718_v13 = vsel %vm6699_vm1, %v16570_v51, -inf }
0x12f3   :  { %v16533_v3 = vpop.f32.mrb[136].mxu0 }
0x12f4   :  { %v16535_v24 = vpop.f32.mrb[137].mxu0 }
0x12f5   :  { %v13400_v57 = vpop.f32.mrb[138].mxu0 }
0x12f6   :  { %v16537_v20 = vpop.f32.mrb[139].mxu0 }
0x12fa   :  { %v5665_v34 = vpop.permute.xlu0 %5664 }
0x12fc   :  { %v5667_v26 = vpop.permute.xlu1 %5666 }
0x12fd   :  { %v16542_v56 = vpop.f32.mrb[144].mxu1  ;;  %v7056_v0 = vcombine.low %v5665_v34, %v5667_v26 }
0x12fe   :  { %v5671_v19 = vpop.permute.xlu0 %5670  ;;  %v16547_v4 = vpop.f32.mrb[145].mxu1 }
0x12ff   :  { %6701 = vmax.xlane.f32.xlu0 %v6700_v43  ;;  %v13408_v48 = vpop.f32.mrb[146].mxu1  ;;  %v7064_v57 = vrot.slane %v7056_v0, %v18475_v39 }
0x1300   :  { %v5669_v25 = vpop.permute.xlu1 %5668  ;;  %v16551_v35 = vpop.f32.mrb[147].mxu1 }
0x1301   :  { %v7057_v32 = vcombine.low %v5669_v25, %v5671_v19  ;;  %v16591_v19 = vmul.f32 0.35355338, %v6327_v55  ;;  %v16595_v25 = vmul.f32 0.35355338, %v13391_v53  ;;  %v16605_v55 = vmul.f32 0.35355338, %v6459_v2 }
0x1302   :  { %v5675_v6 = vpop.permute.xlu0 %5674  ;;  %v16611_v53 = vmul.f32 0.35355338, %v16531_v17  ;;  %v16620_v2 = vmul.f32 0.35355338, %v16525_v49 }
0x1303   :  { %6694 = vmax.xlane.f32.xlu0 %v6693_v42  ;;  %v7071_v47 = vrot.slane %v7057_v32, %v18475_v39  ;;  %v6712_v42 = vsel %vm6692_vm3, %v16582_v44, -inf }
0x1304   :  { %v16561_v33 = vpop.f32.mrb[140].mxu0  ;;  %v5673_v8 = vpop.permute.xlu1 %5672  ;;  %v6727_v49 = vsel %vm6699_vm1, %v16620_v2, -inf }
0x1305   :  { %v16566_v27 = vpop.f32.mrb[141].mxu0  ;;  %v7073_v11 = vcombine.low %v5673_v8, %v5675_v6  ;;  %v7072_v43 = vcombine.low %v7064_v57, %v7071_v47 }
0x1306   :  { %v13416_v12 = vpop.f32.mrb[142].mxu0  ;;  %6697 = vmax.xlane.f32.xlu1 %v6696_v54  ;;  %v5679_v41 = vpop.permute.xlu0 %5678  ;;  %v6715_v54 = vsel %vm6692_vm3, %v16591_v19, -inf }
0x1307   :  { %v16574_v14 = vpop.f32.mrb[143].mxu0  ;;  %6707 = vmax.xlane.f32.xlu0 %v6706_v18  ;;  %v7081_v34 = vrot.slane %v7073_v11, %v18475_v39  ;;  %v6736_v18 = vsel %vm6699_vm1, %v16595_v25, -inf  ;;  %v6733_v11 = vsel %vm6692_vm3, %v16605_v55, -inf }
0x1308   :  { %v5677_v21 = vpop.permute.xlu1 %5676 }
0x1309   :  { %v7074_v15 = vcombine.low %v5677_v21, %v5679_v41  ;;  %v16625_v41 = vmul.f32 0.35355338, %v16529_v63  ;;  %v6730_v21 = vsel %vm6692_vm3, %v16611_v53, -inf }
0x130a   :  { %6710 = vmax.xlane.f32.xlu1 %v6709_v31  ;;  %v16639_v31 = vmul.f32 0.35355338, %v16542_v56 }
0x130b   :  { %v7088_v26 = vrot.slane %v7074_v15, %v18475_v39  ;;  %6719 = vmax.xlane.f32.xlu0 %v6718_v13  ;;  %v16634_v15 = vmul.f32 0.35355338, %v16527_v5  ;;  %v6724_v13 = vsel %vm6692_vm3, %v16625_v41, -inf }
0x130c   :  { %v16589_v45 = vpop.permute.xlu1 %5700 }
0x130d   :  { %v7089_v48 = vcombine.low %v7081_v34, %v7088_v26  ;;  %v16648_v34 = vmul.f32 0.35355338, %v16551_v35  ;;  %v6721_v5 = vsel %vm6692_vm3, %v16634_v15, -inf  ;;  %v16653_v26 = vmul.f32 0.35355338, %v16547_v4 }
0x130e   :  { %v16597_v6 = vpop.permute.xlu0 %13819  ;;  %6704 = vmax.xlane.f32.xlu1 %v6703_v16  ;;  %v16658_v16 = vmul.f32 0.35355338, %v16533_v3 }
0x130f   :  { %6713 = vmax.xlane.f32.xlu0 %v6712_v42  ;;  %v16601_v8 = vpack.c.bf16 %v7089_v48, %v7072_v43  ;;  %v6754_v43 = vsel %vm6699_vm1, %v16639_v31, -inf  ;;  %v6751_v35 = vsel %vm6692_vm3, %v16648_v34, -inf }
0x1310   :  { %v16603_v32 = vpop.permute.xlu1 %5702 }
0x1311   :  { %13433 = vmatprep.subr.bf16.mxu1 %v16601_v8 }
0x1312   :  { %v16613_v12 = vpop.permute.xlu0 %5704  ;;  %6716 = vmax.xlane.f32.xlu1 %v6715_v54  ;;  %v6748_v54 = vsel %vm6692_vm3, %v16653_v26, -inf }
0x1313   :  { %6737 = vmax.xlane.f32.xlu0 %v6736_v18  ;;  %v16665_v18 = vmul.f32 0.35355338, %v16535_v24 }
0x1314   :  { %v16617_v0 = vpop.permute.xlu1 %5706 }
0x1316   :  { %v16627_v17 = vpop.permute.xlu0 %5708  ;;  %6734 = vmax.xlane.f32.xlu1 %v6733_v11  ;;  %v6745_v11 = vsel %vm6699_vm1, %v16658_v16, -inf }
0x1317   :  { %6731 = vmax.xlane.f32.xlu0 %v6730_v21 }
0x1318   :  { %v16631_v47 = vpop.permute.xlu1 %5710 }
0x131a   :  { %v16641_v63 = vpop.permute.xlu0 %5712  ;;  %6728 = vmax.xlane.f32.xlu1 %v6727_v49 }
0x131b   :  { %6725 = vmax.xlane.f32.xlu0 %v6724_v13  ;;  %v6739_v13 = vsel %vm6692_vm3, %v16665_v18, -inf }
0x131c   :  { %v16645_v57 = vpop.permute.xlu1 %5714 }
0x131e   :  { %v5683_v56 = vpop.permute.xlu0 %5682  ;;  %6722 = vmax.xlane.f32.xlu1 %v6721_v5 }
0x131f   :  { %6755 = vmax.xlane.f32.xlu0 %v6754_v43 }
0x1320   :  { %v5685_v48 = vpop.permute.xlu1 %5684 }
0x1321   :  { %v7097_v5 = vcombine.low %v5683_v56, %v5685_v48 }
0x1322   :  { %v5687_v42 = vpop.permute.xlu0 %5686  ;;  %6752 = vmax.xlane.f32.xlu1 %v6751_v35 }
0x1323   :  { %6749 = vmax.xlane.f32.xlu0 %v6748_v54  ;;  %v7105_v24 = vrot.slane %v7097_v5, %v18475_v39 }
0x1324   :  { %v5689_v4 = vpop.permute.xlu1 %5688 }
0x1325   :  { %v7098_v49 = vcombine.low %v5687_v42, %v5689_v4 }
0x1326   :  { %v5691_v21 = vpop.permute.xlu0 %5690  ;;  %6746 = vmax.xlane.f32.xlu1 %v6745_v11 }
0x1327   :  { %v7112_v54 = vrot.slane %v7098_v49, %v18475_v39 }
0x1328   :  { %v5693_v3 = vpop.permute.xlu1 %5692 }
0x1329   :  { %v7114_v43 = vcombine.low %v5691_v21, %v5693_v3  ;;  %v7113_v11 = vcombine.low %v7105_v24, %v7112_v54 }
0x132a   :  { %6740 = vmax.xlane.f32.xlu1 %v6739_v13  ;;  %v5695_v35 = vpop.permute.xlu0 %5694 }
0x132b   :  { %v7122_v1 = vrot.slane %v7114_v43, %v18475_v39 }
0x132c   :  { %v5697_v50 = vpop.permute.xlu1 %5696 }
0x132d   :  { %v7115_v9 = vcombine.low %v5695_v35, %v5697_v50  ;;  %v16685_v50 = vmul.f32 0.35355338, %v16537_v20 }
0x132e   :  { %v16682_v56 = vpop.permute.xlu0 %13824 }
0x132f   :  { %v7129_v62 = vrot.slane %v7115_v9, %v18475_v39  ;;  %18482 = vst [vmem:[#allocation18_spill] sm:$0xff] %v16682_v56  ;;  %v6742_v9 = vsel %vm6692_vm3, %v16685_v50, -inf }
0x1331   :  { %v7130_v52 = vcombine.low %v7122_v1, %v7129_v62  ;;  %v16694_v62 = vmul.f32 0.35355338, %v16574_v14 }
0x1332   :  { %v16689_v48 = vpop.permute.xlu0 %5740 }
0x1333   :  { %v16675_v42 = vpack.c.bf16 %v7130_v52, %v7113_v11  ;;  %18483 = vst [vmem:[#allocation8_spill] sm:$0xff] %v16689_v48  ;;  %v16691_v52 = vpop.permute.xlu1 %5736 }
0x1334   :  { %18484 = vst [vmem:[#allocation10_spill] sm:$0xff] %v16691_v52 }
0x1335   :  { %18481 = vst [vmem:[#allocation16_spill] sm:$0xff] %v16675_v42  ;;  %13441 = vmatprep.subr.bf16.mxu0 %v16675_v42 }
0x1336   :  { %v16696_v1 = vpop.permute.xlu0 %5744 }
0x1337   :  { %18485 = vst [vmem:[#allocation19_spill] sm:$0xff] %v16696_v1 }
0x1339   :  { %5760 = vrot.lane.b32.xlu0 %v16380_v7, %s14196_s18  ;;  %v6760_v7 = vsel %vm6692_vm3, %v16694_v62, -inf }
0x133a   :  { %v16702_v20 = vpop.permute.xlu0 %5748 }
0x133b   :  { %5758 = vrot.lane.b32.xlu1 %v16395_v28, %s14196_s18  ;;  %v16700_v28 = vpop.permute.xlu1 %5738  ;;  %18487 = vst [vmem:[#allocation21_spill] sm:$0xff] %v16702_v20 }
0x133c   :  { %18486 = vst [vmem:[#allocation20_spill] sm:$0xff] %v16700_v28 }
0x133e   :  { %v16706_v21 = vpop.permute.xlu0 %5718 }
0x133f   :  { %v16704_v4 = vpop.permute.xlu1 %5742  ;;  %18489 = vst [vmem:[#allocation23_spill] sm:$0xff] %v16706_v21 }
0x1340   :  { %18488 = vst [vmem:[#allocation22_spill] sm:$0xff] %v16704_v4 }
0x1342   :  { %v16710_v49 = vpop.permute.xlu0 %5722 }
0x1343   :  { %v16708_v3 = vpop.permute.xlu1 %5746 }
0x1344   :  { %18490 = vst [vmem:[#allocation24_spill] sm:$0xff] %v16708_v3 }
0x1346   :  { %v16718_v13 = vpop.permute.xlu0 %5726 }
0x1347   :  { %v16714_v14 = vpop.permute.xlu1 %5750  ;;  %18492 = vst [vmem:[#allocation26_spill] sm:$0xff] %v16718_v13 }
0x1348   :  { %18491 = vst [vmem:[#allocation25_spill] sm:$0xff] %v16714_v14 }
0x134a   :  { %v16722_v43 = vpop.permute.xlu0 %5730 }
0x134b   :  { %v16720_v5 = vpop.permute.xlu1 %5720 }
0x134c   :  { %18493 = vst [vmem:[#allocation27_spill] sm:$0xff] %v16720_v5 }
0x134e   :  { %v16726_v54 = vpop.permute.xlu0 %5752 }
0x134f   :  { %v16724_v35 = vpop.permute.xlu1 %5724  ;;  %18494 = vst [vmem:[#allocation28_spill] sm:$0xff] %v16726_v54 }
0x1352   :  { %v16730_v11 = vpop.permute.xlu0 %5756 }
0x1353   :  { %v16728_v24 = vpop.permute.xlu1 %5728  ;;  %18496 = vst [vmem:[#allocation30_spill] sm:$0xff] %v16730_v11 }
0x1354   :  { %18495 = vst [vmem:[#allocation29_spill] sm:$0xff] %v16728_v24 }
0x1358   :  { %6743 = vmax.xlane.f32.xlu0 %v6742_v9 }
0x135f   :  { %6761 = vmax.xlane.f32.xlu1 %v6760_v7 }
0x1370   :  { %5762 = vrot.lane.b32.xlu1 %v16402_v38, %s14196_s18  ;;  %v16732_v38 = vpop.permute.xlu1 %5732 }
0x1374   :  { %5766 = vrot.lane.b32.xlu1 %v16418_v10, %s14196_s18  ;;  %v16735_v10 = vpop.permute.xlu1 %5754 }
0x1375   :  { %18497 = vst [vmem:[#allocation31_spill] sm:$0xff] %v16735_v10 }
0x138c   :  { %v6702_v9 = vpop.xlane.xlu0 %6701 }
0x138d   :  { %v6768_v7 = vsub.f32 %v16540_v23, %v6702_v9 }
0x138f   :  { %v6794_v60 = vmul.f32 1.442695, %v6768_v7 }
0x1390   :  { %v6695_v36 = vpop.xlane.xlu0 %6694 }
0x1391   :  { %13966 = vpow2.f32 %v6794_v60  ;;  %v6766_v61 = vsub.f32 %v16545_v30, %v6695_v36 }
0x1393   :  { %v6790_v52 = vmul.f32 1.442695, %v6766_v61  ;;  %v6698_v28 = vpop.xlane.xlu1 %6697 }
0x1394   :  { %v6767_v54 = vsub.f32 %v16554_v29, %v6698_v28  ;;  %v16739_v1 = vpop.xlane.xlu0 %6707 }
0x1395   :  { %13968 = vpow2.f32 %v6790_v52 }
0x1396   :  { %v6792_v11 = vmul.f32 1.442695, %v6767_v54 }
0x1397   :  { %v16741_v3 = vpop.xlane.xlu1 %6710 }
0x1398   :  { %13970 = vpow2.f32 %v6792_v11  ;;  %v16743_v42 = vpop.xlane.xlu0 %6719 }
0x139b   :  { %v16745_v23 = vpop.eup %13966  ;;  %v16747_v9 = vpop.xlane.xlu1 %6704 }
0x139c   :  { %v16749_v60 = vpop.xlane.xlu0 %6713  ;;  %v6844_v61 = vsel %vm6699_vm1, %v16745_v23, 0.0 }
0x139d   :  { %6845 = vadd.xlane.f32.xlu0 %v6844_v61  ;;  %v16767_v61 = vmul.f32 0.35355338, %v16561_v33 }
0x139f   :  { %v16753_v36 = vpop.eup %13968  ;;  %v6717_v30 = vpop.xlane.xlu1 %6716 }
0x13a0   :  { %v6773_v29 = vsub.f32 %v16591_v19, %v6717_v30  ;;  %v16756_v52 = vpop.xlane.xlu0 %6737  ;;  %v6838_v28 = vsel %vm6692_vm3, %v16753_v36, 0.0  ;;  %v16772_v30 = vmul.f32 0.35355338, %v16566_v27 }
0x13a1   :  { %6839 = vadd.xlane.f32.xlu0 %v6838_v28 }
0x13a2   :  { %v16760_v54 = vpop.eup %13970  ;;  %v6804_v11 = vmul.f32 1.442695, %v6773_v29  ;;  %v6763_v29 = vsel %vm6699_vm1, %v16767_v61, -inf }
0x13a3   :  { %v16762_v7 = vpop.xlane.xlu1 %6734  ;;  %v6841_v10 = vsel %vm6692_vm3, %v16760_v54, 0.0 }
0x13a4   :  { %13972 = vpow2.f32 %v6804_v11  ;;  %v16769_v48 = vpop.xlane.xlu0 %6731 }
0x13a5   :  { %6842 = vadd.xlane.f32.xlu0 %v6841_v10  ;;  %v6757_v10 = vsel %vm6692_vm3, %v16772_v30, -inf }
0x13a7   :  { %v6729_v19 = vpop.xlane.xlu1 %6728 }
0x13a8   :  { %v6777_v28 = vsub.f32 %v16620_v2, %v6729_v19  ;;  %v16775_v4 = vpop.xlane.xlu0 %6725 }
0x13a9   :  { %6764 = vmax.xlane.f32.xlu0 %v6763_v29 }
0x13aa   :  { %v6812_v20 = vmul.f32 1.442695, %v6777_v28 }
0x13ab   :  { %v16779_v14 = vpop.xlane.xlu1 %6722 }
0x13ac   :  { %13974 = vpow2.f32 %v6812_v20  ;;  %v16781_v33 = vpop.xlane.xlu0 %6755 }
0x13ad   :  { %6758 = vmax.xlane.f32.xlu0 %v6757_v10 }
0x13ae   :  { %v16785_v27 = vpop.eup %13972 }
0x13af   :  { %18498 = vst [vmem:[#allocation32_spill] sm:$0xff] %v16785_v27  ;;  %v16787_v11 = vpop.xlane.xlu1 %6752  ;;  %v6859_v2 = vsel %vm6692_vm3, %v16785_v27, 0.0 }
0x13b0   :  { %v6750_v19 = vpop.xlane.xlu0 %6749  ;;  %6860 = vadd.xlane.f32.xlu1 %v6859_v2 }
0x13b1   :  { %v6784_v28 = vsub.f32 %v16653_v26, %v6750_v19 }
0x13b3   :  { %v6826_v29 = vmul.f32 1.442695, %v6784_v28  ;;  %v6747_v56 = vpop.xlane.xlu1 %6746 }
0x13b4   :  { %v6783_v20 = vsub.f32 %v16658_v16, %v6747_v56 }
0x13b5   :  { %13976 = vpow2.f32 %v6826_v29  ;;  %v6774_v29 = vsub.f32 %v16570_v51, %v16743_v42  ;;  %v6778_v42 = vsub.f32 %v16611_v53, %v16769_v48  ;;  %v6775_v48 = vsub.f32 %v16634_v15, %v16779_v14 }
0x13b6   :  { %v16793_v21 = vpop.eup %13974  ;;  %v6824_v5 = vmul.f32 1.442695, %v6783_v20  ;;  %v6786_v14 = vsub.f32 %v16639_v31, %v16781_v33 }
0x13b7   :  { %v6741_v10 = vpop.xlane.xlu1 %6740  ;;  %v6871_v13 = vsel %vm6699_vm1, %v16793_v21, 0.0  ;;  %v6806_v20 = vmul.f32 1.442695, %v6774_v29 }
0x13b8   :  { %13978 = vpow2.f32 %v6824_v5  ;;  %v6781_v24 = vsub.f32 %v16665_v18, %v6741_v10  ;;  %6872 = vadd.xlane.f32.xlu1 %v6871_v13  ;;  %v6771_v13 = vsub.f32 %v16564_v58, %v16741_v3  ;;  %v6772_v10 = vsub.f32 %v16582_v44, %v16749_v60 }
0x13b9   :  { %v6814_v60 = vmul.f32 1.442695, %v6778_v42 }
0x13ba   :  { %v6820_v27 = vmul.f32 1.442695, %v6781_v24  ;;  %v6800_v24 = vmul.f32 1.442695, %v6771_v13  ;;  %v6802_v3 = vmul.f32 1.442695, %v6772_v10 }
0x13bc   :  { %13980 = vpow2.f32 %v6820_v27  ;;  %v6769_v27 = vsub.f32 %v16577_v46, %v16747_v9  ;;  %v6780_v46 = vsub.f32 %v16595_v25, %v16756_v52  ;;  %v6779_v25 = vsub.f32 %v16605_v55, %v16762_v7  ;;  %v16838_v52 = vpop.permute.xlu1 %5758 }
0x13bd   :  { %13982 = vpow2.f32 %v6800_v24 }
0x13be   :  { %v6796_v19 = vmul.f32 1.442695, %v6769_v27  ;;  %v6818_v51 = vmul.f32 1.442695, %v6780_v46  ;;  %v6816_v53 = vmul.f32 1.442695, %v6779_v25  ;;  %v6776_v27 = vsub.f32 %v16625_v41, %v16775_v4 }
0x13bf   :  { %v16798_v2 = vpop.eup %13976  ;;  %v6830_v41 = vmul.f32 1.442695, %v6786_v14  ;;  %v6785_v4 = vsub.f32 %v16648_v34, %v16787_v11 }
0x13c0   :  { %v6892_v26 = vsel %vm6692_vm3, %v16798_v2, 0.0  ;;  %13984 = vpow2.f32 %v6796_v19 }
0x13c1   :  { %6893 = vadd.xlane.f32.xlu1 %v6892_v26  ;;  %v6828_v33 = vmul.f32 1.442695, %v6785_v4  ;;  %v13821_v4 = vunpack.i.l.bf16 %v16597_v6 }
0x13c2   :  { %v16802_v16 = vpop.eup %13978 }
0x13c3   :  { %5764 = vrot.lane.b32.xlu0 %v16398_v22, %s14196_s18  ;;  %v6889_v56 = vsel %vm6699_vm1, %v16802_v16, 0.0  ;;  %v6770_v22 = vsub.f32 %v16557_v59, %v16739_v1 }
0x13c5   :  { %6890 = vadd.xlane.f32.xlu1 %v6889_v56  ;;  %v6798_v28 = vmul.f32 1.442695, %v6770_v22  ;;  %v6808_v22 = vmul.f32 1.442695, %v6775_v48 }
0x13c6   :  { %v16808_v5 = vpop.eup %13980 }
0x13c7   :  { %v6883_v18 = vsel %vm6692_vm3, %v16808_v5, 0.0  ;;  %13986 = vpow2.f32 %v6798_v28  ;;  %v16822_v58 = vpop.eup %13982  ;;  %v16859_v28 = vpop.permute.xlu0 %5760 }
0x13c8   :  { %13988 = vpow2.f32 %v6806_v20  ;;  %v6853_v59 = vsel %vm6699_vm1, %v16822_v58, 0.0 }
0x13c9   :  { %6884 = vadd.xlane.f32.xlu1 %v6883_v18  ;;  %13990 = vpow2.f32 %v6802_v3 }
0x13ca   :  { %v16828_v1 = vpop.eup %13984  ;;  %13992 = vpow2.f32 %v6818_v51 }
0x13cb   :  { %v6847_v44 = vsel %vm6692_vm3, %v16828_v1, 0.0  ;;  %13994 = vpow2.f32 %v6814_v60 }
0x13cc   :  { %13996 = vpow2.f32 %v6816_v53 }
0x13d1   :  { %v16834_v9 = vpop.eup %13986 }
0x13d2   :  { %v6850_v26 = vsel %vm6692_vm3, %v16834_v9, 0.0  ;;  %v16842_v56 = vpop.eup %13988 }
0x13d3   :  { %v6862_v55 = vsel %vm6699_vm1, %v16842_v56, 0.0  ;;  %v16849_v7 = vpop.eup %13990 }
0x13d4   :  { %v6856_v19 = vsel %vm6692_vm3, %v16849_v7, 0.0  ;;  %v16855_v15 = vpop.eup %13992 }
0x13d5   :  { %v6880_v29 = vsel %vm6699_vm1, %v16855_v15, 0.0  ;;  %v16863_v20 = vpop.eup %13994 }
0x13d6   :  { %v6874_v3 = vsel %vm6692_vm3, %v16863_v20, 0.0  ;;  %v16869_v46 = vpop.eup %13996 }
0x13d7   :  { %v6877_v34 = vsel %vm6692_vm3, %v16869_v46, 0.0 }
0x13e2   :  { %6854 = vadd.xlane.f32.xlu0 %v6853_v59 }
0x13e5   :  { %v6744_v10 = vpop.xlane.xlu0 %6743 }
0x13e6   :  { %6848 = vadd.xlane.f32.xlu0 %v6847_v44  ;;  %v6782_v59 = vsub.f32 %v16685_v50, %v6744_v10 }
0x13e8   :  { %v6822_v42 = vmul.f32 1.442695, %v6782_v59  ;;  %v7155_v59 = vcombine.low %v16627_v17, %v16631_v47 }
0x13ea   :  { %6851 = vadd.xlane.f32.xlu0 %v6850_v26 }
0x13ec   :  { %v6762_v18 = vpop.xlane.xlu1 %6761 }
0x13ed   :  { %v6788_v13 = vsub.f32 %v16694_v62, %v6762_v18  ;;  %v6810_v62 = vmul.f32 1.442695, %v6776_v27 }
0x13ee   :  { %6863 = vadd.xlane.f32.xlu0 %v6862_v55 }
0x13ef   :  { %v6834_v24 = vmul.f32 1.442695, %v6788_v13 }
0x13f1   :  { %13998 = vpow2.f32 %v6834_v24 }
0x13f2   :  { %6857 = vadd.xlane.f32.xlu0 %v6856_v19  ;;  %14000 = vpow2.f32 %v6808_v22 }
0x13f3   :  { %14002 = vpow2.f32 %v6810_v62 }
0x13f4   :  { %14004 = vpow2.f32 %v6830_v41 }
0x13f5   :  { %14006 = vpow2.f32 %v6828_v33  ;;  %v7139_v33 = vcombine.low %v16613_v12, %v16617_v0  ;;  %v7163_v0 = vrot.slane %v7155_v59, %v18475_v39  ;;  %v18500_v59 = vld [vmem:[#allocation26_spill] sm:$0xff] }
0x13f6   :  { %6881 = vadd.xlane.f32.xlu0 %v6880_v29  ;;  %14008 = vpow2.f32 %v6822_v42 }
0x13f7   :  { %v7153_v12 = vrot.slane %v7139_v33, %v18475_v39  ;;  %v18499_v33 = vld [vmem:[#allocation29_spill] sm:$0xff] }
0x13fa   :  { %6875 = vadd.xlane.f32.xlu0 %v6874_v3 }
0x13fb   :  { %v16871_v31 = vpop.eup %13998 }
0x13fc   :  { %v6904_v51 = vsel %vm6692_vm3, %v16871_v31, 0.0  ;;  %v16878_v11 = vpop.eup %14000 }
0x13fd   :  { %6905 = vadd.xlane.f32.xlu1 %v6904_v51  ;;  %v6865_v44 = vsel %vm6692_vm3, %v16878_v11, 0.0  ;;  %v16882_v25 = vpop.eup %14002 }
0x13fe   :  { %6878 = vadd.xlane.f32.xlu0 %v6877_v34  ;;  %v6868_v50 = vsel %vm6692_vm3, %v16882_v25, 0.0  ;;  %v16886_v60 = vpop.eup %14004 }
0x13ff   :  { %v6898_v26 = vsel %vm6699_vm1, %v16886_v60, 0.0  ;;  %v16890_v53 = vpop.eup %14006 }
0x1400   :  { %v6895_v48 = vsel %vm6692_vm3, %v16890_v53, 0.0  ;;  %v16894_v18 = vpop.eup %14008 }
0x1401   :  { %v6886_v13 = vsel %vm6692_vm3, %v16894_v18, 0.0 }
0x1402   :  { %6866 = vadd.xlane.f32.xlu0 %v6865_v44  ;;  %v7096_v44 = vrot.slane %v13821_v4, %v18475_v39 }
0x1404   :  { %v7331_v47 = vpack.c.bf16 %v7096_v44, %v7096_v44 }
0x1406   :  { %6869 = vadd.xlane.f32.xlu0 %v6868_v50  ;;  %v7463_v50 = vsel %vm279_vm5, %v7331_v47, 0 }
0x140a   :  { %6899 = vadd.xlane.f32.xlu0 %v6898_v26 }
0x140e   :  { %6896 = vadd.xlane.f32.xlu0 %v6895_v48  ;;  %5770 = vrot.lane.b32.xlu1 %v16431_v40, %s14196_s18  ;;  %v7156_v40 = vcombine.low %v16641_v63, %v16645_v57  ;;  %v7138_v63 = vcombine.low %v16589_v45, %v16603_v32 }
0x1410   :  { %v7170_v57 = vrot.slane %v7156_v40, %v18475_v39  ;;  %v7197_v40 = vcombine.low %v16722_v43, %v16732_v38 }
0x1412   :  { %6887 = vadd.xlane.f32.xlu0 %v6886_v13  ;;  %v7211_v38 = vrot.slane %v7197_v40, %v18475_v39 }
0x142a   :  { %v6846_v55 = vpop.xlane.xlu0 %6845 }
0x142b   :  { %14010 = vrcp.f32 %v6846_v55 }
0x142e   :  { %v6840_v24 = vpop.xlane.xlu0 %6839 }
0x142f   :  { %14012 = vrcp.f32 %v6840_v24  ;;  %v16939_v24 = vpop.permute.xlu1 %5762 }
0x1432   :  { %v6843_v27 = vpop.xlane.xlu0 %6842 }
0x1433   :  { %14014 = vrcp.f32 %v6843_v27 }
0x1435   :  { %v14011_v14 = vpop.eup %14010 }
0x1436   :  { %v6765_v22 = vpop.xlane.xlu0 %6764  ;;  %v6936_v51 = vmul.f32 %v14011_v14, %v16745_v23  ;;  %v7146_v23 = vrot.slane %v7138_v63, %v18475_v39  ;;  %v18501_v63 = vld [vmem:[#allocation27_spill] sm:$0xff] }
0x1437   :  { %v6789_v19 = vsub.f32 %v16767_v61, %v6765_v22  ;;  %v16941_v22 = vpop.permute.xlu1 %5766 }
0x1438   :  { %v6959_v17 = vpack.c.bf16 %v6936_v51, %v6936_v51  ;;  %v7154_v32 = vcombine.low %v7146_v23, %v7153_v12 }
0x1439   :  { %v6836_v62 = vmul.f32 1.442695, %v6789_v19  ;;  %v14013_v41 = vpop.eup %14012 }
0x143a   :  { %v6759_v29 = vpop.xlane.xlu0 %6758  ;;  %v6934_v34 = vmul.f32 %v14013_v41, %v16753_v36  ;;  %v7171_v36 = vcombine.low %v7163_v0, %v7170_v57  ;;  %v13822_v41 = vunpack.i.h.bf16 %v16597_v6  ;;  %v18502_v57 = vld [vmem:[#allocation23_spill] sm:$0xff] }
0x143b   :  { %14016 = vpow2.f32 %v6836_v62  ;;  %v6787_v10 = vsub.f32 %v16772_v30, %v6759_v29  ;;  %v7179_v43 = vcombine.low %v18502_v57, %v18501_v63 }
0x143c   :  { %v16928_v26 = vpack.c.bf16 %v7171_v36, %v7154_v32  ;;  %v18505_v36 = vld [vmem:[#allocation21_spill] sm:$0xff] }
0x143d   :  { %v14015_v3 = vpop.eup %14014  ;;  %v6832_v61 = vmul.f32 1.442695, %v6787_v10  ;;  %v6861_v62 = vpop.xlane.xlu1 %6860 }
0x143e   :  { %v6935_v42 = vmul.f32 %v14015_v3, %v16760_v54  ;;  %v16937_v13 = vpop.permute.xlu0 %5764  ;;  %v7180_v3 = vcombine.low %v16710_v49, %v16724_v35 }
0x143f   :  { %14018 = vpow2.f32 %v6832_v61  ;;  %v7196_v61 = vcombine.low %v18500_v59, %v18499_v33 }
0x1440   :  { %v6958_v30 = vpack.c.bf16 %v6935_v42, %v6934_v34  ;;  %v7137_v34 = vrot.slane %v13822_v41, %v18475_v39  ;;  %v7194_v49 = vrot.slane %v7180_v3, %v18475_v39 }
0x1441   :  { %v7204_v35 = vrot.slane %v7196_v61, %v18475_v39  ;;  %v18511_v61 = vld [vmem:[#allocation32_spill] sm:$0xff] }
0x1442   :  { %13421 = vmatprep.mubr.msk.bf16.mxu1 %vm6692_vm3, %v6958_v30 }
0x1443   :  { %13422 = vmatmul.mubr.msk.bf16.vlgmr.msra.gmra.mrb[148].mxu1 %vm6692_vm3, %v6959_v17  ;;  %v18503_v17 = vld [vmem:[#allocation18_spill] sm:$0xff] }
0x1444   :  { %13434 = vmatpush3.bf16.msra.mxu1 %v16601_v8 }
0x1445   :  { %v16922_v45 = vpop.eup %14016  ;;  %13765 = vmatprep.subr.msk.bf16.mxu1 %vm279_vm5, %v7331_v47  ;;  %v13826_v47 = vunpack.i.l.bf16 %v18503_v17 }
0x1446   :  { %v6907_v54 = vsel %vm6699_vm1, %v16922_v45, 0.0 }
0x1447   :  { %6908 = vadd.xlane.f32.xlu0 %v6907_v54  ;;  %v7187_v54 = vrot.slane %v7179_v43, %v18475_v39  ;;  %v7178_v40 = vrot.slane %v13826_v47, %v18475_v39 }
0x1448   :  { %13436 = vmatpush3.bf16.msra.mxu1 %v7463_v50  ;;  %v7212_v50 = vcombine.low %v7204_v35, %v7211_v38 }
0x1449   :  { %v16930_v48 = vpop.eup %14018  ;;  %13449 = vmatprep.subr.bf16.mxu1 %v16928_v26 }
0x144a   :  { %v6901_v8 = vsel %vm6692_vm3, %v16930_v48, 0.0 }
0x144b   :  { %6902 = vadd.xlane.f32.xlu0 %v6901_v8  ;;  %v18506_v8 = vld [vmem:[#allocation22_spill] sm:$0xff] }
0x1461   :  { %5768 = vrot.lane.b32.xlu0 %v16421_v37, %s14196_s18 }
0x146f   :  { %v6855_v55 = vpop.xlane.xlu0 %6854 }
0x1470   :  { %14020 = vrcp.f32 %v6855_v55  ;;  %v18507_v55 = vld [vmem:[#allocation8_spill] sm:$0xff] }
0x1473   :  { %v6849_v27 = vpop.xlane.xlu0 %6848 }
0x1474   :  { %14022 = vrcp.f32 %v6849_v27  ;;  %v7221_v27 = vcombine.low %v18507_v55, %v18506_v8  ;;  %v18514_v55 = vld [vmem:[#allocation28_spill] sm:$0xff] }
0x1476   :  { %v7235_v57 = vrot.slane %v7221_v27, %v18475_v39  ;;  %v7260_v27 = vrot.slane %v18514_v55, %v18475_v39 }
0x1477   :  { %v6852_v19 = vpop.xlane.xlu0 %6851 }
0x1478   :  { %14024 = vrcp.f32 %v6852_v19  ;;  %v18508_v19 = vld [vmem:[#allocation16_spill] sm:$0xff] }
0x147a   :  { %v14021_v29 = vpop.eup %14020 }
0x147b   :  { %v6864_v14 = vpop.xlane.xlu0 %6863  ;;  %v6939_v51 = vmul.f32 %v14021_v29, %v16822_v58  ;;  %v7333_v58 = vpack.c.bf16 %v7137_v34, %v7137_v34  ;;  %v18510_v29 = vld [vmem:[#allocation19_spill] sm:$0xff]  ;;  %v18512_v34 = vld [vmem:[#allocation20_spill] sm:$0xff] }
0x147c   :  { %14026 = vrcp.f32 %v6864_v14  ;;  %v18509_v14 = vld [vmem:[#allocation24_spill] sm:$0xff] }
0x147d   :  { %14028 = vrcp.f32 %v6861_v62  ;;  %v6961_v12 = vpack.c.bf16 %v6939_v51, %v6939_v51  ;;  %v7237_v41 = vcombine.low %v18510_v29, %v18509_v14  ;;  %v7520_v33 = vsel %vm279_vm5, %v7333_v58, 0 }
0x147e   :  { %v14023_v4 = vpop.eup %14022 }
0x147f   :  { %v6858_v37 = vpop.xlane.xlu0 %6857  ;;  %v6937_v6 = vmul.f32 %v14023_v4, %v16828_v1  ;;  %v7245_v43 = vrot.slane %v7237_v41, %v18475_v39 }
0x1480   :  { %14030 = vrcp.f32 %v6858_v37  ;;  %v7195_v37 = vcombine.low %v7187_v54, %v7194_v49  ;;  %v7335_v49 = vpack.c.bf16 %v7178_v40, %v7178_v40 }
0x1482   :  { %v14025_v10 = vpop.eup %14024  ;;  %v16979_v63 = vpack.c.bf16 %v7212_v50, %v7195_v37 }
0x1483   :  { %v6882_v42 = vpop.xlane.xlu0 %6881  ;;  %v6938_v44 = vmul.f32 %v14025_v10, %v16834_v9  ;;  %v18504_v9 = vld [vmem:[#allocation25_spill] sm:$0xff]  ;;  %v6873_v10 = vpop.xlane.xlu1 %6872 }
0x1484   :  { %v7238_v32 = vcombine.low %v18505_v36, %v18504_v9  ;;  %14032 = vrcp.f32 %v6882_v42  ;;  %v18513_v42 = vld [vmem:[#allocation10_spill] sm:$0xff] }
0x1485   :  { %v6960_v30 = vpack.c.bf16 %v6938_v44, %v6937_v6  ;;  %v7220_v6 = vcombine.low %v18513_v42, %v18512_v34 }
0x1486   :  { %v14027_v0 = vpop.eup %14026  ;;  %v7252_v44 = vrot.slane %v7238_v32, %v18475_v39 }
0x1487   :  { %13429 = vmatprep.mubr.msk.bf16.mxu0 %vm6692_vm3, %v6960_v30  ;;  %v6876_v1 = vpop.xlane.xlu0 %6875  ;;  %v14029_v23 = vpop.eup %14028  ;;  %v6942_v4 = vmul.f32 %v14027_v0, %v16842_v56  ;;  %v7228_v35 = vrot.slane %v7220_v6, %v18475_v39 }
0x1488   :  { %13430 = vmatmul.mubr.msk.bf16.vlgmr.msra.gmra.mrb[144].mxu0 %vm6692_vm3, %v6961_v12  ;;  %14034 = vrcp.f32 %v6876_v1  ;;  %v6941_v51 = vmul.f32 %v14029_v23, %v18511_v61  ;;  %v7253_v12 = vcombine.low %v7245_v43, %v7252_v44  ;;  %v7577_v23 = vsel %vm279_vm5, %v7335_v49, 0 }
0x1489   :  { %13442 = vmatpush3.bf16.msra.mxu0 %v18508_v19  ;;  %v6963_v38 = vpack.c.bf16 %v6942_v4, %v6942_v4  ;;  %v7236_v0 = vcombine.low %v7228_v35, %v7235_v57  ;;  %v7339_v4 = vpack.c.bf16 %v7260_v27, %v7260_v27 }
0x148a   :  { %v14031_v62 = vpop.eup %14030  ;;  %13766 = vmatprep.subr.msk.bf16.mxu0 %vm279_vm5, %v7333_v58 }
0x148b   :  { %v6879_v3 = vpop.xlane.xlu0 %6878  ;;  %v6940_v59 = vmul.f32 %v14031_v62, %v16849_v7  ;;  %v6894_v7 = vpop.xlane.xlu1 %6893  ;;  %v7338_v9 = vpack.c.bf16 %v7253_v12, %v7236_v0  ;;  %v18517_v0 = vld [vmem:[#allocation31_spill] sm:$0xff] }
0x148c   :  { %14036 = vrcp.f32 %v6879_v3 }
0x148d   :  { %13444 = vmatpush3.bf16.msra.mxu0 %v7520_v33  ;;  %v6962_v56 = vpack.c.bf16 %v6941_v51, %v6940_v59  ;;  %14038 = vrcp.f32 %v6873_v10  ;;  %v18515_v51 = vmov 0.0  }
0x148e   :  { %13457 = vmatprep.subr.bf16.mxu0 %v16979_v63  ;;  %v14033_v58 = vpop.eup %14032 }
0x148f   :  { %v6867_v30 = vpop.xlane.xlu0 %6866  ;;  %13437 = vmatprep.mubr.msk.bf16.mxu1 %vm6692_vm3, %v6962_v56  ;;  %v6891_v36 = vpop.xlane.xlu1 %6890  ;;  %v6948_v54 = vmul.f32 %v14033_v58, %v16855_v15  ;;  %v13827_v15 = vunpack.i.h.bf16 %v18503_v17  ;;  %v7691_v17 = vsel %vm279_vm5, %v7339_v4, 0 }
0x1490   :  { %13438 = vmatmul.mubr.msk.bf16.vlgmr.msra.gmra.mrb[152].mxu1 %vm6692_vm3, %v6963_v38  ;;  %14040 = vrcp.f32 %v6867_v30 }
0x1491   :  { %13450 = vmatpush3.bf16.msra.mxu1 %v16928_v26  ;;  %v6967_v62 = vpack.c.bf16 %v6948_v54, %v6948_v54  ;;  %v7219_v33 = vrot.slane %v13827_v15, %v18475_v39 }
0x1492   :  { %13767 = vmatprep.subr.msk.bf16.mxu1 %vm279_vm5, %v7335_v49  ;;  %v14035_v1 = vpop.eup %14034 }
0x1493   :  { %v6870_v47 = vpop.xlane.xlu0 %6869  ;;  %v6946_v26 = vmul.f32 %v14035_v1, %v16863_v20  ;;  %v6885_v29 = vpop.xlane.xlu1 %6884 }
0x1494   :  { %14042 = vrcp.f32 %v6870_v47  ;;  %v7278_v47 = vcombine.low %v16939_v24, %v16937_v13 }
0x1495   :  { %13452 = vmatpush3.bf16.msra.mxu1 %v7577_v23 }
0x1496   :  { %v14037_v32 = vpop.eup %14036  ;;  %13465 = vmatprep.subr.bf16.mxu1 %v7338_v9  ;;  %v7286_v54 = vrot.slane %v7278_v47, %v18475_v39 }
0x1497   :  { %v6900_v50 = vpop.xlane.xlu0 %6899  ;;  %v6947_v8 = vmul.f32 %v14037_v32, %v16869_v46  ;;  %v14039_v14 = vpop.eup %14038 }
0x1498   :  { %14044 = vrcp.f32 %v6900_v50  ;;  %v6945_v46 = vmul.f32 %v14039_v14, %v16793_v21  ;;  %v7337_v21 = vpack.c.bf16 %v7219_v33, %v7219_v33  ;;  %v6906_v35 = vpop.xlane.xlu1 %6905 }
0x1499   :  { %v6966_v19 = vpack.c.bf16 %v6947_v8, %v6946_v26  ;;  %14046 = vrcp.f32 %v6894_v7 }
0x149a   :  { %v14041_v37 = vpop.eup %14040  ;;  %v6965_v61 = vpack.c.bf16 %v6945_v46, %v6945_v46  ;;  %v7634_v43 = vsel %vm279_vm5, %v7337_v21, 0 }
0x149b   :  { %v6897_v41 = vpop.xlane.xlu0 %6896  ;;  %13453 = vmatprep.mubr.msk.bf16.mxu1 %vm6692_vm3, %v6966_v19  ;;  %v6943_v10 = vmul.f32 %v14041_v37, %v16878_v11 }
0x149c   :  { %14048 = vrcp.f32 %v6897_v41  ;;  %13454 = vmatmul.mubr.msk.bf16.vlgmr.msra.gmra.mrb[156].mxu1 %vm6692_vm3, %v6967_v62 }
0x149d   :  { %14050 = vrcp.f32 %v6891_v36  ;;  %13466 = vmatpush3.bf16.msra.mxu1 %v7338_v9  ;;  %v5771_v36 = vpop.permute.xlu1 %5770 }
0x149e   :  { %v14043_v20 = vpop.eup %14042  ;;  %14052 = vrcp.f32 %v6885_v29  ;;  %13769 = vmatprep.subr.msk.bf16.mxu1 %vm279_vm5, %v7339_v4  ;;  %v7301_v26 = vrot.slane %v5771_v36, %v18475_v39 }
0x149f   :  { %v6888_v40 = vpop.xlane.xlu0 %6887  ;;  %v6944_v3 = vmul.f32 %v14043_v20, %v16882_v25 }
0x14a0   :  { %14054 = vrcp.f32 %v6888_v40 }
0x14a1   :  { %13468 = vmatpush3.bf16.msra.mxu1 %v7691_v17  ;;  %v6964_v59 = vpack.c.bf16 %v6944_v3, %v6943_v10  ;;  %14056 = vrcp.f32 %v6906_v35 }
0x14a2   :  { %13481 = vmatprep.subr.bf16.mxu1 %v18515_v51  ;;  %v14045_v34 = vpop.eup %14044 }
0x14a3   :  { %13445 = vmatprep.mubr.msk.bf16.mxu0 %vm6692_vm3, %v6964_v59  ;;  %v14047_v42 = vpop.eup %14046  ;;  %v6954_v25 = vmul.f32 %v14045_v34, %v16886_v60 }
0x14a4   :  { %13446 = vmatmul.mubr.msk.bf16.vlgmr.msra.gmra.mrb[148].mxu0 %vm6692_vm3, %v6965_v61  ;;  %v6952_v44 = vmul.f32 %v14047_v42, %v16798_v2 }
0x14a5   :  { %13458 = vmatpush3.bf16.msra.mxu0 %v16979_v63  ;;  %v6971_v30 = vpack.c.bf16 %v6954_v25, %v6954_v25 }
0x14a6   :  { %v14049_v11 = vpop.eup %14048  ;;  %13768 = vmatprep.subr.msk.bf16.mxu0 %vm279_vm5, %v7337_v21 }
0x14a7   :  { %v14051_v6 = vpop.eup %14050  ;;  %v6953_v56 = vmul.f32 %v14049_v11, %v16890_v53 }
0x14a8   :  { %v14053_v57 = vpop.eup %14052  ;;  %v6951_v49 = vmul.f32 %v14051_v6, %v16802_v16  ;;  %v4901_v6 = vld [vmem:[%s18429_s6 + $0x160] sm:$0xff] }
0x14a9   :  { %13460 = vmatpush3.bf16.msra.mxu0 %v7634_v43  ;;  %v6970_v38 = vpack.c.bf16 %v6953_v56, %v6952_v44  ;;  %v6949_v63 = vmul.f32 %v14053_v57, %v16808_v5  ;;  %v7262_v5 = vcombine.low %v16838_v52, %v16859_v28  ;;  %v4902_v44 = vld [vmem:[%s18429_s6 + $0x168] sm:$0xff] }
0x14aa   :  { %v14055_v7 = vpop.eup %14054  ;;  %v6969_v53 = vpack.c.bf16 %v6951_v49, %v6951_v49  ;;  %v8060_v57 = vpack.c.bf16 %v4902_v44, %v4901_v6  ;;  %v4904_v49 = vld [vmem:[%s18429_s6 + $0x178] sm:$0xff] }
0x14ab   :  { %13469 = vmatprep.mubr.msk.bf16.mxu1 %vm6692_vm3, %v6970_v38  ;;  %v6950_v60 = vmul.f32 %v14055_v7, %v16894_v18  ;;  %v18516_v18 = vld [vmem:[#allocation30_spill] sm:$0xff]  ;;  %v7276_v23 = vrot.slane %v7262_v5, %v18475_v39  ;;  %v14057_v28 = vpop.eup %14056 }
0x14ac   :  { %13470 = vmatmul.mubr.msk.bf16.vlgmr.msra.gmra.mrb[160].mxu1 %vm6692_vm3, %v6971_v30  ;;  %v7261_v58 = vcombine.low %v18517_v0, %v18516_v18  ;;  %v6956_v19 = vmul.f32 %v14057_v28, %v16871_v31  ;;  %v4903_v30 = vld [vmem:[%s18429_s6 + $0x170] sm:$0xff] }
0x14ad   :  { %v6968_v2 = vpack.c.bf16 %v6950_v60, %v6949_v63  ;;  %13485 = vmatprep.mubr.msk.bf16.mxu1 %vm14191_vm0, %v18515_v51  ;;  %13482 = vmatpush3.bf16.msra.mxu1 %v8060_v57  ;;  %v8061_v60 = vpack.c.bf16 %v4904_v49, %v4903_v30 }
0x14ae   :  { %v7269_v32 = vrot.slane %v7261_v58, %v18475_v39  ;;  %13483 = vmatprep.subr.bf16.mxu1 %v18515_v51 }
0x14af   :  { %13461 = vmatprep.mubr.msk.bf16.mxu0 %vm6692_vm3, %v6968_v2 }
0x14b0   :  { %13462 = vmatmul.mubr.msk.bf16.vlgmr.msra.gmra.mrb[152].mxu0 %vm6692_vm3, %v6969_v53  ;;  %v7277_v50 = vcombine.low %v7269_v32, %v7276_v23 }
0x14b1   :  { %13484 = vmatpush3.bf16.msra.mxu1 %v8061_v60 }
0x14b2   :  { %13513 = vmatprep.subr.bf16.mxu1 %v18515_v51 }
0x14d4   :  { %v6909_v12 = vpop.xlane.xlu0 %6908 }
0x14d8   :  { %v6903_v16 = vpop.xlane.xlu0 %6902 }
0x14d9   :  { %14058 = vrcp.f32 %v6903_v16 }
0x14da   :  { %14060 = vrcp.f32 %v6909_v12 }
0x14dc   :  { %v5769_v1 = vpop.permute.xlu0 %5768 }
0x14dd   :  { %v7279_v9 = vcombine.low %v16941_v22, %v5769_v1  ;;  %v7341_v22 = vpack.c.bf16 %v7301_v26, %v7301_v26 }
0x14df   :  { %v7293_v52 = vrot.slane %v7279_v9, %v18475_v39  ;;  %v7748_v29 = vsel %vm279_vm5, %v7341_v22, 0 }
0x14e1   :  { %v7294_v8 = vcombine.low %v7286_v54, %v7293_v52 }
0x14e3   :  { %v14059_v55 = vpop.eup %14058  ;;  %v7340_v27 = vpack.c.bf16 %v7294_v8, %v7277_v50 }
0x14e4   :  { %v14061_v13 = vpop.eup %14060  ;;  %v6955_v24 = vmul.f32 %v14059_v55, %v16930_v48 }
0x14e5   :  { %13473 = vmatprep.subr.bf16.mxu0 %v7340_v27  ;;  %v6957_v14 = vmul.f32 %v14061_v13, %v16922_v45 }
0x14e6   :  { %13474 = vmatpush3.bf16.msra.mxu0 %v7340_v27  ;;  %v6972_v62 = vpack.c.bf16 %v6956_v19, %v6955_v24 }
0x14e7   :  { %13770 = vmatprep.subr.msk.bf16.mxu0 %vm279_vm5, %v7341_v22  ;;  %v6973_v41 = vpack.c.bf16 %v6957_v14, %v6957_v14 }
0x14e8   :  { %13477 = vmatprep.mubr.msk.bf16.mxu0 %vm6692_vm3, %v6972_v62 }
0x14ea   :  { %13476 = vmatpush3.bf16.msra.mxu0 %v7748_v29 }
0x14eb   :  { %13497 = vmatprep.subr.bf16.mxu0 %v18515_v51 }
0x14ed   :  { %13478 = vmatmul.mubr.msk.bf16.vlgmr.msra.gmra.mrb[156].mxu0 %vm6692_vm3, %v6973_v41 }
0x14ee   :  { %13501 = vmatprep.mubr.msk.bf16.mxu0 %vm14191_vm0, %v18515_v51 }
0x1516   :  { %v17044_v31 = vpop.f32.mrb[148].mxu1 }
0x1517   :  { %v17046_v48 = vpop.f32.mrb[149].mxu1 }
0x1518   :  { %v13424_v37 = vpop.f32.mrb[150].mxu1 }
0x1519   :  { %v17048_v15 = vpop.f32.mrb[151].mxu1 }
0x155b   :  { %v17050_v45 = vpop.f32.mrb[144].mxu0 }
0x155c   :  { %v17052_v4 = vpop.f32.mrb[145].mxu0 }
0x155d   :  { %v13432_v20 = vpop.f32.mrb[146].mxu0 }
0x155e   :  { %v17054_v46 = vpop.f32.mrb[147].mxu0 }
0x1563   :  { %v13439_v40 = vpop.f32.mrb[152].mxu1 }
0x1564   :  { %7808 = vrot.lane.b32.xlu1 %v13439_v40, %s14189_s10  ;;  %v7499_v10 = vpop.f32.mrb[153].mxu1 }
0x1565   :  { %7804 = vrot.lane.b32.xlu0 %v7499_v10, %s14189_s10  ;;  %v13440_v3 = vpop.f32.mrb[154].mxu1 }
0x1566   :  { %v7502_v33 = vpop.f32.mrb[155].mxu1 }
0x1568   :  { %7806 = vrot.lane.b32.xlu1 %v7502_v33, %s14189_s10 }
0x156f   :  { %v13455_v17 = vpop.f32.mrb[156].mxu1 }
0x1570   :  { %v7613_v59 = vpop.f32.mrb[157].mxu1 }
0x1571   :  { %7828 = vrot.lane.b32.xlu0 %v7613_v59, %s14186_s20  ;;  %v13456_v61 = vpop.f32.mrb[158].mxu1 }
0x1572   :  { %v7616_v34 = vpop.f32.mrb[159].mxu1 }
0x1573   :  { %7830 = vrot.lane.b32.xlu1 %v7616_v34, %s14186_s20 }
0x1577   :  { %v13447_v42 = vpop.f32.mrb[148].mxu0 }
0x1578   :  { %v7556_v21 = vpop.f32.mrb[149].mxu0 }
0x1579   :  { %7810 = vrot.lane.b32.xlu0 %v7556_v21, %s14189_s10  ;;  %v13448_v11 = vpop.f32.mrb[150].mxu0 }
0x157a   :  { %v7559_v25 = vpop.f32.mrb[151].mxu0 }
0x157d   :  { %7812 = vrot.lane.b32.xlu0 %v7559_v25, %s14189_s10 }
0x157f   :  { %v13471_v56 = vpop.f32.mrb[160].mxu1 }
0x1580   :  { %v7727_v43 = vpop.f32.mrb[161].mxu1 }
0x1581   :  { %7852 = vrot.lane.b32.xlu0 %v7727_v43, %s14199_s2  ;;  %v13472_v38 = vpop.f32.mrb[162].mxu1 }
0x1582   :  { %v7730_v7 = vpop.f32.mrb[163].mxu1 }
0x1583   :  { %7854 = vrot.lane.b32.xlu1 %v7730_v7, %s14199_s2  ;;  %v13463_v63 = vpop.f32.mrb[152].mxu0 }
0x1584   :  { %v7670_v2 = vpop.f32.mrb[153].mxu0 }
0x1585   :  { %v13464_v53 = vpop.f32.mrb[154].mxu0 }
0x1586   :  { %v7673_v35 = vpop.f32.mrb[155].mxu0 }
0x1587   :  { %7834 = vrot.lane.b32.xlu1 %v7670_v2, %s14186_s20  ;;  %7836 = vrot.lane.b32.xlu0 %v7673_v35, %s14186_s20 }
0x15c0   :  { %v13479_v12 = vpop.f32.mrb[156].mxu0 }
0x15c1   :  { %v7784_v16 = vpop.f32.mrb[157].mxu0 }
0x15c2   :  { %7858 = vrot.lane.b32.xlu1 %v7784_v16, %s14199_s2  ;;  %v13480_v5 = vpop.f32.mrb[158].mxu0 }
0x15c3   :  { %v7787_v18 = vpop.f32.mrb[159].mxu0 }
0x15c4   :  { %7860 = vrot.lane.b32.xlu0 %v7787_v18, %s14199_s2 }
0x15c6   :  { %7832 = vrot.lane.b32.xlu1 %v13455_v17, %s14186_s20 }
0x15c8   :  { %7856 = vrot.lane.b32.xlu0 %v13471_v56, %s14199_s2 }
0x15ca   :  { %7814 = vrot.lane.b32.xlu1 %v13447_v42, %s14189_s10 }
0x15cc   :  { %7838 = vrot.lane.b32.xlu0 %v13463_v63, %s14186_s20 }
0x15ce   :  { %7862 = vrot.lane.b32.xlu1 %v13479_v12, %s14199_s2 }
0x15d6   :  { %v7809_v58 = vpop.permute.xlu1 %7808 }
0x15d7   :  { %v7805_v0 = vpop.permute.xlu0 %7804  ;;  %v7872_v30 = vsel %vm1081_vm8, %v17044_v31, %v7809_v58 }
0x15d8   :  { %v7870_v32 = vsel %vm1081_vm8, %v17046_v48, %v7805_v0 }
0x15da   :  { %v7807_v23 = vpop.permute.xlu1 %7806 }
0x15db   :  { %v7871_v28 = vsel %vm1081_vm8, %v17048_v15, %v7807_v23 }
0x15e3   :  { %v7829_v47 = vpop.permute.xlu0 %7828 }
0x15e4   :  { %v7876_v54 = vsel %vm2354_vm12, %v7870_v32, %v7829_v47 }
0x15e5   :  { %v7831_v36 = vpop.permute.xlu1 %7830 }
0x15e6   :  { %v7877_v26 = vsel %vm2354_vm12, %v7871_v28, %v7831_v36 }
0x15eb   :  { %v7811_v1 = vpop.permute.xlu0 %7810 }
0x15ec   :  { %v7873_v11 = vsel %vm1081_vm8, %v17052_v4, %v7811_v1 }
0x15ef   :  { %v7813_v9 = vpop.permute.xlu0 %7812 }
0x15f0   :  { %v7874_v44 = vsel %vm1081_vm8, %v17054_v46, %v7813_v9 }
0x15f3   :  { %v7853_v52 = vpop.permute.xlu0 %7852 }
0x15f4   :  { %v7882_v50 = vsel %vm2359_vm13, %v7876_v54, %v7853_v52 }
0x15f5   :  { %v7894_v8 = vcombine.high %v7882_v50, %v7882_v50  ;;  %v7901_v55 = vrot.slane %v7882_v50, %v18475_v39  ;;  %v7855_v27 = vpop.permute.xlu1 %7854 }
0x15f6   :  { %v7883_v13 = vsel %vm2359_vm13, %v7877_v26, %v7855_v27 }
0x15f7   :  { %v7908_v24 = vrot.slane %v7894_v8, %v18475_v39  ;;  %v7909_v19 = vcombine.high %v7901_v55, %v7901_v55  ;;  %v7911_v22 = vcombine.high %v7883_v13, %v7883_v13  ;;  %v7918_v62 = vrot.slane %v7883_v13, %v18475_v39 }
0x15f9   :  { %v7910_v14 = vcombine.high %v7908_v24, %v7908_v24  ;;  %v7925_v29 = vrot.slane %v7911_v22, %v18475_v39  ;;  %v7926_v41 = vcombine.high %v7918_v62, %v7918_v62  ;;  %v7976_v48 = vcombine.low %v7901_v55, %v7909_v19  ;;  %v7835_v42 = vpop.permute.xlu1 %7834  ;;  %v7837_v21 = vpop.permute.xlu0 %7836 }
0x15fa   :  { %v7879_v25 = vsel %vm2354_vm12, %v7873_v11, %v7835_v42  ;;  %v7880_v57 = vsel %vm2354_vm12, %v7874_v44, %v7837_v21 }
0x15fb   :  { %v7977_v37 = vcombine.low %v7908_v24, %v7910_v14  ;;  %v7927_v15 = vcombine.high %v7925_v29, %v7925_v29  ;;  %v7993_v20 = vcombine.low %v7918_v62, %v7926_v41  ;;  %v7984_v3 = vrot.slane %v7976_v48, %v18475_v39  ;;  %v12489_v14 = vld [vmem:[#allocation4 + $0x10] ss:$0 sm:$0xff] }
0x15fd   :  { %v7991_v40 = vrot.slane %v7977_v37, %v18475_v39  ;;  %v7994_v10 = vcombine.low %v7925_v29, %v7927_v15  ;;  %v8001_v33 = vrot.slane %v7993_v20, %v18475_v39 }
0x15ff   :  { %v8008_v17 = vrot.slane %v7994_v10, %v18475_v39  ;;  %v7992_v59 = vcombine.low %v7984_v3, %v7991_v40 }
0x1601   :  { %v8009_v61 = vcombine.low %v8001_v33, %v8008_v17 }
0x1603   :  { %v8057_v34 = vpack.c.bf16 %v8009_v61, %v7992_v59 }
0x1605   :  { %13486 = vmatmul.mubr.msk.bf16.vlgmr.msra.gmra.mrb[164].mxu1 %vm434_vm7, %v8057_v34 }
0x1606   :  { %13489 = vmatprep.mubr.msk.bf16.mxu1 %vm14191_vm0, %v18515_v51 }
0x1634   :  { %v7859_v6 = vpop.permute.xlu1 %7858 }
0x1635   :  { %v7885_v56 = vsel %vm2359_vm13, %v7879_v25, %v7859_v6 }
0x1636   :  { %v7935_v43 = vcombine.high %v7885_v56, %v7885_v56  ;;  %v7942_v38 = vrot.slane %v7885_v56, %v18475_v39  ;;  %v7861_v7 = vpop.permute.xlu0 %7860 }
0x1637   :  { %v7886_v49 = vsel %vm2359_vm13, %v7880_v57, %v7861_v7 }
0x1638   :  { %v7949_v4 = vrot.slane %v7935_v43, %v18475_v39  ;;  %v7950_v63 = vcombine.high %v7942_v38, %v7942_v38  ;;  %v7952_v60 = vcombine.high %v7886_v49, %v7886_v49  ;;  %v7959_v2 = vrot.slane %v7886_v49, %v18475_v39  ;;  %v7833_v46 = vpop.permute.xlu1 %7832 }
0x1639   :  { %v7878_v53 = vsel %vm2354_vm12, %v7872_v30, %v7833_v46  ;;  %v18518_v30 = vld [vmem:[#allocation12_spill] sm:$0xff] }
0x163a   :  { %v7951_v35 = vcombine.high %v7949_v4, %v7949_v4  ;;  %v7966_v12 = vrot.slane %v7952_v60, %v18475_v39  ;;  %v7967_v16 = vcombine.high %v7959_v2, %v7959_v2  ;;  %v7857_v5 = vpop.permute.xlu0 %7856  ;;  %v8011_v0 = vcombine.low %v7950_v63, %v7949_v4  ;;  %v18519_v60 = vld [vmem:[#allocation13_spill] sm:$0xff] }
0x163b   :  { %v7884_v18 = vsel %vm2359_vm13, %v7878_v53, %v7857_v5 }
0x163c   :  { %v8027_v31 = vcombine.low %v7951_v35, %v7959_v2  ;;  %v8028_v58 = vcombine.low %v7967_v16, %v7966_v12  ;;  %v7934_v47 = vrot.slane %v7884_v18, %v18475_v39  ;;  %v7815_v1 = vpop.permute.xlu1 %7814  ;;  %v8025_v28 = vrot.slane %v8011_v0, %v18475_v39 }
0x163d   :  { %v7875_v23 = vsel %vm1081_vm8, %v17050_v45, %v7815_v1  ;;  %v7968_v13 = vcombine.high %v7966_v12, %v7966_v12 }
0x163e   :  { %v8035_v9 = vrot.slane %v8027_v31, %v18475_v39  ;;  %v8042_v36 = vrot.slane %v8028_v58, %v18475_v39  ;;  %v8010_v32 = vcombine.low %v7934_v47, %v7942_v38  ;;  %v7839_v54 = vpop.permute.xlu0 %7838 }
0x163f   :  { %v7881_v52 = vsel %vm2354_vm12, %v7875_v23, %v7839_v54 }
0x1640   :  { %v8043_v50 = vcombine.low %v8035_v9, %v8042_v36  ;;  %v8018_v26 = vrot.slane %v8010_v32, %v18475_v39  ;;  %v7863_v8 = vpop.permute.xlu1 %7862 }
0x1641   :  { %v7887_v55 = vsel %vm2359_vm13, %v7881_v52, %v7863_v8  ;;  %v18520_v52 = vld [vmem:[#allocation11_spill] sm:$0xff] }
0x1642   :  { %v8026_v27 = vcombine.low %v8018_v26, %v8025_v28  ;;  %v7975_v45 = vrot.slane %v7887_v55, %v18475_v39 }
0x1644   :  { %v8044_v24 = vcombine.low %v7968_v13, %v7975_v45  ;;  %v8058_v19 = vpack.c.bf16 %v8043_v50, %v8026_v27 }
0x1646   :  { %13490 = vmatmul.mubr.msk.bf16.gmra.mrb[168].mxu1 %vm434_vm7, %v8058_v19  ;;  %v8051_v22 = vrot.slane %v8044_v24, %v18475_v39 }
0x1647   :  { %13493 = vmatprep.mubr.msk.bf16.mxu1 %vm14191_vm0, %v18515_v51 }
0x1648   :  { %v8059_v62 = vpack.c.bf16 %v8051_v22, %v8051_v22 }
0x164e   :  { %13494 = vmatmul.mubr.msk.bf16.gmra.mrb[172].mxu1 %vm434_vm7, %v8059_v62 }
0x164f   :  { %13521 = vmatprep.mubr.msk.bf16.mxu1 %vm14191_vm0, %v18515_v51 }
0x16d8   :  { %v8109_v29 = vpop.f32.mrb[164].mxu1 }
0x16d9   :  { %v8110_v41 = vadd.f32 %v12489_v14, %v8109_v29  ;;  %v13487_v48 = vpop.f32.mrb[165].mxu1 }
0x16da   :  { %v8112_v37 = vpop.f32.mrb[166].mxu1 }
0x16db   :  { %v8136_v15 = vcombine.high %v8110_v41, %v8110_v41  ;;  %v8143_v20 = vrot.slane %v8110_v41, %v18475_v39  ;;  %v8113_v40 = vadd.f32 %v12489_v14, %v8112_v37  ;;  %v13488_v10 = vpop.f32.mrb[167].mxu1 }
0x16dd   :  { %v8150_v3 = vrot.slane %v8136_v15, %v18475_v39  ;;  %v8151_v33 = vcombine.high %v8143_v20, %v8143_v20  ;;  %v8153_v17 = vcombine.high %v8113_v40, %v8113_v40  ;;  %v8160_v59 = vrot.slane %v8113_v40, %v18475_v39 }
0x16df   :  { %v8152_v61 = vcombine.high %v8150_v3, %v8150_v3  ;;  %v8212_v34 = vcombine.low %v8143_v20, %v8151_v33  ;;  %v8167_v42 = vrot.slane %v8153_v17, %v18475_v39  ;;  %v8168_v21 = vcombine.high %v8160_v59, %v8160_v59 }
0x16e1   :  { %v8213_v11 = vcombine.low %v8150_v3, %v8152_v61  ;;  %v8169_v25 = vcombine.high %v8167_v42, %v8167_v42  ;;  %v8229_v6 = vcombine.low %v8160_v59, %v8168_v21  ;;  %v8220_v44 = vrot.slane %v8212_v34, %v18475_v39  ;;  %v18522_v59 = vld [vmem:[#allocation17_spill] sm:$0xff] }
0x16e3   :  { %v8230_v56 = vcombine.low %v8167_v42, %v8169_v25  ;;  %v8227_v57 = vrot.slane %v8213_v11, %v18475_v39  ;;  %v8237_v43 = vrot.slane %v8229_v6, %v18475_v39  ;;  %v18523_v42 = vld [vmem:[#allocation14_spill] sm:$0xff] }
0x16e5   :  { %v8228_v38 = vcombine.low %v8220_v44, %v8227_v57  ;;  %v8244_v7 = vrot.slane %v8230_v56, %v18475_v39 }
0x16e7   :  { %v8300_v49 = vadd.f32 %v8228_v38, %v18518_v30  ;;  %v8245_v4 = vcombine.low %v8237_v43, %v8244_v7 }
0x16e9   :  { %v8308_v63 = vsel %vm434_vm7, %v8300_v49, 0.0  ;;  %v8301_v2 = vadd.f32 %v8245_v4, %v18519_v60  ;;  %v8407_v60 = vld [vmem:[%s18429_s6 + $0x188] sm:$0xff] }
0x16ea   :  { %8309 = vadd.xlane.f32.xlu0 %v8308_v63  ;;  %v8406_v63 = vld [vmem:[%s18429_s6 + $0x180] sm:$0xff] }
0x16eb   :  { %v8311_v46 = vsel %vm434_vm7, %v8301_v2, 0.0 }
0x16ec   :  { %8312 = vadd.xlane.f32.xlu1 %v8311_v46  ;;  %v8409_v46 = vld [vmem:[%s18429_s6 + $0x198] sm:$0xff] }
0x1719   :  { %v8117_v53 = vpop.f32.mrb[168].mxu1 }
0x171a   :  { %v8118_v35 = vadd.f32 %v12489_v14, %v8117_v53  ;;  %v13491_v12 = vpop.f32.mrb[169].mxu1 }
0x171b   :  { %v8120_v16 = vpop.f32.mrb[170].mxu1 }
0x171c   :  { %v8170_v5 = vcombine.high %v8118_v35, %v8118_v35  ;;  %v8177_v18 = vrot.slane %v8118_v35, %v18475_v39  ;;  %v8121_v0 = vadd.f32 %v12489_v14, %v8120_v16  ;;  %v13492_v31 = vpop.f32.mrb[171].mxu1 }
0x171e   :  { %v8184_v58 = vrot.slane %v8170_v5, %v18475_v39  ;;  %v8185_v47 = vcombine.high %v8177_v18, %v8177_v18  ;;  %v8252_v1 = vrot.slane %v8177_v18, %v18475_v39  ;;  %v8187_v23 = vcombine.high %v8121_v0, %v8121_v0 }
0x171f   :  { %v8194_v9 = vrot.slane %v8121_v0, %v18475_v39 }
0x1720   :  { %v8253_v36 = vcombine.low %v8185_v47, %v8184_v58  ;;  %v8186_v32 = vcombine.high %v8184_v58, %v8184_v58  ;;  %v8201_v54 = vrot.slane %v8187_v23, %v18475_v39  ;;  %v8302_v28 = vadd.f32 %v8252_v1, %v18520_v52 }
0x1721   :  { %v8202_v50 = vcombine.high %v8194_v9, %v8194_v9  ;;  %v8125_v26 = vpop.f32.mrb[172].mxu1 }
0x1722   :  { %v8254_v8 = vcombine.low %v8186_v32, %v8194_v9  ;;  %v8126_v55 = vadd.f32 %v12489_v14, %v8125_v26  ;;  %v13495_v27 = vpop.f32.mrb[173].mxu1  ;;  %v8314_v13 = vsel %vm2629_vm14, %v8302_v28, 0.0  ;;  %v8203_v45 = vcombine.high %v8201_v54, %v8201_v54  ;;  %v18521_v14 = vld [vmem:[#allocation15_spill] sm:$0xff] }
0x1723   :  { %8315 = vadd.xlane.f32.xlu1 %v8314_v13  ;;  %v8128_v24 = vpop.f32.mrb[174].mxu1  ;;  %v8270_v22 = vcombine.low %v8202_v50, %v8201_v54  ;;  %v8261_v41 = vrot.slane %v8253_v36, %v18475_v39 }
0x1724   :  { %v8268_v19 = vrot.slane %v8254_v8, %v18475_v39  ;;  %v8210_v62 = vrot.slane %v8126_v55, %v18475_v39  ;;  %v13496_v29 = vpop.f32.mrb[175].mxu1  ;;  %v9230_v55 = vld [vmem:[#allocation4 + $0x17] sm:$0x1] }
0x1725   :  { %v8278_v10 = vrot.slane %v8270_v22, %v18475_v39  ;;  %v9235_v27 = vpack.c.bf16 %v9230_v55, %v9230_v55 }
0x1726   :  { %v8211_v48 = vcombine.high %v8210_v62, %v8210_v62  ;;  %v8271_v37 = vcombine.low %v8203_v45, %v8210_v62  ;;  %v8269_v15 = vcombine.low %v8261_v41, %v8268_v19  ;;  %v17208_v41 = vld [vmem:[#allocation4 + $0x11] ss:$0 sm:$0xff] }
0x1728   :  { %v8285_v20 = vrot.slane %v8271_v37, %v18475_v39  ;;  %v8303_v40 = vadd.f32 %v8269_v15, %v18521_v14  ;;  %v8293_v17 = vrot.slane %v8211_v48, %v18475_v39  ;;  %v17210_v15 = vld [vmem:[#allocation4 + $0x12] ss:$0 sm:$0xff] }
0x172a   :  { %v8317_v3 = vsel %vm434_vm7, %v8303_v40, 0.0  ;;  %v8286_v33 = vcombine.low %v8278_v10, %v8285_v20  ;;  %v8305_v21 = vadd.f32 %v8293_v17, %v18523_v42 }
0x172b   :  { %8318 = vadd.xlane.f32.xlu0 %v8317_v3 }
0x172c   :  { %v8304_v61 = vadd.f32 %v8286_v33, %v18522_v59  ;;  %v8323_v11 = vsel %vm2629_vm14, %v8305_v21, 0.0 }
0x172e   :  { %v8320_v34 = vsel %vm434_vm7, %v8304_v61, 0.0 }
0x172f   :  { %8321 = vadd.xlane.f32.xlu0 %v8320_v34 }
0x1733   :  { %8324 = vadd.xlane.f32.xlu0 %v8323_v11 }
0x1777   :  { %v8310_v25 = vpop.xlane.xlu0 %8309 }
0x1778   :  { %v8326_v6 = vmul.f32 0.03125, %v8310_v25 }
0x1779   :  { %v8313_v44 = vpop.xlane.xlu1 %8312 }
0x177a   :  { %v8332_v56 = vsub.f32 %v8300_v49, %v8326_v6  ;;  %v8327_v57 = vmul.f32 0.03125, %v8313_v44  ;;  %v8408_v49 = vld [vmem:[%s18429_s6 + $0x190] sm:$0xff] }
0x177b   :  { %v8584_v53 = vpack.c.bf16 %v8409_v46, %v8408_v49 }
0x177c   :  { %v8333_v43 = vsub.f32 %v8301_v2, %v8327_v57  ;;  %v8338_v38 = vmul.f32 %v8332_v56, %v8332_v56  ;;  %v8583_v2 = vpack.c.bf16 %v8407_v60, %v8406_v63 }
0x177e   :  { %v8344_v7 = vsel %vm434_vm7, %v8338_v38, 0.0  ;;  %v8339_v30 = vmul.f32 %v8333_v43, %v8333_v43  ;;  %13498 = vmatpush3.bf16.msra.mxu0 %v8583_v2 }
0x177f   :  { %8345 = vadd.xlane.f32.xlu1 %v8344_v7  ;;  %13499 = vmatprep.subr.bf16.mxu0 %v18515_v51 }
0x1780   :  { %v8347_v4 = vsel %vm434_vm7, %v8339_v30, 0.0 }
0x1781   :  { %8348 = vadd.xlane.f32.xlu0 %v8347_v4 }
0x1782   :  { %13500 = vmatpush3.bf16.msra.mxu0 %v8584_v53 }
0x1783   :  { %13533 = vmatprep.subr.bf16.mxu0 %v18515_v51 }
0x17b0   :  { %v8316_v35 = vpop.xlane.xlu1 %8315 }
0x17b1   :  { %v8328_v12 = vmul.f32 0.03125, %v8316_v35 }
0x17b3   :  { %v17187_v18 = vsub.f32 %v8302_v28, %v8328_v12 }
0x17b5   :  { %v8340_v9 = vmul.f32 %v17187_v18, %v17187_v18 }
0x17b7   :  { %v8350_v50 = vsel %vm2629_vm14, %v8340_v9, 0.0 }
0x17b8   :  { %v8319_v16 = vpop.xlane.xlu0 %8318 }
0x17b9   :  { %v8329_v5 = vmul.f32 0.03125, %v8319_v16 }
0x17bb   :  { %v17189_v0 = vsub.f32 %v8303_v40, %v8329_v5 }
0x17bc   :  { %v8322_v31 = vpop.xlane.xlu0 %8321 }
0x17bd   :  { %v8330_v58 = vmul.f32 0.03125, %v8322_v31  ;;  %v8341_v47 = vmul.f32 %v17189_v0, %v17189_v0 }
0x17bf   :  { %v17193_v1 = vsub.f32 %v8304_v61, %v8330_v58  ;;  %v8353_v23 = vsel %vm434_vm7, %v8341_v47, 0.0 }
0x17c0   :  { %8354 = vadd.xlane.f32.xlu1 %v8353_v23  ;;  %v8325_v36 = vpop.xlane.xlu0 %8324 }
0x17c1   :  { %v8331_v32 = vmul.f32 0.03125, %v8325_v36  ;;  %v8342_v54 = vmul.f32 %v17193_v1, %v17193_v1 }
0x17c3   :  { %v17200_v52 = vsub.f32 %v8305_v21, %v8331_v32  ;;  %v8356_v28 = vsel %vm434_vm7, %v8342_v54, 0.0 }
0x17c4   :  { %8357 = vadd.xlane.f32.xlu0 %v8356_v28  ;;  %8351 = vadd.xlane.f32.xlu1 %v8350_v50 }
0x17c5   :  { %v8343_v26 = vmul.f32 %v17200_v52, %v17200_v52 }
0x17c7   :  { %v8359_v8 = vsel %vm2629_vm14, %v8343_v26, 0.0 }
0x17c8   :  { %8360 = vadd.xlane.f32.xlu0 %v8359_v8 }
0x17d5   :  { %9240 = vrot.lane.b32.xlu1 %v9235_v27, %s14197_s19 }
0x180c   :  { %v8346_v13 = vpop.xlane.xlu1 %8345 }
0x180d   :  { %v8362_v45 = vmul.f32 0.03125, %v8346_v13 }
0x180e   :  { %v8349_v24 = vpop.xlane.xlu0 %8348 }
0x180f   :  { %v8368_v19 = vadd.f32 1e-05, %v8362_v45  ;;  %v8363_v22 = vmul.f32 0.03125, %v8349_v24 }
0x1811   :  { %14062 = vrsqrt.f32 %v8368_v19  ;;  %v8369_v62 = vadd.f32 1e-05, %v8363_v22 }
0x1813   :  { %14064 = vrsqrt.f32 %v8369_v62 }
0x181b   :  { %v14063_v29 = vpop.eup %14062 }
0x181c   :  { %v8380_v48 = vmul.f32 %v14063_v29, %v8332_v56 }
0x181d   :  { %v14065_v37 = vpop.eup %14064 }
0x181e   :  { %v8390_v20 = vmul.f32 %v17208_v41, %v8380_v48  ;;  %v8381_v14 = vmul.f32 %v14065_v37, %v8333_v43 }
0x1820   :  { %v17214_v40 = vadd.f32 %v17210_v15, %v8390_v20  ;;  %v8391_v10 = vmul.f32 %v17208_v41, %v8381_v14 }
0x1822   :  { %v17218_v3 = vadd.f32 %v17210_v15, %v8391_v10  ;;  %v8417_v33 = vcombine.high %v17214_v40, %v17214_v40  ;;  %v8424_v17 = vrot.slane %v17214_v40, %v18475_v39 }
0x1824   :  { %v8431_v59 = vrot.slane %v8417_v33, %v18475_v39  ;;  %v8432_v61 = vcombine.high %v8424_v17, %v8424_v17  ;;  %v8434_v34 = vcombine.high %v17218_v3, %v17218_v3  ;;  %v8441_v42 = vrot.slane %v17218_v3, %v18475_v39 }
0x1826   :  { %v8433_v21 = vcombine.high %v8431_v59, %v8431_v59  ;;  %v8448_v11 = vrot.slane %v8434_v34, %v18475_v39  ;;  %v8449_v25 = vcombine.high %v8441_v42, %v8441_v42  ;;  %v8499_v44 = vcombine.low %v8424_v17, %v8432_v61 }
0x1828   :  { %v8450_v6 = vcombine.high %v8448_v11, %v8448_v11  ;;  %v8500_v56 = vcombine.low %v8431_v59, %v8433_v21  ;;  %v8516_v57 = vcombine.low %v8441_v42, %v8449_v25  ;;  %v8507_v7 = vrot.slane %v8499_v44, %v18475_v39 }
0x182a   :  { %v8514_v43 = vrot.slane %v8500_v56, %v18475_v39  ;;  %v8517_v38 = vcombine.low %v8448_v11, %v8450_v6  ;;  %v8524_v30 = vrot.slane %v8516_v57, %v18475_v39 }
0x182c   :  { %v8531_v4 = vrot.slane %v8517_v38, %v18475_v39  ;;  %v8515_v63 = vcombine.low %v8507_v7, %v8514_v43  ;;  %v8771_v7 = vld [vmem:[%s18429_s6 + $0x1a0] sm:$0xff] }
0x182e   :  { %v8532_v60 = vcombine.low %v8524_v30, %v8531_v4  ;;  %v8772_v30 = vld [vmem:[%s18429_s6 + $0x1a8] sm:$0xff] }
0x182f   :  { %v8882_v4 = vpack.c.bf16 %v8772_v30, %v8771_v7 }
0x1830   :  { %v8580_v49 = vpack.c.bf16 %v8532_v60, %v8515_v63  ;;  %v8773_v63 = vld [vmem:[%s18429_s6 + $0x1b0] sm:$0xff]  ;;  %v8774_v60 = vld [vmem:[%s18429_s6 + $0x1b8] sm:$0xff] }
0x1831   :  { %13514 = vmatpush3.bf16.msra.mxu1 %v8882_v4 }
0x1832   :  { %13502 = vmatmul.mubr.msk.bf16.vlgmr.msra.gmra.mrb[160].mxu0 %vm434_vm7, %v8580_v49  ;;  %13515 = vmatprep.subr.bf16.mxu1 %v18515_v51  ;;  %v8883_v49 = vpack.c.bf16 %v8774_v60, %v8773_v63 }
0x1833   :  { %13505 = vmatprep.mubr.msk.bf16.mxu0 %vm14191_vm0, %v18515_v51 }
0x1835   :  { %13516 = vmatpush3.bf16.msra.mxu1 %v8883_v49 }
0x1836   :  { %13517 = vmatprep.subr.bf16.mxu1 %v18515_v51 }
0x184d   :  { %v8355_v2 = vpop.xlane.xlu1 %8354 }
0x184e   :  { %v8365_v46 = vmul.f32 0.03125, %v8355_v2  ;;  %v8775_v2 = vld [vmem:[%s18429_s6 + $0x1c0] sm:$0xff] }
0x1850   :  { %v8371_v53 = vadd.f32 1e-05, %v8365_v46  ;;  %v8776_v46 = vld [vmem:[%s18429_s6 + $0x1c8] sm:$0xff] }
0x1851   :  { %v8358_v35 = vpop.xlane.xlu0 %8357  ;;  %v8352_v12 = vpop.xlane.xlu1 %8351 }
0x1852   :  { %14066 = vrsqrt.f32 %v8371_v53  ;;  %v8366_v16 = vmul.f32 0.03125, %v8358_v35  ;;  %v8364_v5 = vmul.f32 0.03125, %v8352_v12  ;;  %v8884_v53 = vpack.c.bf16 %v8776_v46, %v8775_v2  ;;  %v8777_v35 = vld [vmem:[%s18429_s6 + $0x1d0] sm:$0xff]  ;;  %v8778_v12 = vld [vmem:[%s18429_s6 + $0x1d8] sm:$0xff] }
0x1854   :  { %v8372_v31 = vadd.f32 1e-05, %v8366_v16  ;;  %v8370_v58 = vadd.f32 1e-05, %v8364_v5  ;;  %13518 = vmatpush3.bf16.msra.mxu1 %v8884_v53  ;;  %v8885_v16 = vpack.c.bf16 %v8778_v12, %v8777_v35  ;;  %v9231_v5 = vld [vmem:[%s18429_s6 + $0x1e0] sm:$0xff] }
0x1855   :  { %v8361_v47 = vpop.xlane.xlu0 %8360  ;;  %13519 = vmatprep.subr.bf16.mxu1 %v18515_v51 }
0x1856   :  { %14068 = vrsqrt.f32 %v8372_v31  ;;  %v8367_v23 = vmul.f32 0.03125, %v8361_v47  ;;  %v9232_v31 = vld [vmem:[%s18429_s6 + $0x1e8] sm:$0xff] }
0x1857   :  { %14070 = vrsqrt.f32 %v8370_v58  ;;  %v9233_v58 = vld [vmem:[%s18429_s6 + $0x1f0] sm:$0xff]  ;;  %v9236_v47 = vpack.c.bf16 %v9232_v31, %v9231_v5 }
0x1858   :  { %v8373_v9 = vadd.f32 1e-05, %v8367_v23  ;;  %13520 = vmatpush3.bf16.msra.mxu1 %v8885_v16  ;;  %v9234_v23 = vld [vmem:[%s18429_s6 + $0x1f8] sm:$0xff] }
0x1859   :  { %13565 = vmatprep.subr.bf16.mxu1 %v18515_v51  ;;  %13534 = vmatpush3.bf16.msra.mxu0 %v9236_v47 }
0x185a   :  { %14072 = vrsqrt.f32 %v8373_v9  ;;  %v9237_v9 = vpack.c.bf16 %v9234_v23, %v9233_v58  ;;  %13535 = vmatprep.subr.bf16.mxu0 %v18515_v51 }
0x185c   :  { %v14067_v36 = vpop.eup %14066 }
0x185d   :  { %v8383_v32 = vmul.f32 %v14067_v36, %v17189_v0  ;;  %13536 = vmatpush3.bf16.msra.mxu0 %v9237_v9  ;;  %v9241_v36 = vpop.permute.xlu1 %9240 }
0x185e   :  { %13541 = vmatprep.subr.bf16.mxu0 %v18515_v51 }
0x185f   :  { %v8393_v54 = vmul.f32 %v17208_v41, %v8383_v32  ;;  %v12495_v32 = vld [vmem:[#allocation4 + $0x13] ss:$0 sm:$0xff] }
0x1860   :  { %v14069_v28 = vpop.eup %14068 }
0x1861   :  { %v14071_v50 = vpop.eup %14070  ;;  %v17240_v26 = vadd.f32 %v17210_v15, %v8393_v54  ;;  %v8384_v8 = vmul.f32 %v14069_v28, %v17193_v1 }
0x1862   :  { %v8382_v55 = vmul.f32 %v14071_v50, %v17187_v18 }
0x1863   :  { %v8394_v27 = vmul.f32 %v17208_v41, %v8384_v8  ;;  %v8458_v13 = vcombine.high %v17240_v26, %v17240_v26  ;;  %v8465_v45 = vrot.slane %v17240_v26, %v18475_v39 }
0x1864   :  { %v14073_v0 = vpop.eup %14072  ;;  %v8392_v24 = vmul.f32 %v17208_v41, %v8382_v55 }
0x1865   :  { %v17251_v19 = vadd.f32 %v17210_v15, %v8394_v27  ;;  %v8385_v22 = vmul.f32 %v14073_v0, %v17200_v52  ;;  %v8472_v1 = vrot.slane %v8458_v13, %v18475_v39  ;;  %v8473_v62 = vcombine.high %v8465_v45, %v8465_v45 }
0x1866   :  { %v17256_v18 = vadd.f32 %v17210_v15, %v8392_v24 }
0x1867   :  { %v8395_v29 = vmul.f32 %v17208_v41, %v8385_v22  ;;  %v8474_v48 = vcombine.high %v8472_v1, %v8472_v1  ;;  %v8475_v37 = vcombine.high %v17251_v19, %v17251_v19  ;;  %v8482_v20 = vrot.slane %v17251_v19, %v18475_v39 }
0x1868   :  { %v8457_v14 = vrot.slane %v17256_v18, %v18475_v39  ;;  %v8534_v10 = vcombine.low %v8473_v62, %v8472_v1 }
0x1869   :  { %v8489_v52 = vrot.slane %v8475_v37, %v18475_v39  ;;  %v8490_v33 = vcombine.high %v8482_v20, %v8482_v20  ;;  %v8550_v17 = vcombine.low %v8474_v48, %v8482_v20  ;;  %v17267_v59 = vadd.f32 %v17210_v15, %v8395_v29 }
0x186a   :  { %v8533_v61 = vcombine.low %v8457_v14, %v8465_v45  ;;  %v8548_v42 = vrot.slane %v8534_v10, %v18475_v39 }
0x186b   :  { %v8551_v41 = vcombine.low %v8490_v33, %v8489_v52  ;;  %v8558_v21 = vrot.slane %v8550_v17, %v18475_v39  ;;  %v8491_v25 = vcombine.high %v8489_v52, %v8489_v52  ;;  %v8498_v6 = vrot.slane %v17267_v59, %v18475_v39 }
0x186c   :  { %v8541_v34 = vrot.slane %v8533_v61, %v18475_v39 }
0x186d   :  { %v8565_v11 = vrot.slane %v8551_v41, %v18475_v39  ;;  %v8567_v43 = vcombine.low %v8491_v25, %v8498_v6 }
0x186e   :  { %v8549_v44 = vcombine.low %v8541_v34, %v8548_v42 }
0x186f   :  { %v8566_v56 = vcombine.low %v8558_v21, %v8565_v11  ;;  %v8574_v15 = vrot.slane %v8567_v43, %v18475_v39 }
0x1871   :  { %v8581_v57 = vpack.c.bf16 %v8566_v56, %v8549_v44  ;;  %v8582_v38 = vpack.c.bf16 %v8574_v15, %v8574_v15 }
0x1873   :  { %13506 = vmatmul.mubr.msk.bf16.gmra.mrb[164].mxu0 %vm434_vm7, %v8581_v57 }
0x1874   :  { %13509 = vmatprep.mubr.msk.bf16.mxu0 %vm14191_vm0, %v18515_v51 }
0x187b   :  { %13510 = vmatmul.mubr.msk.bf16.gmra.mrb[168].mxu0 %vm434_vm7, %v8582_v38 }
0x187c   :  { %13537 = vmatprep.mubr.msk.bf16.mxu0 %vm14191_vm0, %v18515_v51 }
0x1883   :  { %13538 = vmatmul.mubr.msk.bf16.vlgmr.msra.gmra.mrb[172].mxu0 %vm434_vm7, %v9241_v36 }
0x1884   :  { %13545 = vmatprep.mubr.msk.bf16.mxu0 %vm14191_vm0, %v18515_v51 }
0x1905   :  { %v8632_v54 = vpop.f32.mrb[160].mxu0 }
0x1906   :  { %v8633_v28 = vadd.f32 %v12495_v32, %v8632_v54  ;;  %v13503_v50 = vpop.f32.mrb[161].mxu0 }
0x1907   :  { %v8635_v8 = vpop.f32.mrb[162].mxu0 }
0x1908   :  { %v8659_v55 = vcombine.high %v8633_v28, %v8633_v28  ;;  %v8666_v27 = vrot.slane %v8633_v28, %v18475_v39  ;;  %v8636_v13 = vadd.f32 %v12495_v32, %v8635_v8  ;;  %v13504_v45 = vpop.f32.mrb[163].mxu0 }
0x190a   :  { %v8673_v0 = vrot.slane %v8659_v55, %v18475_v39  ;;  %v8674_v24 = vcombine.high %v8666_v27, %v8666_v27  ;;  %v8676_v22 = vcombine.high %v8636_v13, %v8636_v13  ;;  %v8683_v1 = vrot.slane %v8636_v13, %v18475_v39 }
0x190b   :  { %v8753_v20 = vmax.f32 %v8666_v27, 0.0 }
0x190c   :  { %v8675_v62 = vcombine.high %v8673_v0, %v8673_v0  ;;  %v8754_v29 = vmax.f32 %v8674_v24, 0.0  ;;  %v8690_v48 = vrot.slane %v8676_v22, %v18475_v39  ;;  %v8691_v37 = vcombine.high %v8683_v1, %v8683_v1 }
0x190d   :  { %v8755_v14 = vmax.f32 %v8673_v0, 0.0  ;;  %v8757_v33 = vmax.f32 %v8683_v1, 0.0 }
0x190e   :  { %v8756_v10 = vmax.f32 %v8675_v62, 0.0  ;;  %v8692_v52 = vcombine.high %v8690_v48, %v8690_v48  ;;  %v8758_v17 = vmax.f32 %v8691_v37, 0.0  ;;  %v8798_v61 = vcombine.low %v8753_v20, %v8754_v29 }
0x190f   :  { %v8759_v34 = vmax.f32 %v8690_v48, 0.0 }
0x1910   :  { %v8799_v41 = vcombine.low %v8755_v14, %v8756_v10  ;;  %v8760_v42 = vmax.f32 %v8692_v52, 0.0  ;;  %v8815_v21 = vcombine.low %v8757_v33, %v8758_v17  ;;  %v8806_v6 = vrot.slane %v8798_v61, %v18475_v39 }
0x1912   :  { %v8813_v11 = vrot.slane %v8799_v41, %v18475_v39  ;;  %v8816_v25 = vcombine.low %v8759_v34, %v8760_v42  ;;  %v8823_v44 = vrot.slane %v8815_v21, %v18475_v39 }
0x1914   :  { %v8830_v56 = vrot.slane %v8816_v25, %v18475_v39  ;;  %v8814_v57 = vcombine.low %v8806_v6, %v8813_v11 }
0x1916   :  { %v8831_v43 = vcombine.low %v8823_v44, %v8830_v56  ;;  %v12499_v44 = vld [vmem:[#allocation4 + $0x14] ss:$0 sm:$0xff] }
0x1918   :  { %v8879_v15 = vpack.c.bf16 %v8831_v43, %v8814_v57 }
0x191a   :  { %13522 = vmatmul.mubr.msk.bf16.vlgmr.msra.gmra.mrb[176].mxu1 %vm2999_vm15, %v8879_v15 }
0x191b   :  { %13525 = vmatprep.mubr.msk.bf16.mxu1 %vm14191_vm0, %v18515_v51 }
0x1946   :  { %v8640_v38 = vpop.f32.mrb[164].mxu0 }
0x1947   :  { %v8641_v7 = vadd.f32 %v12495_v32, %v8640_v38  ;;  %v13507_v30 = vpop.f32.mrb[165].mxu0 }
0x1948   :  { %v8643_v4 = vpop.f32.mrb[166].mxu0 }
0x1949   :  { %v8693_v63 = vcombine.high %v8641_v7, %v8641_v7  ;;  %v8700_v60 = vrot.slane %v8641_v7, %v18475_v39  ;;  %v8644_v49 = vadd.f32 %v12495_v32, %v8643_v4  ;;  %v13508_v2 = vpop.f32.mrb[167].mxu0 }
0x194b   :  { %v8707_v46 = vrot.slane %v8693_v63, %v18475_v39  ;;  %v8708_v53 = vcombine.high %v8700_v60, %v8700_v60  ;;  %v8710_v35 = vcombine.high %v8644_v49, %v8644_v49  ;;  %v8717_v12 = vrot.slane %v8644_v49, %v18475_v39 }
0x194c   :  { %v8761_v23 = vmax.f32 %v8700_v60, 0.0 }
0x194d   :  { %v8709_v16 = vcombine.high %v8707_v46, %v8707_v46  ;;  %v8762_v5 = vmax.f32 %v8708_v53, 0.0  ;;  %v8724_v31 = vrot.slane %v8710_v35, %v18475_v39  ;;  %v8725_v58 = vcombine.high %v8717_v12, %v8717_v12 }
0x194e   :  { %v8648_v47 = vpop.f32.mrb[168].mxu0  ;;  %v8763_v9 = vmax.f32 %v8707_v46, 0.0  ;;  %v8765_v50 = vmax.f32 %v8717_v12, 0.0 }
0x194f   :  { %v8764_v36 = vmax.f32 %v8709_v16, 0.0  ;;  %v8726_v54 = vcombine.high %v8724_v31, %v8724_v31  ;;  %v13511_v28 = vpop.f32.mrb[169].mxu0  ;;  %v8766_v8 = vmax.f32 %v8725_v58, 0.0  ;;  %v8649_v55 = vadd.f32 %v12495_v32, %v8648_v47 }
0x1950   :  { %v8651_v27 = vpop.f32.mrb[170].mxu0  ;;  %v8832_v13 = vcombine.low %v8761_v23, %v8762_v5  ;;  %v8767_v0 = vmax.f32 %v8724_v31, 0.0 }
0x1951   :  { %v8833_v45 = vcombine.low %v8763_v9, %v8764_v36  ;;  %v8768_v24 = vmax.f32 %v8726_v54, 0.0  ;;  %v13512_v22 = vpop.f32.mrb[171].mxu0  ;;  %v8849_v1 = vcombine.low %v8765_v50, %v8766_v8  ;;  %v8733_v62 = vrot.slane %v8649_v55, %v18475_v39  ;;  %v9238_v8 = vld [vmem:[#allocation4 + $0x18] sm:$0x1] }
0x1952   :  { %v8840_v20 = vrot.slane %v8832_v13, %v18475_v39 }
0x1953   :  { %v8847_v29 = vrot.slane %v8833_v45, %v18475_v39  ;;  %v8850_v48 = vcombine.low %v8767_v0, %v8768_v24  ;;  %v8734_v37 = vcombine.high %v8733_v62, %v8733_v62  ;;  %v8857_v14 = vrot.slane %v8849_v1, %v18475_v39 }
0x1954   :  { %v8769_v52 = vmax.f32 %v8733_v62, 0.0 }
0x1955   :  { %v8864_v10 = vrot.slane %v8850_v48, %v18475_v39  ;;  %v8770_v32 = vmax.f32 %v8734_v37, 0.0  ;;  %v8848_v33 = vcombine.low %v8840_v20, %v8847_v29 }
0x1956   :  { %v9279_v21 = vpop.f32.mrb[172].mxu0 }
0x1957   :  { %v8865_v17 = vcombine.low %v8857_v14, %v8864_v10  ;;  %v8866_v61 = vcombine.low %v8769_v52, %v8770_v32  ;;  %v13539_v11 = vpop.f32.mrb[173].mxu0  ;;  %v17370_v13 = vadd.f32 %v9279_v21, %v9238_v8 }
0x1958   :  { %v9282_v25 = vpop.f32.mrb[174].mxu0 }
0x1959   :  { %v8880_v41 = vpack.c.bf16 %v8865_v17, %v8848_v33  ;;  %v8873_v34 = vrot.slane %v8866_v61, %v18475_v39  ;;  %v13540_v6 = vpop.f32.mrb[175].mxu0 }
0x195b   :  { %13526 = vmatmul.mubr.msk.bf16.gmra.mrb[180].mxu1 %vm2999_vm15, %v8880_v41  ;;  %v8881_v42 = vpack.c.bf16 %v8873_v34, %v8873_v34 }
0x195c   :  { %13529 = vmatprep.mubr.msk.bf16.mxu1 %vm14191_vm0, %v18515_v51 }
0x1963   :  { %13530 = vmatmul.mubr.msk.bf16.gmra.mrb[184].mxu1 %vm2999_vm15, %v8881_v42 }
0x1964   :  { %13569 = vmatprep.mubr.msk.bf16.mxu1 %vm14191_vm0, %v18515_v51 }
0x19ed   :  { %v8933_v56 = vpop.f32.mrb[176].mxu1 }
0x19ee   :  { %v8934_v57 = vadd.f32 %v12499_v44, %v8933_v56  ;;  %v13523_v43 = vpop.f32.mrb[177].mxu1 }
0x19ef   :  { %v8936_v15 = vpop.f32.mrb[178].mxu1 }
0x19f0   :  { %v8960_v38 = vcombine.high %v8934_v57, %v8934_v57  ;;  %v8967_v7 = vrot.slane %v8934_v57, %v18475_v39  ;;  %v8937_v30 = vadd.f32 %v12499_v44, %v8936_v15  ;;  %v13524_v4 = vpop.f32.mrb[179].mxu1 }
0x19f2   :  { %v8974_v63 = vrot.slane %v8960_v38, %v18475_v39  ;;  %v8975_v60 = vcombine.high %v8967_v7, %v8967_v7  ;;  %v8977_v49 = vcombine.high %v8937_v30, %v8937_v30  ;;  %v8984_v2 = vrot.slane %v8937_v30, %v18475_v39 }
0x19f4   :  { %v8976_v46 = vcombine.high %v8974_v63, %v8974_v63  ;;  %v9036_v53 = vcombine.low %v8967_v7, %v8975_v60  ;;  %v8991_v35 = vrot.slane %v8977_v49, %v18475_v39  ;;  %v8992_v12 = vcombine.high %v8984_v2, %v8984_v2 }
0x19f6   :  { %v9037_v16 = vcombine.low %v8974_v63, %v8976_v46  ;;  %v8993_v5 = vcombine.high %v8991_v35, %v8991_v35  ;;  %v9053_v31 = vcombine.low %v8984_v2, %v8992_v12  ;;  %v9044_v58 = vrot.slane %v9036_v53, %v18475_v39 }
0x19f8   :  { %v9054_v47 = vcombine.low %v8991_v35, %v8993_v5  ;;  %v9051_v23 = vrot.slane %v9037_v16, %v18475_v39  ;;  %v9061_v9 = vrot.slane %v9053_v31, %v18475_v39  ;;  %v9318_v5 = vld [vmem:[%s18429_s6 + $0x218] sm:$0xff] }
0x19fa   :  { %v9052_v36 = vcombine.low %v9044_v58, %v9051_v23  ;;  %v9068_v54 = vrot.slane %v9054_v47, %v18475_v39  ;;  %v17411_v47 = vld [vmem:[#allocation4 + $0x1b] ss:$0 sm:$0xff] }
0x19fc   :  { %v17363_v28 = vadd.f32 %v9052_v36, %v17214_v40  ;;  %v9069_v50 = vcombine.low %v9061_v9, %v9068_v54  ;;  %v9288_v40 = vsel %vm9287_vm6, %v17370_v13, 0.0 }
0x19fe   :  { %v9132_v55 = vsel %vm434_vm7, %v17363_v28, 0.0  ;;  %v17368_v27 = vadd.f32 %v9069_v50, %v17218_v3 }
0x19ff   :  { %9133 = vadd.xlane.f32.xlu0 %v9132_v55 }
0x1a00   :  { %v9135_v45 = vsel %vm434_vm7, %v17368_v27, 0.0 }
0x1a03   :  { %9136 = vadd.xlane.f32.xlu0 %v9135_v45 }
0x1a07   :  { %9289 = vadd.xlane.f32.xlu0 %v9288_v40 }
0x1a2e   :  { %v8941_v0 = vpop.f32.mrb[180].mxu1 }
0x1a2f   :  { %v8942_v24 = vadd.f32 %v12499_v44, %v8941_v0  ;;  %v13527_v22 = vpop.f32.mrb[181].mxu1 }
0x1a30   :  { %v8944_v1 = vpop.f32.mrb[182].mxu1 }
0x1a31   :  { %v8994_v62 = vcombine.high %v8942_v24, %v8942_v24  ;;  %v9001_v3 = vrot.slane %v8942_v24, %v18475_v39  ;;  %v8945_v29 = vadd.f32 %v12499_v44, %v8944_v1  ;;  %v13528_v48 = vpop.f32.mrb[183].mxu1 }
0x1a33   :  { %v9008_v37 = vrot.slane %v8994_v62, %v18475_v39  ;;  %v9009_v20 = vcombine.high %v9001_v3, %v9001_v3  ;;  %v9076_v14 = vrot.slane %v9001_v3, %v18475_v39  ;;  %v9011_v10 = vcombine.high %v8945_v29, %v8945_v29 }
0x1a34   :  { %v9018_v32 = vrot.slane %v8945_v29, %v18475_v39 }
0x1a35   :  { %v9077_v52 = vcombine.low %v9009_v20, %v9008_v37  ;;  %v9010_v33 = vcombine.high %v9008_v37, %v9008_v37  ;;  %v9025_v17 = vrot.slane %v9011_v10, %v18475_v39  ;;  %v17382_v61 = vadd.f32 %v9076_v14, %v17256_v18 }
0x1a36   :  { %v9026_v41 = vcombine.high %v9018_v32, %v9018_v32  ;;  %v8949_v34 = vpop.f32.mrb[184].mxu1 }
0x1a37   :  { %v9078_v42 = vcombine.low %v9010_v33, %v9018_v32  ;;  %v8950_v21 = vadd.f32 %v12499_v44, %v8949_v34  ;;  %v13531_v11 = vpop.f32.mrb[185].mxu1  ;;  %v9138_v25 = vsel %vm2629_vm14, %v17382_v61, 0.0  ;;  %v9027_v6 = vcombine.high %v9025_v17, %v9025_v17 }
0x1a38   :  { %9139 = vadd.xlane.f32.xlu1 %v9138_v25  ;;  %v8952_v56 = vpop.f32.mrb[186].mxu1  ;;  %v9094_v43 = vcombine.low %v9026_v41, %v9025_v17  ;;  %v9085_v18 = vrot.slane %v9077_v52, %v18475_v39 }
0x1a39   :  { %v9092_v57 = vrot.slane %v9078_v42, %v18475_v39  ;;  %v9034_v15 = vrot.slane %v8950_v21, %v18475_v39  ;;  %v13532_v38 = vpop.f32.mrb[187].mxu1 }
0x1a3a   :  { %v9102_v60 = vrot.slane %v9094_v43, %v18475_v39 }
0x1a3b   :  { %v9035_v7 = vcombine.high %v9034_v15, %v9034_v15  ;;  %v9095_v30 = vcombine.low %v9027_v6, %v9034_v15  ;;  %v9093_v4 = vcombine.low %v9085_v18, %v9092_v57 }
0x1a3d   :  { %v9109_v44 = vrot.slane %v9095_v30, %v18475_v39  ;;  %v9127_v63 = vadd.f32 %v9093_v4, %v17240_v26  ;;  %v9117_v46 = vrot.slane %v9035_v7, %v18475_v39  ;;  %v9317_v26 = vld [vmem:[%s18429_s6 + $0x210] sm:$0xff] }
0x1a3e   :  { %v9327_v31 = vpack.c.bf16 %v9318_v5, %v9317_v26 }
0x1a3f   :  { %v9141_v49 = vsel %vm434_vm7, %v9127_v63, 0.0  ;;  %v9110_v2 = vcombine.low %v9102_v60, %v9109_v44  ;;  %v9129_v12 = vadd.f32 %v9117_v46, %v17267_v59  ;;  %v9316_v59 = vld [vmem:[%s18429_s6 + $0x208] sm:$0xff]  ;;  %v9285_v44 = vld [vmem:[#allocation4 + $0x19] sm:$0x1] }
0x1a40   :  { %9142 = vadd.xlane.f32.xlu0 %v9141_v49  ;;  %v9286_v49 = vld [vmem:[#allocation4 + $0x1a] sm:$0x1] }
0x1a41   :  { %v9128_v53 = vadd.f32 %v9110_v2, %v17251_v19  ;;  %v9147_v16 = vsel %vm2629_vm14, %v9129_v12, 0.0  ;;  %v9315_v19 = vld [vmem:[%s18429_s6 + $0x200] sm:$0xff] }
0x1a42   :  { %v9326_v58 = vpack.c.bf16 %v9316_v59, %v9315_v19 }
0x1a43   :  { %v9144_v35 = vsel %vm434_vm7, %v9128_v53, 0.0 }
0x1a44   :  { %9145 = vadd.xlane.f32.xlu0 %v9144_v35  ;;  %13542 = vmatpush3.bf16.msra.mxu0 %v9326_v58 }
0x1a45   :  { %13543 = vmatprep.subr.bf16.mxu0 %v18515_v51 }
0x1a48   :  { %9148 = vadd.xlane.f32.xlu0 %v9147_v16  ;;  %13544 = vmatpush3.bf16.msra.mxu0 %v9327_v31  ;;  %v18524_v16 = vld [vmem:[#allocation9_spill] sm:$0xff] }
0x1a49   :  { %9552 = vrot.lane.b32.xlu1 %v9327_v31, %s14198_s21  ;;  %13549 = vmatprep.subr.bf16.mxu0 %v18515_v51 }
0x1a4d   :  { %9557 = vrot.lane.b32.xlu1 %v17411_v47, %s14198_s21 }
0x1a51   :  { %9878 = vrot.lane.b32.xlu1 %v9326_v58, %s14197_s19 }
0x1a8c   :  { %v9134_v23 = vpop.xlane.xlu0 %9133 }
0x1a8d   :  { %v9150_v36 = vmul.f32 0.03125, %v9134_v23 }
0x1a8f   :  { %v17419_v8 = vsub.f32 %v17363_v28, %v9150_v36 }
0x1a90   :  { %v9137_v9 = vpop.xlane.xlu0 %9136 }
0x1a91   :  { %v9151_v55 = vmul.f32 0.03125, %v9137_v9  ;;  %v9162_v22 = vmul.f32 %v17419_v8, %v17419_v8  ;;  %v17472_v9 = vld [vmem:[#allocation4 + $0x15] ss:$0 sm:$0xff] }
0x1a93   :  { %v17423_v0 = vsub.f32 %v17368_v27, %v9151_v55  ;;  %v9168_v1 = vsel %vm434_vm7, %v9162_v22, 0.0 }
0x1a94   :  { %v9290_v54 = vpop.xlane.xlu0 %9289 }
0x1a95   :  { %v9291_v50 = vmul.f32 0.03125, %v9290_v54  ;;  %v9163_v62 = vmul.f32 %v17423_v0, %v17423_v0 }
0x1a97   :  { %v9292_v45 = vsub.f32 %v17370_v13, %v9291_v50  ;;  %v9171_v28 = vsel %vm434_vm7, %v9163_v62, 0.0  ;;  %v17476_v50 = vld [vmem:[#allocation4 + $0x16] ss:$0 sm:$0xff] }
0x1a99   :  { %v9293_v40 = vmul.f32 %v9292_v45, %v9292_v45 }
0x1a9b   :  { %v9294_v24 = vsel %vm9287_vm6, %v9293_v40, 0.0  ;;  %v17483_v40 = vld [vmem:[%s18429_s6 + $0x128] sm:$0xff] }
0x1a9c   :  { %9295 = vadd.xlane.f32.xlu0 %v9294_v24  ;;  %v17489_v24 = vld [vmem:[%s18429_s6 + $0x120] sm:$0xff] }
0x1aa0   :  { %9169 = vadd.xlane.f32.xlu0 %v9168_v1 }
0x1aa4   :  { %9172 = vadd.xlane.f32.xlu0 %v9171_v28 }
0x1ac5   :  { %v9140_v13 = vpop.xlane.xlu1 %9139 }
0x1ac6   :  { %v9152_v3 = vmul.f32 0.03125, %v9140_v13 }
0x1ac8   :  { %v17433_v27 = vsub.f32 %v17382_v61, %v9152_v3 }
0x1ac9   :  { %v17453_v6 = vpop.permute.xlu1 %9552 }
0x1aca   :  { %v9164_v29 = vmul.f32 %v17433_v27, %v17433_v27 }
0x1acc   :  { %v9174_v48 = vsel %vm2629_vm14, %v9164_v29, 0.0 }
0x1acd   :  { %v9143_v37 = vpop.xlane.xlu0 %9142  ;;  %9175 = vadd.xlane.f32.xlu0 %v9174_v48  ;;  %v17455_v56 = vpop.permute.xlu1 %9557 }
0x1ace   :  { %v9153_v20 = vmul.f32 0.03125, %v9143_v37 }
0x1ad0   :  { %v17438_v14 = vsub.f32 %v9127_v63, %v9153_v20 }
0x1ad1   :  { %v9146_v10 = vpop.xlane.xlu0 %9145  ;;  %v9879_v57 = vpop.permute.xlu1 %9878 }
0x1ad2   :  { %v9154_v32 = vmul.f32 0.03125, %v9146_v10  ;;  %v9165_v52 = vmul.f32 %v17438_v14, %v17438_v14  ;;  %13566 = vmatpush3.bf16.msra.mxu1 %v9879_v57 }
0x1ad3   :  { %13567 = vmatprep.subr.bf16.mxu1 %v18515_v51 }
0x1ad4   :  { %v17442_v33 = vsub.f32 %v9128_v53, %v9154_v32  ;;  %v9177_v17 = vsel %vm434_vm7, %v9165_v52, 0.0 }
0x1ad5   :  { %v9149_v61 = vpop.xlane.xlu0 %9148  ;;  %9178 = vadd.xlane.f32.xlu0 %v9177_v17 }
0x1ad6   :  { %v9155_v41 = vmul.f32 0.03125, %v9149_v61  ;;  %v9166_v34 = vmul.f32 %v17442_v33, %v17442_v33 }
0x1ad8   :  { %v17447_v42 = vsub.f32 %v9129_v12, %v9155_v41  ;;  %v9180_v21 = vsel %vm434_vm7, %v9166_v34, 0.0  ;;  %v9307_v12 = vld [vmem:[%s18429_s6 + $0x138] sm:$0xff] }
0x1ad9   :  { %9181 = vadd.xlane.f32.xlu0 %v9180_v21 }
0x1ada   :  { %v9167_v11 = vmul.f32 %v17447_v42, %v17447_v42 }
0x1adc   :  { %v9183_v25 = vsel %vm2629_vm14, %v9167_v11, 0.0 }
0x1add   :  { %9184 = vadd.xlane.f32.xlu0 %v9183_v25 }
0x1af3   :  { %9550 = vrot.lane.b32.xlu0 %v9326_v58, %s14198_s21 }
0x1af7   :  { %9880 = vrot.lane.b32.xlu0 %v9327_v31, %s14197_s19 }
0x1b29   :  { %v9296_v43 = vpop.xlane.xlu0 %9295 }
0x1b2a   :  { %v9297_v15 = vmul.f32 0.03125, %v9296_v43 }
0x1b2c   :  { %v9298_v38 = vadd.f32 1e-05, %v9297_v15 }
0x1b2d   :  { %v9170_v18 = vpop.xlane.xlu0 %9169 }
0x1b2e   :  { %14074 = vrsqrt.f32 %v9298_v38  ;;  %v9186_v60 = vmul.f32 0.03125, %v9170_v18 }
0x1b30   :  { %v9192_v35 = vadd.f32 1e-05, %v9186_v60 }
0x1b31   :  { %v9173_v7 = vpop.xlane.xlu0 %9172 }
0x1b32   :  { %v9187_v30 = vmul.f32 0.03125, %v9173_v7 }
0x1b34   :  { %v9193_v46 = vadd.f32 1e-05, %v9187_v30 }
0x1b36   :  { %14076 = vrsqrt.f32 %v9193_v46 }
0x1b37   :  { %14078 = vrsqrt.f32 %v9192_v35 }
0x1b38   :  { %v14075_v4 = vpop.eup %14074 }
0x1b39   :  { %v9300_v63 = vmul.f32 %v14075_v4, %v9292_v45 }
0x1b3b   :  { %v9301_v2 = vmul.f32 %v9300_v63, %v9285_v44 }
0x1b3d   :  { %v9302_v53 = vadd.f32 %v9301_v2, %v9286_v49 }
0x1b3f   :  { %v17464_v26 = vrot.slane %v9302_v53, %v18524_v16 }
0x1b40   :  { %v14077_v19 = vpop.eup %14076 }
0x1b41   :  { %v9308_v5 = vadd.f32 %v9307_v12, %v17464_v26  ;;  %v14079_v59 = vpop.eup %14078  ;;  %v9205_v58 = vmul.f32 %v14077_v19, %v17423_v0 }
0x1b42   :  { %v9204_v23 = vmul.f32 %v14079_v59, %v17419_v8 }
0x1b43   :  { %v9325_v31 = vpack.c.bf16 %v9308_v5, %v9308_v5  ;;  %v9215_v36 = vmul.f32 %v17472_v9, %v9205_v58 }
0x1b44   :  { %v9214_v54 = vmul.f32 %v17472_v9, %v9204_v23 }
0x1b45   :  { %13546 = vmatmul.mubr.msk.bf16.vlgmr.msra.gmra.mrb[176].mxu0 %vm434_vm7, %v9325_v31  ;;  %v9225_v55 = vadd.f32 %v17476_v50, %v9215_v36 }
0x1b46   :  { %13553 = vmatprep.mubr.msk.bf16.mxu0 %vm14191_vm0, %v18515_v51  ;;  %v9224_v45 = vadd.f32 %v17476_v50, %v9214_v54 }
0x1b47   :  { %v9310_v0 = vadd.f32 %v17483_v40, %v9225_v55  ;;  %v9729_v62 = vcombine.high %v9225_v55, %v9225_v55  ;;  %v9736_v10 = vrot.slane %v9225_v55, %v18475_v39 }
0x1b48   :  { %v9309_v22 = vadd.f32 %v17489_v24, %v9224_v45  ;;  %v9712_v3 = vcombine.high %v9224_v45, %v9224_v45  ;;  %v9719_v41 = vrot.slane %v9224_v45, %v18475_v39 }
0x1b49   :  { %v9399_v28 = vcombine.high %v9310_v0, %v9310_v0  ;;  %v9743_v48 = vrot.slane %v9729_v62, %v18475_v39  ;;  %v9406_v17 = vrot.slane %v9310_v0, %v18475_v39  ;;  %v9744_v57 = vcombine.high %v9736_v10, %v9736_v10 }
0x1b4a   :  { %v9382_v29 = vcombine.high %v9309_v22, %v9309_v22  ;;  %v9726_v20 = vrot.slane %v9712_v3, %v18475_v39  ;;  %v9389_v34 = vrot.slane %v9309_v22, %v18475_v39  ;;  %v9727_v30 = vcombine.high %v9719_v41, %v9719_v41 }
0x1b4b   :  { %v9413_v37 = vrot.slane %v9399_v28, %v18475_v39  ;;  %v9745_v11 = vcombine.high %v9743_v48, %v9743_v48  ;;  %v9414_v38 = vcombine.high %v9406_v17, %v9406_v17  ;;  %v9811_v12 = vcombine.low %v9736_v10, %v9744_v57 }
0x1b4c   :  { %v9396_v52 = vrot.slane %v9382_v29, %v18475_v39  ;;  %v9728_v18 = vcombine.high %v9726_v20, %v9726_v20  ;;  %v9397_v4 = vcombine.high %v9389_v34, %v9389_v34  ;;  %v9794_v19 = vcombine.low %v9719_v41, %v9727_v30 }
0x1b4d   :  { %v9415_v21 = vcombine.high %v9413_v37, %v9413_v37  ;;  %v9812_v63 = vcombine.low %v9743_v48, %v9745_v11  ;;  %v9481_v53 = vcombine.low %v9406_v17, %v9414_v38  ;;  %v9819_v0 = vrot.slane %v9811_v12, %v18475_v39 }
0x1b4e   :  { %v9398_v15 = vcombine.high %v9396_v52, %v9396_v52  ;;  %v9795_v35 = vcombine.low %v9726_v20, %v9728_v18  ;;  %v9464_v5 = vcombine.low %v9389_v34, %v9397_v4 }
0x1b4f   :  { %v9482_v44 = vcombine.low %v9413_v37, %v9415_v21  ;;  %v9826_v59 = vrot.slane %v9812_v63, %v18475_v39  ;;  %v9489_v55 = vrot.slane %v9481_v53, %v18475_v39 }
0x1b50   :  { %v9465_v46 = vcombine.low %v9396_v52, %v9398_v15  ;;  %v9809_v45 = vrot.slane %v9795_v35, %v18475_v39  ;;  %v14135_v15 = vld [vmem:[%s18429_s6 + $0x130] sm:$0x3] }
0x1b51   :  { %v9496_v31 = vrot.slane %v9482_v44, %v18475_v39 }
0x1b52   :  { %v9479_v54 = vrot.slane %v9465_v46, %v18475_v39 }
0x1b53   :  { %v9497_v22 = vcombine.low %v9489_v55, %v9496_v31 }
0x1b5a   :  { %v9176_v8 = vpop.xlane.xlu0 %9175 }
0x1b5b   :  { %v9188_v1 = vmul.f32 0.03125, %v9176_v8  ;;  %v9472_v8 = vrot.slane %v9464_v5, %v18475_v39 }
0x1b5d   :  { %v9194_v13 = vadd.f32 1e-05, %v9188_v1  ;;  %v9802_v1 = vrot.slane %v9794_v19, %v18475_v39  ;;  %v9480_v29 = vcombine.low %v9472_v8, %v9479_v54 }
0x1b5f   :  { %14080 = vrsqrt.f32 %v9194_v13  ;;  %v9810_v48 = vcombine.low %v9802_v1, %v9809_v45  ;;  %v9545_v20 = vpack.c.bf16 %v9497_v22, %v9480_v29 }
0x1b62   :  { %v9179_v32 = vpop.xlane.xlu0 %9178 }
0x1b63   :  { %v9189_v61 = vmul.f32 0.03125, %v9179_v32 }
0x1b65   :  { %v9195_v25 = vadd.f32 1e-05, %v9189_v61 }
0x1b66   :  { %v9182_v43 = vpop.xlane.xlu0 %9181 }
0x1b67   :  { %14082 = vrsqrt.f32 %v9195_v25  ;;  %v9190_v7 = vmul.f32 0.03125, %v9182_v43 }
0x1b69   :  { %v9196_v60 = vadd.f32 1e-05, %v9190_v7  ;;  %v14081_v49 = vpop.eup %14080 }
0x1b6a   :  { %v9185_v2 = vpop.xlane.xlu0 %9184  ;;  %v9206_v58 = vmul.f32 %v14081_v49, %v17433_v27  ;;  %v9827_v27 = vcombine.low %v9819_v0, %v9826_v59 }
0x1b6b   :  { %14084 = vrsqrt.f32 %v9196_v60  ;;  %v9191_v16 = vmul.f32 0.03125, %v9185_v2 }
0x1b6c   :  { %v9216_v28 = vmul.f32 %v17472_v9, %v9206_v58  ;;  %v9875_v10 = vpack.c.bf16 %v9827_v27, %v9810_v48 }
0x1b6d   :  { %v9197_v23 = vadd.f32 1e-05, %v9191_v16 }
0x1b6e   :  { %v9551_v36 = vpop.permute.xlu0 %9550  ;;  %v9226_v52 = vadd.f32 %v17476_v50, %v9216_v28 }
0x1b6f   :  { %14086 = vrsqrt.f32 %v9197_v23  ;;  %13550 = vmatpush3.bf16.msra.mxu0 %v9551_v36 }
0x1b70   :  { %13551 = vmatprep.subr.bf16.mxu0 %v18515_v51  ;;  %v9311_v38 = vadd.f32 %v14135_v15, %v9226_v52 }
0x1b71   :  { %v14083_v62 = vpop.eup %14082 }
0x1b72   :  { %v9207_v13 = vmul.f32 %v14083_v62, %v17438_v14  ;;  %v9881_v3 = vpop.permute.xlu0 %9880  ;;  %v9422_v12 = vrot.slane %v9311_v38, %v18475_v39 }
0x1b73   :  { %13552 = vmatpush3.bf16.msra.mxu0 %v17453_v6  ;;  %13568 = vmatpush3.bf16.msra.mxu1 %v9881_v3 }
0x1b74   :  { %v9217_v37 = vmul.f32 %v17472_v9, %v9207_v13  ;;  %13581 = vmatprep.subr.bf16.mxu0 %v18515_v51  ;;  %13589 = vmatprep.subr.bf16.mxu1 %v18515_v51 }
0x1b75   :  { %v14085_v32 = vpop.eup %14084 }
0x1b76   :  { %v9227_v17 = vadd.f32 %v17476_v50, %v9217_v37  ;;  %v9208_v14 = vmul.f32 %v14085_v32, %v17442_v33  ;;  %13554 = vmatmul.mubr.msk.bf16.vlgmr.msra.gmra.mrb[180].mxu0 %vm434_vm7, %v9545_v20  ;;  %13570 = vmatmul.mubr.msk.bf16.vlgmr.msra.gmra.mrb[188].mxu1 %vm434_vm7, %v9875_v10  ;;  %v9752_v33 = vrot.slane %v9226_v52, %v18475_v39 }
0x1b77   :  { %13573 = vmatprep.mubr.msk.bf16.mxu1 %vm14191_vm0, %v18515_v51  ;;  %13557 = vmatprep.mubr.msk.bf16.mxu0 %vm14191_vm0, %v18515_v51 }
0x1b78   :  { %v9218_v6 = vmul.f32 %v17472_v9, %v9208_v14  ;;  %v9753_v61 = vcombine.high %v9227_v17, %v9227_v17  ;;  %v9760_v41 = vrot.slane %v9227_v17, %v18475_v39  ;;  %v9312_v34 = vadd.f32 %v17489_v24, %v9227_v17 }
0x1b79   :  { %v14087_v21 = vpop.eup %14086 }
0x1b7a   :  { %v9228_v11 = vadd.f32 %v17476_v50, %v9218_v6  ;;  %v9209_v25 = vmul.f32 %v14087_v21, %v17447_v42  ;;  %v9767_v57 = vrot.slane %v9753_v61, %v18475_v39  ;;  %v9768_v43 = vcombine.high %v9760_v41, %v9760_v41 }
0x1b7b   :  { %v9423_v18 = vcombine.high %v9312_v34, %v9312_v34  ;;  %v9430_v7 = vrot.slane %v9312_v34, %v18475_v39  ;;  %v9828_v44 = vcombine.low %v9752_v33, %v9760_v41 }
0x1b7c   :  { %v9769_v30 = vcombine.high %v9767_v57, %v9767_v57  ;;  %v9770_v24 = vcombine.high %v9228_v11, %v9228_v11  ;;  %v9777_v4 = vrot.slane %v9228_v11, %v18475_v39  ;;  %v9219_v63 = vmul.f32 %v17472_v9, %v9209_v25 }
0x1b7d   :  { %v9829_v60 = vcombine.low %v9768_v43, %v9767_v57  ;;  %v9313_v42 = vadd.f32 %v17483_v40, %v9228_v11  ;;  %v9437_v49 = vrot.slane %v9423_v18, %v18475_v39  ;;  %v9438_v35 = vcombine.high %v9430_v7, %v9430_v7 }
0x1b7e   :  { %v9784_v2 = vrot.slane %v9770_v24, %v18475_v39  ;;  %v9785_v46 = vcombine.high %v9777_v4, %v9777_v4  ;;  %v9845_v53 = vcombine.low %v9769_v30, %v9777_v4  ;;  %v9498_v23 = vcombine.low %v9422_v12, %v9430_v7 }
0x1b7f   :  { %v9439_v16 = vcombine.high %v9437_v49, %v9437_v49  ;;  %v9440_v5 = vcombine.high %v9313_v42, %v9313_v42  ;;  %v9447_v31 = vrot.slane %v9313_v42, %v18475_v39  ;;  %v9843_v19 = vrot.slane %v9829_v60, %v18475_v39 }
0x1b80   :  { %v9846_v59 = vcombine.low %v9785_v46, %v9784_v2  ;;  %v9499_v9 = vcombine.low %v9438_v35, %v9437_v49  ;;  %v9836_v54 = vrot.slane %v9828_v44, %v18475_v39  ;;  %v9853_v55 = vrot.slane %v9845_v53, %v18475_v39 }
0x1b81   :  { %v9454_v58 = vrot.slane %v9440_v5, %v18475_v39  ;;  %v9455_v40 = vcombine.high %v9447_v31, %v9447_v31  ;;  %v9515_v36 = vcombine.low %v9439_v16, %v9447_v31  ;;  %v9229_v0 = vadd.f32 %v17476_v50, %v9219_v63 }
0x1b82   :  { %v9860_v45 = vrot.slane %v9846_v59, %v18475_v39  ;;  %v9513_v8 = vrot.slane %v9499_v9, %v18475_v39  ;;  %v9786_v1 = vcombine.high %v9784_v2, %v9784_v2  ;;  %v9844_v27 = vcombine.low %v9836_v54, %v9843_v19 }
0x1b83   :  { %v9516_v22 = vcombine.low %v9455_v40, %v9454_v58  ;;  %v9793_v28 = vrot.slane %v9229_v0, %v18475_v39  ;;  %v9314_v13 = vadd.f32 %v14135_v15, %v9229_v0  ;;  %v9506_v3 = vrot.slane %v9498_v23, %v18475_v39 }
0x1b84   :  { %v9861_v62 = vcombine.low %v9853_v55, %v9860_v45  ;;  %v9523_v29 = vrot.slane %v9515_v36, %v18475_v39  ;;  %v9456_v37 = vcombine.high %v9454_v58, %v9454_v58 }
0x1b85   :  { %v9530_v48 = vrot.slane %v9516_v22, %v18475_v39  ;;  %v9862_v10 = vcombine.low %v9786_v1, %v9793_v28  ;;  %v9463_v50 = vrot.slane %v9314_v13, %v18475_v39  ;;  %v9514_v32 = vcombine.low %v9506_v3, %v9513_v8 }
0x1b86   :  { %v9876_v20 = vpack.c.bf16 %v9861_v62, %v9844_v27 }
0x1b87   :  { %v9531_v52 = vcombine.low %v9523_v29, %v9530_v48  ;;  %v9532_v14 = vcombine.low %v9456_v37, %v9463_v50  ;;  %v9869_v6 = vrot.slane %v9862_v10, %v18475_v39 }
0x1b88   :  { %13574 = vmatmul.mubr.msk.bf16.gmra.mrb[192].mxu1 %vm434_vm7, %v9876_v20 }
0x1b89   :  { %v9546_v17 = vpack.c.bf16 %v9531_v52, %v9514_v32  ;;  %13577 = vmatprep.mubr.msk.bf16.mxu1 %vm14191_vm0, %v18515_v51  ;;  %v9539_v61 = vrot.slane %v9532_v14, %v18475_v39  ;;  %v9877_v41 = vpack.c.bf16 %v9869_v6, %v9869_v6 }
0x1b8b   :  { %13558 = vmatmul.mubr.msk.bf16.gmra.mrb[184].mxu0 %vm434_vm7, %v9546_v17  ;;  %v9547_v34 = vpack.c.bf16 %v9539_v61, %v9539_v61 }
0x1b8c   :  { %13561 = vmatprep.mubr.msk.bf16.mxu0 %vm14191_vm0, %v18515_v51 }
0x1b90   :  { %13578 = vmatmul.mubr.msk.bf16.gmra.mrb[196].mxu1 %vm434_vm7, %v9877_v41 }
0x1b91   :  { %13593 = vmatprep.mubr.msk.bf16.mxu1 %vm14191_vm0, %v18515_v51 }
0x1b93   :  { %13562 = vmatmul.mubr.msk.bf16.gmra.mrb[188].mxu0 %vm434_vm7, %v9547_v34 }
0x1b94   :  { %13585 = vmatprep.mubr.msk.bf16.mxu0 %vm14191_vm0, %v18515_v51 }
0x1c18   :  { %v9369_v21 = vpop.f32.mrb[176].mxu0 }
0x1c19   :  { %v13547_v33 = vpop.f32.mrb[177].mxu0  ;;  %v17570_v25 = vadd.f32 %v17411_v47, %v9369_v21 }
0x1c1a   :  { %v9372_v11 = vpop.f32.mrb[178].mxu0 }
0x1c1b   :  { %v17573_v57 = vadd.f32 %v17411_v47, %v9372_v11  ;;  %v13548_v43 = vpop.f32.mrb[179].mxu0 }
0x1c1d   :  { %v17577_v15 = vpack.i.bf16 %v17573_v57, %v17570_v25 }
0x1c1f   :  { %13829 = vrot.lane.b32.xlu0 %v17577_v15, %s14195_s17 }
0x1c49   :  { %v9603_v38 = vpop.f32.mrb[180].mxu0  ;;  %v17581_v18 = vpop.f32.mrb[188].mxu1 }
0x1c4a   :  { %v9604_v7 = vadd.f32 %v9603_v38, %v17455_v56  ;;  %v13555_v30 = vpop.f32.mrb[181].mxu0  ;;  %v13571_v24 = vpop.f32.mrb[189].mxu1 }
0x1c4b   :  { %v9606_v4 = vpop.f32.mrb[182].mxu0  ;;  %v17584_v44 = vpop.f32.mrb[190].mxu1 }
0x1c4c   :  { %v9630_v63 = vcombine.high %v9604_v7, %v9604_v7  ;;  %v17587_v60 = vrot.slane %v9604_v7, %v18475_v39  ;;  %v9607_v42 = vadd.f32 %v9606_v4, %v17455_v56  ;;  %v13556_v49 = vpop.f32.mrb[183].mxu0  ;;  %v13572_v2 = vpop.f32.mrb[191].mxu1 }
0x1c4e   :  { %v17591_v46 = vrot.slane %v9630_v63, %v18475_v39  ;;  %v9647_v53 = vcombine.high %v9607_v42, %v9607_v42  ;;  %v17594_v35 = vrot.slane %v9607_v42, %v18475_v39  ;;  %10089 = vrot.lane.b32.xlu0 %v17587_v60, %s14194_s7  ;;  %10053 = vrot.lane.b32.xlu1 %v17587_v60, %s14195_s17 }
0x1c4f   :  { %v17602_v12 = vcombine.high %v17587_v60, %v17587_v60 }
0x1c50   :  { %v17606_v16 = vcombine.high %v17591_v46, %v17591_v46  ;;  %v17609_v5 = vrot.slane %v9647_v53, %v18475_v39  ;;  %v17613_v31 = vcombine.high %v17594_v35, %v17594_v35 }
0x1c51   :  { %v10277_v19 = vcombine.low %v17587_v60, %v17602_v12 }
0x1c52   :  { %v17619_v59 = vcombine.high %v17609_v5, %v17609_v5  ;;  %10055 = vrot.lane.b32.xlu0 %v17602_v12, %s14195_s17  ;;  %10057 = vrot.lane.b32.xlu1 %v17591_v46, %s14195_s17  ;;  %v10278_v9 = vcombine.low %v17591_v46, %v17606_v16  ;;  %v10294_v58 = vcombine.low %v17594_v35, %v17613_v31 }
0x1c53   :  { %v10285_v36 = vrot.slane %v10277_v19, %v18475_v39 }
0x1c54   :  { %v10292_v40 = vrot.slane %v10278_v9, %v18475_v39  ;;  %v10295_v23 = vcombine.low %v17609_v5, %v17619_v59  ;;  %v10302_v54 = vrot.slane %v10294_v58, %v18475_v39 }
0x1c56   :  { %10093 = vrot.lane.b32.xlu0 %v17591_v46, %s14194_s7  ;;  %10061 = vrot.lane.b32.xlu1 %v17594_v35, %s14195_s17  ;;  %v10309_v55 = vrot.slane %v10295_v23, %v18475_v39  ;;  %v10293_v45 = vcombine.low %v10285_v36, %v10292_v40  ;;  %v10269_v36 = vpack.c.bf16 %v17570_v25, %v17570_v25 }
0x1c58   :  { %v10310_v0 = vcombine.low %v10302_v54, %v10309_v55 }
0x1c5a   :  { %10097 = vrot.lane.b32.xlu0 %v17594_v35, %s14194_s7  ;;  %10091 = vrot.lane.b32.xlu1 %v17602_v12, %s14194_s7  ;;  %v10629_v8 = vpack.c.bf16 %v10310_v0, %v10293_v45 }
0x1c5b   :  { %v17643_v22 = vpop.f32.mrb[192].mxu1 }
0x1c5c   :  { %v13575_v1 = vpop.f32.mrb[193].mxu1  ;;  %v10649_v27 = vsel %vm1081_vm8, %v10629_v8, 0 }
0x1c5d   :  { %v17646_v62 = vpop.f32.mrb[194].mxu1  ;;  %13582 = vmatpush3.bf16.xpose.msra.mxu0 %v10649_v27 }
0x1c5e   :  { %v9611_v28 = vpop.f32.mrb[184].mxu0  ;;  %10065 = vrot.lane.b32.xlu1 %v17609_v5, %s14195_s17  ;;  %10059 = vrot.lane.b32.xlu0 %v17606_v16, %s14195_s17  ;;  %v13576_v13 = vpop.f32.mrb[195].mxu1 }
0x1c5f   :  { %v9612_v3 = vadd.f32 %v9611_v28, %v17455_v56  ;;  %v13559_v29 = vpop.f32.mrb[185].mxu0  ;;  %13583 = vmatprep.subr.bf16.mxu0 %v18515_v51  ;;  %v10270_v13 = vpack.c.bf16 %v17573_v57, %v17573_v57 }
0x1c60   :  { %v9614_v48 = vpop.f32.mrb[186].mxu0 }
0x1c61   :  { %v9664_v37 = vcombine.high %v9612_v3, %v9612_v3  ;;  %v17655_v20 = vrot.slane %v9612_v3, %v18475_v39  ;;  %v9615_v10 = vadd.f32 %v9614_v48, %v17455_v56  ;;  %v13560_v50 = vpop.f32.mrb[187].mxu0 }
0x1c62   :  { %10095 = vrot.lane.b32.xlu1 %v17606_v16, %s14194_s7  ;;  %10063 = vrot.lane.b32.xlu0 %v17613_v31, %s14195_s17 }
0x1c63   :  { %v17663_v32 = vrot.slane %v9664_v37, %v18475_v39  ;;  %v9681_v52 = vcombine.high %v9615_v10, %v9615_v10  ;;  %v17666_v17 = vrot.slane %v9615_v10, %v18475_v39  ;;  %v17668_v14 = vpop.f32.mrb[196].mxu1  ;;  %v10317_v6 = vrot.slane %v17655_v20, %v18475_v39 }
0x1c64   :  { %v13579_v61 = vpop.f32.mrb[197].mxu1  ;;  %v17674_v41 = vcombine.high %v17655_v20, %v17655_v20 }
0x1c65   :  { %v17678_v34 = vcombine.high %v17663_v32, %v17663_v32  ;;  %v17681_v21 = vrot.slane %v9681_v52, %v18475_v39  ;;  %v17685_v33 = vcombine.high %v17666_v17, %v17666_v17  ;;  %v9949_v11 = vpop.f32.mrb[198].mxu1  ;;  %v10630_v43 = vpack.c.bf16 %v10317_v6, %v10317_v6 }
0x1c66   :  { %v9619_v38 = vpop.f32.mrb[188].mxu0  ;;  %10099 = vrot.lane.b32.xlu1 %v17613_v31, %s14194_s7  ;;  %10101 = vrot.lane.b32.xlu0 %v17609_v5, %s14194_s7  ;;  %v13580_v7 = vpop.f32.mrb[199].mxu1  ;;  %v10318_v30 = vcombine.low %v17674_v41, %v17663_v32 }
0x1c67   :  { %v9620_v24 = vadd.f32 %v9619_v38, %v17455_v56  ;;  %v13563_v4 = vpop.f32.mrb[189].mxu0  ;;  %v10652_v63 = vsel %vm1081_vm8, %v10630_v43, 0  ;;  %v10319_v42 = vcombine.low %v17678_v34, %v17666_v17  ;;  %v17699_v49 = vcombine.high %v17681_v21, %v17681_v21 }
0x1c68   :  { %v9622_v2 = vpop.f32.mrb[190].mxu0  ;;  %13584 = vmatpush3.bf16.xpose.msra.mxu0 %v10652_v63  ;;  %v10326_v9 = vrot.slane %v10318_v30, %v18475_v39  ;;  %v10335_v58 = vcombine.low %v17685_v33, %v17681_v21 }
0x1c69   :  { %v17702_v53 = vrot.slane %v9620_v24, %v18475_v39  ;;  %v13564_v19 = vpop.f32.mrb[191].mxu0  ;;  %v10333_v56 = vrot.slane %v10319_v42, %v18475_v39  ;;  %13597 = vmatprep.subr.bf16.mxu0 %v18515_v51 }
0x1c6a   :  { %10103 = vrot.lane.b32.xlu1 %v17619_v59, %s14194_s7  ;;  %10067 = vrot.lane.b32.xlu0 %v17619_v59, %s14195_s17  ;;  %v10343_v54 = vrot.slane %v10335_v58, %v18475_v39 }
0x1c6b   :  { %v10334_v40 = vcombine.low %v10326_v9, %v10333_v56  ;;  %v10336_v23 = vcombine.low %v17699_v49, %v17702_v53  ;;  %v9705_v0 = vcombine.high %v17702_v53, %v17702_v53 }
0x1c6d   :  { %v10350_v55 = vrot.slane %v10336_v23, %v18475_v39  ;;  %v10358_v1 = vrot.slane %v9705_v0, %v18475_v39  ;;  %v13833_v57 = vpack.i.bf16 %v9705_v0, %v17655_v20 }
0x1c6e   :  { %10071 = vrot.lane.b32.xlu1 %v17674_v41, %s14195_s17  ;;  %10073 = vrot.lane.b32.xlu0 %v17663_v32, %s14195_s17 }
0x1c6f   :  { %13586 = vmatmul.mubr.msk.bf16.vlgmr.msra.gmra.mrb[192].mxu0 %vm1081_vm8, %v10269_v36  ;;  %v10351_v45 = vcombine.low %v10343_v54, %v10350_v55  ;;  %v10632_v27 = vpack.c.bf16 %v10358_v1, %v10358_v1 }
0x1c70   :  { %13601 = vmatprep.mubr.msk.bf16.mxu0 %vm14191_vm0, %v18515_v51 }
0x1c71   :  { %v10631_v25 = vpack.c.bf16 %v10351_v45, %v10334_v40  ;;  %v10701_v28 = vsel %vm1081_vm8, %v10632_v27, 0 }
0x1c72   :  { %10109 = vrot.lane.b32.xlu1 %v17663_v32, %s14194_s7  ;;  %10077 = vrot.lane.b32.xlu0 %v17666_v17, %s14195_s17 }
0x1c73   :  { %v10698_v8 = vsel %vm1081_vm8, %v10631_v25, 0 }
0x1c74   :  { %13590 = vmatpush3.bf16.xpose.msra.mxu1 %v10698_v8 }
0x1c75   :  { %13591 = vmatprep.subr.bf16.mxu1 %v18515_v51 }
0x1c76   :  { %10113 = vrot.lane.b32.xlu1 %v17666_v17, %s14194_s7  ;;  %10107 = vrot.lane.b32.xlu0 %v17674_v41, %s14194_s7 }
0x1c7a   :  { %10075 = vrot.lane.b32.xlu1 %v17678_v34, %s14195_s17  ;;  %10081 = vrot.lane.b32.xlu0 %v17681_v21, %s14195_s17 }
0x1c7c   :  { %13592 = vmatpush3.bf16.xpose.msra.mxu1 %v10701_v28 }
0x1c7d   :  { %13605 = vmatprep.subr.bf16.mxu1 %v18515_v51 }
0x1c7e   :  { %10079 = vrot.lane.b32.xlu1 %v17685_v33, %s14195_s17  ;;  %10111 = vrot.lane.b32.xlu0 %v17678_v34, %s14194_s7 }
0x1c82   :  { %10117 = vrot.lane.b32.xlu1 %v17681_v21, %s14194_s7  ;;  %10115 = vrot.lane.b32.xlu0 %v17685_v33, %s14194_s7 }
0x1c83   :  { %13594 = vmatmul.mubr.msk.bf16.vlgmr.msra.gmra.mrb[200].mxu1 %vm1081_vm8, %v10270_v13 }
0x1c84   :  { %13609 = vmatprep.mubr.msk.bf16.mxu1 %vm14191_vm0, %v18515_v51 }
0x1c86   :  { %10083 = vrot.lane.b32.xlu1 %v17699_v49, %s14195_s17  ;;  %10119 = vrot.lane.b32.xlu0 %v17699_v49, %s14194_s7 }
0x1c8a   :  { %10127 = vrot.lane.b32.xlu1 %v17602_v12, %s14196_s18  ;;  %10085 = vrot.lane.b32.xlu0 %v17702_v53, %s14195_s17 }
0x1c8e   :  { %10131 = vrot.lane.b32.xlu1 %v17606_v16, %s14196_s18  ;;  %10125 = vrot.lane.b32.xlu0 %v17587_v60, %s14196_s18 }
0x1c91   :  { %v17808_v60 = vpop.permute.xlu0 %13829 }
0x1c92   :  { %10135 = vrot.lane.b32.xlu1 %v17613_v31, %s14196_s18  ;;  %10129 = vrot.lane.b32.xlu0 %v17591_v46, %s14196_s18 }
0x1c96   :  { %10139 = vrot.lane.b32.xlu1 %v17619_v59, %s14196_s18  ;;  %10133 = vrot.lane.b32.xlu0 %v17594_v35, %s14196_s18 }
0x1c9a   :  { %10121 = vrot.lane.b32.xlu1 %v17702_v53, %s14194_s7  ;;  %10137 = vrot.lane.b32.xlu0 %v17609_v5, %s14196_s18 }
0x1c9e   :  { %13834 = vrot.lane.b32.xlu1 %v13833_v57, %s14195_s17  ;;  %10143 = vrot.lane.b32.xlu0 %v17674_v41, %s14196_s18 }
0x1ca2   :  { %10145 = vrot.lane.b32.xlu1 %v17663_v32, %s14196_s18  ;;  %10147 = vrot.lane.b32.xlu0 %v17678_v34, %s14196_s18 }
0x1ca6   :  { %10149 = vrot.lane.b32.xlu1 %v17666_v17, %s14196_s18  ;;  %10151 = vrot.lane.b32.xlu0 %v17685_v33, %s14196_s18 }
0x1caa   :  { %10153 = vrot.lane.b32.xlu1 %v17681_v21, %s14196_s18  ;;  %10155 = vrot.lane.b32.xlu0 %v17699_v49, %s14196_s18 }
0x1cae   :  { %13839 = vrot.lane.b32.xlu1 %v13833_v57, %s14194_s7  ;;  %13844 = vrot.lane.b32.xlu0 %v17577_v15, %s14194_s7 }
0x1cb2   :  { %10157 = vrot.lane.b32.xlu1 %v17702_v53, %s14196_s18  ;;  %13854 = vrot.lane.b32.xlu0 %v17577_v15, %s14196_s18 }
0x1cb6   :  { %13849 = vrot.lane.b32.xlu1 %v13833_v57, %s14196_s18 }
0x1cba   :  { %9884 = vrot.lane.b32.xlu1 %v17411_v47, %s14197_s19 }
0x1cc0   :  { %v17810_v46 = vpop.permute.xlu0 %10089  ;;  %v10054_v35 = vpop.permute.xlu1 %10053 }
0x1cc4   :  { %v10056_v12 = vpop.permute.xlu0 %10055  ;;  %v10058_v16 = vpop.permute.xlu1 %10057 }
0x1cc5   :  { %v10359_v50 = vcombine.low %v10054_v35, %v10056_v12 }
0x1cc7   :  { %v10367_v41 = vrot.slane %v10359_v50, %v18475_v39 }
0x1cc8   :  { %v17812_v5 = vpop.permute.xlu0 %10093  ;;  %v10062_v31 = vpop.permute.xlu1 %10061 }
0x1ccc   :  { %v17814_v59 = vpop.permute.xlu0 %10097  ;;  %v17816_v3 = vpop.permute.xlu1 %10091 }
0x1cd0   :  { %v10060_v15 = vpop.permute.xlu0 %10059  ;;  %v10066_v29 = vpop.permute.xlu1 %10065 }
0x1cd1   :  { %v10360_v10 = vcombine.low %v10058_v16, %v10060_v15 }
0x1cd3   :  { %v10374_v6 = vrot.slane %v10360_v10, %v18475_v39 }
0x1cd4   :  { %v10064_v48 = vpop.permute.xlu0 %10063  ;;  %v17818_v37 = vpop.permute.xlu1 %10095 }
0x1cd5   :  { %v10376_v32 = vcombine.low %v10062_v31, %v10064_v48  ;;  %v10375_v43 = vcombine.low %v10367_v41, %v10374_v6  ;;  %v10442_v6 = vcombine.low %v17812_v5, %v17818_v37 }
0x1cd7   :  { %v10384_v34 = vrot.slane %v10376_v32, %v18475_v39  ;;  %v10456_v37 = vrot.slane %v10442_v6, %v18475_v39 }
0x1cd8   :  { %v17820_v47 = vpop.permute.xlu0 %10101  ;;  %v17822_v20 = vpop.permute.xlu1 %10099 }
0x1cdc   :  { %v10068_v52 = vpop.permute.xlu0 %10067  ;;  %v10104_v17 = vpop.permute.xlu1 %10103 }
0x1cdd   :  { %v10377_v61 = vcombine.low %v10066_v29, %v10068_v52  ;;  %v10459_v32 = vcombine.low %v17820_v47, %v10104_v17 }
0x1cdf   :  { %v10391_v21 = vrot.slane %v10377_v61, %v18475_v39  ;;  %v10458_v61 = vcombine.low %v17814_v59, %v17822_v20 }
0x1ce0   :  { %v10074_v33 = vpop.permute.xlu0 %10073  ;;  %v10072_v11 = vpop.permute.xlu1 %10071 }
0x1ce1   :  { %v10392_v38 = vcombine.low %v10384_v34, %v10391_v21  ;;  %v10400_v36 = vcombine.low %v10072_v11, %v10074_v33  ;;  %v10466_v20 = vrot.slane %v10458_v61, %v18475_v39 }
0x1ce3   :  { %v10633_v7 = vpack.c.bf16 %v10392_v38, %v10375_v43  ;;  %v10408_v8 = vrot.slane %v10400_v36, %v18475_v39  ;;  %v10441_v38 = vcombine.low %v17810_v46, %v17816_v3 }
0x1ce4   :  { %v10078_v30 = vpop.permute.xlu0 %10077  ;;  %v17828_v24 = vpop.permute.xlu1 %10109 }
0x1ce5   :  { %v10747_v4 = vsel %vm1081_vm8, %v10633_v7, 0  ;;  %v10473_v7 = vrot.slane %v10459_v32, %v18475_v39 }
0x1ce6   :  { %13598 = vmatpush3.bf16.xpose.msra.mxu0 %v10747_v4 }
0x1ce7   :  { %13599 = vmatprep.subr.bf16.mxu0 %v18515_v51 }
0x1ce8   :  { %v10108_v63 = vpop.permute.xlu0 %10107  ;;  %v10114_v42 = vpop.permute.xlu1 %10113 }
0x1ce9   :  { %v10482_v47 = vcombine.low %v10108_v63, %v17828_v24  ;;  %v10449_v24 = vrot.slane %v10441_v38, %v18475_v39  ;;  %v10474_v63 = vcombine.low %v10466_v20, %v10473_v7 }
0x1cec   :  { %v10082_v49 = vpop.permute.xlu0 %10081  ;;  %v10076_v2 = vpop.permute.xlu1 %10075 }
0x1ced   :  { %v10401_v23 = vcombine.low %v10076_v2, %v10078_v30  ;;  %v10490_v2 = vrot.slane %v10482_v47, %v18475_v39 }
0x1cef   :  { %v10415_v0 = vrot.slane %v10401_v23, %v18475_v39  ;;  %v10457_v23 = vcombine.low %v10449_v24, %v10456_v37 }
0x1cf0   :  { %v10112_v53 = vpop.permute.xlu0 %10111  ;;  %v10080_v19 = vpop.permute.xlu1 %10079 }
0x1cf1   :  { %v10417_v54 = vcombine.low %v10080_v19, %v10082_v49  ;;  %v10416_v57 = vcombine.low %v10408_v8, %v10415_v0  ;;  %v10483_v21 = vcombine.low %v10112_v53, %v10114_v42  ;;  %v10637_v0 = vpack.c.bf16 %v10474_v63, %v10457_v23 }
0x1cf3   :  { %v10425_v1 = vrot.slane %v10417_v54, %v18475_v39  ;;  %v10497_v42 = vrot.slane %v10483_v21, %v18475_v39 }
0x1cf4   :  { %v10116_v9 = vpop.permute.xlu0 %10115  ;;  %v10118_v56 = vpop.permute.xlu1 %10117 }
0x1cf5   :  { %v10499_v33 = vcombine.low %v10116_v9, %v10118_v56  ;;  %v10498_v36 = vcombine.low %v10490_v2, %v10497_v42 }
0x1cf7   :  { %v10507_v46 = vrot.slane %v10499_v33, %v18475_v39 }
0x1cf8   :  { %v10120_v58 = vpop.permute.xlu0 %10119  ;;  %v10084_v40 = vpop.permute.xlu1 %10083 }
0x1cfc   :  { %v10086_v55 = vpop.permute.xlu0 %10085  ;;  %v17832_v45 = vpop.permute.xlu1 %10127 }
0x1cfd   :  { %v10418_v25 = vcombine.low %v10084_v40, %v10086_v55  ;;  %v13831_v40 = vunpack.i.l.bf16 %v17808_v60 }
0x1cff   :  { %v10432_v27 = vrot.slane %v10418_v25, %v18475_v39 }
0x1d00   :  { %v17838_v28 = vpop.permute.xlu0 %10125  ;;  %v17840_v13 = vpop.permute.xlu1 %10131 }
0x1d01   :  { %v10433_v35 = vcombine.low %v10425_v1, %v10432_v27  ;;  %v10271_v27 = vpack.c.bf16 %v13831_v40, %v13831_v40 }
0x1d03   :  { %v10635_v12 = vpack.c.bf16 %v10433_v35, %v10416_v57 }
0x1d04   :  { %v17842_v16 = vpop.permute.xlu0 %10129  ;;  %v17844_v31 = vpop.permute.xlu1 %10135 }
0x1d05   :  { %v10796_v15 = vsel %vm1081_vm8, %v10635_v12, 0  ;;  %v10524_v57 = vcombine.low %v17842_v16, %v17840_v13 }
0x1d06   :  { %13606 = vmatpush3.bf16.xpose.msra.mxu1 %v10796_v15 }
0x1d07   :  { %13607 = vmatprep.subr.bf16.mxu1 %v18515_v51  ;;  %v10538_v13 = vrot.slane %v10524_v57, %v18475_v39 }
0x1d08   :  { %v17848_v29 = vpop.permute.xlu0 %10133  ;;  %v10140_v48 = vpop.permute.xlu1 %10139 }
0x1d09   :  { %v10540_v35 = vcombine.low %v17848_v29, %v17844_v31 }
0x1d0b   :  { %v10548_v16 = vrot.slane %v10540_v35, %v18475_v39 }
0x1d0c   :  { %v10138_v10 = vpop.permute.xlu0 %10137  ;;  %v10122_v50 = vpop.permute.xlu1 %10121 }
0x1d0d   :  { %v10500_v52 = vcombine.low %v10120_v58, %v10122_v50  ;;  %v13832_v58 = vunpack.i.h.bf16 %v17808_v60  ;;  %v10541_v55 = vcombine.low %v10138_v10, %v10140_v48  ;;  %v10523_v60 = vcombine.low %v17838_v28, %v17832_v45 }
0x1d0e   :  { %v10845_v48 = vsel %vm1081_vm8, %v10637_v0, 0 }
0x1d0f   :  { %v10514_v17 = vrot.slane %v10500_v52, %v18475_v39  ;;  %v10272_v1 = vpack.c.bf16 %v13832_v58, %v13832_v58  ;;  %v10555_v12 = vrot.slane %v10541_v55, %v18475_v39  ;;  %v10531_v28 = vrot.slane %v10523_v60, %v18475_v39 }
0x1d10   :  { %v17855_v41 = vpop.permute.xlu0 %10143  ;;  %v13835_v34 = vpop.permute.xlu1 %13834 }
0x1d11   :  { %v13837_v11 = vunpack.i.h.bf16 %v13835_v34  ;;  %v13836_v43 = vunpack.i.l.bf16 %v13835_v34  ;;  %v10515_v53 = vcombine.low %v10507_v46, %v10514_v17  ;;  %v10556_v32 = vcombine.low %v10548_v16, %v10555_v12 }
0x1d12   :  { %v10539_v33 = vcombine.low %v10531_v28, %v10538_v13 }
0x1d13   :  { %v10440_v5 = vrot.slane %v13837_v11, %v18475_v39  ;;  %v10399_v59 = vrot.slane %v13836_v43, %v18475_v39  ;;  %v10639_v25 = vpack.c.bf16 %v10515_v53, %v10498_v36 }
0x1d14   :  { %v10148_v30 = vpop.permute.xlu0 %10147  ;;  %v10146_v4 = vpop.permute.xlu1 %10145 }
0x1d15   :  { %v10636_v3 = vpack.c.bf16 %v10440_v5, %v10440_v5  ;;  %v10634_v49 = vpack.c.bf16 %v10399_v59, %v10399_v59  ;;  %v10894_v10 = vsel %vm1081_vm8, %v10639_v25, 0  ;;  %v10564_v52 = vcombine.low %v17855_v41, %v10146_v4 }
0x1d16   :  { %v10641_v41 = vpack.c.bf16 %v10556_v32, %v10539_v33 }
0x1d17   :  { %v10750_v19 = vsel %vm1081_vm8, %v10634_v49, 0  ;;  %v10799_v9 = vsel %vm1081_vm8, %v10636_v3, 0  ;;  %v10572_v17 = vrot.slane %v10564_v52, %v18475_v39 }
0x1d18   :  { %v10150_v56 = vpop.permute.xlu1 %10149  ;;  %13600 = vmatpush3.bf16.xpose.msra.mxu0 %v10750_v19  ;;  %13608 = vmatpush3.bf16.xpose.msra.mxu1 %v10799_v9  ;;  %v10152_v54 = vpop.permute.xlu0 %10151 }
0x1d19   :  { %13613 = vmatprep.subr.bf16.mxu0 %v18515_v51  ;;  %13621 = vmatprep.subr.bf16.mxu1 %v18515_v51  ;;  %v10565_v29 = vcombine.low %v10148_v30, %v10150_v56  ;;  %v10943_v56 = vsel %vm1081_vm8, %v10641_v41, 0 }
0x1d1b   :  { %v10579_v7 = vrot.slane %v10565_v29, %v18475_v39 }
0x1d1c   :  { %v10154_v8 = vpop.permute.xlu1 %10153  ;;  %v10156_v15 = vpop.permute.xlu0 %10155 }
0x1d1d   :  { %v10581_v34 = vcombine.low %v10152_v54, %v10154_v8  ;;  %v10580_v49 = vcombine.low %v10572_v17, %v10579_v7 }
0x1d1f   :  { %13602 = vmatmul.mubr.msk.bf16.vlgmr.msra.gmra.mrb[196].mxu0 %vm1081_vm8, %v10271_v27  ;;  %13610 = vmatmul.mubr.msk.bf16.vlgmr.msra.gmra.mrb[204].mxu1 %vm1081_vm8, %v10272_v1  ;;  %v10589_v37 = vrot.slane %v10581_v34, %v18475_v39 }
0x1d20   :  { %v13840_v50 = vpop.permute.xlu1 %13839  ;;  %13614 = vmatpush3.bf16.xpose.msra.mxu0 %v10845_v48  ;;  %13622 = vmatpush3.bf16.xpose.msra.mxu1 %v10894_v10  ;;  %v13845_v11 = vpop.permute.xlu0 %13844 }
0x1d21   :  { %v13842_v31 = vunpack.i.h.bf16 %v13840_v50  ;;  %v13841_v45 = vunpack.i.l.bf16 %v13840_v50  ;;  %13615 = vmatprep.subr.bf16.mxu0 %v18515_v51  ;;  %13623 = vmatprep.subr.bf16.mxu1 %v18515_v51  ;;  %v13847_v20 = vunpack.i.h.bf16 %v13845_v11  ;;  %v13846_v30 = vunpack.i.l.bf16 %v13845_v11 }
0x1d22   :  { %13617 = vmatprep.mubr.msk.bf16.mxu0 %vm14191_vm0, %v18515_v51  ;;  %13625 = vmatprep.mubr.msk.bf16.mxu1 %vm14191_vm0, %v18515_v51 }
0x1d23   :  { %v10522_v6 = vrot.slane %v13842_v31, %v18475_v39  ;;  %v10481_v61 = vrot.slane %v13841_v45, %v18475_v39  ;;  %v10274_v53 = vpack.c.bf16 %v13847_v20, %v13847_v20  ;;  %v10273_v19 = vpack.c.bf16 %v13846_v30, %v13846_v30 }
0x1d24   :  { %v10158_v21 = vpop.permute.xlu1 %10157  ;;  %v13855_v11 = vpop.permute.xlu0 %13854 }
0x1d25   :  { %v10640_v43 = vpack.c.bf16 %v10522_v6, %v10522_v6  ;;  %v10638_v38 = vpack.c.bf16 %v10481_v61, %v10481_v61  ;;  %v10582_v47 = vcombine.low %v10156_v15, %v10158_v21 }
0x1d27   :  { %v10848_v5 = vsel %vm1081_vm8, %v10638_v38, 0  ;;  %v10897_v59 = vsel %vm1081_vm8, %v10640_v43, 0  ;;  %v10596_v4 = vrot.slane %v10582_v47, %v18475_v39 }
0x1d28   :  { %v13850_v42 = vpop.permute.xlu1 %13849  ;;  %13616 = vmatpush3.bf16.xpose.msra.mxu0 %v10848_v5  ;;  %13624 = vmatpush3.bf16.xpose.msra.mxu1 %v10897_v59 }
0x1d29   :  { %v13852_v46 = vunpack.i.h.bf16 %v13850_v42  ;;  %v13851_v3 = vunpack.i.l.bf16 %v13850_v42  ;;  %13629 = vmatprep.subr.bf16.mxu0 %v18515_v51  ;;  %13637 = vmatprep.subr.bf16.mxu1 %v18515_v51  ;;  %v10597_v24 = vcombine.low %v10589_v37, %v10596_v4  ;;  %v13857_v4 = vunpack.i.h.bf16 %v13855_v11 }
0x1d2a   :  { %v13856_v42 = vunpack.i.l.bf16 %v13855_v11 }
0x1d2b   :  { %v10604_v63 = vrot.slane %v13852_v46, %v18475_v39  ;;  %v10563_v2 = vrot.slane %v13851_v3, %v18475_v39  ;;  %v10643_v58 = vpack.c.bf16 %v10597_v24, %v10580_v49 }
0x1d2c   :  { %v9885_v9 = vpop.permute.xlu1 %9884 }
0x1d2d   :  { %v10644_v40 = vpack.c.bf16 %v10604_v63, %v10604_v63  ;;  %v10642_v23 = vpack.c.bf16 %v10563_v2, %v10563_v2  ;;  %v9931_v36 = vadd.f32 %v17581_v18, %v9885_v9  ;;  %v9934_v54 = vadd.f32 %v17584_v44, %v9885_v9 }
0x1d2e   :  { %v9939_v55 = vadd.f32 %v17643_v22, %v9885_v9  ;;  %v9942_v0 = vadd.f32 %v17646_v62, %v9885_v9  ;;  %v9947_v25 = vadd.f32 %v17668_v14, %v9885_v9  ;;  %v10992_v8 = vsel %vm1081_vm8, %v10643_v58, 0 }
0x1d2f   :  { %v9957_v1 = vcombine.high %v9931_v36, %v9931_v36  ;;  %v17917_v27 = vrot.slane %v9931_v36, %v18475_v39  ;;  %v9974_v57 = vcombine.high %v9934_v54, %v9934_v54  ;;  %v17920_v35 = vrot.slane %v9934_v54, %v18475_v39  ;;  %13618 = vmatmul.mubr.msk.bf16.vlgmr.msra.gmra.mrb[200].mxu0 %vm1081_vm8, %v10273_v19 }
0x1d30   :  { %v9991_v18 = vcombine.high %v9939_v55, %v9939_v55  ;;  %v9998_v44 = vrot.slane %v9939_v55, %v18475_v39  ;;  %v10008_v22 = vcombine.high %v9942_v0, %v9942_v0  ;;  %v17925_v62 = vrot.slane %v9942_v0, %v18475_v39  ;;  %13626 = vmatmul.mubr.msk.bf16.vlgmr.msra.gmra.mrb[208].mxu1 %vm1081_vm8, %v10274_v53 }
0x1d31   :  { %v17929_v14 = vrot.slane %v9957_v1, %v18475_v39  ;;  %v17932_v60 = vrot.slane %v9974_v57, %v18475_v39  ;;  %v17935_v12 = vrot.slane %v9947_v25, %v18475_v39  ;;  %13630 = vmatpush3.bf16.xpose.msra.mxu0 %v10943_v56  ;;  %13638 = vmatpush3.bf16.xpose.msra.mxu1 %v10992_v8  ;;  %v10946_v43 = vsel %vm1081_vm8, %v10642_v23, 0 }
0x1d32   :  { %v17938_v15 = vrot.slane %v10008_v22, %v18475_v39  ;;  %10161 = vrot.lane.b32.xlu0 %v17917_v27, %s14195_s17  ;;  %v17944_v48 = vcombine.high %v17917_v27, %v17917_v27  ;;  %13631 = vmatprep.subr.bf16.mxu0 %v18515_v51  ;;  %v17948_v10 = vrot.slane %v9991_v18, %v18475_v39  ;;  %v10995_v17 = vsel %vm1081_vm8, %v10644_v40, 0 }
0x1d33   :  { %v17952_v50 = vcombine.high %v17929_v14, %v17929_v14  ;;  %13639 = vmatprep.subr.bf16.mxu1 %v18515_v51  ;;  %13633 = vmatprep.mubr.msk.bf16.mxu0 %vm14191_vm0, %v18515_v51  ;;  %v17959_v13 = vcombine.high %v17920_v35, %v17920_v35  ;;  %v17963_v16 = vcombine.high %v17932_v60, %v17932_v60 }
0x1d34   :  { %13641 = vmatprep.mubr.msk.bf16.mxu1 %vm14191_vm0, %v18515_v51  ;;  %v11141_v31 = vcombine.low %v17917_v27, %v17944_v48  ;;  %v17969_v45 = vcombine.high %v9998_v44, %v9998_v44  ;;  %v17973_v28 = vcombine.high %v17948_v10, %v17948_v10  ;;  %v17977_v29 = vcombine.high %v17925_v62, %v17925_v62 }
0x1d35   :  { %10167 = vrot.lane.b32.xlu1 %v17952_v50, %s14195_s17  ;;  %v11142_v32 = vcombine.low %v17929_v14, %v17952_v50  ;;  %v11158_v52 = vcombine.low %v17920_v35, %v17959_v13  ;;  %v11159_v6 = vcombine.low %v17932_v60, %v17963_v16  ;;  %v17989_v61 = vcombine.high %v17938_v15, %v17938_v15 }
0x1d36   :  { %10163 = vrot.lane.b32.xlu0 %v17944_v48, %s14195_s17  ;;  %v11182_v34 = vcombine.low %v17969_v45, %v17948_v10  ;;  %v11183_v21 = vcombine.low %v17973_v28, %v17925_v62  ;;  %v11199_v33 = vcombine.low %v17977_v29, %v17938_v15  ;;  %v11149_v5 = vrot.slane %v11141_v31, %v18475_v39 }
0x1d37   :  { %v11156_v38 = vrot.slane %v11142_v32, %v18475_v39  ;;  %v11173_v7 = vrot.slane %v11159_v6, %v18475_v39  ;;  %v11200_v47 = vcombine.low %v17989_v61, %v17935_v12  ;;  %v11166_v59 = vrot.slane %v11158_v52, %v18475_v39 }
0x1d38   :  { %v11197_v41 = vrot.slane %v11183_v21, %v18475_v39  ;;  %v11190_v37 = vrot.slane %v11182_v34, %v18475_v39  ;;  %v11207_v20 = vrot.slane %v11199_v33, %v18475_v39  ;;  %v10032_v3 = vcombine.high %v17935_v12, %v17935_v12 }
0x1d39   :  { %13632 = vmatpush3.bf16.xpose.msra.mxu0 %v10946_v43  ;;  %13640 = vmatpush3.bf16.xpose.msra.mxu1 %v10995_v17  ;;  %v11214_v30 = vrot.slane %v11200_v47, %v18475_v39  ;;  %v11157_v46 = vcombine.low %v11149_v5, %v11156_v38  ;;  %v11174_v49 = vcombine.low %v11166_v59, %v11173_v7 }
0x1d3a   :  { %10165 = vrot.lane.b32.xlu0 %v17929_v14, %s14195_s17  ;;  %10181 = vrot.lane.b32.xlu1 %v17948_v10, %s14195_s17  ;;  %v11198_v24 = vcombine.low %v11190_v37, %v11197_v41  ;;  %v11181_v2 = vrot.slane %v9998_v44, %v18475_v39  ;;  %v11222_v53 = vrot.slane %v10032_v3, %v18475_v39 }
0x1d3b   :  { %13645 = vmatprep.subr.bf16.mxu0 %v18515_v51  ;;  %13653 = vmatprep.subr.bf16.mxu1 %v18515_v51  ;;  %v11215_v63 = vcombine.low %v11207_v20, %v11214_v30  ;;  %v18021_v19 = vpack.i.bf16 %v10032_v3, %v9998_v44  ;;  %v10276_v9 = vpack.c.bf16 %v13857_v4, %v13857_v4 }
0x1d3c   :  { %v10275_v56 = vpack.c.bf16 %v13856_v42, %v13856_v42  ;;  %v11493_v58 = vpack.c.bf16 %v11174_v49, %v11157_v46  ;;  %v11494_v23 = vpack.c.bf16 %v11181_v2, %v11181_v2  ;;  %v11496_v36 = vpack.c.bf16 %v11222_v53, %v11222_v53 }
0x1d3d   :  { %v11495_v40 = vpack.c.bf16 %v11215_v63, %v11198_v24 }
0x1d3e   :  { %10169 = vrot.lane.b32.xlu0 %v17920_v35, %s14195_s17  ;;  %10185 = vrot.lane.b32.xlu1 %v17925_v62, %s14195_s17  ;;  %v11513_v25 = vsel %vm279_vm5, %v11494_v23, 0  ;;  %v11559_v8 = vsel %vm279_vm5, %v11496_v36, 0 }
0x1d40   :  { %13634 = vmatmul.mubr.msk.bf16.vlgmr.msra.gmra.mrb[204].mxu0 %vm1081_vm8, %v10275_v56  ;;  %13642 = vmatmul.mubr.msk.bf16.vlgmr.msra.gmra.mrb[212].mxu1 %vm1081_vm8, %v10276_v9 }
0x1d41   :  { %13646 = vmatpush3.bf16.msra.mxu0 %v11493_v58  ;;  %13654 = vmatpush3.bf16.msra.mxu1 %v11495_v40 }
0x1d42   :  { %v10688_v54 = vpop.f32.mrb[192].mxu0  ;;  %10171 = vrot.lane.b32.xlu0 %v17959_v13, %s14195_s17  ;;  %10189 = vrot.lane.b32.xlu1 %v17938_v15, %s14195_s17 }
0x1d43   :  { %v13587_v55 = vpop.f32.mrb[193].mxu0  ;;  %13647 = vmatprep.subr.bf16.mxu0 %v18515_v51  ;;  %13655 = vmatprep.subr.bf16.mxu1 %v18515_v51 }
0x1d44   :  { %v10691_v0 = vpop.f32.mrb[194].mxu0  ;;  %13649 = vmatprep.mubr.msk.bf16.mxu0 %vm14191_vm0, %v18515_v51  ;;  %13657 = vmatprep.mubr.msk.bf16.mxu1 %vm14191_vm0, %v18515_v51 }
0x1d45   :  { %v13588_v1 = vpop.f32.mrb[195].mxu0  ;;  %13648 = vmatpush3.bf16.msra.mxu0 %v11513_v25  ;;  %13656 = vmatpush3.bf16.msra.mxu1 %v11559_v8 }
0x1d46   :  { %10173 = vrot.lane.b32.xlu0 %v17932_v60, %s14195_s17  ;;  %10193 = vrot.lane.b32.xlu1 %v17935_v12, %s14195_s17 }
0x1d47   :  { %13661 = vmatprep.subr.bf16.mxu0 %v18515_v51  ;;  %13669 = vmatprep.subr.bf16.mxu1 %v18515_v51 }
0x1d4a   :  { %10175 = vrot.lane.b32.xlu0 %v17963_v16, %s14195_s17  ;;  %10197 = vrot.lane.b32.xlu1 %v17917_v27, %s14194_s7 }
0x1d4e   :  { %10179 = vrot.lane.b32.xlu0 %v17969_v45, %s14195_s17  ;;  %10201 = vrot.lane.b32.xlu1 %v17929_v14, %s14194_s7 }
0x1d52   :  { %10183 = vrot.lane.b32.xlu0 %v17973_v28, %s14195_s17  ;;  %10205 = vrot.lane.b32.xlu1 %v17920_v35, %s14194_s7 }
0x1d56   :  { %v10737_v57 = vpop.f32.mrb[200].mxu1  ;;  %10187 = vrot.lane.b32.xlu0 %v17977_v29, %s14195_s17  ;;  %10209 = vrot.lane.b32.xlu1 %v17932_v60, %s14194_s7 }
0x1d57   :  { %v13595_v18 = vpop.f32.mrb[201].mxu1  ;;  %v18107_v31 = vmul.f32 0.35355338, %v10737_v57 }
0x1d58   :  { %v10740_v44 = vpop.f32.mrb[202].mxu1 }
0x1d59   :  { %v13596_v22 = vpop.f32.mrb[203].mxu1 }
0x1d5a   :  { %10191 = vrot.lane.b32.xlu0 %v17989_v61, %s14195_s17  ;;  %10215 = vrot.lane.b32.xlu1 %v17969_v45, %s14194_s7 }
0x1d5e   :  { %13859 = vrot.lane.b32.xlu0 %v18021_v19, %s14195_s17  ;;  %10219 = vrot.lane.b32.xlu1 %v17973_v28, %s14194_s7 }
0x1d62   :  { %10199 = vrot.lane.b32.xlu0 %v17944_v48, %s14194_s7  ;;  %10223 = vrot.lane.b32.xlu1 %v17977_v29, %s14194_s7 }
0x1d66   :  { %10203 = vrot.lane.b32.xlu0 %v17952_v50, %s14194_s7  ;;  %10227 = vrot.lane.b32.xlu1 %v17989_v61, %s14194_s7 }
0x1d6a   :  { %10207 = vrot.lane.b32.xlu0 %v17959_v13, %s14194_s7  ;;  %13864 = vrot.lane.b32.xlu1 %v18021_v19, %s14194_s7 }
0x1d6e   :  { %10211 = vrot.lane.b32.xlu0 %v17963_v16, %s14194_s7  ;;  %10235 = vrot.lane.b32.xlu1 %v17944_v48, %s14196_s18  ;;  %v18103_v48 = vmul.f32 0.35355338, %v10688_v54 }
0x1d72   :  { %10217 = vrot.lane.b32.xlu0 %v17948_v10, %s14194_s7  ;;  %10239 = vrot.lane.b32.xlu1 %v17952_v50, %s14196_s18  ;;  %v11045_v50 = vsel %vm6692_vm3, %v18103_v48, -inf }
0x1d76   :  { %10221 = vrot.lane.b32.xlu0 %v17925_v62, %s14194_s7 }
0x1d7a   :  { %10225 = vrot.lane.b32.xlu0 %v17938_v15, %s14194_s7 }
0x1d7e   :  { %10229 = vrot.lane.b32.xlu0 %v17935_v12, %s14194_s7 }
0x1d82   :  { %10233 = vrot.lane.b32.xlu0 %v17917_v27, %s14196_s18  ;;  %v11048_v27 = vsel %vm6692_vm3, %v18107_v31, -inf }
0x1d86   :  { %10237 = vrot.lane.b32.xlu0 %v17929_v14, %s14196_s18 }
0x1d8a   :  { %10241 = vrot.lane.b32.xlu0 %v17920_v35, %s14196_s18 }
0x1d96   :  { %11046 = vmax.xlane.f32.xlu1 %v11045_v50 }
0x1da4   :  { %v10162_v32 = vpop.permute.xlu0 %10161 }
0x1da7   :  { %v10168_v52 = vpop.permute.xlu1 %10167 }
0x1da8   :  { %v10164_v6 = vpop.permute.xlu0 %10163 }
0x1da9   :  { %v11223_v34 = vcombine.low %v10162_v32, %v10164_v6  ;;  %11049 = vmax.xlane.f32.xlu0 %v11048_v27 }
0x1dab   :  { %v11231_v35 = vrot.slane %v11223_v34, %v18475_v39 }
0x1dac   :  { %v10166_v14 = vpop.permute.xlu0 %10165  ;;  %v10182_v21 = vpop.permute.xlu1 %10181 }
0x1dad   :  { %v11224_v33 = vcombine.low %v10166_v14, %v10168_v52 }
0x1daf   :  { %v11238_v11 = vrot.slane %v11224_v33, %v18475_v39 }
0x1db0   :  { %v10170_v43 = vpop.permute.xlu0 %10169  ;;  %v10186_v38 = vpop.permute.xlu1 %10185 }
0x1db1   :  { %v11239_v7 = vcombine.low %v11231_v35, %v11238_v11 }
0x1db4   :  { %v10172_v47 = vpop.permute.xlu0 %10171  ;;  %v10190_v17 = vpop.permute.xlu1 %10189 }
0x1db5   :  { %v11240_v5 = vcombine.low %v10170_v43, %v10172_v47 }
0x1db7   :  { %v11248_v4 = vrot.slane %v11240_v5, %v18475_v39 }
0x1db8   :  { %v10174_v59 = vpop.permute.xlu0 %10173  ;;  %v10194_v41 = vpop.permute.xlu1 %10193 }
0x1dbc   :  { %v10176_v37 = vpop.permute.xlu0 %10175  ;;  %v10198_v20 = vpop.permute.xlu1 %10197 }
0x1dbd   :  { %v11241_v30 = vcombine.low %v10174_v59, %v10176_v37 }
0x1dbf   :  { %v11255_v42 = vrot.slane %v11241_v30, %v18475_v39 }
0x1dc0   :  { %v10180_v46 = vpop.permute.xlu0 %10179  ;;  %v10202_v24 = vpop.permute.xlu1 %10201 }
0x1dc1   :  { %v11256_v3 = vcombine.low %v11248_v4, %v11255_v42  ;;  %v11264_v49 = vcombine.low %v10180_v46, %v10182_v21 }
0x1dc3   :  { %v18115_v63 = vpack.c.bf16 %v11256_v3, %v11239_v7  ;;  %v11272_v9 = vrot.slane %v11264_v49, %v18475_v39 }
0x1dc4   :  { %v10184_v2 = vpop.permute.xlu0 %10183  ;;  %v10206_v58 = vpop.permute.xlu1 %10205 }
0x1dc5   :  { %v11265_v53 = vcombine.low %v10184_v2, %v10186_v38 }
0x1dc7   :  { %v11279_v56 = vrot.slane %v11265_v53, %v18475_v39 }
0x1dc8   :  { %v10188_v40 = vpop.permute.xlu0 %10187  ;;  %v10210_v55 = vpop.permute.xlu1 %10209 }
0x1dc9   :  { %v11280_v23 = vcombine.low %v11272_v9, %v11279_v56  ;;  %v11281_v36 = vcombine.low %v10188_v40, %v10190_v17 }
0x1dcb   :  { %v11289_v25 = vrot.slane %v11281_v36, %v18475_v39 }
0x1dcc   :  { %v10192_v54 = vpop.permute.xlu0 %10191  ;;  %v10216_v44 = vpop.permute.xlu1 %10215 }
0x1dcd   :  { %v11282_v0 = vcombine.low %v10192_v54, %v10194_v41 }
0x1dcf   :  { %v11296_v8 = vrot.slane %v11282_v0, %v18475_v39 }
0x1dd0   :  { %v18121_v1 = vpop.permute.xlu0 %13859  ;;  %v10220_v52 = vpop.permute.xlu1 %10219 }
0x1dd1   :  { %v11297_v57 = vcombine.low %v11289_v25, %v11296_v8 }
0x1dd3   :  { %v18123_v18 = vpack.c.bf16 %v11297_v57, %v11280_v23 }
0x1dd4   :  { %v10200_v22 = vpop.permute.xlu0 %10199  ;;  %v10224_v35 = vpop.permute.xlu1 %10223 }
0x1dd5   :  { %v11305_v50 = vcombine.low %v10198_v20, %v10200_v22 }
0x1dd7   :  { %v11313_v27 = vrot.slane %v11305_v50, %v18475_v39 }
0x1dd8   :  { %v10204_v32 = vpop.permute.xlu0 %10203  ;;  %v10228_v17 = vpop.permute.xlu1 %10227 }
0x1dd9   :  { %v11306_v6 = vcombine.low %v10202_v24, %v10204_v32 }
0x1ddb   :  { %v11320_v34 = vrot.slane %v11306_v6, %v18475_v39 }
0x1ddc   :  { %v10208_v14 = vpop.permute.xlu0 %10207  ;;  %v18131_v30 = vpop.permute.xlu1 %13864 }
0x1ddd   :  { %v11321_v21 = vcombine.low %v11313_v27, %v11320_v34  ;;  %v11322_v33 = vcombine.low %v10206_v58, %v10208_v14 }
0x1ddf   :  { %v11330_v38 = vrot.slane %v11322_v33, %v18475_v39 }
0x1de0   :  { %v10212_v11 = vpop.permute.xlu0 %10211  ;;  %v10236_v2 = vpop.permute.xlu1 %10235 }
0x1de1   :  { %v11323_v43 = vcombine.low %v10210_v55, %v10212_v11 }
0x1de3   :  { %v11337_v7 = vrot.slane %v11323_v43, %v18475_v39 }
0x1de4   :  { %v10218_v47 = vpop.permute.xlu0 %10217  ;;  %v10240_v6 = vpop.permute.xlu1 %10239 }
0x1de5   :  { %v11338_v5 = vcombine.low %v11330_v38, %v11337_v7  ;;  %v11346_v59 = vcombine.low %v10216_v44, %v10218_v47 }
0x1de7   :  { %v18129_v41 = vpack.c.bf16 %v11338_v5, %v11321_v21  ;;  %v11354_v4 = vrot.slane %v11346_v59, %v18475_v39 }
0x1de8   :  { %v10222_v37 = vpop.permute.xlu0 %10221 }
0x1de9   :  { %v11347_v20 = vcombine.low %v10220_v52, %v10222_v37 }
0x1deb   :  { %v11361_v42 = vrot.slane %v11347_v20, %v18475_v39 }
0x1dec   :  { %v10226_v46 = vpop.permute.xlu0 %10225 }
0x1ded   :  { %v11362_v3 = vcombine.low %v11354_v4, %v11361_v42  ;;  %v11363_v49 = vcombine.low %v10224_v35, %v10226_v46 }
0x1def   :  { %v11371_v58 = vrot.slane %v11363_v49, %v18475_v39 }
0x1df0   :  { %v10230_v24 = vpop.permute.xlu0 %10229 }
0x1df1   :  { %v11364_v53 = vcombine.low %v10228_v17, %v10230_v24 }
0x1df2   :  { %v10786_v9 = vpop.f32.mrb[196].mxu0  ;;  %v10835_v56 = vpop.f32.mrb[204].mxu1 }
0x1df3   :  { %v11378_v40 = vrot.slane %v11364_v53, %v18475_v39  ;;  %v18137_v23 = vmul.f32 0.35355338, %v10786_v9  ;;  %v13603_v36 = vpop.f32.mrb[197].mxu0  ;;  %v13611_v54 = vpop.f32.mrb[205].mxu1  ;;  %v18139_v8 = vmul.f32 0.35355338, %v10835_v56 }
0x1df4   :  { %v10234_v55 = vpop.permute.xlu0 %10233  ;;  %v10789_v0 = vpop.f32.mrb[198].mxu0 }
0x1df5   :  { %v11379_v25 = vcombine.low %v11371_v58, %v11378_v40  ;;  %v11387_v57 = vcombine.low %v10234_v55, %v10236_v2  ;;  %v10838_v44 = vpop.f32.mrb[206].mxu1  ;;  %v13604_v22 = vpop.f32.mrb[199].mxu0  ;;  %v11051_v50 = vsel %vm6692_vm3, %v18137_v23, -inf  ;;  %v11054_v14 = vsel %vm6692_vm3, %v18139_v8, -inf }
0x1df6   :  { %v13612_v32 = vpop.f32.mrb[207].mxu1  ;;  %11052 = vmax.xlane.f32.xlu0 %v11051_v50 }
0x1df7   :  { %v18143_v52 = vpack.c.bf16 %v11379_v25, %v11362_v3  ;;  %v18148_v21 = vrot.slane %v11387_v57, %v18475_v39 }
0x1df8   :  { %v10238_v27 = vpop.permute.xlu0 %10237 }
0x1df9   :  { %v11388_v34 = vcombine.low %v10238_v27, %v10240_v6 }
0x1dfa   :  { %11055 = vmax.xlane.f32.xlu0 %v11054_v14 }
0x1dfb   :  { %v18151_v33 = vrot.slane %v11388_v34, %v18475_v39 }
0x1dfd   :  { %v11403_v35 = vcombine.low %v18148_v21, %v18151_v33 }
0x1e02   :  { %v10884_v11 = vpop.f32.mrb[200].mxu0 }
0x1e03   :  { %v18155_v43 = vmul.f32 0.35355338, %v10884_v11  ;;  %v10933_v38 = vpop.f32.mrb[208].mxu1  ;;  %v13619_v7 = vpop.f32.mrb[201].mxu0 }
0x1e04   :  { %v13627_v47 = vpop.f32.mrb[209].mxu1  ;;  %v10887_v17 = vpop.f32.mrb[202].mxu0  ;;  %v18164_v40 = vmul.f32 0.35355338, %v10933_v38 }
0x1e05   :  { %v10936_v5 = vpop.f32.mrb[210].mxu1  ;;  %v13620_v59 = vpop.f32.mrb[203].mxu0  ;;  %v11057_v37 = vsel %vm6692_vm3, %v18155_v43, -inf }
0x1e06   :  { %v13628_v20 = vpop.f32.mrb[211].mxu1  ;;  %11058 = vmax.xlane.f32.xlu1 %v11057_v37 }
0x1e07   :  { %v13861_v20 = vunpack.i.l.bf16 %v18121_v1 }
0x1e10   :  { %10245 = vrot.lane.b32.xlu0 %v17932_v60, %s14196_s18  ;;  %v11060_v60 = vsel %vm6692_vm3, %v18164_v40, -inf }
0x1e13   :  { %v10982_v4 = vpop.f32.mrb[204].mxu0  ;;  %v11031_v42 = vpop.f32.mrb[212].mxu1 }
0x1e14   :  { %v13635_v46 = vpop.f32.mrb[205].mxu0  ;;  %v13643_v3 = vpop.f32.mrb[213].mxu1  ;;  %v11044_v54 = vmul.f32 0.35355338, %v11031_v42  ;;  %v11043_v0 = vmul.f32 0.35355338, %v10982_v4 }
0x1e15   :  { %v10985_v49 = vpop.f32.mrb[206].mxu0  ;;  %v11034_v24 = vpop.f32.mrb[214].mxu1 }
0x1e16   :  { %v13636_v2 = vpop.f32.mrb[207].mxu0  ;;  %v13644_v53 = vpop.f32.mrb[215].mxu1 }
0x1e17   :  { %10243 = vrot.lane.b32.xlu1 %v17959_v13, %s14196_s18  ;;  %v11066_v13 = vsel %vm6692_vm3, %v11044_v54, -inf  ;;  %v11263_v2 = vrot.slane %v13861_v20, %v18475_v39 }
0x1e23   :  { %v11047_v9 = vpop.xlane.xlu1 %11046 }
0x1e24   :  { %v11069_v56 = vsub.f32 %v18103_v48, %v11047_v9  ;;  %v11063_v48 = vsel %vm6692_vm3, %v11043_v0, -inf }
0x1e26   :  { %v11077_v58 = vmul.f32 1.442695, %v11069_v56 }
0x1e28   :  { %14088 = vpow2.f32 %v11077_v58 }
0x1e2f   :  { %11061 = vmax.xlane.f32.xlu0 %v11060_v60 }
0x1e32   :  { %v18168_v36 = vpop.eup %14088 }
0x1e33   :  { %v11093_v55 = vsel %vm6692_vm3, %v18168_v36, 0.0 }
0x1e34   :  { %11094 = vadd.xlane.f32.xlu0 %v11093_v55  ;;  %v11498_v55 = vpack.c.bf16 %v11263_v2, %v11263_v2 }
0x1e38   :  { %11067 = vmax.xlane.f32.xlu0 %v11066_v13 }
0x1e3b   :  { %11064 = vmax.xlane.f32.xlu1 %v11063_v48 }
0x1e4c   :  { %10247 = vrot.lane.b32.xlu1 %v17963_v16, %s14196_s18  ;;  %v10242_v16 = vpop.permute.xlu0 %10241 }
0x1e4e   :  { %10251 = vrot.lane.b32.xlu0 %v17969_v45, %s14196_s18 }
0x1e50   :  { %10253 = vrot.lane.b32.xlu1 %v17948_v10, %s14196_s18  ;;  %v11050_v45 = vpop.xlane.xlu0 %11049 }
0x1e51   :  { %v11070_v25 = vsub.f32 %v18107_v31, %v11050_v45 }
0x1e52   :  { %10255 = vrot.lane.b32.xlu0 %v17973_v28, %s14196_s18 }
0x1e53   :  { %v11079_v10 = vmul.f32 1.442695, %v11070_v25  ;;  %v11605_v25 = vsel %vm279_vm5, %v11498_v55, 0 }
0x1e54   :  { %10257 = vrot.lane.b32.xlu1 %v17925_v62, %s14196_s18 }
0x1e55   :  { %14090 = vpow2.f32 %v11079_v10 }
0x1e56   :  { %10259 = vrot.lane.b32.xlu0 %v17977_v29, %s14196_s18 }
0x1e58   :  { %10261 = vrot.lane.b32.xlu1 %v17938_v15, %s14196_s18 }
0x1e5a   :  { %10263 = vrot.lane.b32.xlu0 %v17989_v61, %s14196_s18 }
0x1e5f   :  { %v18191_v57 = vpop.eup %14090 }
0x1e60   :  { %v11096_v62 = vsel %vm6692_vm3, %v18191_v57, 0.0 }
0x1e79   :  { %11097 = vadd.xlane.f32.xlu0 %v11096_v62 }
0x1e83   :  { %v11053_v28 = vpop.xlane.xlu0 %11052 }
0x1e84   :  { %v11071_v29 = vsub.f32 %v18137_v23, %v11053_v28 }
0x1e86   :  { %v11081_v44 = vmul.f32 1.442695, %v11071_v29 }
0x1e87   :  { %v11056_v15 = vpop.xlane.xlu0 %11055 }
0x1e88   :  { %14092 = vpow2.f32 %v11081_v44  ;;  %v11072_v61 = vsub.f32 %v18139_v8, %v11056_v15 }
0x1e8a   :  { %v11083_v22 = vmul.f32 1.442695, %v11072_v61 }
0x1e8b   :  { %v10246_v11 = vpop.permute.xlu0 %10245 }
0x1e8c   :  { %14094 = vpow2.f32 %v11083_v22 }
0x1e92   :  { %v18197_v50 = vpop.eup %14092 }
0x1e93   :  { %v11059_v31 = vpop.xlane.xlu1 %11058  ;;  %v11099_v32 = vsel %vm6692_vm3, %v18197_v50, 0.0 }
0x1e94   :  { %v11073_v6 = vsub.f32 %v18155_v43, %v11059_v31  ;;  %11100 = vadd.xlane.f32.xlu0 %v11099_v32  ;;  %v13862_v31 = vunpack.i.h.bf16 %v18121_v1 }
0x1e96   :  { %v18202_v27 = vpop.eup %14094  ;;  %v11085_v34 = vmul.f32 1.442695, %v11073_v6  ;;  %v11304_v6 = vrot.slane %v13862_v31, %v18475_v39 }
0x1e97   :  { %v11102_v23 = vsel %vm6692_vm3, %v18202_v27, 0.0  ;;  %v10244_v43 = vpop.permute.xlu1 %10243 }
0x1e98   :  { %14096 = vpow2.f32 %v11085_v34  ;;  %11103 = vadd.xlane.f32.xlu0 %v11102_v23  ;;  %v11404_v42 = vcombine.low %v10242_v16, %v10244_v43 }
0x1e9a   :  { %v11412_v58 = vrot.slane %v11404_v42, %v18475_v39 }
0x1ea2   :  { %v18206_v8 = vpop.eup %14096 }
0x1ea3   :  { %v11105_v14 = vsel %vm6692_vm3, %v18206_v8, 0.0 }
0x1ea4   :  { %11106 = vadd.xlane.f32.xlu1 %v11105_v14  ;;  %v11500_v14 = vpack.c.bf16 %v11304_v6, %v11304_v6 }
0x1ebc   :  { %v11062_v38 = vpop.xlane.xlu0 %11061 }
0x1ebd   :  { %v11074_v5 = vsub.f32 %v18164_v40, %v11062_v38  ;;  %v13867_v38 = vunpack.i.h.bf16 %v18131_v30 }
0x1ebf   :  { %v11087_v46 = vmul.f32 1.442695, %v11074_v5  ;;  %v11386_v5 = vrot.slane %v13867_v38, %v18475_v39 }
0x1ec1   :  { %v11095_v7 = vpop.xlane.xlu0 %11094 }
0x1ec2   :  { %14098 = vrcp.f32 %v11095_v7 }
0x1ec5   :  { %v11068_v47 = vpop.xlane.xlu0 %11067 }
0x1ec6   :  { %v11076_v17 = vsub.f32 %v11044_v54, %v11068_v47 }
0x1ec8   :  { %v11091_v59 = vmul.f32 1.442695, %v11076_v17  ;;  %v11065_v37 = vpop.xlane.xlu1 %11064 }
0x1ec9   :  { %v11075_v4 = vsub.f32 %v11043_v0, %v11065_v37  ;;  %v10252_v56 = vpop.permute.xlu0 %10251 }
0x1eca   :  { %14100 = vpow2.f32 %v11091_v59 }
0x1ecb   :  { %v11089_v3 = vmul.f32 1.442695, %v11075_v4 }
0x1ecc   :  { %v14099_v49 = vpop.eup %14098  ;;  %v10248_v24 = vpop.permute.xlu1 %10247 }
0x1ecd   :  { %v11125_v53 = vmul.f32 %v14099_v49, %v18168_v36  ;;  %14102 = vpow2.f32 %v11089_v3  ;;  %v11405_v9 = vcombine.low %v10246_v11, %v10248_v24  ;;  %v10256_v16 = vpop.permute.xlu0 %10255 }
0x1ece   :  { %14104 = vpow2.f32 %v11087_v46 }
0x1ecf   :  { %v11419_v40 = vrot.slane %v11405_v9, %v18475_v39  ;;  %v11133_v60 = vpack.c.bf16 %v11125_v53, %v11125_v53 }
0x1ed0   :  { %v10254_v54 = vpop.permute.xlu1 %10253 }
0x1ed1   :  { %v11420_v0 = vcombine.low %v11412_v58, %v11419_v40  ;;  %13650 = vmatmul.mubr.msk.bf16.vlgmr.msra.gmra.mrb[208].mxu0 %vm6692_vm3, %v11133_v60  ;;  %v11428_v13 = vcombine.low %v10252_v56, %v10254_v54  ;;  %v18252_v15 = vpop.permute.xlu0 %10259 }
0x1ed2   :  { %13662 = vmatpush3.bf16.msra.mxu0 %v18115_v63  ;;  %13665 = vmatprep.mubr.msk.bf16.mxu0 %vm14191_vm0, %v18515_v51 }
0x1ed3   :  { %v18223_v36 = vpack.c.bf16 %v11420_v0, %v11403_v35  ;;  %13663 = vmatprep.subr.bf16.mxu0 %v18515_v51  ;;  %v18234_v21 = vrot.slane %v11428_v13, %v18475_v39 }
0x1ed4   :  { %v18226_v48 = vpop.eup %14100  ;;  %v10258_v45 = vpop.permute.xlu1 %10257 }
0x1ed5   :  { %v11429_v10 = vcombine.low %v10256_v16, %v10258_v45  ;;  %v11114_v63 = vsel %vm6692_vm3, %v18226_v48, 0.0  ;;  %v18254_v61 = vpop.permute.xlu0 %10263 }
0x1ed6   :  { %13664 = vmatpush3.bf16.msra.mxu0 %v11605_v25  ;;  %11115 = vadd.xlane.f32.xlu1 %v11114_v63 }
0x1ed7   :  { %v18231_v62 = vpop.eup %14102  ;;  %v18237_v33 = vrot.slane %v11429_v10, %v18475_v39  ;;  %13677 = vmatprep.subr.bf16.mxu0 %v18515_v51 }
0x1ed8   :  { %v11111_v35 = vsel %vm6692_vm3, %v18231_v62, 0.0  ;;  %v18242_v28 = vpop.eup %14104  ;;  %v10262_v7 = vpop.permute.xlu1 %10261 }
0x1ed9   :  { %v11444_v29 = vcombine.low %v18234_v21, %v18237_v33  ;;  %11112 = vadd.xlane.f32.xlu0 %v11111_v35  ;;  %v11108_v44 = vsel %vm6692_vm3, %v18242_v28, 0.0  ;;  %v11445_v3 = vcombine.low %v18252_v15, %v10262_v7 }
0x1edd   :  { %11109 = vadd.xlane.f32.xlu0 %v11108_v44 }
0x1ee7   :  { %10265 = vrot.lane.b32.xlu1 %v17935_v12, %s14196_s18  ;;  %v11651_v12 = vsel %vm279_vm5, %v11500_v14, 0 }
0x1ef3   :  { %13869 = vrot.lane.b32.xlu0 %v18021_v19, %s14196_s18 }
0x1f06   :  { %v11098_v22 = vpop.xlane.xlu0 %11097 }
0x1f07   :  { %14106 = vrcp.f32 %v11098_v22 }
0x1f11   :  { %v14107_v32 = vpop.eup %14106 }
0x1f12   :  { %v11126_v34 = vmul.f32 %v14107_v32, %v18191_v57  ;;  %v13866_v57 = vunpack.i.l.bf16 %v18131_v30 }
0x1f14   :  { %v11134_v23 = vpack.c.bf16 %v11126_v34, %v11126_v34 }
0x1f16   :  { %13658 = vmatmul.mubr.msk.bf16.vlgmr.msra.gmra.mrb[216].mxu1 %vm6692_vm3, %v11134_v23 }
0x1f17   :  { %13670 = vmatpush3.bf16.msra.mxu1 %v18123_v18  ;;  %13673 = vmatprep.mubr.msk.bf16.mxu1 %vm14191_vm0, %v18515_v51  ;;  %v11345_v18 = vrot.slane %v13866_v57, %v18475_v39 }
0x1f18   :  { %13671 = vmatprep.subr.bf16.mxu1 %v18515_v51 }
0x1f19   :  { %v11502_v59 = vpack.c.bf16 %v11345_v18, %v11345_v18 }
0x1f1b   :  { %13672 = vmatpush3.bf16.msra.mxu1 %v11651_v12  ;;  %v11697_v4 = vsel %vm279_vm5, %v11502_v59, 0 }
0x1f1c   :  { %13685 = vmatprep.subr.bf16.mxu1 %v18515_v51 }
0x1f21   :  { %v11101_v19 = vpop.xlane.xlu0 %11100 }
0x1f22   :  { %14108 = vrcp.f32 %v11101_v19 }
0x1f25   :  { %v11104_v1 = vpop.xlane.xlu0 %11103 }
0x1f26   :  { %14110 = vrcp.f32 %v11104_v1 }
0x1f2c   :  { %v14109_v11 = vpop.eup %14108 }
0x1f2d   :  { %v11127_v43 = vmul.f32 %v14109_v11, %v18197_v50  ;;  %v11504_v50 = vpack.c.bf16 %v11386_v5, %v11386_v5 }
0x1f2f   :  { %v11135_v47 = vpack.c.bf16 %v11127_v43, %v11127_v43 }
0x1f30   :  { %v14111_v17 = vpop.eup %14110 }
0x1f31   :  { %v11128_v37 = vmul.f32 %v14111_v17, %v18202_v27  ;;  %13666 = vmatmul.mubr.msk.bf16.vlgmr.msra.gmra.mrb[212].mxu0 %vm6692_vm3, %v11135_v47  ;;  %v11107_v20 = vpop.xlane.xlu1 %11106  ;;  %v9320_v47 = vld [vmem:[%s18429_s6 + $0x220] sm:$0xff]  ;;  %v9321_v17 = vld [vmem:[%s18429_s6 + $0x228] sm:$0xff] }
0x1f32   :  { %13678 = vmatpush3.bf16.msra.mxu0 %v18129_v41  ;;  %14112 = vrcp.f32 %v11107_v20  ;;  %13681 = vmatprep.mubr.msk.bf16.mxu0 %vm14191_vm0, %v18515_v51  ;;  %v11743_v41 = vsel %vm279_vm5, %v11504_v50, 0  ;;  %v11908_v5 = vpack.c.bf16 %v9321_v17, %v9320_v47  ;;  %v12058_v47 = vld [vmem:[%s18429_s6 + $0x260] sm:$0xff]  ;;  %v12059_v17 = vld [vmem:[%s18429_s6 + $0x268] sm:$0xff] }
0x1f33   :  { %13679 = vmatprep.subr.bf16.mxu0 %v18515_v51  ;;  %v11136_v30 = vpack.c.bf16 %v11128_v37, %v11128_v37 }
0x1f35   :  { %13674 = vmatmul.mubr.msk.bf16.vlgmr.msra.gmra.mrb[220].mxu1 %vm6692_vm3, %v11136_v30 }
0x1f36   :  { %13680 = vmatpush3.bf16.msra.mxu0 %v11697_v4  ;;  %13686 = vmatpush3.bf16.msra.mxu1 %v18143_v52 }
0x1f37   :  { %13687 = vmatprep.subr.bf16.mxu1 %v18515_v51  ;;  %13693 = vmatprep.subr.bf16.mxu0 %v18515_v51 }
0x1f38   :  { %13689 = vmatprep.mubr.msk.bf16.mxu1 %vm14191_vm0, %v18515_v51 }
0x1f3a   :  { %13688 = vmatpush3.bf16.msra.mxu1 %v11743_v41  ;;  %v9322_v41 = vld [vmem:[%s18429_s6 + $0x230] sm:$0xff] }
0x1f3b   :  { %13701 = vmatprep.subr.bf16.mxu1 %v18515_v51 }
0x1f3c   :  { %v14113_v27 = vpop.eup %14112 }
0x1f3d   :  { %v11129_v42 = vmul.f32 %v14113_v27, %v18206_v8  ;;  %v11453_v8 = vrot.slane %v11445_v3, %v18475_v39  ;;  %v9323_v27 = vld [vmem:[%s18429_s6 + $0x238] sm:$0xff] }
0x1f3f   :  { %v11137_v46 = vpack.c.bf16 %v11129_v42, %v11129_v42 }
0x1f41   :  { %13682 = vmatmul.mubr.msk.bf16.vlgmr.msra.gmra.mrb[216].mxu0 %vm6692_vm3, %v11137_v46 }
0x1f42   :  { %13694 = vmatpush3.bf16.msra.mxu0 %v18223_v36  ;;  %13697 = vmatprep.mubr.msk.bf16.mxu0 %vm14191_vm0, %v18515_v51 }
0x1f43   :  { %13695 = vmatprep.subr.bf16.mxu0 %v18515_v51 }
0x1f63   :  { %v11116_v52 = vpop.xlane.xlu1 %11115 }
0x1f66   :  { %v11113_v49 = vpop.xlane.xlu0 %11112 }
0x1f67   :  { %14114 = vrcp.f32 %v11113_v49  ;;  %v10266_v24 = vpop.permute.xlu1 %10265 }
0x1f68   :  { %v11446_v2 = vcombine.low %v18254_v61, %v10266_v24 }
0x1f6a   :  { %v11460_v53 = vrot.slane %v11446_v2, %v18475_v39  ;;  %v11110_v9 = vpop.xlane.xlu0 %11109 }
0x1f6b   :  { %14116 = vrcp.f32 %v11110_v9 }
0x1f6c   :  { %v11461_v56 = vcombine.low %v11453_v8, %v11460_v53  ;;  %14118 = vrcp.f32 %v11116_v52  ;;  %v11909_v52 = vpack.c.bf16 %v9323_v27, %v9322_v41 }
0x1f6e   :  { %v11507_v58 = vpack.c.bf16 %v11461_v56, %v11444_v29  ;;  %v13870_v40 = vpop.permute.xlu0 %13869 }
0x1f6f   :  { %v13871_v60 = vunpack.i.l.bf16 %v13870_v40  ;;  %v13872_v0 = vunpack.i.h.bf16 %v13870_v40 }
0x1f71   :  { %v14115_v54 = vpop.eup %14114  ;;  %v11427_v55 = vrot.slane %v13871_v60, %v18475_v39  ;;  %v11468_v10 = vrot.slane %v13872_v0, %v18475_v39 }
0x1f72   :  { %v11131_v13 = vmul.f32 %v14115_v54, %v18231_v62 }
0x1f73   :  { %v11506_v36 = vpack.c.bf16 %v11427_v55, %v11427_v55  ;;  %v11508_v35 = vpack.c.bf16 %v11468_v10, %v11468_v10 }
0x1f74   :  { %v11139_v63 = vpack.c.bf16 %v11131_v13, %v11131_v13 }
0x1f75   :  { %v14117_v16 = vpop.eup %14116  ;;  %v11789_v45 = vsel %vm279_vm5, %v11506_v36, 0  ;;  %v11835_v62 = vsel %vm279_vm5, %v11508_v35, 0 }
0x1f76   :  { %v11130_v25 = vmul.f32 %v14117_v16, %v18242_v28  ;;  %13696 = vmatpush3.bf16.msra.mxu0 %v11789_v45  ;;  %v14119_v33 = vpop.eup %14118 }
0x1f77   :  { %13709 = vmatprep.subr.bf16.mxu0 %v18515_v51  ;;  %v11132_v39 = vmul.f32 %v14119_v33, %v18226_v48  ;;  %v12530_v33 = vld [vmem:[#allocation4 + $0x1c] ss:$0 sm:$0xff] }
0x1f78   :  { %v11138_v21 = vpack.c.bf16 %v11130_v25, %v11130_v25 }
0x1f79   :  { %13698 = vmatmul.mubr.msk.bf16.vlgmr.msra.gmra.mrb[220].mxu0 %vm6692_vm3, %v11139_v63  ;;  %v11140_v28 = vpack.c.bf16 %v11132_v39, %v11132_v39 }
0x1f7a   :  { %13690 = vmatmul.mubr.msk.bf16.vlgmr.msra.gmra.mrb[224].mxu1 %vm6692_vm3, %v11138_v21  ;;  %13713 = vmatprep.mubr.msk.bf16.mxu0 %vm14191_vm0, %v18515_v51 }
0x1f7b   :  { %13702 = vmatpush3.bf16.msra.mxu1 %v11507_v58  ;;  %13705 = vmatprep.mubr.msk.bf16.mxu1 %vm14191_vm0, %v18515_v51 }
0x1f7c   :  { %13703 = vmatprep.subr.bf16.mxu1 %v18515_v51  ;;  %13710 = vmatpush3.bf16.msra.mxu0 %v11908_v5  ;;  %v12060_v5 = vld [vmem:[%s18429_s6 + $0x270] sm:$0xff] }
0x1f7d   :  { %13711 = vmatprep.subr.bf16.mxu0 %v18515_v51 }
0x1f7f   :  { %13704 = vmatpush3.bf16.msra.mxu1 %v11835_v62 }
0x1f80   :  { %13717 = vmatprep.subr.bf16.mxu1 %v18515_v51  ;;  %13712 = vmatpush3.bf16.msra.mxu0 %v11909_v52 }
0x1f81   :  { %13725 = vmatprep.subr.bf16.mxu0 %v18515_v51 }
0x1f82   :  { %13706 = vmatmul.mubr.msk.bf16.vlgmr.msra.gmra.mrb[228].mxu1 %vm6692_vm3, %v11140_v28 }
0x1f83   :  { %13721 = vmatprep.mubr.msk.bf16.mxu1 %vm14191_vm0, %v18515_v51 }
0x1fa4   :  { %v11549_v29 = vpop.f32.mrb[208].mxu0 }
0x1fa5   :  { %v13651_v44 = vpop.f32.mrb[209].mxu0 }
0x1fa6   :  { %v11552_v15 = vpop.f32.mrb[210].mxu0 }
0x1fa7   :  { %v13652_v61 = vpop.f32.mrb[211].mxu0 }
0x1fe9   :  { %v11595_v22 = vpop.f32.mrb[216].mxu1 }
0x1fea   :  { %v13659_v31 = vpop.f32.mrb[217].mxu1 }
0x1feb   :  { %v11598_v48 = vpop.f32.mrb[218].mxu1 }
0x1fec   :  { %v13660_v32 = vpop.f32.mrb[219].mxu1 }
0x2004   :  { %v11641_v6 = vpop.f32.mrb[212].mxu0 }
0x2005   :  { %v13667_v34 = vpop.f32.mrb[213].mxu0 }
0x2006   :  { %v11644_v23 = vpop.f32.mrb[214].mxu0 }
0x2007   :  { %v13668_v14 = vpop.f32.mrb[215].mxu0 }
0x2008   :  { %v11687_v12 = vpop.f32.mrb[220].mxu1 }
0x2009   :  { %v13873_v19 = vpack.i.bf16 %v11687_v12, %v11641_v6  ;;  %v13675_v1 = vpop.f32.mrb[221].mxu1 }
0x200a   :  { %v11690_v57 = vpop.f32.mrb[222].mxu1 }
0x200b   :  { %v13676_v11 = vpop.f32.mrb[223].mxu1  ;;  %13874 = vrot.lane.b32.xlu1 %v13873_v19, %s14189_s10 }
0x200c   :  { %v12001_v11 = vld [vmem:[%s18429_s6 + $0x248] sm:$0xff] }
0x2014   :  { %v11733_v38 = vpop.f32.mrb[216].mxu0 }
0x2015   :  { %v13683_v18 = vpop.f32.mrb[217].mxu0 }
0x2016   :  { %v11736_v7 = vpop.f32.mrb[218].mxu0 }
0x2017   :  { %v13684_v43 = vpop.f32.mrb[219].mxu0  ;;  %v12003_v7 = vld [vmem:[%s18429_s6 + $0x258] sm:$0xff] }
0x204c   :  { %v11825_v59 = vpop.f32.mrb[220].mxu0 }
0x204d   :  { %v11779_v37 = vpop.f32.mrb[224].mxu1  ;;  %v13699_v20 = vpop.f32.mrb[221].mxu0 }
0x204e   :  { %v13878_v30 = vpack.i.bf16 %v11779_v37, %v11733_v38  ;;  %v13691_v50 = vpop.f32.mrb[225].mxu1  ;;  %v11828_v4 = vpop.f32.mrb[222].mxu0  ;;  %v12002_v38 = vld [vmem:[%s18429_s6 + $0x250] sm:$0xff]  ;;  %v12061_v37 = vld [vmem:[%s18429_s6 + $0x278] sm:$0xff] }
0x204f   :  { %v11782_v42 = vpop.f32.mrb[226].mxu1  ;;  %v13700_v46 = vpop.f32.mrb[223].mxu0  ;;  %v12007_v43 = vpack.c.bf16 %v12003_v7, %v12002_v38  ;;  %v12069_v20 = vpack.c.bf16 %v12061_v37, %v12060_v5  ;;  %v12538_v37 = vld [vmem:[#allocation4 + $0x21] ss:$0 sm:$0xff] }
0x2050   :  { %v13692_v3 = vpop.f32.mrb[227].mxu1  ;;  %13879 = vrot.lane.b32.xlu0 %v13878_v30, %s14186_s20 }
0x2051   :  { %v12532_v3 = vld [vmem:[#allocation4 + $0x1d] ss:$0 sm:$0xff] }
0x2055   :  { %v11871_v49 = vpop.f32.mrb[228].mxu1 }
0x2056   :  { %v13883_v24 = vpack.i.bf16 %v11871_v49, %v11825_v59  ;;  %v13707_v2 = vpop.f32.mrb[229].mxu1  ;;  %v12068_v59 = vpack.c.bf16 %v12059_v17, %v12058_v47 }
0x2057   :  { %v11874_v8 = vpop.f32.mrb[230].mxu1 }
0x2058   :  { %v13708_v53 = vpop.f32.mrb[231].mxu1  ;;  %13884 = vrot.lane.b32.xlu1 %v13883_v24, %s14199_s2  ;;  %v12533_v8 = vld [vmem:[#allocation4 + $0x1e] ss:$0 sm:$0xff] }
0x207d   :  { %v13875_v9 = vpop.permute.xlu1 %13874 }
0x207e   :  { %v13877_v58 = vunpack.i.h.bf16 %v13875_v9  ;;  %v13876_v40 = vunpack.i.l.bf16 %v13875_v9 }
0x2080   :  { %v11902_v0 = vsel %vm1081_vm8, %v11595_v22, %v13877_v58  ;;  %v11901_v13 = vsel %vm1081_vm8, %v11549_v29, %v13876_v40  ;;  %v12062_v40 = vld [vmem:[%s18429_s6 + $0x280] sm:$0xff] }
0x20c2   :  { %v13880_v56 = vpop.permute.xlu0 %13879 }
0x20c3   :  { %v13882_v60 = vunpack.i.h.bf16 %v13880_v56  ;;  %v13881_v54 = vunpack.i.l.bf16 %v13880_v56 }
0x20c5   :  { %v11904_v45 = vsel %vm2354_vm12, %v11902_v0, %v13882_v60  ;;  %v11903_v25 = vsel %vm2354_vm12, %v11901_v13, %v13881_v54  ;;  %v12063_v60 = vld [vmem:[%s18429_s6 + $0x288] sm:$0xff]  ;;  %v12064_v54 = vld [vmem:[%s18429_s6 + $0x290] sm:$0xff]  ;;  %v12065_v0 = vld [vmem:[%s18429_s6 + $0x298] sm:$0xff] }
0x20c6   :  { %v12071_v13 = vpack.c.bf16 %v12065_v0, %v12064_v54  ;;  %v12202_v54 = vld [vmem:[%s18429_s6 + $0x2a0] sm:$0xff]  ;;  %v12204_v0 = vld [vmem:[%s18429_s6 + $0x2b0] sm:$0xff] }
0x20ca   :  { %v13885_v55 = vpop.permute.xlu1 %13884 }
0x20cb   :  { %v13887_v36 = vunpack.i.h.bf16 %v13885_v55  ;;  %v13886_v16 = vunpack.i.l.bf16 %v13885_v55  ;;  %v12070_v55 = vpack.c.bf16 %v12063_v60, %v12062_v40 }
0x20cd   :  { %v11906_v10 = vsel %vm2359_vm13, %v11904_v45, %v13887_v36  ;;  %v11905_v63 = vsel %vm2359_vm13, %v11903_v25, %v13886_v16  ;;  %v12534_v36 = vld [vmem:[#allocation4 + $0x1f] ss:$0 sm:$0xff] }
0x20ce   :  { %v11907_v21 = vpack.c.bf16 %v11906_v10, %v11905_v63 }
0x20d0   :  { %13714 = vmatmul.mubr.msk.bf16.vlgmr.msra.gmra.mrb[224].mxu0 %vm434_vm7, %v11907_v21 }
0x20d1   :  { %13733 = vmatprep.mubr.msk.bf16.mxu0 %vm14191_vm0, %v18515_v51  ;;  %13726 = vmatpush3.bf16.msra.mxu0 %v12068_v59 }
0x20d2   :  { %13727 = vmatprep.subr.bf16.mxu0 %v18515_v51 }
0x20d5   :  { %13728 = vmatpush3.bf16.msra.mxu0 %v12069_v20 }
0x20d6   :  { %13729 = vmatprep.subr.bf16.mxu0 %v18515_v51 }
0x20d9   :  { %13730 = vmatpush3.bf16.msra.mxu0 %v12070_v55  ;;  %v12203_v55 = vld [vmem:[%s18429_s6 + $0x2a8] sm:$0xff] }
0x20da   :  { %13731 = vmatprep.subr.bf16.mxu0 %v18515_v51 }
0x20dd   :  { %13732 = vmatpush3.bf16.msra.mxu0 %v12071_v13  ;;  %v12207_v13 = vpack.c.bf16 %v12203_v55, %v12202_v54 }
0x21a3   :  { %v11951_v35 = vpop.f32.mrb[224].mxu0 }
0x21a4   :  { %v11952_v39 = vadd.f32 %v12530_v33, %v11951_v35  ;;  %v13715_v62 = vpop.f32.mrb[225].mxu0 }
0x21a5   :  { %v11954_v28 = vpop.f32.mrb[226].mxu0  ;;  %v12536_v62 = vld [vmem:[#allocation4 + $0x20] ss:$0 sm:$0xff] }
0x21a6   :  { %v11958_v29 = vadd.f32 %v11952_v39, %v17464_v26  ;;  %v11955_v44 = vadd.f32 %v12530_v33, %v11954_v28  ;;  %v13716_v15 = vpop.f32.mrb[227].mxu0 }
0x21a8   :  { %v11959_v61 = vadd.f32 %v11955_v44, %v17464_v26  ;;  %v11962_v22 = vsel %vm434_vm7, %v11958_v29, 0.0  ;;  %v12000_v26 = vld [vmem:[%s18429_s6 + $0x240] sm:$0xff] }
0x21a9   :  { %11963 = vadd.xlane.f32.xlu0 %v11962_v22  ;;  %v12006_v18 = vpack.c.bf16 %v12001_v11, %v12000_v26 }
0x21aa   :  { %v11965_v31 = vsel %vm434_vm7, %v11959_v61, 0.0 }
0x21ab   :  { %11966 = vadd.xlane.f32.xlu1 %v11965_v31  ;;  %13718 = vmatpush3.bf16.msra.mxu1 %v12006_v18 }
0x21ac   :  { %13719 = vmatprep.subr.bf16.mxu1 %v18515_v51 }
0x21af   :  { %13720 = vmatpush3.bf16.msra.mxu1 %v12007_v43 }
0x21b0   :  { %13737 = vmatprep.subr.bf16.mxu1 %v18515_v51 }
0x2236   :  { %v11964_v48 = vpop.xlane.xlu0 %11963 }
0x2237   :  { %v11968_v32 = vmul.f32 0.03125, %v11964_v48 }
0x2238   :  { %v11967_v6 = vpop.xlane.xlu1 %11966 }
0x2239   :  { %v11970_v34 = vsub.f32 %v11958_v29, %v11968_v32  ;;  %v11969_v23 = vmul.f32 0.03125, %v11967_v6 }
0x223b   :  { %v11971_v14 = vsub.f32 %v11959_v61, %v11969_v23  ;;  %v11972_v12 = vmul.f32 %v11970_v34, %v11970_v34 }
0x223d   :  { %v11974_v19 = vsel %vm434_vm7, %v11972_v12, 0.0  ;;  %v11973_v1 = vmul.f32 %v11971_v14, %v11971_v14 }
0x223e   :  { %11975 = vadd.xlane.f32.xlu0 %v11974_v19 }
0x223f   :  { %v11977_v57 = vsel %vm434_vm7, %v11973_v1, 0.0 }
0x2242   :  { %11978 = vadd.xlane.f32.xlu0 %v11977_v57 }
0x22cb   :  { %v11976_v30 = vpop.xlane.xlu0 %11975 }
0x22cc   :  { %v11980_v50 = vmul.f32 0.03125, %v11976_v30 }
0x22ce   :  { %v11982_v4 = vadd.f32 1e-05, %v11980_v50  ;;  %v12539_v50 = vld [vmem:[#allocation4 + $0x22] ss:$0 sm:$0xff] }
0x22cf   :  { %v11979_v41 = vpop.xlane.xlu0 %11978 }
0x22d0   :  { %14120 = vrsqrt.f32 %v11982_v4  ;;  %v11981_v27 = vmul.f32 0.03125, %v11979_v41 }
0x22d2   :  { %v11983_v42 = vadd.f32 1e-05, %v11981_v27 }
0x22d4   :  { %14122 = vrsqrt.f32 %v11983_v42 }
0x22da   :  { %v14121_v46 = vpop.eup %14120 }
0x22db   :  { %v11986_v52 = vmul.f32 %v14121_v46, %v11970_v34 }
0x22dd   :  { %v11992_v24 = vmul.f32 %v12532_v3, %v11986_v52 }
0x22de   :  { %v14123_v49 = vpop.eup %14122 }
0x22df   :  { %v11987_v2 = vmul.f32 %v14123_v49, %v11971_v14  ;;  %v11998_v9 = vadd.f32 %v12533_v8, %v11992_v24 }
0x22e1   :  { %v11993_v53 = vmul.f32 %v12532_v3, %v11987_v2 }
0x22e3   :  { %v11999_v56 = vadd.f32 %v12533_v8, %v11993_v53 }
0x22e5   :  { %v12005_v58 = vpack.c.bf16 %v11999_v56, %v11998_v9 }
0x22e7   :  { %13722 = vmatmul.mubr.msk.bf16.vlgmr.msra.gmra.mrb[232].mxu1 %vm434_vm7, %v12005_v58 }
0x22e8   :  { %13741 = vmatprep.mubr.msk.bf16.mxu1 %vm14191_vm0, %v18515_v51  ;;  %13738 = vmatpush3.bf16.msra.mxu1 %v12207_v13 }
0x22e9   :  { %13739 = vmatprep.subr.bf16.mxu1 %v18515_v51 }
0x23ba   :  { %v12049_v16 = vpop.f32.mrb[232].mxu1 }
0x23bb   :  { %v12050_v45 = vadd.f32 %v12534_v36, %v12049_v16  ;;  %v13723_v25 = vpop.f32.mrb[233].mxu1 }
0x23bc   :  { %v12052_v10 = vpop.f32.mrb[234].mxu1 }
0x23bd   :  { %v12053_v63 = vadd.f32 %v12534_v36, %v12052_v10  ;;  %v13724_v21 = vpop.f32.mrb[235].mxu1  ;;  %v12056_v33 = vmax.f32 %v12050_v45, 0.0  ;;  %v12205_v36 = vld [vmem:[%s18429_s6 + $0x2b8] sm:$0xff] }
0x23be   :  { %v12208_v16 = vpack.c.bf16 %v12205_v36, %v12204_v0 }
0x23bf   :  { %v12057_v35 = vmax.f32 %v12053_v63, 0.0 }
0x23c0   :  { %13740 = vmatpush3.bf16.msra.mxu1 %v12208_v16 }
0x23c1   :  { %v12067_v39 = vpack.c.bf16 %v12057_v35, %v12056_v33 }
0x23c3   :  { %13734 = vmatmul.mubr.msk.bf16.vlgmr.msra.gmra.mrb[228].mxu0 %vm2999_vm15, %v12067_v39  ;;  %v12540_v39 = vld [vmem:[#allocation4 + $0x23] ss:$0 sm:$0xff] }
0x2496   :  { %v12113_v28 = vpop.f32.mrb[228].mxu0 }
0x2497   :  { %v12114_v29 = vadd.f32 %v12536_v62, %v12113_v28  ;;  %v13735_v44 = vpop.f32.mrb[229].mxu0 }
0x2498   :  { %v12116_v15 = vpop.f32.mrb[230].mxu0 }
0x2499   :  { %v12120_v61 = vadd.f32 %v12114_v29, %v11998_v9  ;;  %v12117_v22 = vadd.f32 %v12536_v62, %v12116_v15  ;;  %v13736_v31 = vpop.f32.mrb[231].mxu0  ;;  %v12541_v15 = vld [vmem:[#allocation4 + $0x24] ss:$0 sm:$0xff] }
0x249b   :  { %v12121_v48 = vadd.f32 %v12117_v22, %v11999_v56  ;;  %v12124_v32 = vsel %vm434_vm7, %v12120_v61, 0.0 }
0x249c   :  { %12125 = vadd.xlane.f32.xlu1 %v12124_v32 }
0x249d   :  { %v12127_v6 = vsel %vm434_vm7, %v12121_v48, 0.0 }
0x249e   :  { %12128 = vadd.xlane.f32.xlu0 %v12127_v6 }
0x2529   :  { %v12126_v34 = vpop.xlane.xlu1 %12125 }
0x252a   :  { %v12130_v23 = vmul.f32 0.03125, %v12126_v34 }
0x252b   :  { %v12129_v14 = vpop.xlane.xlu0 %12128 }
0x252c   :  { %v12132_v12 = vsub.f32 %v12120_v61, %v12130_v23  ;;  %v12131_v19 = vmul.f32 0.03125, %v12129_v14 }
0x252e   :  { %v12133_v1 = vsub.f32 %v12121_v48, %v12131_v19  ;;  %v12134_v57 = vmul.f32 %v12132_v12, %v12132_v12  ;;  %v12542_v48 = vld [vmem:[#allocation4 + $0x25] ss:$0 sm:$0xff] }
0x2530   :  { %v12136_v26 = vsel %vm434_vm7, %v12134_v57, 0.0  ;;  %v12135_v11 = vmul.f32 %v12133_v1, %v12133_v1 }
0x2531   :  { %12137 = vadd.xlane.f32.xlu1 %v12136_v26 }
0x2532   :  { %v12139_v38 = vsel %vm434_vm7, %v12135_v11, 0.0 }
0x2533   :  { %12140 = vadd.xlane.f32.xlu0 %v12139_v38 }
0x25be   :  { %v12138_v18 = vpop.xlane.xlu1 %12137 }
0x25bf   :  { %v12142_v7 = vmul.f32 0.03125, %v12138_v18 }
0x25c0   :  { %v12141_v43 = vpop.xlane.xlu0 %12140 }
0x25c1   :  { %v12144_v47 = vadd.f32 1e-05, %v12142_v7  ;;  %v12143_v17 = vmul.f32 0.03125, %v12141_v43 }
0x25c3   :  { %14124 = vrsqrt.f32 %v12144_v47  ;;  %v12145_v5 = vadd.f32 1e-05, %v12143_v17 }
0x25c5   :  { %14126 = vrsqrt.f32 %v12145_v5 }
0x25cd   :  { %v14125_v59 = vpop.eup %14124 }
0x25ce   :  { %v12148_v20 = vmul.f32 %v14125_v59, %v12132_v12 }
0x25cf   :  { %v14127_v30 = vpop.eup %14126 }
0x25d0   :  { %v12154_v4 = vmul.f32 %v12538_v37, %v12148_v20  ;;  %v12149_v41 = vmul.f32 %v14127_v30, %v12133_v1 }
0x25d2   :  { %v12160_v27 = vadd.f32 %v12539_v50, %v12154_v4  ;;  %v12155_v42 = vmul.f32 %v12538_v37, %v12149_v41 }
0x25d4   :  { %v12164_v46 = vsel %vm434_vm7, %v12160_v27, 0.0  ;;  %v12161_v52 = vadd.f32 %v12539_v50, %v12155_v42 }
0x25d5   :  { %12165 = vadd.xlane.f32.xlu1 %v12164_v46 }
0x25d6   :  { %v12167_v3 = vsel %vm434_vm7, %v12161_v52, 0.0 }
0x25d7   :  { %12168 = vadd.xlane.f32.xlu0 %v12167_v3 }
0x2662   :  { %v12166_v49 = vpop.xlane.xlu1 %12165 }
0x2663   :  { %v12170_v24 = vmul.f32 0.03125, %v12166_v49 }
0x2664   :  { %v12169_v2 = vpop.xlane.xlu0 %12168 }
0x2665   :  { %v12172_v8 = vsub.f32 %v12160_v27, %v12170_v24  ;;  %v12171_v53 = vmul.f32 0.03125, %v12169_v2 }
0x2667   :  { %v12173_v9 = vsub.f32 %v12161_v52, %v12171_v53  ;;  %v12174_v56 = vmul.f32 %v12172_v8, %v12172_v8 }
0x2669   :  { %v12176_v58 = vsel %vm434_vm7, %v12174_v56, 0.0  ;;  %v12175_v40 = vmul.f32 %v12173_v9, %v12173_v9 }
0x266a   :  { %12177 = vadd.xlane.f32.xlu1 %v12176_v58 }
0x266b   :  { %v12179_v60 = vsel %vm434_vm7, %v12175_v40, 0.0 }
0x266c   :  { %12180 = vadd.xlane.f32.xlu0 %v12179_v60 }
0x26f7   :  { %v12178_v45 = vpop.xlane.xlu1 %12177 }
0x26f8   :  { %v12182_v25 = vmul.f32 0.03125, %v12178_v45 }
0x26f9   :  { %v12181_v10 = vpop.xlane.xlu0 %12180 }
0x26fa   :  { %v12184_v63 = vadd.f32 1e-05, %v12182_v25  ;;  %v12183_v21 = vmul.f32 0.03125, %v12181_v10 }
0x26fc   :  { %14128 = vrsqrt.f32 %v12184_v63  ;;  %v12185_v33 = vadd.f32 1e-05, %v12183_v21 }
0x26fe   :  { %14130 = vrsqrt.f32 %v12185_v33 }
0x2706   :  { %v14129_v35 = vpop.eup %14128 }
0x2707   :  { %v12188_v62 = vmul.f32 %v14129_v35, %v12172_v8 }
0x2708   :  { %v14131_v28 = vpop.eup %14130 }
0x2709   :  { %v12194_v29 = vmul.f32 %v12540_v39, %v12188_v62  ;;  %v12189_v44 = vmul.f32 %v14131_v28, %v12173_v9 }
0x270b   :  { %v12195_v61 = vmul.f32 %v12540_v39, %v12189_v44  ;;  %v12200_v22 = vadd.f32 %v12541_v15, %v12194_v29 }
0x270d   :  { %v12201_v31 = vadd.f32 %v12541_v15, %v12195_v61 }
0x270f   :  { %v12206_v51 = vpack.c.bf16 %v12201_v31, %v12200_v22 }
0x2711   :  { %13742 = vmatmul.mubr.msk.bf16.vlgmr.msra.gmra.mrb[236].mxu1 %vm434_vm7, %v12206_v51 }
0x27e4   :  { %v12251_v32 = vpop.f32.mrb[236].mxu1 }
0x27e5   :  { %v12252_v6 = vadd.f32 %v12542_v48, %v12251_v32  ;;  %v13743_v34 = vpop.f32.mrb[237].mxu1 }
0x27e6   :  { %v12254_v23 = vpop.f32.mrb[238].mxu1 }
0x27e7   :  { %12258 = vst [vmem:[%s18432_s9] sm:$0xff] %v12252_v6  ;;  %v12255_v14 = vadd.f32 %v12542_v48, %v12254_v23  ;;  %v13744_v12 = vpop.f32.mrb[239].mxu1 }
0x27e9   :  { %12259 = vst [vmem:[%s18432_s9 + $0x8] sm:$0xff] %v12255_v14 }
0x27ea   :  { %12268 = vsyncpa [#allocation3], 1 }
0x27eb   :  { %12269 = vsyncpa [#allocation5], 1 }

</bundles_post_ra>
